<compile_context>
chip_gen: v5e
topology: v5e:2x2
jax: 0.10.0
libtpu: 0.0.40
codegen_flags: <defaults>
</compile_context>

<pallas_src>
import jax
import jax.numpy as jnp
from jax.experimental import pallas as pl
from jax.experimental.pallas import tpu as pltpu

NUM_HIDDENS = 256
NUM_HEADS = 4
HEAD_DIM = NUM_HIDDENS // NUM_HEADS   # 64


def cross_attention_kernel(x_ref, xen_ref, wq_ref, wk_ref, wv_ref, wo_ref, o_ref):
    Tb, Sq, H = x_ref.shape
    _, Skv, _ = xen_ref.shape
    Mq = Tb * Sq
    Mkv = Tb * Skv

    # Activation slabs, cast to bf16 once (hoisted out of the head loop).
    x = x_ref[...].reshape(Mq, H).astype(jnp.bfloat16)         # (Mq, 256)
    xen = xen_ref[...].reshape(Mkv, H).astype(jnp.bfloat16)    # (Mkv, 256)

    scale = 1.0 / (HEAD_DIM ** 0.5)
    acc = jnp.zeros((Mq, H), jnp.float32)
    for h in range(NUM_HEADS):                                 # static, 4 iterations
        # Head-major bf16 weights -> per-head projections, no lane slicing of activations.
        qh = jnp.dot(x, wq_ref[h], preferred_element_type=jnp.float32)     # (Mq, 64)
        kh = jnp.dot(xen, wk_ref[h], preferred_element_type=jnp.float32)   # (Mkv, 64)
        vh = jnp.dot(xen, wv_ref[h], preferred_element_type=jnp.float32)   # (Mkv, 64)

        qh = qh.reshape(Tb, Sq, HEAD_DIM)
        kh = kh.reshape(Tb, Skv, HEAD_DIM)
        vh = vh.reshape(Tb, Skv, HEAD_DIM)

        # Scores + stable softmax (mask I_m intentionally not applied -- see header note).
        s = jnp.einsum("bqd,bkd->bqk", qh, kh,
                       preferred_element_type=jnp.float32) * scale         # (Tb, Sq, Skv)
        s = s - jnp.max(s, axis=-1, keepdims=True)
        p = jnp.exp(s)
        p = p * pl.reciprocal(jnp.sum(p, axis=-1, keepdims=True), approx=True)

        oh = jnp.einsum("bqk,bkd->bqd", p, vh,
                        preferred_element_type=jnp.float32)                # (Tb, Sq, 64)

        # Fold this head's 64 rows of Wo straight into the (Mq, 256) accumulator
        # (replaces concat + one big Wo matmul; output stays 256-lane dense).
        acc = acc + jnp.dot(oh.reshape(Mq, HEAD_DIM).astype(jnp.bfloat16),
                            wo_ref[h], preferred_element_type=jnp.float32)

    o_ref[...] = acc.reshape(Tb, Sq, H)


def _pick_block_b(batch, seq_q, seq_kv, target_rows=256):
    """Largest sequences-per-step so the matmul M dimension is ~128-256 rows while keeping
    >= 2 grid steps (both v7x TensorCores busy) whenever the batch allows it."""
    rows = max(seq_q, seq_kv)
    divs = [d for d in range(1, batch + 1) if batch % d == 0 and d * rows <= target_rows]
    if not divs:
        divs = [1]
    multi = [d for d in divs if batch // d >= 2]
    return max(multi) if multi else max(divs)


def cross_attention_block(x, x_en, i_m, params, block_b=None):
    """x: (B, Sq, 256) f32, x_en: (B, Skv, 256) f32, i_m: mask (no-op in the reference)."""
    del i_m  # the reference's masked_fill is non-inplace and discarded -> mask has no effect
    wq_t, wk_t, wv_t, wo_t = params        # pre-transposed (in, out), bf16
    B, Sq, H = x.shape
    Be, Skv, He = x_en.shape
    assert H == NUM_HIDDENS and He == NUM_HIDDENS and Be == B

    if block_b is None:
        block_b = _pick_block_b(B, Sq, Skv)
    assert B % block_b == 0, (B, block_b)
    grid = (B // block_b,)

    # Head-major weight layout so the kernel never slices 64 lanes out of 256.
    def head_major(w):  # (H_in, H_out) -> (NUM_HEADS, H_in, HEAD_DIM)
        return jnp.transpose(w.reshape(H, NUM_HEADS, HEAD_DIM), (1, 0, 2))

    wq_h = head_major(wq_t)                        # (4, 256, 64)
    wk_h = head_major(wk_t)
    wv_h = head_major(wv_t)
    wo_h = wo_t.reshape(NUM_HEADS, HEAD_DIM, H)    # (4, 64, 256)

    def full(shape):
        return pl.BlockSpec(shape, lambda i, _n=len(shape): (0,) * _n)

    return pl.pallas_call(
        cross_attention_kernel,
        out_shape=jax.ShapeDtypeStruct((B, Sq, H), jnp.float32),
        grid_spec=pltpu.PrefetchScalarGridSpec(
            num_scalar_prefetch=0,
            grid=grid,
            in_specs=[
                pl.BlockSpec((block_b, Sq, H), lambda i: (i, 0, 0)),    # X block
                pl.BlockSpec((block_b, Skv, H), lambda i: (i, 0, 0)),   # X_en block
                full((NUM_HEADS, H, HEAD_DIM)),    # Wq (head-major, bf16)
                full((NUM_HEADS, H, HEAD_DIM)),    # Wk
                full((NUM_HEADS, H, HEAD_DIM)),    # Wv
                full((NUM_HEADS, HEAD_DIM, H)),    # Wo
            ],
            out_specs=pl.BlockSpec((block_b, Sq, H), lambda i: (i, 0, 0)),
        ),
        compiler_params=pltpu.CompilerParams(
            dimension_semantics=("parallel",)),
    )(x, x_en, wq_h, wk_h, wv_h, wo_h)


def make_params(key):
    """Linear weights stored pre-transposed as (in, out) in bf16 (MXU-native)."""
    ks = jax.random.split(key, 4)
    scale = 1.0 / (NUM_HIDDENS ** 0.5)

    def lin_w(k):
        w = jax.random.normal(k, (NUM_HIDDENS, NUM_HIDDENS), jnp.float32) * scale
        return w.astype(jnp.bfloat16)

    return tuple(lin_w(k) for k in ks)   # (wq_t, wk_t, wv_t, wo_t)


def reference_forward(x, x_en, i_m, params):
    """Pure-JAX replica of the PyTorch forward (mask is a no-op in the reference itself;
    weight matmuls use the same bf16-in / f32-accumulate scheme as the kernel)."""
    del i_m
    wq_t, wk_t, wv_t, wo_t = params
    B, Sq, H = x.shape

    def lin(a, w):
        out = jnp.dot(a.reshape(-1, H).astype(jnp.bfloat16), w,
                      preferred_element_type=jnp.float32)
        return out.reshape(a.shape[0], a.shape[1], H)

    def split(t):  # transpose_qkv
        return t.reshape(t.shape[0], t.shape[1], NUM_HEADS, HEAD_DIM).transpose(0, 2, 1, 3)

    Q, K, V = split(lin(x, wq_t)), split(lin(x_en, wk_t)), split(lin(x_en, wv_t))
    A = jnp.einsum("bhqd,bhkd->bhqk", Q, K) / (HEAD_DIM ** 0.5)
    A = jax.nn.softmax(A, axis=-1)
    O = jnp.einsum("bhqk,bhkd->bhqd", A, V)
    O = O.transpose(0, 2, 1, 3).reshape(B, Sq, H)   # transpost_o
    return lin(O, wo_t)


if __name__ == "__main__":
    key = jax.random.PRNGKey(0)
    kx, ke, km, kp = jax.random.split(key, 4)

    # 32 query sequences of length 8 (cross-attending to encoder length 16)
    # -> 2 parallel grid steps of 16 sequences each, M = 128 query rows per step.
    B, Sq, Skv = 32, 8, 16
    x = jax.random.normal(kx, (B, Sq, NUM_HIDDENS), jnp.float32)
    x_en = jax.random.normal(ke, (B, Skv, NUM_HIDDENS), jnp.float32)
    i_m = (jax.random.uniform(km, (B, Sq, Skv)) > 0.2).astype(jnp.float32)  # unused (see note)
    params = make_params(kp)

    out = cross_attention_block(x, x_en, i_m, params)
    out = jax.block_until_ready(out)

    ref = reference_forward(x, x_en, i_m, params)
    assert out.shape == (B, Sq, NUM_HIDDENS)
    max_diff = float(jnp.max(jnp.abs(out - ref)))
    assert jnp.allclose(out, ref, atol=2e-2, rtol=2e-2), (
        f"mismatch vs pure-JAX reference, max abs diff = {max_diff}")

    print("KERNEL_OK")
</pallas_src>

<mosaic_0001>
module attributes {stable_mosaic.version = 11 : i64} {
  func.func @cross_attention_kernel(%arg0: i32, %arg1: memref<16x8x256xf32, #tpu.memory_space<vmem>>, %arg2: memref<16x16x256xf32, #tpu.memory_space<vmem>>, %arg3: memref<4x256x64xbf16, #tpu.memory_space<vmem>>, %arg4: memref<4x256x64xbf16, #tpu.memory_space<vmem>>, %arg5: memref<4x256x64xbf16, #tpu.memory_space<vmem>>, %arg6: memref<4x64x256xbf16, #tpu.memory_space<vmem>>, %arg7: memref<16x8x256xf32, #tpu.memory_space<vmem>>) attributes {dimension_semantics = [#tpu.dimension_semantics<parallel>], iteration_bounds = array<i64: 2>, scalar_prefetch = 0 : i64, scratch_operands = 0 : i64, tpu.core_type = #tpu.core_type<tc>, window_params = [{transform_indices = @transform_0, window_bounds = array<i64: 16, 8, 256>}, {transform_indices = @transform_1, window_bounds = array<i64: 16, 16, 256>}, {pipeline_mode = #tpu.pipeline_mode<synchronous>, transform_indices = @transform_2, window_bounds = array<i64: 4, 256, 64>}, {pipeline_mode = #tpu.pipeline_mode<synchronous>, transform_indices = @transform_3, window_bounds = array<i64: 4, 256, 64>}, {pipeline_mode = #tpu.pipeline_mode<synchronous>, transform_indices = @transform_4, window_bounds = array<i64: 4, 256, 64>}, {pipeline_mode = #tpu.pipeline_mode<synchronous>, transform_indices = @transform_5, window_bounds = array<i64: 4, 64, 256>}, {transform_indices = @transform_6, window_bounds = array<i64: 16, 8, 256>}]} {
    %c0 = arith.constant 0 : index
    %c0_0 = arith.constant 0 : index
    %c0_1 = arith.constant 0 : index
    %0 = vector.load %arg1[%c0, %c0_0, %c0_1] : memref<16x8x256xf32, #tpu.memory_space<vmem>>, vector<16x8x256xf32>
    %1 = vector.shape_cast %0 : vector<16x8x256xf32> to vector<128x256xf32>
    %2 = arith.truncf %1 : vector<128x256xf32> to vector<128x256xbf16>
    %c0_2 = arith.constant 0 : index
    %c0_3 = arith.constant 0 : index
    %c0_4 = arith.constant 0 : index
    %3 = vector.load %arg2[%c0_2, %c0_3, %c0_4] : memref<16x16x256xf32, #tpu.memory_space<vmem>>, vector<16x16x256xf32>
    %4 = vector.shape_cast %3 : vector<16x16x256xf32> to vector<256x256xf32>
    %5 = arith.truncf %4 : vector<256x256xf32> to vector<256x256xbf16>
    %cst = arith.constant 0.000000e+00 : f32
    %6 = vector.broadcast %cst : f32 to vector<128x256xf32>
    %c0_5 = arith.constant 0 : index
    %c0_6 = arith.constant 0 : index
    %c0_7 = arith.constant 0 : index
    %7 = vector.load %arg3[%c0_5, %c0_6, %c0_7] : memref<4x256x64xbf16, #tpu.memory_space<vmem>>, vector<1x256x64xbf16>
    %8 = vector.shape_cast %7 : vector<1x256x64xbf16> to vector<256x64xbf16>
    %cst_8 = arith.constant dense<0.000000e+00> : vector<128x64xf32>
    %9 = tpu.matmul %2, %8, %cst_8 {dimension_numbers = #tpu.dot_dimension_numbers<[1], [0], [0], [1], [0, 0, 1, 1], [], []>} : vector<128x256xbf16>, vector<256x64xbf16>, vector<128x64xf32> -> vector<128x64xf32>
    %c0_9 = arith.constant 0 : index
    %c0_10 = arith.constant 0 : index
    %c0_11 = arith.constant 0 : index
    %10 = vector.load %arg4[%c0_9, %c0_10, %c0_11] : memref<4x256x64xbf16, #tpu.memory_space<vmem>>, vector<1x256x64xbf16>
    %11 = vector.shape_cast %10 : vector<1x256x64xbf16> to vector<256x64xbf16>
    %cst_12 = arith.constant dense<0.000000e+00> : vector<256x64xf32>
    %12 = tpu.matmul %5, %11, %cst_12 {dimension_numbers = #tpu.dot_dimension_numbers<[1], [0], [0], [1], [0, 0, 1, 1], [], []>} : vector<256x256xbf16>, vector<256x64xbf16>, vector<256x64xf32> -> vector<256x64xf32>
    %c0_13 = arith.constant 0 : index
    %c0_14 = arith.constant 0 : index
    %c0_15 = arith.constant 0 : index
    %13 = vector.load %arg5[%c0_13, %c0_14, %c0_15] : memref<4x256x64xbf16, #tpu.memory_space<vmem>>, vector<1x256x64xbf16>
    %14 = vector.shape_cast %13 : vector<1x256x64xbf16> to vector<256x64xbf16>
    %cst_16 = arith.constant dense<0.000000e+00> : vector<256x64xf32>
    %15 = tpu.matmul %5, %14, %cst_16 {dimension_numbers = #tpu.dot_dimension_numbers<[1], [0], [0], [1], [0, 0, 1, 1], [], []>} : vector<256x256xbf16>, vector<256x64xbf16>, vector<256x64xf32> -> vector<256x64xf32>
    %16 = vector.shape_cast %9 : vector<128x64xf32> to vector<16x8x64xf32>
    %17 = vector.shape_cast %12 : vector<256x64xf32> to vector<16x16x64xf32>
    %18 = vector.shape_cast %15 : vector<256x64xf32> to vector<16x16x64xf32>
    "tpu.trace_start"() <{level = 10 : i32, message = "bqd,bkd->bqk"}> : () -> ()
    %cst_17 = arith.constant dense<0.000000e+00> : vector<16x8x16xf32>
    %19 = tpu.matmul %16, %17, %cst_17 {dimension_numbers = #tpu.dot_dimension_numbers<[2], [2], [1], [1], [0, 0, 0, 1, 1, 1], [0], [0]>} : vector<16x8x64xf32>, vector<16x16x64xf32>, vector<16x8x16xf32> -> vector<16x8x16xf32>
    "tpu.trace_stop"() : () -> ()
    %cst_18 = arith.constant 1.250000e-01 : f32
    %20 = vector.broadcast %cst_18 : f32 to vector<16x8x16xf32>
    %21 = arith.mulf %19, %20 : vector<16x8x16xf32>
    %cst_19 = arith.constant dense<0xFF800000> : vector<16x8xf32>
    %22 = vector.multi_reduction <maximumf>, %21, %cst_19 [2] : vector<16x8x16xf32> to vector<16x8xf32>
    %23 = vector.shape_cast %22 : vector<16x8xf32> to vector<16x8x1xf32>
    %24 = vector.broadcast %23 : vector<16x8x1xf32> to vector<16x8x16xf32>
    %25 = arith.subf %21, %24 : vector<16x8x16xf32>
    %26 = math.exp %25 : vector<16x8x16xf32>
    %cst_20 = arith.constant dense<0.000000e+00> : vector<16x8xf32>
    %27 = vector.multi_reduction <add>, %26, %cst_20 [2] : vector<16x8x16xf32> to vector<16x8xf32>
    %28 = vector.shape_cast %27 : vector<16x8xf32> to vector<16x8x1xf32>
    %29 = tpu.reciprocal %28 {approx = true} : vector<16x8x1xf32> -> vector<16x8x1xf32>
    %30 = vector.broadcast %29 : vector<16x8x1xf32> to vector<16x8x16xf32>
    %31 = arith.mulf %26, %30 : vector<16x8x16xf32>
    "tpu.trace_start"() <{level = 10 : i32, message = "bqk,bkd->bqd"}> : () -> ()
    %cst_21 = arith.constant dense<0.000000e+00> : vector<16x8x64xf32>
    %32 = tpu.matmul %31, %18, %cst_21 {dimension_numbers = #tpu.dot_dimension_numbers<[2], [1], [1], [2], [0, 0, 0, 1, 1, 2], [0], [0]>} : vector<16x8x16xf32>, vector<16x16x64xf32>, vector<16x8x64xf32> -> vector<16x8x64xf32>
    "tpu.trace_stop"() : () -> ()
    %33 = vector.shape_cast %32 : vector<16x8x64xf32> to vector<128x64xf32>
    %34 = arith.truncf %33 : vector<128x64xf32> to vector<128x64xbf16>
    %c0_22 = arith.constant 0 : index
    %c0_23 = arith.constant 0 : index
    %c0_24 = arith.constant 0 : index
    %35 = vector.load %arg6[%c0_22, %c0_23, %c0_24] : memref<4x64x256xbf16, #tpu.memory_space<vmem>>, vector<1x64x256xbf16>
    %36 = vector.shape_cast %35 : vector<1x64x256xbf16> to vector<64x256xbf16>
    %cst_25 = arith.constant dense<0.000000e+00> : vector<128x256xf32>
    %37 = tpu.matmul %34, %36, %cst_25 {dimension_numbers = #tpu.dot_dimension_numbers<[1], [0], [0], [1], [0, 0, 1, 1], [], []>} : vector<128x64xbf16>, vector<64x256xbf16>, vector<128x256xf32> -> vector<128x256xf32>
    %38 = arith.addf %6, %37 : vector<128x256xf32>
    %c1 = arith.constant 1 : index
    %c0_26 = arith.constant 0 : index
    %c0_27 = arith.constant 0 : index
    %39 = vector.load %arg3[%c1, %c0_26, %c0_27] : memref<4x256x64xbf16, #tpu.memory_space<vmem>>, vector<1x256x64xbf16>
    %40 = vector.shape_cast %39 : vector<1x256x64xbf16> to vector<256x64xbf16>
    %cst_28 = arith.constant dense<0.000000e+00> : vector<128x64xf32>
    %41 = tpu.matmul %2, %40, %cst_28 {dimension_numbers = #tpu.dot_dimension_numbers<[1], [0], [0], [1], [0, 0, 1, 1], [], []>} : vector<128x256xbf16>, vector<256x64xbf16>, vector<128x64xf32> -> vector<128x64xf32>
    %c1_29 = arith.constant 1 : index
    %c0_30 = arith.constant 0 : index
    %c0_31 = arith.constant 0 : index
    %42 = vector.load %arg4[%c1_29, %c0_30, %c0_31] : memref<4x256x64xbf16, #tpu.memory_space<vmem>>, vector<1x256x64xbf16>
    %43 = vector.shape_cast %42 : vector<1x256x64xbf16> to vector<256x64xbf16>
    %cst_32 = arith.constant dense<0.000000e+00> : vector<256x64xf32>
    %44 = tpu.matmul %5, %43, %cst_32 {dimension_numbers = #tpu.dot_dimension_numbers<[1], [0], [0], [1], [0, 0, 1, 1], [], []>} : vector<256x256xbf16>, vector<256x64xbf16>, vector<256x64xf32> -> vector<256x64xf32>
    %c1_33 = arith.constant 1 : index
    %c0_34 = arith.constant 0 : index
    %c0_35 = arith.constant 0 : index
    %45 = vector.load %arg5[%c1_33, %c0_34, %c0_35] : memref<4x256x64xbf16, #tpu.memory_space<vmem>>, vector<1x256x64xbf16>
    %46 = vector.shape_cast %45 : vector<1x256x64xbf16> to vector<256x64xbf16>
    %cst_36 = arith.constant dense<0.000000e+00> : vector<256x64xf32>
    %47 = tpu.matmul %5, %46, %cst_36 {dimension_numbers = #tpu.dot_dimension_numbers<[1], [0], [0], [1], [0, 0, 1, 1], [], []>} : vector<256x256xbf16>, vector<256x64xbf16>, vector<256x64xf32> -> vector<256x64xf32>
    %48 = vector.shape_cast %41 : vector<128x64xf32> to vector<16x8x64xf32>
    %49 = vector.shape_cast %44 : vector<256x64xf32> to vector<16x16x64xf32>
    %50 = vector.shape_cast %47 : vector<256x64xf32> to vector<16x16x64xf32>
    "tpu.trace_start"() <{level = 10 : i32, message = "bqd,bkd->bqk"}> : () -> ()
    %cst_37 = arith.constant dense<0.000000e+00> : vector<16x8x16xf32>
    %51 = tpu.matmul %48, %49, %cst_37 {dimension_numbers = #tpu.dot_dimension_numbers<[2], [2], [1], [1], [0, 0, 0, 1, 1, 1], [0], [0]>} : vector<16x8x64xf32>, vector<16x16x64xf32>, vector<16x8x16xf32> -> vector<16x8x16xf32>
    "tpu.trace_stop"() : () -> ()
    %cst_38 = arith.constant 1.250000e-01 : f32
    %52 = vector.broadcast %cst_38 : f32 to vector<16x8x16xf32>
    %53 = arith.mulf %51, %52 : vector<16x8x16xf32>
    %cst_39 = arith.constant dense<0xFF800000> : vector<16x8xf32>
    %54 = vector.multi_reduction <maximumf>, %53, %cst_39 [2] : vector<16x8x16xf32> to vector<16x8xf32>
    %55 = vector.shape_cast %54 : vector<16x8xf32> to vector<16x8x1xf32>
    %56 = vector.broadcast %55 : vector<16x8x1xf32> to vector<16x8x16xf32>
    %57 = arith.subf %53, %56 : vector<16x8x16xf32>
    %58 = math.exp %57 : vector<16x8x16xf32>
    %cst_40 = arith.constant dense<0.000000e+00> : vector<16x8xf32>
    %59 = vector.multi_reduction <add>, %58, %cst_40 [2] : vector<16x8x16xf32> to vector<16x8xf32>
    %60 = vector.shape_cast %59 : vector<16x8xf32> to vector<16x8x1xf32>
    %61 = tpu.reciprocal %60 {approx = true} : vector<16x8x1xf32> -> vector<16x8x1xf32>
    %62 = vector.broadcast %61 : vector<16x8x1xf32> to vector<16x8x16xf32>
    %63 = arith.mulf %58, %62 : vector<16x8x16xf32>
    "tpu.trace_start"() <{level = 10 : i32, message = "bqk,bkd->bqd"}> : () -> ()
    %cst_41 = arith.constant dense<0.000000e+00> : vector<16x8x64xf32>
    %64 = tpu.matmul %63, %50, %cst_41 {dimension_numbers = #tpu.dot_dimension_numbers<[2], [1], [1], [2], [0, 0, 0, 1, 1, 2], [0], [0]>} : vector<16x8x16xf32>, vector<16x16x64xf32>, vector<16x8x64xf32> -> vector<16x8x64xf32>
    "tpu.trace_stop"() : () -> ()
    %65 = vector.shape_cast %64 : vector<16x8x64xf32> to vector<128x64xf32>
    %66 = arith.truncf %65 : vector<128x64xf32> to vector<128x64xbf16>
    %c1_42 = arith.constant 1 : index
    %c0_43 = arith.constant 0 : index
    %c0_44 = arith.constant 0 : index
    %67 = vector.load %arg6[%c1_42, %c0_43, %c0_44] : memref<4x64x256xbf16, #tpu.memory_space<vmem>>, vector<1x64x256xbf16>
    %68 = vector.shape_cast %67 : vector<1x64x256xbf16> to vector<64x256xbf16>
    %cst_45 = arith.constant dense<0.000000e+00> : vector<128x256xf32>
    %69 = tpu.matmul %66, %68, %cst_45 {dimension_numbers = #tpu.dot_dimension_numbers<[1], [0], [0], [1], [0, 0, 1, 1], [], []>} : vector<128x64xbf16>, vector<64x256xbf16>, vector<128x256xf32> -> vector<128x256xf32>
    %70 = arith.addf %38, %69 : vector<128x256xf32>
    %c2 = arith.constant 2 : index
    %c0_46 = arith.constant 0 : index
    %c0_47 = arith.constant 0 : index
    %71 = vector.load %arg3[%c2, %c0_46, %c0_47] : memref<4x256x64xbf16, #tpu.memory_space<vmem>>, vector<1x256x64xbf16>
    %72 = vector.shape_cast %71 : vector<1x256x64xbf16> to vector<256x64xbf16>
    %cst_48 = arith.constant dense<0.000000e+00> : vector<128x64xf32>
    %73 = tpu.matmul %2, %72, %cst_48 {dimension_numbers = #tpu.dot_dimension_numbers<[1], [0], [0], [1], [0, 0, 1, 1], [], []>} : vector<128x256xbf16>, vector<256x64xbf16>, vector<128x64xf32> -> vector<128x64xf32>
    %c2_49 = arith.constant 2 : index
    %c0_50 = arith.constant 0 : index
    %c0_51 = arith.constant 0 : index
    %74 = vector.load %arg4[%c2_49, %c0_50, %c0_51] : memref<4x256x64xbf16, #tpu.memory_space<vmem>>, vector<1x256x64xbf16>
    %75 = vector.shape_cast %74 : vector<1x256x64xbf16> to vector<256x64xbf16>
    %cst_52 = arith.constant dense<0.000000e+00> : vector<256x64xf32>
    %76 = tpu.matmul %5, %75, %cst_52 {dimension_numbers = #tpu.dot_dimension_numbers<[1], [0], [0], [1], [0, 0, 1, 1], [], []>} : vector<256x256xbf16>, vector<256x64xbf16>, vector<256x64xf32> -> vector<256x64xf32>
    %c2_53 = arith.constant 2 : index
    %c0_54 = arith.constant 0 : index
    %c0_55 = arith.constant 0 : index
    %77 = vector.load %arg5[%c2_53, %c0_54, %c0_55] : memref<4x256x64xbf16, #tpu.memory_space<vmem>>, vector<1x256x64xbf16>
    %78 = vector.shape_cast %77 : vector<1x256x64xbf16> to vector<256x64xbf16>
    %cst_56 = arith.constant dense<0.000000e+00> : vector<256x64xf32>
    %79 = tpu.matmul %5, %78, %cst_56 {dimension_numbers = #tpu.dot_dimension_numbers<[1], [0], [0], [1], [0, 0, 1, 1], [], []>} : vector<256x256xbf16>, vector<256x64xbf16>, vector<256x64xf32> -> vector<256x64xf32>
    %80 = vector.shape_cast %73 : vector<128x64xf32> to vector<16x8x64xf32>
    %81 = vector.shape_cast %76 : vector<256x64xf32> to vector<16x16x64xf32>
    %82 = vector.shape_cast %79 : vector<256x64xf32> to vector<16x16x64xf32>
    "tpu.trace_start"() <{level = 10 : i32, message = "bqd,bkd->bqk"}> : () -> ()
    %cst_57 = arith.constant dense<0.000000e+00> : vector<16x8x16xf32>
    %83 = tpu.matmul %80, %81, %cst_57 {dimension_numbers = #tpu.dot_dimension_numbers<[2], [2], [1], [1], [0, 0, 0, 1, 1, 1], [0], [0]>} : vector<16x8x64xf32>, vector<16x16x64xf32>, vector<16x8x16xf32> -> vector<16x8x16xf32>
    "tpu.trace_stop"() : () -> ()
    %cst_58 = arith.constant 1.250000e-01 : f32
    %84 = vector.broadcast %cst_58 : f32 to vector<16x8x16xf32>
    %85 = arith.mulf %83, %84 : vector<16x8x16xf32>
    %cst_59 = arith.constant dense<0xFF800000> : vector<16x8xf32>
    %86 = vector.multi_reduction <maximumf>, %85, %cst_59 [2] : vector<16x8x16xf32> to vector<16x8xf32>
    %87 = vector.shape_cast %86 : vector<16x8xf32> to vector<16x8x1xf32>
    %88 = vector.broadcast %87 : vector<16x8x1xf32> to vector<16x8x16xf32>
    %89 = arith.subf %85, %88 : vector<16x8x16xf32>
    %90 = math.exp %89 : vector<16x8x16xf32>
    %cst_60 = arith.constant dense<0.000000e+00> : vector<16x8xf32>
    %91 = vector.multi_reduction <add>, %90, %cst_60 [2] : vector<16x8x16xf32> to vector<16x8xf32>
    %92 = vector.shape_cast %91 : vector<16x8xf32> to vector<16x8x1xf32>
    %93 = tpu.reciprocal %92 {approx = true} : vector<16x8x1xf32> -> vector<16x8x1xf32>
    %94 = vector.broadcast %93 : vector<16x8x1xf32> to vector<16x8x16xf32>
    %95 = arith.mulf %90, %94 : vector<16x8x16xf32>
    "tpu.trace_start"() <{level = 10 : i32, message = "bqk,bkd->bqd"}> : () -> ()
    %cst_61 = arith.constant dense<0.000000e+00> : vector<16x8x64xf32>
    %96 = tpu.matmul %95, %82, %cst_61 {dimension_numbers = #tpu.dot_dimension_numbers<[2], [1], [1], [2], [0, 0, 0, 1, 1, 2], [0], [0]>} : vector<16x8x16xf32>, vector<16x16x64xf32>, vector<16x8x64xf32> -> vector<16x8x64xf32>
    "tpu.trace_stop"() : () -> ()
    %97 = vector.shape_cast %96 : vector<16x8x64xf32> to vector<128x64xf32>
    %98 = arith.truncf %97 : vector<128x64xf32> to vector<128x64xbf16>
    %c2_62 = arith.constant 2 : index
    %c0_63 = arith.constant 0 : index
    %c0_64 = arith.constant 0 : index
    %99 = vector.load %arg6[%c2_62, %c0_63, %c0_64] : memref<4x64x256xbf16, #tpu.memory_space<vmem>>, vector<1x64x256xbf16>
    %100 = vector.shape_cast %99 : vector<1x64x256xbf16> to vector<64x256xbf16>
    %cst_65 = arith.constant dense<0.000000e+00> : vector<128x256xf32>
    %101 = tpu.matmul %98, %100, %cst_65 {dimension_numbers = #tpu.dot_dimension_numbers<[1], [0], [0], [1], [0, 0, 1, 1], [], []>} : vector<128x64xbf16>, vector<64x256xbf16>, vector<128x256xf32> -> vector<128x256xf32>
    %102 = arith.addf %70, %101 : vector<128x256xf32>
    %c3 = arith.constant 3 : index
    %c0_66 = arith.constant 0 : index
    %c0_67 = arith.constant 0 : index
    %103 = vector.load %arg3[%c3, %c0_66, %c0_67] : memref<4x256x64xbf16, #tpu.memory_space<vmem>>, vector<1x256x64xbf16>
    %104 = vector.shape_cast %103 : vector<1x256x64xbf16> to vector<256x64xbf16>
    %cst_68 = arith.constant dense<0.000000e+00> : vector<128x64xf32>
    %105 = tpu.matmul %2, %104, %cst_68 {dimension_numbers = #tpu.dot_dimension_numbers<[1], [0], [0], [1], [0, 0, 1, 1], [], []>} : vector<128x256xbf16>, vector<256x64xbf16>, vector<128x64xf32> -> vector<128x64xf32>
    %c3_69 = arith.constant 3 : index
    %c0_70 = arith.constant 0 : index
    %c0_71 = arith.constant 0 : index
    %106 = vector.load %arg4[%c3_69, %c0_70, %c0_71] : memref<4x256x64xbf16, #tpu.memory_space<vmem>>, vector<1x256x64xbf16>
    %107 = vector.shape_cast %106 : vector<1x256x64xbf16> to vector<256x64xbf16>
    %cst_72 = arith.constant dense<0.000000e+00> : vector<256x64xf32>
    %108 = tpu.matmul %5, %107, %cst_72 {dimension_numbers = #tpu.dot_dimension_numbers<[1], [0], [0], [1], [0, 0, 1, 1], [], []>} : vector<256x256xbf16>, vector<256x64xbf16>, vector<256x64xf32> -> vector<256x64xf32>
    %c3_73 = arith.constant 3 : index
    %c0_74 = arith.constant 0 : index
    %c0_75 = arith.constant 0 : index
    %109 = vector.load %arg5[%c3_73, %c0_74, %c0_75] : memref<4x256x64xbf16, #tpu.memory_space<vmem>>, vector<1x256x64xbf16>
    %110 = vector.shape_cast %109 : vector<1x256x64xbf16> to vector<256x64xbf16>
    %cst_76 = arith.constant dense<0.000000e+00> : vector<256x64xf32>
    %111 = tpu.matmul %5, %110, %cst_76 {dimension_numbers = #tpu.dot_dimension_numbers<[1], [0], [0], [1], [0, 0, 1, 1], [], []>} : vector<256x256xbf16>, vector<256x64xbf16>, vector<256x64xf32> -> vector<256x64xf32>
    %112 = vector.shape_cast %105 : vector<128x64xf32> to vector<16x8x64xf32>
    %113 = vector.shape_cast %108 : vector<256x64xf32> to vector<16x16x64xf32>
    %114 = vector.shape_cast %111 : vector<256x64xf32> to vector<16x16x64xf32>
    "tpu.trace_start"() <{level = 10 : i32, message = "bqd,bkd->bqk"}> : () -> ()
    %cst_77 = arith.constant dense<0.000000e+00> : vector<16x8x16xf32>
    %115 = tpu.matmul %112, %113, %cst_77 {dimension_numbers = #tpu.dot_dimension_numbers<[2], [2], [1], [1], [0, 0, 0, 1, 1, 1], [0], [0]>} : vector<16x8x64xf32>, vector<16x16x64xf32>, vector<16x8x16xf32> -> vector<16x8x16xf32>
    "tpu.trace_stop"() : () -> ()
    %cst_78 = arith.constant 1.250000e-01 : f32
    %116 = vector.broadcast %cst_78 : f32 to vector<16x8x16xf32>
    %117 = arith.mulf %115, %116 : vector<16x8x16xf32>
    %cst_79 = arith.constant dense<0xFF800000> : vector<16x8xf32>
    %118 = vector.multi_reduction <maximumf>, %117, %cst_79 [2] : vector<16x8x16xf32> to vector<16x8xf32>
    %119 = vector.shape_cast %118 : vector<16x8xf32> to vector<16x8x1xf32>
    %120 = vector.broadcast %119 : vector<16x8x1xf32> to vector<16x8x16xf32>
    %121 = arith.subf %117, %120 : vector<16x8x16xf32>
    %122 = math.exp %121 : vector<16x8x16xf32>
    %cst_80 = arith.constant dense<0.000000e+00> : vector<16x8xf32>
    %123 = vector.multi_reduction <add>, %122, %cst_80 [2] : vector<16x8x16xf32> to vector<16x8xf32>
    %124 = vector.shape_cast %123 : vector<16x8xf32> to vector<16x8x1xf32>
    %125 = tpu.reciprocal %124 {approx = true} : vector<16x8x1xf32> -> vector<16x8x1xf32>
    %126 = vector.broadcast %125 : vector<16x8x1xf32> to vector<16x8x16xf32>
    %127 = arith.mulf %122, %126 : vector<16x8x16xf32>
    "tpu.trace_start"() <{level = 10 : i32, message = "bqk,bkd->bqd"}> : () -> ()
    %cst_81 = arith.constant dense<0.000000e+00> : vector<16x8x64xf32>
    %128 = tpu.matmul %127, %114, %cst_81 {dimension_numbers = #tpu.dot_dimension_numbers<[2], [1], [1], [2], [0, 0, 0, 1, 1, 2], [0], [0]>} : vector<16x8x16xf32>, vector<16x16x64xf32>, vector<16x8x64xf32> -> vector<16x8x64xf32>
    "tpu.trace_stop"() : () -> ()
    %129 = vector.shape_cast %128 : vector<16x8x64xf32> to vector<128x64xf32>
    %130 = arith.truncf %129 : vector<128x64xf32> to vector<128x64xbf16>
    %c3_82 = arith.constant 3 : index
    %c0_83 = arith.constant 0 : index
    %c0_84 = arith.constant 0 : index
    %131 = vector.load %arg6[%c3_82, %c0_83, %c0_84] : memref<4x64x256xbf16, #tpu.memory_space<vmem>>, vector<1x64x256xbf16>
    %132 = vector.shape_cast %131 : vector<1x64x256xbf16> to vector<64x256xbf16>
    %cst_85 = arith.constant dense<0.000000e+00> : vector<128x256xf32>
    %133 = tpu.matmul %130, %132, %cst_85 {dimension_numbers = #tpu.dot_dimension_numbers<[1], [0], [0], [1], [0, 0, 1, 1], [], []>} : vector<128x64xbf16>, vector<64x256xbf16>, vector<128x256xf32> -> vector<128x256xf32>
    %134 = arith.addf %102, %133 : vector<128x256xf32>
    %135 = vector.shape_cast %134 : vector<128x256xf32> to vector<16x8x256xf32>
    %c0_86 = arith.constant 0 : index
    %c0_87 = arith.constant 0 : index
    %c0_88 = arith.constant 0 : index
    %136 = vector.load %arg7[%c0_86, %c0_87, %c0_88] : memref<16x8x256xf32, #tpu.memory_space<vmem>>, vector<16x8x256xf32>
    tpu.vector_store %arg7[%c0_86, %c0_87, %c0_88], %135 {strides = array<i32>} : memref<16x8x256xf32, #tpu.memory_space<vmem>>, vector<16x8x256xf32>,
    return
  }
  func.func @transform_0(%arg0: i32) -> (i32, i32, i32) {
    %c0_i32 = arith.constant 0 : i32
    %c0_i32_0 = arith.constant 0 : i32
    %c0_i32_1 = arith.constant 0 : i32
    return %arg0, %c0_i32, %c0_i32_0 : i32, i32, i32
  }
  func.func @transform_1(%arg0: i32) -> (i32, i32, i32) {
    %c0_i32 = arith.constant 0 : i32
    %c0_i32_0 = arith.constant 0 : i32
    %c0_i32_1 = arith.constant 0 : i32
    return %arg0, %c0_i32, %c0_i32_0 : i32, i32, i32
  }
  func.func @transform_2(%arg0: i32) -> (i32, i32, i32) {
    %c0_i32 = arith.constant 0 : i32
    %c0_i32_0 = arith.constant 0 : i32
    %c0_i32_1 = arith.constant 0 : i32
    %c0_i32_2 = arith.constant 0 : i32
    return %c0_i32, %c0_i32_0, %c0_i32_1 : i32, i32, i32
  }
  func.func @transform_3(%arg0: i32) -> (i32, i32, i32) {
    %c0_i32 = arith.constant 0 : i32
    %c0_i32_0 = arith.constant 0 : i32
    %c0_i32_1 = arith.constant 0 : i32
    %c0_i32_2 = arith.constant 0 : i32
    return %c0_i32, %c0_i32_0, %c0_i32_1 : i32, i32, i32
  }
  func.func @transform_4(%arg0: i32) -> (i32, i32, i32) {
    %c0_i32 = arith.constant 0 : i32
    %c0_i32_0 = arith.constant 0 : i32
    %c0_i32_1 = arith.constant 0 : i32
    %c0_i32_2 = arith.constant 0 : i32
    return %c0_i32, %c0_i32_0, %c0_i32_1 : i32, i32, i32
  }
  func.func @transform_5(%arg0: i32) -> (i32, i32, i32) {
    %c0_i32 = arith.constant 0 : i32
    %c0_i32_0 = arith.constant 0 : i32
    %c0_i32_1 = arith.constant 0 : i32
    %c0_i32_2 = arith.constant 0 : i32
    return %c0_i32, %c0_i32_0, %c0_i32_1 : i32, i32, i32
  }
  func.func @transform_6(%arg0: i32) -> (i32, i32, i32) {
    %c0_i32 = arith.constant 0 : i32
    %c0_i32_0 = arith.constant 0 : i32
    %c0_i32_1 = arith.constant 0 : i32
    return %arg0, %c0_i32, %c0_i32_0 : i32, i32, i32
  }
}

</mosaic_0001>

<bundles_post_ra>
// kernel: tpu_custom_call.1
= control target key start
LH: loop header
LB: loop body
LE: loop exit
PB: predicated region body
PF: predicated region fallthrough
CT: control target
= control target key end

     0   :  { %11 = vsyncpa [#allocation3], 0  ;;  %s14177_s0 = inlined_call_operand.vmem [shape: f32[32,8,256], index: 0, kind: input, shape index: {}]   ;;  %s14178_s1 = inlined_call_operand.vmem [shape: f32[32,16,256], index: 1, kind: input, shape index: {}]   ;;  %s14179_s2 = inlined_call_operand.vmem [shape: bf16[4,256,64], index: 2, kind: input, shape index: {}]   ;;  %s14180_s3 = inlined_call_operand.vmem [shape: bf16[4,256,64], index: 3, kind: input, shape index: {}]   ;;  %s14181_s4 = inlined_call_operand.vmem [shape: bf16[4,256,64], index: 4, kind: input, shape index: {}]   ;;  %s14182_s5 = inlined_call_operand.vmem [shape: bf16[4,64,256], index: 5, kind: input, shape index: {}]   ;;  %s14183_s6 = inlined_call_operand.hbm [shape: f32[32,8,256], index: 6, kind: output, shape index: {}]  }
   0x1   :  { %13 = vsyncpa [#allocation3 + $0x1], 0  ;;  %s10974_s21 = smov 0   ;;  %s10976_s22 = smov 0  }
   0x2   :  { %s10978_s23 = smov 0   ;;  %s10980_s24 = smov 0  }
   0x3 LB: > { %s10995_s25 = sadd.s32 4294967295, %s10935_s24   ;;  %s8787_s26 = sadd.s32 4294967294, %s10935_s24   ;;  %s10935_s24 = sphi %s10980_s24, %s14678_s24   ;;  %s10931_s23 = sphi %s10978_s23, %s14677_s23   ;;  %s10927_s22 = sphi %s10976_s22, %s14676_s22   ;;  %s10923_s21 = sphi %s10974_s21, %s14675_s21  }
   0x4   : > { %s10999_s27 = sadd.s32 1, %s10935_s24   ;;  %s162_s28 = sadd.s32 1, %s10931_s23 }
   0x5   : > { %s159_s29 = ssub.s32 %s10935_s24, %s10999_s27  ;;  %p172_p0 = scmp.ne.s32.totalorder %s10931_s23, %s10927_s22 }
   0x6   : > { %p160_p1 = scmp.eq.s32.totalorder %s159_s29, 0  ;;  %p173_p2 = scmp.eq.s32.totalorder %s10995_s25, 1 }
   0x7   : > { %p178_p3 = scmp.ne.s32.totalorder %s10927_s22, %s10923_s21  ;;  %p179_p4 = scmp.eq.s32.totalorder %s8787_s26, 1 }
   0x8   : > { %s11010_s30 = scalar_select %p160_p1, %s10931_s23, %s162_s28  }
   0x9   : > { %p11012_p5 = por %p173_p2, %p172_p0  ;;  %p11016_p6 = por %p179_p4, %p178_p3 }
   0xa   : > { %p8790_p7 = scmp.ge.s32.totalorder %s10935_s24, 1  ;;  %p229_p8 = scmp.lt.s32.totalorder %s10935_s24, 3 }
   0xc   : > { %p230_p9 = pnand %p8790_p7, %p229_p8 }
   0xe   : > { %233 = sbr.rel (%p230_p9) target bundleno = 3949 (0xf6d), region = 44 }
  0x13   : > { %v10341_v0 = vld [vmem:[%s14179_s2 + $0x38] sm:$0xff]  ;;  %v10340_v2 = vld [vmem:[%s14179_s2 + $0x30] sm:$0xff]  ;;  %v10339_v4 = vld [vmem:[%s14179_s2 + $0x28] sm:$0xff]  ;;  %s8792_s26 = sshll.u32 %s10995_s25, 4  ;;  %vm1264_vm0 = vcmask 523264   ;;  %vm1745_vm1 = vcmask 130048  }
  0x14   : > { %v10349_v1 = vld [vmem:[%s14179_s2 + $0x78] sm:$0xff]  ;;  %10560 = vmatpush.bf16.msra.mxu2 %v10341_v0  ;;  %v10348_v3 = vld [vmem:[%s14179_s2 + $0x70] sm:$0xff]  ;;  %554 = vmatpush.bf16.msra.mxu0 %v10341_v0  ;;  %v10347_v5 = vld [vmem:[%s14179_s2 + $0x68] sm:$0xff]  ;;  %p267_p10 = scmp.lt.s32.totalorder %s8792_s26, 31  ;;  %s263_s11 = sand.u32 1, %s10927_s22  }
  0x15   : > { %10568 = vmatpush.bf16.msra.mxu3 %v10349_v1  ;;  %603 = vmatpush.bf16.msra.mxu1 %v10349_v1  ;;  %v10338_v6 = vld [vmem:[%s14179_s2 + $0x20] sm:$0xff]  ;;  %v10337_v8 = vld [vmem:[%s14179_s2 + $0x18] sm:$0xff]  ;;  %v10336_v10 = vld [vmem:[%s14179_s2 + $0x10] sm:$0xff]  ;;  %s8697_s18 = scalar_lea.sflag [#allocation3], %s263_s11 }
  0x16   : > { %v10346_v7 = vld [vmem:[%s14179_s2 + $0x60] sm:$0xff]  ;;  %v10345_v9 = vld [vmem:[%s14179_s2 + $0x58] sm:$0xff]  ;;  %s14680_s26 = smov (!%p267_p10, %s8792_s26), 31  ;;  %v10344_v11 = vld [vmem:[%s14179_s2 + $0x50] sm:$0xff] }
  0x17   : > { %s10332_s19 = sshll.u32 %s14680_s26, 4  ;;  %v10335_v12 = vld [vmem:[%s14179_s2 + $0x8] sm:$0xff]  ;;  %v10334_v14 = vld [vmem:[%s14179_s2] sm:$0xff]  ;;  %v10357_v22 = vld [vmem:[%s14180_s3 + $0x38] sm:$0xff]  ;;  %s10333_s9 = sshll.u32 %s14680_s26, 5 }
  0x18   : > { %10561 = vmatpush.bf16.msra.mxu2 %v10340_v2  ;;  %555 = vmatpush.bf16.msra.mxu0 %v10340_v2  ;;  %v10343_v13 = vld [vmem:[%s14179_s2 + $0x48] sm:$0xff]  ;;  %s11071_s12 = scalar_lea.vmem %s14177_s0, %s10332_s19  ;;  %v10342_v15 = vld [vmem:[%s14179_s2 + $0x40] sm:$0xff]  ;;  %v10365_v23 = vld [vmem:[%s14180_s3 + $0x78] sm:$0xff]  ;;  %s11171_s13 = scalar_lea.vmem %s14178_s1, %s10333_s9 }
  0x19   : > { %10569 = vmatpush.bf16.msra.mxu3 %v10348_v3  ;;  %604 = vmatpush.bf16.msra.mxu1 %v10348_v3  ;;  %v298_v16 = vld [vmem:[%s11071_s12 + $0x80] sm:$0xff]  ;;  %v300_v17 = vld [vmem:[%s11071_s12 + $0x90] sm:$0xff]  ;;  %v299_v18 = vld [vmem:[%s11071_s12 + $0x88] sm:$0xff]  ;;  %s10893_s9 = scalar_lea.hbm %s14183_s6, 512 }
  0x1a   : > { %v301_v19 = vld [vmem:[%s11071_s12 + $0x98] sm:$0xff]  ;;  %v11083_v20 = vpack.c.bf16 %v300_v17, %v298_v16  ;;  %v10356_v24 = vld [vmem:[%s14180_s3 + $0x30] sm:$0xff]  ;;  %v10355_v26 = vld [vmem:[%s14180_s3 + $0x28] sm:$0xff] }
  0x1b   : > { %v11085_v21 = vpack.c.bf16 %v301_v19, %v299_v18  ;;  %v10364_v25 = vld [vmem:[%s14180_s3 + $0x70] sm:$0xff]  ;;  %v10363_v27 = vld [vmem:[%s14180_s3 + $0x68] sm:$0xff]  ;;  %v302_v28 = vld [vmem:[%s11071_s12 + $0xa0] sm:$0xff] }
  0x1c   : > { %10562 = vmatpush.bf16.msra.mxu2 %v10339_v4  ;;  %556 = vmatpush.bf16.msra.mxu0 %v10339_v4  ;;  %14265 = vst [vmem:[#allocation5_spill] sm:$0xff] %v11083_v20  ;;  %v304_v29 = vld [vmem:[%s11071_s12 + $0xb0] sm:$0xff]  ;;  %v303_v30 = vld [vmem:[%s11071_s12 + $0xa8] sm:$0xff]  ;;  %v305_v31 = vld [vmem:[%s11071_s12 + $0xb8] sm:$0xff] }
  0x1d   : > { %10570 = vmatpush.bf16.msra.mxu3 %v10347_v5  ;;  %605 = vmatpush.bf16.msra.mxu1 %v10347_v5  ;;  %14266 = vst [vmem:[#allocation6_spill] sm:$0xff] %v11085_v21  ;;  %v10354_v32 = vld [vmem:[%s14180_s3 + $0x20] sm:$0xff]  ;;  %v11117_v34 = vpack.c.bf16 %v304_v29, %v302_v28  ;;  %v11119_v35 = vpack.c.bf16 %v305_v31, %v303_v30  ;;  %v10353_v36 = vld [vmem:[%s14180_s3 + $0x18] sm:$0xff]  ;;  %v10352_v38 = vld [vmem:[%s14180_s3 + $0x10] sm:$0xff] }
  0x1e   : > { %v10362_v33 = vld [vmem:[%s14180_s3 + $0x60] sm:$0xff]  ;;  %v10361_v37 = vld [vmem:[%s14180_s3 + $0x58] sm:$0xff]  ;;  %v10360_v39 = vld [vmem:[%s14180_s3 + $0x50] sm:$0xff] }
  0x1f   : > { %14267 = vst [vmem:[#allocation7_spill] sm:$0xff] %v11117_v34  ;;  %v10351_v40 = vld [vmem:[%s14180_s3 + $0x8] sm:$0xff]  ;;  %v306_v42 = vld [vmem:[%s11071_s12 + $0xc0] sm:$0xff]  ;;  %v308_v43 = vld [vmem:[%s11071_s12 + $0xd0] sm:$0xff] }
  0x20   : > { %10563 = vmatpush.bf16.msra.mxu2 %v10338_v6  ;;  %557 = vmatpush.bf16.msra.mxu0 %v10338_v6  ;;  %14268 = vst [vmem:[#allocation8_spill] sm:$0xff] %v11119_v35  ;;  %v10359_v41 = vld [vmem:[%s14180_s3 + $0x48] sm:$0xff]  ;;  %v309_v45 = vld [vmem:[%s11071_s12 + $0xd8] sm:$0xff]  ;;  %v10350_v46 = vld [vmem:[%s14180_s3] sm:$0xff]  ;;  %v11151_v48 = vpack.c.bf16 %v308_v43, %v306_v42 }
  0x21   : > { %10571 = vmatpush.bf16.msra.mxu3 %v10346_v7  ;;  %606 = vmatpush.bf16.msra.mxu1 %v10346_v7  ;;  %v307_v44 = vld [vmem:[%s11071_s12 + $0xc8] sm:$0xff]  ;;  %v10358_v47 = vld [vmem:[%s14180_s3 + $0x40] sm:$0xff]  ;;  %v312_v51 = vld [vmem:[%s11071_s12 + $0xf0] sm:$0xff] }
  0x22   : > { %14269 = vst [vmem:[#allocation9_spill] sm:$0xff] %v11151_v48  ;;  %v11153_v49 = vpack.c.bf16 %v309_v45, %v307_v44  ;;  %v310_v50 = vld [vmem:[%s11071_s12 + $0xe0] sm:$0xff]  ;;  %v311_v52 = vld [vmem:[%s11071_s12 + $0xe8] sm:$0xff]  ;;  %v313_v53 = vld [vmem:[%s11071_s12 + $0xf8] sm:$0xff] }
  0x23   : > { %v11161_v54 = vpack.c.bf16 %v312_v51, %v310_v50  ;;  %v11163_v55 = vpack.c.bf16 %v313_v53, %v311_v52  ;;  %v330_v56 = vld [vmem:[%s11171_s13] sm:$0xff]  ;;  %v332_v57 = vld [vmem:[%s11171_s13 + $0x10] sm:$0xff]  ;;  %v331_v58 = vld [vmem:[%s11171_s13 + $0x8] sm:$0xff] }
  0x24   : > { %10564 = vmatpush.bf16.msra.mxu2 %v10337_v8  ;;  %558 = vmatpush.bf16.msra.mxu0 %v10337_v8  ;;  %14270 = vst [vmem:[#allocation10_spill] sm:$0xff] %v11153_v49  ;;  %v333_v59 = vld [vmem:[%s11171_s13 + $0x18] sm:$0xff]  ;;  %v11177_v60 = vpack.c.bf16 %v332_v57, %v330_v56  ;;  %v334_v62 = vld [vmem:[%s11171_s13 + $0x20] sm:$0xff]  ;;  %v336_v63 = vld [vmem:[%s11171_s13 + $0x30] sm:$0xff] }
  0x25   : > { %10572 = vmatpush.bf16.msra.mxu3 %v10345_v9  ;;  %607 = vmatpush.bf16.msra.mxu1 %v10345_v9  ;;  %14271 = vst [vmem:[#allocation11_spill] sm:$0xff] %v11161_v54  ;;  %v11179_v61 = vpack.c.bf16 %v333_v59, %v331_v58  ;;  %v335_v0 = vld [vmem:[%s11171_s13 + $0x28] sm:$0xff]  ;;  %v337_v1 = vld [vmem:[%s11171_s13 + $0x38] sm:$0xff]  ;;  %v11187_v2 = vpack.c.bf16 %v336_v63, %v334_v62  ;;  %v338_v4 = vld [vmem:[%s11171_s13 + $0x40] sm:$0xff] }
  0x26   : > { %14272 = vst [vmem:[#allocation12_spill] sm:$0xff] %v11163_v55  ;;  %v11189_v3 = vpack.c.bf16 %v337_v1, %v335_v0  ;;  %v340_v5 = vld [vmem:[%s11171_s13 + $0x50] sm:$0xff]  ;;  %v339_v6 = vld [vmem:[%s11171_s13 + $0x48] sm:$0xff]  ;;  %v341_v7 = vld [vmem:[%s11171_s13 + $0x58] sm:$0xff] }
  0x27   : > { %v11197_v8 = vpack.c.bf16 %v340_v5, %v338_v4  ;;  %v11199_v9 = vpack.c.bf16 %v341_v7, %v339_v6  ;;  %v346_v16 = vld [vmem:[%s11171_s13 + $0x80] sm:$0xff]  ;;  %v348_v17 = vld [vmem:[%s11171_s13 + $0x90] sm:$0xff]  ;;  %v347_v18 = vld [vmem:[%s11171_s13 + $0x88] sm:$0xff] }
  0x28   : > { %10565 = vmatpush.bf16.msra.mxu2 %v10336_v10  ;;  %559 = vmatpush.bf16.msra.mxu0 %v10336_v10  ;;  %v342_v10 = vld [vmem:[%s11171_s13 + $0x60] sm:$0xff]  ;;  %v349_v19 = vld [vmem:[%s11171_s13 + $0x98] sm:$0xff]  ;;  %v288_v45 = vld [vmem:[%s11071_s12 + $0x30] sm:$0xff] }
  0x29   : > { %10573 = vmatpush.bf16.msra.mxu3 %v10344_v11  ;;  %608 = vmatpush.bf16.msra.mxu1 %v10344_v11  ;;  %v344_v11 = vld [vmem:[%s11171_s13 + $0x70] sm:$0xff]  ;;  %v285_v28 = vld [vmem:[%s11071_s12 + $0x18] sm:$0xff]  ;;  %v286_v44 = vld [vmem:[%s11071_s12 + $0x20] sm:$0xff] }
  0x2a   : > { %v289_v50 = vld [vmem:[%s11071_s12 + $0x38] sm:$0xff]  ;;  %v354_v57 = vld [vmem:[%s11171_s13 + $0xc0] sm:$0xff]  ;;  %v356_v58 = vld [vmem:[%s11171_s13 + $0xd0] sm:$0xff] }
  0x2b   : > { %v355_v59 = vld [vmem:[%s11171_s13 + $0xc8] sm:$0xff]  ;;  %v357_v62 = vld [vmem:[%s11171_s13 + $0xd8] sm:$0xff]  ;;  %v11265_v4 = vpack.c.bf16 %v356_v58, %v354_v57  ;;  %v290_v6 = vld [vmem:[%s11071_s12 + $0x40] sm:$0xff] }
  0x2c   : > { %10566 = vmatpush.bf16.msra.mxu2 %v10335_v12  ;;  %560 = vmatpush.bf16.msra.mxu0 %v10335_v12  ;;  %v343_v12 = vld [vmem:[%s11171_s13 + $0x68] sm:$0xff]  ;;  %v11267_v5 = vpack.c.bf16 %v357_v62, %v355_v59  ;;  %v292_v7 = vld [vmem:[%s11071_s12 + $0x50] sm:$0xff]  ;;  %v365_v59 = vld [vmem:[%s11171_s13 + $0x118] sm:$0xff] }
  0x2d   : > { %10574 = vmatpush.bf16.msra.mxu3 %v10343_v13  ;;  %609 = vmatpush.bf16.msra.mxu1 %v10343_v13  ;;  %v345_v13 = vld [vmem:[%s11171_s13 + $0x78] sm:$0xff]  ;;  %v364_v57 = vld [vmem:[%s11171_s13 + $0x110] sm:$0xff]  ;;  %v363_v58 = vld [vmem:[%s11171_s13 + $0x108] sm:$0xff] }
  0x30   : > { %10567 = vmatpush.bf16.msra.mxu2 %v10334_v14  ;;  %561 = vmatpush.bf16.msra.mxu0 %v10334_v14  ;;  %v11207_v14 = vpack.c.bf16 %v344_v11, %v342_v10  ;;  %v291_v10 = vld [vmem:[%s11071_s12 + $0x48] sm:$0xff]  ;;  %v11272_v11 = vpack.c.bf16 %v292_v7, %v290_v6  ;;  %v11315_v7 = vpack.c.bf16 %v365_v59, %v363_v58 }
  0x31   : > { %10575 = vmatpush.bf16.msra.mxu3 %v10342_v15  ;;  %610 = vmatpush.bf16.msra.mxu1 %v10342_v15  ;;  %v11209_v15 = vpack.c.bf16 %v345_v13, %v343_v12  ;;  %v293_v12 = vld [vmem:[%s11071_s12 + $0x58] sm:$0xff] }
  0x32   : > { %14277 = vst [vmem:[#allocation17_spill] sm:$0xff] %v11272_v11  ;;  %v11275_v13 = vpack.c.bf16 %v293_v12, %v291_v10 }
  0x33   : > { %582 = vmatmul.bf16.vlgmr.msra.gmra.mxu2 %v11083_v20  ;;  %14281 = vst [vmem:[#allocation21_spill] sm:$0xff] %v11315_v7 }
  0x34   : > { %631 = vmatmul.bf16.vlgmr.msra.gmra.mxu3 %v11085_v21  ;;  %780 = vmatpush.bf16.msrb.mxu2 %v10357_v22  ;;  %v11217_v22 = vpack.c.bf16 %v348_v17, %v346_v16  ;;  %14278 = vst [vmem:[#allocation18_spill] sm:$0xff] %v11275_v13 }
  0x35   : > { %869 = vmatpush.bf16.msrb.mxu3 %v10365_v23  ;;  %v11219_v23 = vpack.c.bf16 %v349_v19, %v347_v18  ;;  %v358_v19 = vld [vmem:[%s11171_s13 + $0xe0] sm:$0xff] }
  0x38   : > { %781 = vmatpush.bf16.msrb.mxu2 %v10356_v24  ;;  %v282_v24 = vld [vmem:[%s11071_s12] sm:$0xff] }
  0x39   : > { %870 = vmatpush.bf16.msrb.mxu3 %v10364_v25  ;;  %v284_v25 = vld [vmem:[%s11071_s12 + $0x10] sm:$0xff] }
  0x3c   : > { %782 = vmatpush.bf16.msrb.mxu2 %v10355_v26  ;;  %v283_v26 = vld [vmem:[%s11071_s12 + $0x8] sm:$0xff] }
  0x3d   : > { %871 = vmatpush.bf16.msrb.mxu3 %v10363_v27  ;;  %v11224_v27 = vpack.c.bf16 %v284_v25, %v282_v24  ;;  %v11227_v29 = vpack.c.bf16 %v285_v28, %v283_v26  ;;  %v360_v24 = vld [vmem:[%s11171_s13 + $0xf0] sm:$0xff]  ;;  %v359_v25 = vld [vmem:[%s11171_s13 + $0xe8] sm:$0xff]  ;;  %v361_v26 = vld [vmem:[%s11171_s13 + $0xf8] sm:$0xff] }
  0x3f   : > { %14273 = vst [vmem:[#allocation13_spill] sm:$0xff] %v11224_v27  ;;  %562 = vmatmul.bf16.vlgmr.msra.gmra.mxu0 %v11224_v27  ;;  %611 = vmatmul.bf16.vlgmr.msra.gmra.mxu1 %v11227_v29  ;;  %v393_v27 = vld [vmem:[%s11171_s13 + $0x1f8] sm:$0xff] }
  0x40   : > { %783 = vmatpush.bf16.msrb.mxu2 %v10354_v32  ;;  %14274 = vst [vmem:[#allocation14_spill] sm:$0xff] %v11227_v29  ;;  %v391_v29 = vld [vmem:[%s11171_s13 + $0x1e8] sm:$0xff] }
  0x41   : > { %872 = vmatpush.bf16.msrb.mxu3 %v10362_v33  ;;  %v350_v33 = vld [vmem:[%s11171_s13 + $0xa0] sm:$0xff] }
  0x43   : > { %587 = vmatmul.bf16.gmra.mxu2 %v11117_v34  ;;  %v389_v34 = vld [vmem:[%s11171_s13 + $0x1d8] sm:$0xff] }
  0x44   : > { %636 = vmatmul.bf16.gmra.mxu3 %v11119_v35  ;;  %784 = vmatpush.bf16.msrb.mxu2 %v10353_v36  ;;  %v352_v36 = vld [vmem:[%s11171_s13 + $0xb0] sm:$0xff]  ;;  %v387_v35 = vld [vmem:[%s11171_s13 + $0x1c8] sm:$0xff] }
  0x45   : > { %873 = vmatpush.bf16.msrb.mxu3 %v10361_v37  ;;  %v351_v37 = vld [vmem:[%s11171_s13 + $0xa8] sm:$0xff]  ;;  %v11241_v42 = vpack.c.bf16 %v352_v36, %v350_v33  ;;  %v11289_v33 = vpack.c.bf16 %v360_v24, %v358_v19  ;;  %v11291_v36 = vpack.c.bf16 %v361_v26, %v359_v25  ;;  %v369_v24 = vld [vmem:[%s11171_s13 + $0x138] sm:$0xff] }
  0x46   : > { %v367_v19 = vld [vmem:[%s11171_s13 + $0x128] sm:$0xff] }
  0x48   : > { %785 = vmatpush.bf16.msrb.mxu2 %v10352_v38  ;;  %v353_v38 = vld [vmem:[%s11171_s13 + $0xb8] sm:$0xff] }
  0x49   : > { %874 = vmatpush.bf16.msrb.mxu3 %v10360_v39  ;;  %v11243_v43 = vpack.c.bf16 %v353_v38, %v351_v37  ;;  %v294_v37 = vld [vmem:[%s11071_s12 + $0x60] sm:$0xff]  ;;  %v296_v38 = vld [vmem:[%s11071_s12 + $0x70] sm:$0xff] }
  0x4c   : > { %786 = vmatpush.bf16.msrb.mxu2 %v10351_v40 }
  0x4d   : > { %875 = vmatpush.bf16.msrb.mxu3 %v10359_v41 }
  0x50   : > { %787 = vmatpush.bf16.msrb.mxu2 %v10350_v46  ;;  %v287_v46 = vld [vmem:[%s11071_s12 + $0x28] sm:$0xff] }
  0x51   : > { %876 = vmatpush.bf16.msrb.mxu3 %v10358_v47  ;;  %v11248_v47 = vpack.c.bf16 %v288_v45, %v286_v44  ;;  %v11251_v51 = vpack.c.bf16 %v289_v50, %v287_v46  ;;  %v297_v44 = vld [vmem:[%s11071_s12 + $0x78] sm:$0xff] }
  0x53   : > { %592 = vmatmul.bf16.gmra.mxu2 %v11151_v48  ;;  %14275 = vst [vmem:[#allocation15_spill] sm:$0xff] %v11248_v47  ;;  %567 = vmatmul.bf16.gmra.mxu0 %v11248_v47  ;;  %v388_v48 = vld [vmem:[%s11171_s13 + $0x1d0] sm:$0xff] }
  0x54   : > { %641 = vmatmul.bf16.gmra.mxu3 %v11153_v49  ;;  %14276 = vst [vmem:[#allocation16_spill] sm:$0xff] %v11251_v51  ;;  %616 = vmatmul.bf16.gmra.mxu1 %v11251_v51  ;;  %v386_v49 = vld [vmem:[%s11171_s13 + $0x1c0] sm:$0xff]  ;;  %v392_v47 = vld [vmem:[%s11171_s13 + $0x1f0] sm:$0xff] }
  0x63   : > { %597 = vmatmul.bf16.gmra.mxu2 %v11161_v54  ;;  %572 = vmatmul.bf16.gmra.mxu0 %v11272_v11 }
  0x64   : > { %646 = vmatmul.bf16.gmra.mxu3 %v11163_v55  ;;  %621 = vmatmul.bf16.gmra.mxu1 %v11275_v13  ;;  %v390_v13 = vld [vmem:[%s11171_s13 + $0x1e0] sm:$0xff] }
  0x73   : > { %788 = vmatmul.bf16.vlgmr.msrb.gmra.mxu2 %v11177_v60 }
  0x74   : > { %877 = vmatmul.bf16.vlgmr.msrb.gmra.mxu3 %v11179_v61 }
  0x83   : > { %793 = vmatmul.bf16.gmra.mxu2 %v11187_v2 }
  0x84   : > { %882 = vmatmul.bf16.gmra.mxu3 %v11189_v3 }
  0x93   : > { %798 = vmatmul.bf16.gmra.mxu2 %v11197_v8 }
  0x94   : > { %887 = vmatmul.bf16.gmra.mxu3 %v11199_v9 }
  0xa3   : > { %803 = vmatmul.bf16.gmra.mxu2 %v11207_v14 }
  0xa4   : > { %892 = vmatmul.bf16.gmra.mxu3 %v11209_v15 }
  0xb3   : > { %808 = vmatmul.bf16.gmra.mxu2 %v11217_v22 }
  0xb4   : > { %897 = vmatmul.bf16.gmra.mxu3 %v11219_v23 }
  0xb6   : > { %v583_v30 = vpop.f32.mrf.mxu2 }
  0xb7   : > { %v632_v31 = vpop.f32.mrf.mxu3 }
  0xb8   : > { %v11233_v32 = vadd.f32 %v632_v31, %v583_v30 }
  0xbe   : > { %v585_v39 = vpop.f32.mrf.mxu2 }
  0xbf   : > { %v634_v40 = vpop.f32.mrf.mxu3 }
  0xc0   : > { %v11239_v41 = vadd.f32 %v634_v40, %v585_v39  ;;  %v295_v39 = vld [vmem:[%s11071_s12 + $0x68] sm:$0xff]  ;;  %v11296_v40 = vpack.c.bf16 %v296_v38, %v294_v37  ;;  %v11325_v37 = vpack.c.bf16 %v369_v24, %v367_v19  ;;  %v374_v19 = vld [vmem:[%s11171_s13 + $0x160] sm:$0xff]  ;;  %v376_v24 = vld [vmem:[%s11171_s13 + $0x170] sm:$0xff]  ;;  %s10559_s12 = sshll.u32 %s10995_s25, 8 }
  0xc1   : > { %v11299_v45 = vpack.c.bf16 %v297_v44, %v295_v39  ;;  %s8709_s16 = scalar_lea.hbm %s14183_s6, %s10559_s12 }
  0xc2   : > { %14279 = vst [vmem:[#allocation19_spill] sm:$0xff] %v11296_v40  ;;  %577 = vmatmul.bf16.gmra.mxu0 %v11296_v40  ;;  %s8712_s17 = sshll.u32 %s8709_s16, 4  ;;  %s8713_s17 = int_to_ptr.hbm [resolvable:$true] %s8712_s17 }
  0xc3   : > { %813 = vmatmul.bf16.gmra.mxu2 %v11241_v42  ;;  %14280 = vst [vmem:[#allocation20_spill] sm:$0xff] %v11299_v45  ;;  %626 = vmatmul.bf16.gmra.mxu1 %v11299_v45  ;;  %s10887_s19 = sshra.s32 %s8713_s17, 4  ;;  %s10888_s19 = int_to_ptr.hbm [resolvable:$true] %s10887_s19 }
  0xc4   : > { %902 = vmatmul.bf16.gmra.mxu3 %v11243_v43  ;;  %14283 = vst [vmem:[#allocation23_spill] sm:$0xff] %v11325_v37  ;;  %s10889_s20 = scalar_lea.hbm %s10888_s19, 256  ;;  %p10894_p0 = scmp.lt.s32.totalorder %s10888_s19, %s14183_s6 }
  0xc5   : > { %p10890_p11 = scmp.ne.s32.totalorder %s10888_s19, %s10889_s20  ;;  %p10895_p1 = scmp.lt.s32.totalorder %s10893_s9, %s10889_s20 }
  0xc6   : > { %v588_v52 = vpop.f32.mrf.mxu2 }
  0xc7   : > { %v637_v53 = vpop.f32.mrf.mxu3  ;;  %p10891_p12 = pnand %p10890_p11, %p11012_p5  ;;  %p10896_p2 = por %p10895_p1, %p10894_p0 }
  0xc8   : > { %v11257_v56 = vadd.f32 %v637_v53, %v588_v52  ;;  %v362_v53 = vld [vmem:[%s11171_s13 + $0x100] sm:$0xff] }
  0xc9   : > { %v11313_v6 = vpack.c.bf16 %v364_v57, %v362_v53  ;;  %v371_v53 = vld [vmem:[%s11171_s13 + $0x148] sm:$0xff]  ;;  %v373_v57 = vld [vmem:[%s11171_s13 + $0x158] sm:$0xff]  ;;  %p10892_p13 = pneg %p10891_p12 }
  0xcb   : > { %p10897_p3 = pnand %p10896_p2, %p10892_p13 }
  0xce   : > { %v590_v63 = vpop.f32.mrf.mxu2 }
  0xcf   : > { %v639_v0 = vpop.f32.mrf.mxu3 }
  0xd0   : > { %v11263_v1 = vadd.f32 %v639_v0, %v590_v63 }
  0xd3   : > { %818 = vmatmul.bf16.gmra.mxu2 %v11265_v4 }
  0xd4   : > { %907 = vmatmul.bf16.gmra.mxu3 %v11267_v5 }
  0xd6   : > { %v593_v16 = vpop.f32.mrf.mxu2 }
  0xd7   : > { %v642_v17 = vpop.f32.mrf.mxu3 }
  0xd8   : > { %v11281_v18 = vadd.f32 %v642_v17, %v593_v16  ;;  %v366_v16 = vld [vmem:[%s11171_s13 + $0x120] sm:$0xff]  ;;  %v368_v17 = vld [vmem:[%s11171_s13 + $0x130] sm:$0xff] }
  0xde   : > { %v595_v28 = vpop.f32.mrf.mxu2 }
  0xdf   : > { %v644_v30 = vpop.f32.mrf.mxu3 }
  0xe0   : > { %v11287_v31 = vadd.f32 %v644_v30, %v595_v28  ;;  %v11323_v30 = vpack.c.bf16 %v368_v17, %v366_v16 }
  0xe2   : > { %14282 = vst [vmem:[#allocation22_spill] sm:$0xff] %v11323_v30 }
  0xe3   : > { %823 = vmatmul.bf16.gmra.mxu2 %v11289_v33 }
  0xe4   : > { %912 = vmatmul.bf16.gmra.mxu3 %v11291_v36 }
  0xe6   : > { %v598_v46 = vpop.f32.mrf.mxu2 }
  0xe7   : > { %v647_v50 = vpop.f32.mrf.mxu3 }
  0xe8   : > { %v11305_v52 = vadd.f32 %v647_v50, %v598_v46  ;;  %v370_v46 = vld [vmem:[%s11171_s13 + $0x140] sm:$0xff]  ;;  %v372_v50 = vld [vmem:[%s11171_s13 + $0x150] sm:$0xff] }
  0xee   : > { %v600_v62 = vpop.f32.mrf.mxu2 }
  0xef   : > { %v649_v63 = vpop.f32.mrf.mxu3 }
  0xf0   : > { %v11311_v0 = vadd.f32 %v649_v63, %v600_v62  ;;  %v11335_v63 = vpack.c.bf16 %v372_v50, %v370_v46 }
  0xf2   : > { %14284 = vst [vmem:[#allocation24_spill] sm:$0xff] %v11335_v63 }
  0xf3   : > { %828 = vmatmul.bf16.gmra.mxu2 %v11313_v6 }
  0xf4   : > { %917 = vmatmul.bf16.gmra.mxu3 %v11315_v7 }
  0xf6   : > { %v789_v10 = vpop.f32.mrf.mxu2 }
  0xf7   : > { %v878_v12 = vpop.f32.mrf.mxu3 }
  0xf8   : > { %v879_v38 = vadd.f32 %v878_v12, %v789_v10  ;;  %v11337_v10 = vpack.c.bf16 %v373_v57, %v371_v53 }
  0xfa   : > { %14285 = vst [vmem:[#allocation25_spill] sm:$0xff] %v11337_v10 }
  0xfe   : > { %v791_v25 = vpop.f32.mrf.mxu2 }
  0xff   : > { %v880_v26 = vpop.f32.mrf.mxu3 }
 0x100   : > { %v881_v28 = vadd.f32 %v880_v26, %v791_v25  ;;  %v375_v25 = vld [vmem:[%s11171_s13 + $0x168] sm:$0xff]  ;;  %v377_v26 = vld [vmem:[%s11171_s13 + $0x178] sm:$0xff] }
 0x102   : > { %8990 = vmatpush.xpose.msk.msra.mxu2 %vm1264_vm0, %v881_v28 }
 0x103   : > { %833 = vmatmul.bf16.gmra.mxu2 %v11323_v30 }
 0x104   : > { %922 = vmatmul.bf16.gmra.mxu3 %v11325_v37 }
 0x106   : > { %8991 = vmatpush.xpose.msk.msra.mxu2 %vm1264_vm0, %v879_v38  ;;  %v794_v39 = vpop.f32.mrf.mxu2 }
 0x107   : > { %v883_v44 = vpop.f32.mrf.mxu3 }
 0x108   : > { %v884_v12 = vadd.f32 %v883_v44, %v794_v39  ;;  %v11347_v39 = vpack.c.bf16 %v376_v24, %v374_v19  ;;  %v11349_v44 = vpack.c.bf16 %v377_v26, %v375_v25 }
 0x10a   : > { %14286 = vst [vmem:[#allocation26_spill] sm:$0xff] %v11347_v39 }
 0x10b   : > { %14287 = vst [vmem:[#allocation27_spill] sm:$0xff] %v11349_v44 }
 0x10e   : > { %v796_v58 = vpop.f32.mrf.mxu2 }
 0x10f   : > { %v885_v59 = vpop.f32.mrf.mxu3 }
 0x110   : > { %v886_v62 = vadd.f32 %v885_v59, %v796_v58  ;;  %v378_v58 = vld [vmem:[%s11171_s13 + $0x180] sm:$0xff]  ;;  %v380_v59 = vld [vmem:[%s11171_s13 + $0x190] sm:$0xff] }
 0x112   : > { %8993 = vmatpush.xpose.msk.msra.mxu3 %vm1264_vm0, %v886_v62  ;;  %v379_v62 = vld [vmem:[%s11171_s13 + $0x188] sm:$0xff] }
 0x113   : > { %838 = vmatmul.bf16.gmra.mxu2 %v11335_v63 }
 0x114   : > { %927 = vmatmul.bf16.gmra.mxu3 %v11337_v10 }
 0x116   : > { %8994 = vmatpush.xpose.msk.msra.mxu3 %vm1264_vm0, %v884_v12  ;;  %v799_v16 = vpop.f32.mrf.mxu2  ;;  %v381_v12 = vld [vmem:[%s11171_s13 + $0x198] sm:$0xff] }
 0x117   : > { %v888_v17 = vpop.f32.mrf.mxu3 }
 0x118   : > { %v889_v50 = vadd.f32 %v888_v17, %v799_v16  ;;  %v11359_v16 = vpack.c.bf16 %v380_v59, %v378_v58  ;;  %v11361_v17 = vpack.c.bf16 %v381_v12, %v379_v62  ;;  %v385_v58 = vld [vmem:[%s11171_s13 + $0x1b8] sm:$0xff]  ;;  %v563_v59 = vpop.f32.mrf.mxu0  ;;  %v612_v62 = vpop.f32.mrf.mxu1 }
 0x119   : > { %v613_v10 = vadd.f32 %v612_v62, %v563_v59 }
 0x11a   : > { %14288 = vst [vmem:[#allocation28_spill] sm:$0xff] %v11359_v16 }
 0x11b   : > { %14289 = vst [vmem:[#allocation29_spill] sm:$0xff] %v11361_v17 }
 0x11e   : > { %v801_v28 = vpop.f32.mrf.mxu2 }
 0x11f   : > { %v890_v38 = vpop.f32.mrf.mxu3 }
 0x120   : > { %v891_v46 = vadd.f32 %v890_v38, %v801_v28  ;;  %v565_v55 = vpop.f32.mrf.mxu0  ;;  %v614_v54 = vpop.f32.mrf.mxu1 }
 0x121   : > { %v615_v63 = vadd.f32 %v614_v54, %v565_v55 }
 0x122   : > { %8996 = vmatpush.xpose.msk.msrb.mxu2 %vm1264_vm0, %v891_v46  ;;  %v382_v46 = vld [vmem:[%s11171_s13 + $0x1a0] sm:$0xff] }
 0x123   : > { %843 = vmatmul.bf16.gmra.mxu2 %v11347_v39 }
 0x124   : > { %932 = vmatmul.bf16.gmra.mxu3 %v11349_v44 }
 0x126   : > { %8997 = vmatpush.xpose.msk.msrb.mxu2 %vm1264_vm0, %v889_v50  ;;  %v804_v53 = vpop.f32.mrf.mxu2  ;;  %v384_v50 = vld [vmem:[%s11171_s13 + $0x1b0] sm:$0xff] }
 0x127   : > { %v893_v57 = vpop.f32.mrf.mxu3 }
 0x128   : > { %v894_v26 = vadd.f32 %v893_v57, %v804_v53  ;;  %v11371_v57 = vpack.c.bf16 %v384_v50, %v382_v46  ;;  %v568_v21 = vpop.f32.mrf.mxu0  ;;  %v617_v20 = vpop.f32.mrf.mxu1 }
 0x129   : > { %v618_v59 = vadd.f32 %v617_v20, %v568_v21 }
 0x12a   : > { %14290 = vst [vmem:[#allocation30_spill] sm:$0xff] %v11371_v57 }
 0x12e   : > { %v806_v19 = vpop.f32.mrf.mxu2 }
 0x12f   : > { %v895_v24 = vpop.f32.mrf.mxu3 }
 0x130   : > { %v896_v25 = vadd.f32 %v895_v24, %v806_v19  ;;  %v383_v19 = vld [vmem:[%s11171_s13 + $0x1a8] sm:$0xff]  ;;  %v570_v11 = vpop.f32.mrf.mxu0  ;;  %v619_v51 = vpop.f32.mrf.mxu1  ;;  %s8791_s13 = sshll.u32 %s263_s11, 8 }
 0x131   : > { %v11373_v24 = vpack.c.bf16 %v385_v58, %v383_v19  ;;  %v11381_v19 = vpack.c.bf16 %v388_v48, %v386_v49  ;;  %v11383_v58 = vpack.c.bf16 %v389_v34, %v387_v35  ;;  %v11391_v48 = vpack.c.bf16 %v392_v47, %v390_v13  ;;  %s14043_s26 = scalar_lea.vmem [#allocation2], %s8791_s13 }
 0x132   : > { %8999 = vmatpush.xpose.msk.msrb.mxu3 %vm1264_vm0, %v896_v25  ;;  %v11393_v34 = vpack.c.bf16 %v393_v27, %v391_v29  ;;  %v620_v54 = vadd.f32 %v619_v51, %v570_v11  ;;  %s8710_s25 = sshll.u32 %s14043_s26, 4  ;;  %s8711_s25 = int_to_ptr.vmem [resolvable:$true] %s8710_s25 }
 0x133   : > { %848 = vmatmul.bf16.gmra.mxu2 %v11359_v16  ;;  %14291 = vst [vmem:[#allocation31_spill] sm:$0xff] %v11373_v24 }
 0x134   : > { %937 = vmatmul.bf16.gmra.mxu3 %v11361_v17  ;;  %14292 = vst [vmem:[#allocation32_spill] sm:$0xff] %v11381_v19 }
 0x135   : > { %14293 = vst [vmem:[#allocation33_spill] sm:$0xff] %v11383_v58 }
 0x136   : > { %9000 = vmatpush.xpose.msk.msrb.mxu3 %vm1264_vm0, %v894_v26  ;;  %v809_v28 = vpop.f32.mrf.mxu2  ;;  %14294 = vst [vmem:[#allocation34_spill] sm:$0xff] %v11391_v48 }
 0x137   : > { %v898_v38 = vpop.f32.mrf.mxu3  ;;  %14295 = vst [vmem:[#allocation35_spill] sm:$0xff] %v11393_v34 }
 0x138   : > { %v573_v35 = vpop.f32.mrf.mxu0  ;;  %v622_v49 = vpop.f32.mrf.mxu1  ;;  %v899_v27 = vadd.f32 %v898_v38, %v809_v28 }
 0x139   : > { %v623_v38 = vadd.f32 %v622_v49, %v573_v35 }
 0x13e   : > { %v811_v12 = vpop.f32.mrf.mxu2 }
 0x13f   : > { %v900_v53 = vpop.f32.mrf.mxu3 }
 0x140   : > { %v575_v44 = vpop.f32.mrf.mxu0  ;;  %v624_v39 = vpop.f32.mrf.mxu1  ;;  %v901_v37 = vadd.f32 %v900_v53, %v811_v12 }
 0x141   : > { %v625_v53 = vadd.f32 %v624_v39, %v575_v44 }
 0x143   : > { %853 = vmatmul.bf16.gmra.mxu2 %v11371_v57 }
 0x144   : > { %942 = vmatmul.bf16.gmra.mxu3 %v11373_v24 }
 0x146   : > { %v814_v25 = vpop.f32.mrf.mxu2 }
 0x147   : > { %v903_v26 = vpop.f32.mrf.mxu3 }
 0x148   : > { %v904_v29 = vadd.f32 %v903_v26, %v814_v25  ;;  %v578_v12 = vpop.f32.mrf.mxu0 }
 0x14e   : > { %v816_v46 = vpop.f32.mrf.mxu2 }
 0x14f   : > { %v905_v50 = vpop.f32.mrf.mxu3 }
 0x150   : > { %v906_v30 = vadd.f32 %v905_v50, %v816_v46  ;;  %v580_v21 = vpop.f32.mrf.mxu0 }
 0x153   : > { %858 = vmatmul.bf16.gmra.mxu2 %v11381_v19 }
 0x154   : > { %947 = vmatmul.bf16.gmra.mxu3 %v11383_v58 }
 0x156   : > { %v819_v45 = vpop.f32.mrf.mxu2 }
 0x157   : > { %v908_v40 = vpop.f32.mrf.mxu3 }
 0x15e   : > { %v821_v24 = vpop.f32.mrf.mxu2 }
 0x15f   : > { %v910_v57 = vpop.f32.mrf.mxu3 }
 0x160   : > { %v911_v55 = vadd.f32 %v910_v57, %v821_v24 }
 0x163   : > { %863 = vmatmul.bf16.gmra.mxu2 %v11391_v48 }
 0x164   : > { %952 = vmatmul.bf16.gmra.mxu3 %v11393_v34 }
 0x166   : > { %v824_v58 = vpop.f32.mrf.mxu2 }
 0x167   : > { %v913_v19 = vpop.f32.mrf.mxu3 }
 0x16e   : > { %v826_v17 = vpop.f32.mrf.mxu2 }
 0x16f   : > { %v915_v16 = vpop.f32.mrf.mxu3 }
 0x170   : > { %v916_v62 = vadd.f32 %v915_v16, %v826_v17 }
 0x173   : > { %8992 = vmatmul.msk.f32.vlgmr.msra.gmra.mxu2 %vm1264_vm0, %v613_v10  ;;  %v627_v10 = vpop.f32.mrf.mxu1 }
 0x174   : > { %8995 = vmatmul.msk.f32.vlgmr.msra.gmra.mxu3 %vm1264_vm0, %v615_v63  ;;  %9002 = vmatpush.xpose.msk.msra.mxu2 %vm1264_vm0, %v901_v37  ;;  %v914_v37 = vadd.f32 %v913_v19, %v824_v58  ;;  %v628_v16 = vadd.f32 %v627_v10, %v578_v12  ;;  %v10379_v12 = vld [vmem:[%s14181_s4 + $0x68] sm:$0xff] }
 0x175   : > { %9005 = vmatpush.xpose.msk.msra.mxu3 %vm1264_vm0, %v906_v30  ;;  %v909_v30 = vadd.f32 %v908_v40, %v819_v45 }
 0x176   : > { %v829_v47 = vpop.f32.mrf.mxu2 }
 0x177   : > { %v918_v13 = vpop.f32.mrf.mxu3 }
 0x178   : > { %9003 = vmatpush.xpose.msk.msra.mxu2 %vm1264_vm0, %v899_v27  ;;  %v919_v11 = vadd.f32 %v918_v13, %v829_v47  ;;  %v10381_v47 = vld [vmem:[%s14181_s4 + $0x78] sm:$0xff] }
 0x179   : > { %9006 = vmatpush.xpose.msk.msra.mxu3 %vm1264_vm0, %v904_v29  ;;  %1175 = vmatpush.bf16.msrb.mxu1 %v10381_v47 }
 0x17b   : > { %8998 = vmatmul.msk.f32.vlgmr.msrb.gmra.mxu2 %vm1264_vm0, %v618_v59  ;;  %v629_v51 = vpop.f32.mrf.mxu1 }
 0x17c   : > { %9001 = vmatmul.msk.f32.vlgmr.msrb.gmra.mxu3 %vm1264_vm0, %v620_v54  ;;  %9008 = vmatpush.xpose.msk.msrb.mxu2 %vm1264_vm0, %v911_v55  ;;  %v630_v17 = vadd.f32 %v629_v51, %v580_v21  ;;  %v10372_v54 = vld [vmem:[%s14181_s4 + $0x30] sm:$0xff] }
 0x17d   : > { %9011 = vmatpush.xpose.msk.msrb.mxu3 %vm1264_vm0, %v916_v62  ;;  %v10380_v55 = vld [vmem:[%s14181_s4 + $0x70] sm:$0xff]  ;;  %v10371_v62 = vld [vmem:[%s14181_s4 + $0x28] sm:$0xff] }
 0x17e   : > { %v831_v63 = vpop.f32.mrf.mxu2  ;;  %1176 = vmatpush.bf16.msrb.mxu1 %v10380_v55  ;;  %v10368_v51 = vld [vmem:[%s14181_s4 + $0x10] sm:$0xff] }
 0x17f   : > { %v920_v28 = vpop.f32.mrf.mxu3 }
 0x180   : > { %9009 = vmatpush.xpose.msk.msrb.mxu2 %vm1264_vm0, %v909_v30  ;;  %v921_v20 = vadd.f32 %v920_v28, %v831_v63  ;;  %v10370_v63 = vld [vmem:[%s14181_s4 + $0x20] sm:$0xff]  ;;  %v10369_v28 = vld [vmem:[%s14181_s4 + $0x18] sm:$0xff] }
 0x181   : > { %9012 = vmatpush.xpose.msk.msrb.mxu3 %vm1264_vm0, %v914_v37 }
 0x182   : > { %1177 = vmatpush.bf16.msrb.mxu1 %v10379_v12 }
 0x183   : > { %9004 = vmatmul.msk.f32.vlgmr.msra.gmra.mxu2 %vm1264_vm0, %v623_v38  ;;  %v10377_v38 = vld [vmem:[%s14181_s4 + $0x58] sm:$0xff] }
 0x184   : > { %9007 = vmatmul.msk.f32.vlgmr.msra.gmra.mxu3 %vm1264_vm0, %v625_v53  ;;  %9014 = vmatpush.xpose.msk.msra.mxu2 %vm1264_vm0, %v921_v20 }
 0x186   : > { %v834_v40 = vpop.f32.mrf.mxu2 }
 0x187   : > { %v923_v45 = vpop.f32.mrf.mxu3 }
 0x188   : > { %9015 = vmatpush.xpose.msk.msra.mxu2 %vm1264_vm0, %v919_v11  ;;  %v924_v24 = vadd.f32 %v923_v45, %v834_v40  ;;  %v10376_v11 = vld [vmem:[%s14181_s4 + $0x50] sm:$0xff]  ;;  %v10367_v40 = vld [vmem:[%s14181_s4 + $0x8] sm:$0xff] }
 0x189   : > { %v10375_v45 = vld [vmem:[%s14181_s4 + $0x48] sm:$0xff] }
 0x18b   : > { %9010 = vmatmul.msk.f32.vlgmr.msrb.gmra.mxu2 %vm1264_vm0, %v628_v16 }
 0x18c   : > { %9013 = vmatmul.msk.f32.vlgmr.msrb.gmra.mxu3 %vm1264_vm0, %v630_v17 }
 0x18e   : > { %v836_v39 = vpop.f32.mrf.mxu2 }
 0x18f   : > { %v925_v44 = vpop.f32.mrf.mxu3 }
 0x190   : > { %v926_v57 = vadd.f32 %v925_v44, %v836_v39  ;;  %v10366_v44 = vld [vmem:[%s14181_s4] sm:$0xff] }
 0x192   : > { %9017 = vmatpush.xpose.msk.msra.mxu3 %vm1264_vm0, %v926_v57 }
 0x193   : > { %9016 = vmatmul.msk.f32.vlgmr.msra.gmra.mxu2 %vm1264_vm0, %v11233_v32 }
 0x196   : > { %9018 = vmatpush.xpose.msk.msra.mxu3 %vm1264_vm0, %v924_v24  ;;  %v839_v25 = vpop.f32.mrf.mxu2 }
 0x197   : > { %v928_v26 = vpop.f32.mrf.mxu3 }
 0x198   : > { %v929_v58 = vadd.f32 %v928_v26, %v839_v25 }
 0x199   : > { %9019 = vmatmul.msk.f32.vlgmr.msra.gmra.mxu3 %vm1264_vm0, %v11239_v41  ;;  %v10373_v41 = vld [vmem:[%s14181_s4 + $0x38] sm:$0xff] }
 0x19a   : > { %1086 = vmatpush.bf16.msrb.mxu0 %v10373_v41 }
 0x19e   : > { %v841_v46 = vpop.f32.mrf.mxu2  ;;  %1087 = vmatpush.bf16.msrb.mxu0 %v10372_v54 }
 0x19f   : > { %v930_v50 = vpop.f32.mrf.mxu3 }
 0x1a0   : > { %v931_v19 = vadd.f32 %v930_v50, %v841_v46 }
 0x1a2   : > { %9020 = vmatpush.xpose.msk.msrb.mxu2 %vm1264_vm0, %v931_v19  ;;  %1088 = vmatpush.bf16.msrb.mxu0 %v10371_v62 }
 0x1a6   : > { %9021 = vmatpush.xpose.msk.msrb.mxu2 %vm1264_vm0, %v929_v58  ;;  %v844_v35 = vpop.f32.mrf.mxu2  ;;  %1089 = vmatpush.bf16.msrb.mxu0 %v10370_v63 }
 0x1a7   : > { %v933_v49 = vpop.f32.mrf.mxu3 }
 0x1a8   : > { %v934_v13 = vadd.f32 %v933_v49, %v844_v35 }
 0x1a9   : > { %9022 = vmatmul.msk.f32.vlgmr.msrb.gmra.mxu2 %vm1264_vm0, %v11257_v56 }
 0x1aa   : > { %1090 = vmatpush.bf16.msrb.mxu0 %v10369_v28 }
 0x1ae   : > { %v846_v32 = vpop.f32.mrf.mxu2  ;;  %1091 = vmatpush.bf16.msrb.mxu0 %v10368_v51 }
 0x1af   : > { %v935_v27 = vpop.f32.mrf.mxu3 }
 0x1b0   : > { %v936_v29 = vadd.f32 %v935_v27, %v846_v32 }
 0x1b2   : > { %9023 = vmatpush.xpose.msk.msrb.mxu3 %vm1264_vm0, %v936_v29  ;;  %1092 = vmatpush.bf16.msrb.mxu0 %v10367_v40 }
 0x1b6   : > { %9024 = vmatpush.xpose.msk.msrb.mxu3 %vm1264_vm0, %v934_v13  ;;  %v849_v59 = vpop.f32.mrf.mxu2  ;;  %1093 = vmatpush.bf16.msrb.mxu0 %v10366_v44 }
 0x1b7   : > { %v938_v56 = vpop.f32.mrf.mxu3 }
 0x1b8   : > { %v939_v53 = vadd.f32 %v938_v56, %v849_v59 }
 0x1b9   : > { %9025 = vmatmul.msk.f32.vlgmr.msrb.gmra.mxu3 %vm1264_vm0, %v11263_v1  ;;  %v10378_v1 = vld [vmem:[%s14181_s4 + $0x60] sm:$0xff]  ;;  %1094 = vmatmul.bf16.vlgmr.msrb.gmra.mxu0 %v11177_v60 }
 0x1ba   : > { %1178 = vmatpush.bf16.msrb.mxu1 %v10378_v1 }
 0x1be   : > { %v851_v10 = vpop.f32.mrf.mxu2  ;;  %1179 = vmatpush.bf16.msrb.mxu1 %v10377_v38 }
 0x1bf   : > { %v940_v30 = vpop.f32.mrf.mxu3 }
 0x1c0   : > { %v941_v37 = vadd.f32 %v940_v30, %v851_v10 }
 0x1c2   : > { %9026 = vmatpush.xpose.msk.msra.mxu2 %vm1264_vm0, %v941_v37  ;;  %1180 = vmatpush.bf16.msrb.mxu1 %v10376_v11 }
 0x1c6   : > { %9027 = vmatpush.xpose.msk.msra.mxu2 %vm1264_vm0, %v939_v53  ;;  %v854_v20 = vpop.f32.mrf.mxu2  ;;  %1181 = vmatpush.bf16.msrb.mxu1 %v10375_v45 }
 0x1c7   : > { %v943_v21 = vpop.f32.mrf.mxu3 }
 0x1c8   : > { %v944_v57 = vadd.f32 %v943_v21, %v854_v20 }
 0x1c9   : > { %9028 = vmatmul.msk.f32.vlgmr.msra.gmra.mxu2 %vm1264_vm0, %v11281_v18  ;;  %v10374_v18 = vld [vmem:[%s14181_s4 + $0x40] sm:$0xff]  ;;  %1099 = vmatmul.bf16.gmra.mxu0 %v11187_v2 }
 0x1ca   : > { %1182 = vmatpush.bf16.msrb.mxu1 %v10374_v18 }
 0x1cd   : > { %1183 = vmatmul.bf16.vlgmr.msrb.gmra.mxu1 %v11179_v61 }
 0x1ce   : > { %v856_v16 = vpop.f32.mrf.mxu2 }
 0x1cf   : > { %v945_v17 = vpop.f32.mrf.mxu3 }
 0x1d0   : > { %v946_v39 = vadd.f32 %v945_v17, %v856_v16 }
 0x1d2   : > { %9029 = vmatpush.xpose.msk.msra.mxu3 %vm1264_vm0, %v946_v39 }
 0x1d6   : > { %9030 = vmatpush.xpose.msk.msra.mxu3 %vm1264_vm0, %v944_v57  ;;  %v859_v24 = vpop.f32.mrf.mxu2 }
 0x1d7   : > { %v948_v25 = vpop.f32.mrf.mxu3 }
 0x1d8   : > { %v949_v19 = vadd.f32 %v948_v25, %v859_v24 }
 0x1d9   : > { %9031 = vmatmul.msk.f32.vlgmr.msra.gmra.mxu3 %vm1264_vm0, %v11287_v31  ;;  %1104 = vmatmul.bf16.gmra.mxu0 %v11197_v8 }
 0x1dd   : > { %1188 = vmatmul.bf16.gmra.mxu1 %v11189_v3 }
 0x1de   : > { %v861_v26 = vpop.f32.mrf.mxu2 }
 0x1df   : > { %v950_v46 = vpop.f32.mrf.mxu3 }
 0x1e0   : > { %v951_v50 = vadd.f32 %v950_v46, %v861_v26 }
 0x1e2   : > { %9032 = vmatpush.xpose.msk.msrb.mxu2 %vm1264_vm0, %v951_v50 }
 0x1e6   : > { %9033 = vmatpush.xpose.msk.msrb.mxu2 %vm1264_vm0, %v949_v19  ;;  %v864_v58 = vpop.f32.mrf.mxu2 }
 0x1e7   : > { %v953_v35 = vpop.f32.mrf.mxu3 }
 0x1e8   : > { %v954_v27 = vadd.f32 %v953_v35, %v864_v58 }
 0x1e9   : > { %9034 = vmatmul.msk.f32.vlgmr.msrb.gmra.mxu2 %vm1264_vm0, %v11305_v52  ;;  %1109 = vmatmul.bf16.gmra.mxu0 %v11207_v14 }
 0x1ed   : > { %1193 = vmatmul.bf16.gmra.mxu1 %v11199_v9 }
 0x1ee   : > { %v866_v49 = vpop.f32.mrf.mxu2 }
 0x1ef   : > { %v955_v32 = vpop.f32.mrf.mxu3 }
 0x1f0   : > { %v956_v31 = vadd.f32 %v955_v32, %v866_v49 }
 0x1f2   : > { %9035 = vmatpush.xpose.msk.msrb.mxu3 %vm1264_vm0, %v956_v31 }
 0x1f6   : > { %9036 = vmatpush.xpose.msk.msrb.mxu3 %vm1264_vm0, %v954_v27  ;;  %v1291_v29 = vpop.f32.mrf.mxu2 }
 0x1f7   : > { %v1320_v41 = vpop.f32.mrf.mxu3  ;;  %v11497_v47 = vmul.f32 0.125, %v1291_v29 }
 0x1f8   : > { %v11503_v13 = vmul.f32 0.125, %v1320_v41 }
 0x1f9   : > { %9037 = vmatmul.msk.f32.vlgmr.msrb.gmra.mxu3 %vm1264_vm0, %v11311_v0  ;;  %v1746_v52 = vsel %vm1745_vm1, %v11497_v47, -inf  ;;  %1114 = vmatmul.bf16.gmra.mxu0 %v11217_v22 }
 0x1fa   : > { %1747 = vmax.xlane.f32.xlu0 %v1746_v52  ;;  %v1749_v55 = vsel %vm1745_vm1, %v11503_v13, -inf }
 0x1fd   : > { %1198 = vmatmul.bf16.gmra.mxu1 %v11209_v15 }
 0x1fe   : > { %v1349_v59 = vpop.f32.mrf.mxu2 }
 0x1ff   : > { %v1378_v56 = vpop.f32.mrf.mxu3  ;;  %v11505_v54 = vmul.f32 0.125, %v1349_v59 }
 0x200   : > { %v11512_v0 = vmul.f32 0.125, %v1378_v56 }
 0x201   : > { %v1752_v62 = vsel %vm1745_vm1, %v11505_v54, -inf }
 0x202   : > { %1750 = vmax.xlane.f32.xlu0 %v1749_v55  ;;  %1753 = vmax.xlane.f32.xlu1 %v1752_v62  ;;  %v1755_v37 = vsel %vm1745_vm1, %v11512_v0, -inf  ;;  %v14296_v62 = vld [vmem:[#allocation22_spill] sm:$0xff] }
 0x206   : > { %v1407_v12 = vpop.f32.mrf.mxu2 }
 0x207   : > { %v1436_v10 = vpop.f32.mrf.mxu3  ;;  %v11515_v30 = vmul.f32 0.125, %v1407_v12  ;;  %v14297_v12 = vld [vmem:[#allocation23_spill] sm:$0xff] }
 0x208   : > { %v11521_v1 = vmul.f32 0.125, %v1436_v10 }
 0x209   : > { %v1758_v63 = vsel %vm1745_vm1, %v11515_v30, -inf  ;;  %1119 = vmatmul.bf16.gmra.mxu0 %v11241_v42 }
 0x20a   : > { %1756 = vmax.xlane.f32.xlu1 %v1755_v37  ;;  %1759 = vmax.xlane.f32.xlu2 %v1758_v63  ;;  %v1761_v21 = vsel %vm1745_vm1, %v11521_v1, -inf }
 0x20d   : > { %1203 = vmatmul.bf16.gmra.mxu1 %v11219_v23 }
 0x20e   : > { %v1465_v28 = vpop.f32.mrf.mxu2 }
 0x20f   : > { %v1494_v38 = vpop.f32.mrf.mxu3  ;;  %v11523_v53 = vmul.f32 0.125, %v1465_v28 }
 0x210   : > { %v11525_v20 = vmul.f32 0.125, %v1494_v38 }
 0x211   : > { %v1764_v51 = vsel %vm1745_vm1, %v11523_v53, -inf }
 0x212   : > { %v1767_v11 = vsel %vm1745_vm1, %v11525_v20, -inf  ;;  %1762 = vmax.xlane.f32.xlu2 %v1761_v21  ;;  %1765 = vmax.xlane.f32.xlu0 %v1764_v51 }
 0x213   : > { %1768 = vmax.xlane.f32.xlu1 %v1767_v11 }
 0x216   : > { %v1523_v40 = vpop.f32.mrf.mxu2 }
 0x217   : > { %v11535_v45 = vmul.f32 0.125, %v1523_v40 }
 0x219   : > { %v1770_v16 = vsel %vm1745_vm1, %v11535_v45, -inf  ;;  %1124 = vmatmul.bf16.gmra.mxu0 %v11265_v4 }
 0x21a   : > { %1771 = vmax.xlane.f32.xlu2 %v1770_v16  ;;  %v14298_v16 = vld [vmem:[#allocation24_spill] sm:$0xff] }
 0x21c   : > { %v1552_v17 = vpop.f32.mrf.mxu3 }
 0x21d   : > { %v11539_v39 = vmul.f32 0.125, %v1552_v17  ;;  %1208 = vmatmul.bf16.gmra.mxu1 %v11243_v43 }
 0x21f   : > { %v1773_v44 = vsel %vm1745_vm1, %v11539_v39, -inf }
 0x220   : > { %1774 = vmax.xlane.f32.xlu0 %v1773_v44 }
 0x229   : > { %1129 = vmatmul.bf16.gmra.mxu0 %v11289_v33 }
 0x22c   : > { %v1581_v18 = vpop.f32.mrf.mxu2 }
 0x22d   : > { %v11545_v57 = vmul.f32 0.125, %v1581_v18  ;;  %1213 = vmatmul.bf16.gmra.mxu1 %v11267_v5  ;;  %v14299_v18 = vld [vmem:[#allocation25_spill] sm:$0xff] }
 0x22f   : > { %v1776_v24 = vsel %vm1745_vm1, %v11545_v57, -inf }
 0x230   : > { %1777 = vmax.xlane.f32.xlu1 %v1776_v24 }
 0x236   : > { %v1095_v35 = vpop.f32.mrf.mxu0 }
 0x239   : > { %1134 = vmatmul.bf16.gmra.mxu0 %v11313_v6 }
 0x23c   : > { %v1610_v25 = vpop.f32.mrf.mxu3 }
 0x23d   : > { %v11551_v26 = vmul.f32 0.125, %v1610_v25  ;;  %1218 = vmatmul.bf16.gmra.mxu1 %v11291_v36 }
 0x23e   : > { %v1097_v32 = vpop.f32.mrf.mxu0 }
 0x23f   : > { %v1779_v46 = vsel %vm1745_vm1, %v11551_v26, -inf }
 0x240   : > { %1780 = vmax.xlane.f32.xlu2 %v1779_v46 }
 0x246   : > { %v1100_v56 = vpop.f32.mrf.mxu0 }
 0x249   : > { %1139 = vmatmul.bf16.gmra.mxu0 %v14296_v62 }
 0x24a   : > { %v1184_v49 = vpop.f32.mrf.mxu1 }
 0x24b   : > { %v1185_v29 = vadd.f32 %v1184_v49, %v1095_v35 }
 0x24c   : > { %v1639_v50 = vpop.f32.mrf.mxu2 }
 0x24d   : > { %v11557_v19 = vmul.f32 0.125, %v1639_v50  ;;  %1223 = vmatmul.bf16.gmra.mxu1 %v11315_v7 }
 0x24e   : > { %v1102_v10 = vpop.f32.mrf.mxu0 }
 0x24f   : > { %v1782_v58 = vsel %vm1745_vm1, %v11557_v19, -inf }
 0x250   : > { %1783 = vmax.xlane.f32.xlu0 %v1782_v58 }
 0x252   : > { %v1186_v31 = vpop.f32.mrf.mxu1 }
 0x253   : > { %v1187_v41 = vadd.f32 %v1186_v31, %v1097_v32 }
 0x255   : > { %1939 = vmatpush.msra.mxu2 %v1187_v41 }
 0x256   : > { %v1105_v11 = vpop.f32.mrf.mxu0 }
 0x257   : > { %1940 = vmatpush.msra.mxu2 %v1185_v29 }
 0x259   : > { %1144 = vmatmul.bf16.gmra.mxu0 %v14298_v16 }
 0x25a   : > { %v1189_v55 = vpop.f32.mrf.mxu1 }
 0x25b   : > { %v1190_v63 = vadd.f32 %v1189_v55, %v1100_v56 }
 0x25c   : > { %v1668_v27 = vpop.f32.mrf.mxu3 }
 0x25d   : > { %v11563_v52 = vmul.f32 0.125, %v1668_v27  ;;  %1228 = vmatmul.bf16.gmra.mxu1 %v14297_v12 }
 0x25e   : > { %v1107_v35 = vpop.f32.mrf.mxu0 }
 0x25f   : > { %v1785_v59 = vsel %vm1745_vm1, %v11563_v52, -inf }
 0x260   : > { %1786 = vmax.xlane.f32.xlu1 %v1785_v59 }
 0x262   : > { %v1191_v37 = vpop.f32.mrf.mxu1 }
 0x263   : > { %v1192_v28 = vadd.f32 %v1191_v37, %v1102_v10 }
 0x265   : > { %1962 = vmatpush.msra.mxu3 %v1192_v28 }
 0x267   : > { %1963 = vmatpush.msra.mxu3 %v1190_v63  ;;  %v1110_v63 = vpop.f32.mrf.mxu0 }
 0x26a   : > { %v1194_v40 = vpop.f32.mrf.mxu1 }
 0x26b   : > { %v1195_v32 = vadd.f32 %v1194_v40, %v1105_v11 }
 0x26d   : > { %v1748_v38 = vpop.xlane.xlu0 %1747  ;;  %1233 = vmatmul.bf16.gmra.mxu1 %v14299_v18 }
 0x26e   : > { %v1794_v21 = vsub.f32 %v11497_v47, %v1748_v38 }
 0x270   : > { %v1810_v51 = vmul.f32 1.442695, %v1794_v21  ;;  %v14301_v21 = vld [vmem:[#allocation27_spill] sm:$0xff] }
 0x272   : > { %10617 = vpow2.f32 %v1810_v51  ;;  %v1196_v49 = vpop.f32.mrf.mxu1 }
 0x273   : > { %v1197_v31 = vadd.f32 %v1196_v49, %v1107_v35 }
 0x275   : > { %v1751_v17 = vpop.xlane.xlu0 %1750  ;;  %v1754_v44 = vpop.xlane.xlu1 %1753  ;;  %1985 = vmatpush.msrb.mxu2 %v1197_v31 }
 0x276   : > { %v1795_v24 = vsub.f32 %v11503_v13, %v1751_v17  ;;  %v1796_v25 = vsub.f32 %v11505_v54, %v1754_v44 }
 0x277   : > { %1986 = vmatpush.msrb.mxu2 %v1195_v32 }
 0x278   : > { %v11574_v46 = vpop.eup %10617  ;;  %v1812_v50 = vmul.f32 1.442695, %v1795_v24  ;;  %v1814_v58 = vmul.f32 1.442695, %v1796_v25 }
 0x279   : > { %v1842_v47 = vsel %vm1745_vm1, %v11574_v46, 0.0 }
 0x27a   : > { %10619 = vpow2.f32 %v1812_v50  ;;  %1843 = vadd.xlane.f32.xlu2 %v1842_v47  ;;  %v1199_v28 = vpop.f32.mrf.mxu1  ;;  %v1697_v50 = vpop.f32.mrf.mxu2 }
 0x27b   : > { %10621 = vpow2.f32 %v1814_v58  ;;  %v1200_v32 = vadd.f32 %v1199_v28, %v1110_v63 }
 0x27c   : > { %v1726_v49 = vpop.f32.mrf.mxu3 }
 0x27d   : > { %v1757_v27 = vpop.xlane.xlu1 %1756  ;;  %v1760_v29 = vpop.xlane.xlu2 %1759  ;;  %1238 = vmatmul.bf16.gmra.mxu1 %v14301_v21 }
 0x27e   : > { %v1797_v13 = vsub.f32 %v11512_v0, %v1757_v27  ;;  %v1798_v54 = vsub.f32 %v11515_v30, %v1760_v29  ;;  %v14300_v0 = vld [vmem:[#allocation26_spill] sm:$0xff] }
 0x27f   : > { %1149 = vmatmul.bf16.gmra.mxu0 %v14300_v0 }
 0x280   : > { %v11580_v41 = vpop.eup %10619  ;;  %v1816_v59 = vmul.f32 1.442695, %v1797_v13  ;;  %v1818_v56 = vmul.f32 1.442695, %v1798_v54  ;;  %v11603_v13 = vmul.f32 0.125, %v1726_v49 }
 0x281   : > { %v11582_v55 = vpop.eup %10621  ;;  %v1845_v10 = vsel %vm1745_vm1, %v11580_v41, 0.0 }
 0x282   : > { %10623 = vpow2.f32 %v1816_v59  ;;  %1846 = vadd.xlane.f32.xlu0 %v1845_v10  ;;  %v1848_v37 = vsel %vm1745_vm1, %v11582_v55, 0.0  ;;  %v1201_v35 = vpop.f32.mrf.mxu1  ;;  %v1791_v28 = vsel %vm1745_vm1, %v11603_v13, -inf }
 0x283   : > { %10625 = vpow2.f32 %v1818_v56  ;;  %1849 = vadd.xlane.f32.xlu1 %v1848_v37 }
 0x285   : > { %v1763_v30 = vpop.xlane.xlu2 %1762  ;;  %v1766_v38 = vpop.xlane.xlu0 %1765 }
 0x286   : > { %v1799_v51 = vsub.f32 %v11521_v1, %v1763_v30  ;;  %v1769_v11 = vpop.xlane.xlu1 %1768  ;;  %v1800_v40 = vsub.f32 %v11523_v53, %v1766_v38  ;;  %v1112_v1 = vpop.f32.mrf.mxu0 }
 0x287   : > { %v1801_v24 = vsub.f32 %v11525_v20, %v1769_v11  ;;  %v1202_v31 = vadd.f32 %v1201_v35, %v1112_v1  ;;  %v11601_v20 = vmul.f32 0.125, %v1697_v50  ;;  %v14302_v11 = vld [vmem:[#allocation28_spill] sm:$0xff] }
 0x288   : > { %v11592_v17 = vpop.eup %10623  ;;  %v1820_v44 = vmul.f32 1.442695, %v1799_v51  ;;  %v1822_v53 = vmul.f32 1.442695, %v1800_v40 }
 0x289   : > { %v11595_v25 = vpop.eup %10625  ;;  %v1851_v58 = vsel %vm1745_vm1, %v11592_v17, 0.0  ;;  %v1824_v27 = vmul.f32 1.442695, %v1801_v24  ;;  %2008 = vmatpush.msrb.mxu3 %v1202_v31  ;;  %v1788_v10 = vsel %vm1745_vm1, %v11601_v20, -inf  ;;  %v14303_v24 = vld [vmem:[#allocation29_spill] sm:$0xff] }
 0x28a   : > { %10627 = vpow2.f32 %v1820_v44  ;;  %v1854_v47 = vsel %vm1745_vm1, %v11595_v25, 0.0  ;;  %1852 = vadd.xlane.f32.xlu2 %v1851_v58  ;;  %v1204_v38 = vpop.f32.mrf.mxu1 }
 0x28b   : > { %1855 = vadd.xlane.f32.xlu0 %v1854_v47  ;;  %10629 = vpow2.f32 %v1822_v53  ;;  %2009 = vmatpush.msrb.mxu3 %v1200_v32 }
 0x28c   : > { %10631 = vpow2.f32 %v1824_v27 }
 0x28d   : > { %v1772_v29 = vpop.xlane.xlu2 %1771  ;;  %1243 = vmatmul.bf16.gmra.mxu1 %v14303_v24 }
 0x28e   : > { %v1802_v54 = vsub.f32 %v11535_v45, %v1772_v29  ;;  %v1115_v45 = vpop.f32.mrf.mxu0 }
 0x28f   : > { %v11615_v51 = vadd.f32 %v1204_v38, %v1115_v45  ;;  %1154 = vmatmul.bf16.gmra.mxu0 %v14302_v11 }
 0x290   : > { %v11606_v59 = vpop.eup %10627  ;;  %v1826_v56 = vmul.f32 1.442695, %v1802_v54 }
 0x291   : > { %v1857_v37 = vsel %vm1745_vm1, %v11606_v59, 0.0  ;;  %v11618_v40 = vpop.eup %10629 }
 0x292   : > { %10633 = vpow2.f32 %v1826_v56  ;;  %1789 = vmax.xlane.f32.xlu2 %v1788_v10  ;;  %1858 = vadd.xlane.f32.xlu1 %v1857_v37  ;;  %v11621_v50 = vpop.eup %10631  ;;  %v11633_v49 = vpop.f32.mrf.mxu1  ;;  %v14304_v10 = vld [vmem:[#allocation30_spill] sm:$0xff] }
 0x293   : > { %v1775_v63 = vpop.xlane.xlu0 %1774  ;;  %1792 = vmax.xlane.f32.xlu0 %v1791_v28  ;;  %v1863_v47 = vsel %vm1745_vm1, %v11621_v50, 0.0 }
 0x294   : > { %v1803_v30 = vsub.f32 %v11539_v39, %v1775_v63  ;;  %v1860_v39 = vsel %vm1745_vm1, %v11618_v40, 0.0  ;;  %v14305_v63 = vld [vmem:[#allocation31_spill] sm:$0xff] }
 0x296   : > { %v1828_v44 = vmul.f32 1.442695, %v1803_v30  ;;  %v11631_v35 = vpop.f32.mrf.mxu0 }
 0x298   : > { %v11623_v58 = vpop.eup %10633  ;;  %10635 = vpow2.f32 %v1828_v44 }
 0x299   : > { %v1866_v1 = vsel %vm1745_vm1, %v11623_v58, 0.0 }
 0x29a   : > { %1864 = vadd.xlane.f32.xlu2 %v1863_v47  ;;  %1861 = vadd.xlane.f32.xlu1 %v1860_v39  ;;  %v1209_v54 = vpop.f32.mrf.mxu1 }
 0x29b   : > { %1867 = vadd.xlane.f32.xlu0 %v1866_v1 }
 0x29d   : > { %1248 = vmatmul.bf16.gmra.mxu1 %v14305_v63 }
 0x29e   : > { %v11635_v53 = vpop.eup %10635  ;;  %v1120_v27 = vpop.f32.mrf.mxu0 }
 0x29f   : > { %v1869_v32 = vsel %vm1745_vm1, %v11635_v53, 0.0  ;;  %v11640_v56 = vadd.f32 %v1209_v54, %v1120_v27  ;;  %1159 = vmatmul.bf16.gmra.mxu0 %v14304_v10  ;;  %v14307_v27 = vld [vmem:[#allocation33_spill] sm:$0xff] }
 0x2a2   : > { %1870 = vadd.xlane.f32.xlu1 %v1869_v32  ;;  %v11646_v45 = vpop.f32.mrf.mxu1  ;;  %v14306_v32 = vld [vmem:[#allocation32_spill] sm:$0xff] }
 0x2a3   : > { %v1778_v31 = vpop.xlane.xlu1 %1777 }
 0x2a4   : > { %v1804_v29 = vsub.f32 %v11545_v57, %v1778_v31 }
 0x2a6   : > { %v1830_v37 = vmul.f32 1.442695, %v1804_v29  ;;  %v11644_v28 = vpop.f32.mrf.mxu0 }
 0x2a8   : > { %10637 = vpow2.f32 %v1830_v37 }
 0x2aa   : > { %v1214_v39 = vpop.f32.mrf.mxu1 }
 0x2ad   : > { %1253 = vmatmul.bf16.gmra.mxu1 %v14307_v27 }
 0x2ae   : > { %v11648_v30 = vpop.eup %10637  ;;  %v1125_v44 = vpop.f32.mrf.mxu0 }
 0x2af   : > { %v1872_v38 = vsel %vm1745_vm1, %v11648_v30, 0.0  ;;  %v11653_v1 = vadd.f32 %v1214_v39, %v1125_v44  ;;  %1164 = vmatmul.bf16.gmra.mxu0 %v14306_v32 }
 0x2b0   : > { %1873 = vadd.xlane.f32.xlu2 %v1872_v38 }
 0x2b2   : > { %v1216_v54 = vpop.f32.mrf.mxu1 }
 0x2b3   : > { %v1781_v57 = vpop.xlane.xlu2 %1780 }
 0x2b4   : > { %v1805_v47 = vsub.f32 %v11551_v26, %v1781_v57 }
 0x2b6   : > { %v1832_v31 = vmul.f32 1.442695, %v1805_v47  ;;  %v1127_v29 = vpop.f32.mrf.mxu0 }
 0x2b8   : > { %10639 = vpow2.f32 %v1832_v31 }
 0x2ba   : > { %v1219_v57 = vpop.f32.mrf.mxu1 }
 0x2bd   : > { %1258 = vmatmul.bf16.gmra.mxu1 %v11393_v34 }
 0x2be   : > { %v11657_v37 = vpop.eup %10639  ;;  %v1130_v10 = vpop.f32.mrf.mxu0 }
 0x2bf   : > { %v1875_v38 = vsel %vm1745_vm1, %v11657_v37, 0.0  ;;  %v11662_v44 = vadd.f32 %v1219_v57, %v1130_v10  ;;  %1169 = vmatmul.bf16.gmra.mxu0 %v11391_v48 }
 0x2c0   : > { %1876 = vadd.xlane.f32.xlu0 %v1875_v38 }
 0x2c2   : > { %v1221_v31 = vpop.f32.mrf.mxu1 }
 0x2c3   : > { %v1784_v63 = vpop.xlane.xlu0 %1783 }
 0x2c4   : > { %v1806_v26 = vsub.f32 %v11557_v19, %v1784_v63 }
 0x2c6   : > { %v1834_v47 = vmul.f32 1.442695, %v1806_v26  ;;  %v1132_v39 = vpop.f32.mrf.mxu0 }
 0x2c8   : > { %10641 = vpow2.f32 %v1834_v47 }
 0x2ca   : > { %v1224_v10 = vpop.f32.mrf.mxu1 }
 0x2ce   : > { %v11666_v27 = vpop.eup %10641  ;;  %v11670_v24 = vpop.f32.mrf.mxu0 }
 0x2cf   : > { %v1878_v38 = vsel %vm1745_vm1, %v11666_v27, 0.0 }
 0x2d0   : > { %1879 = vadd.xlane.f32.xlu1 %v1878_v38 }
 0x2d2   : > { %v1226_v57 = vpop.f32.mrf.mxu1 }
 0x2d3   : > { %v1787_v32 = vpop.xlane.xlu1 %1786 }
 0x2d4   : > { %v1807_v19 = vsub.f32 %v11563_v52, %v1787_v32 }
 0x2d6   : > { %v1836_v63 = vmul.f32 1.442695, %v1807_v19  ;;  %v1137_v26 = vpop.f32.mrf.mxu0 }
 0x2d8   : > { %10643 = vpow2.f32 %v1836_v63 }
 0x2da   : > { %v11679_v11 = vpop.f32.mrf.mxu1 }
 0x2de   : > { %v11673_v34 = vpop.eup %10643  ;;  %v11677_v48 = vpop.f32.mrf.mxu0 }
 0x2df   : > { %v1881_v47 = vsel %vm1745_vm1, %v11673_v34, 0.0 }
 0x2e0   : > { %1882 = vadd.xlane.f32.xlu2 %v1881_v47  ;;  %v1207_v47 = vadd.f32 %v11633_v49, %v11631_v35  ;;  %v1212_v35 = vadd.f32 %v11646_v45, %v11644_v28  ;;  %v1222_v45 = vadd.f32 %v1221_v31, %v1132_v39 }
 0x2e2   : > { %v11683_v21 = vpop.f32.mrf.mxu1 }
 0x2e6   : > { %v11681_v38 = vpop.f32.mrf.mxu0 }
 0x2ea   : > { %v11687_v19 = vpop.f32.mrf.mxu1 }
 0x2ed   : > { %v1844_v52 = vpop.xlane.xlu2 %1843 }
 0x2ee   : > { %10645 = vrcp.f32 %v1844_v52  ;;  %v11685_v32 = vpop.f32.mrf.mxu0 }
 0x2f2   : > { %v11696_v12 = vpop.f32.mrf.mxu1 }
 0x2f4   : > { %v10646_v63 = vpop.eup %10645 }
 0x2f5   : > { %v1906_v0 = vmul.f32 %v10646_v63, %v11574_v46  ;;  %v1847_v18 = vpop.xlane.xlu0 %1846 }
 0x2f6   : > { %10647 = vrcp.f32 %v1847_v18  ;;  %v1850_v16 = vpop.xlane.xlu1 %1849  ;;  %v11694_v52 = vpop.f32.mrf.mxu0 }
 0x2f7   : > { %10649 = vrcp.f32 %v1850_v16  ;;  %9038 = vmatmul.msk.f32.vlgmr.msra.gmra.mxu2 %vm1745_vm1, %v1906_v0  ;;  %v1217_v0 = vadd.f32 %v1216_v54, %v1127_v29 }
 0x2f8   : > { %2031 = vmatpush.msra.mxu2 %v1207_v47 }
 0x2fa   : > { %2032 = vmatpush.msra.mxu2 %v11615_v51 }
 0x2fc   : > { %v10648_v62 = vpop.eup %10647 }
 0x2fd   : > { %v10650_v7 = vpop.eup %10649  ;;  %v1907_v46 = vmul.f32 %v10648_v62, %v11580_v41  ;;  %v1853_v63 = vpop.xlane.xlu2 %1852 }
 0x2fe   : > { %v1908_v18 = vmul.f32 %v10650_v7, %v11582_v55  ;;  %v1856_v16 = vpop.xlane.xlu0 %1855  ;;  %10651 = vrcp.f32 %v1853_v63  ;;  %v1150_v51 = vpop.f32.mrf.mxu0 }
 0x2ff   : > { %10653 = vrcp.f32 %v1856_v16  ;;  %9039 = vmatmul.msk.f32.vlgmr.msra.gmra.mxu3 %vm1745_vm1, %v1907_v46  ;;  %v1239_v62 = vpop.f32.mrf.mxu1  ;;  %v1227_v46 = vadd.f32 %v1226_v57, %v1137_v26  ;;  %v1232_v57 = vadd.f32 %v11683_v21, %v11681_v38 }
 0x300   : > { %9040 = vmatmul.msk.f32.vlgmr.msrb.gmra.mxu2 %vm1745_vm1, %v1908_v18  ;;  %2054 = vmatpush.msra.mxu3 %v1212_v35 }
 0x301   : > { %2077 = vmatpush.msrb.mxu2 %v1217_v0 }
 0x302   : > { %2055 = vmatpush.msra.mxu3 %v11640_v56 }
 0x303   : > { %2078 = vmatpush.msrb.mxu2 %v11653_v1 }
 0x304   : > { %v10652_v41 = vpop.eup %10651 }
 0x305   : > { %v10654_v49 = vpop.eup %10653  ;;  %v1909_v7 = vmul.f32 %v10652_v41, %v11592_v17  ;;  %v1790_v55 = vpop.xlane.xlu2 %1789  ;;  %v1225_v17 = vadd.f32 %v1224_v10, %v11670_v24 }
 0x306   : > { %v1859_v28 = vpop.xlane.xlu1 %1858  ;;  %v1910_v29 = vmul.f32 %v10654_v49, %v11595_v25  ;;  %v1808_v54 = vsub.f32 %v11601_v20, %v1790_v55  ;;  %v1793_v47 = vpop.xlane.xlu0 %1792  ;;  %v1237_v49 = vadd.f32 %v11696_v12, %v11694_v52  ;;  %v1240_v55 = vadd.f32 %v1239_v62, %v1150_v51 }
 0x307   : > { %10655 = vrcp.f32 %v1859_v28  ;;  %v1809_v56 = vsub.f32 %v11603_v13, %v1793_v47  ;;  %9041 = vmatmul.msk.f32.vlgmr.msrb.gmra.mxu3 %vm1745_vm1, %v1909_v7  ;;  %v1152_v25 = vpop.f32.mrf.mxu0  ;;  %v1241_v20 = vpop.f32.mrf.mxu1  ;;  %v1235_v28 = vadd.f32 %v11687_v19, %v11685_v32 }
 0x308   : > { %v1838_v1 = vmul.f32 1.442695, %v1808_v54  ;;  %9042 = vmatmul.msk.f32.vlgmr.msra.gmra.mxu2 %vm1745_vm1, %v1910_v29  ;;  %2100 = vmatpush.msrb.mxu3 %v1222_v45  ;;  %v1242_v0 = vadd.f32 %v1241_v20, %v1152_v25 }
 0x309   : > { %v1840_v63 = vmul.f32 1.442695, %v1809_v56  ;;  %2123 = vmatpush.msra.mxu2 %v1227_v46 }
 0x30a   : > { %10657 = vpow2.f32 %v1838_v1  ;;  %2101 = vmatpush.msrb.mxu3 %v11662_v44  ;;  %v1230_v44 = vadd.f32 %v11679_v11, %v11677_v48 }
 0x30b   : > { %10659 = vpow2.f32 %v1840_v63  ;;  %2124 = vmatpush.msra.mxu2 %v1225_v17 }
 0x30d   : > { %v10656_v39 = vpop.eup %10655  ;;  %v1865_v31 = vpop.xlane.xlu2 %1864 }
 0x30e   : > { %v1911_v13 = vmul.f32 %v10656_v39, %v11606_v59  ;;  %v1862_v26 = vpop.xlane.xlu1 %1861  ;;  %10661 = vrcp.f32 %v1865_v31  ;;  %v1868_v35 = vpop.xlane.xlu0 %1867 }
 0x30f   : > { %10663 = vrcp.f32 %v1862_v26  ;;  %v1155_v38 = vpop.f32.mrf.mxu0  ;;  %v1244_v18 = vpop.f32.mrf.mxu1 }
 0x310   : > { %9043 = vmatmul.msk.f32.vlgmr.msra.gmra.mxu3 %vm1745_vm1, %v1911_v13  ;;  %v11718_v24 = vpop.eup %10657  ;;  %10665 = vrcp.f32 %v1868_v35  ;;  %v1245_v32 = vadd.f32 %v1244_v18, %v1155_v38 }
 0x311   : > { %2146 = vmatpush.msra.mxu3 %v1232_v57  ;;  %v11722_v10 = vpop.eup %10659  ;;  %v1884_v59 = vsel %vm1745_vm1, %v11718_v24, 0.0 }
 0x312   : > { %1885 = vadd.xlane.f32.xlu0 %v1884_v59  ;;  %v1887_v21 = vsel %vm1745_vm1, %v11722_v10, 0.0 }
 0x313   : > { %2147 = vmatpush.msra.mxu3 %v1230_v44  ;;  %1888 = vadd.xlane.f32.xlu1 %v1887_v21  ;;  %v10413_v21 = vld [vmem:[%s14180_s3 + $0xb8] sm:$0xff] }
 0x314   : > { %v10662_v16 = vpop.eup %10661 }
 0x315   : > { %v10664_v41 = vpop.eup %10663  ;;  %v1913_v48 = vmul.f32 %v10662_v16, %v11621_v50 }
 0x316   : > { %v1871_v11 = vpop.xlane.xlu1 %1870  ;;  %v1912_v7 = vmul.f32 %v10664_v41, %v11618_v40  ;;  %v10666_v45 = vpop.eup %10665 }
 0x317   : > { %10667 = vrcp.f32 %v1871_v11  ;;  %v1157_v50 = vpop.f32.mrf.mxu0  ;;  %v1246_v29 = vpop.f32.mrf.mxu1  ;;  %v1914_v52 = vmul.f32 %v10666_v45, %v11623_v58  ;;  %v10421_v11 = vld [vmem:[%s14180_s3 + $0xf8] sm:$0xff] }
 0x318   : > { %9045 = vmatmul.msk.f32.vlgmr.msrb.gmra.mxu3 %vm1745_vm1, %v1913_v48  ;;  %9044 = vmatmul.msk.f32.vlgmr.msrb.gmra.mxu2 %vm1745_vm1, %v1912_v7  ;;  %v1247_v40 = vadd.f32 %v1246_v29, %v1157_v50  ;;  %v10411_v7 = vld [vmem:[%s14180_s3 + $0xa8] sm:$0xff]  ;;  %v10418_v50 = vld [vmem:[%s14180_s3 + $0xe0] sm:$0xff]  ;;  %v10409_v45 = vld [vmem:[%s14180_s3 + $0x98] sm:$0xff] }
 0x319   : > { %2192 = vmatpush.msrb.mxu3 %v1242_v0  ;;  %2169 = vmatpush.msrb.mxu2 %v1237_v49  ;;  %v10417_v29 = vld [vmem:[%s14180_s3 + $0xd8] sm:$0xff] }
 0x31b   : > { %2193 = vmatpush.msrb.mxu3 %v1240_v55  ;;  %2170 = vmatpush.msrb.mxu2 %v1235_v28  ;;  %v10420_v55 = vld [vmem:[%s14180_s3 + $0xf0] sm:$0xff]  ;;  %v10410_v28 = vld [vmem:[%s14180_s3 + $0xa0] sm:$0xff] }
 0x31d   : > { %v10668_v54 = vpop.eup %10667 }
 0x31e   : > { %v1915_v12 = vmul.f32 %v10668_v54, %v11635_v53  ;;  %v10408_v54 = vld [vmem:[%s14180_s3 + $0x90] sm:$0xff] }
 0x31f   : > { %v1160_v51 = vpop.f32.mrf.mxu0  ;;  %v1249_v62 = vpop.f32.mrf.mxu1 }
 0x320   : > { %9047 = vmatmul.msk.f32.vlgmr.msra.gmra.mxu3 %vm1745_vm1, %v1915_v12  ;;  %9046 = vmatmul.msk.f32.vlgmr.msra.gmra.mxu2 %vm1745_vm1, %v1914_v52  ;;  %v1250_v53 = vadd.f32 %v1249_v62, %v1160_v51  ;;  %v10416_v12 = vld [vmem:[%s14180_s3 + $0xd0] sm:$0xff]  ;;  %v10415_v52 = vld [vmem:[%s14180_s3 + $0xc8] sm:$0xff] }
 0x321   : > { %2215 = vmatpush.msra.mxu2 %v1247_v40  ;;  %v10407_v40 = vld [vmem:[%s14180_s3 + $0x88] sm:$0xff] }
 0x323   : > { %v1874_v19 = vpop.xlane.xlu2 %1873  ;;  %2216 = vmatpush.msra.mxu2 %v1245_v32  ;;  %v10406_v32 = vld [vmem:[%s14180_s3 + $0x80] sm:$0xff] }
 0x324   : > { %10669 = vrcp.f32 %v1874_v19  ;;  %v10414_v19 = vld [vmem:[%s14180_s3 + $0xc0] sm:$0xff] }
 0x327   : > { %v1162_v56 = vpop.f32.mrf.mxu0  ;;  %v1251_v1 = vpop.f32.mrf.mxu1 }
 0x328   : > { %v1252_v58 = vadd.f32 %v1251_v1, %v1162_v56 }
 0x32a   : > { %v10670_v47 = vpop.eup %10669  ;;  %2238 = vmatpush.msra.mxu3 %v1252_v58 }
 0x32b   : > { %v1916_v46 = vmul.f32 %v10670_v47, %v11648_v30 }
 0x32c   : > { %2239 = vmatpush.msra.mxu3 %v1250_v53 }
 0x32d   : > { %9048 = vmatmul.msk.f32.vlgmr.msrb.gmra.mxu2 %vm1745_vm1, %v1916_v46 }
 0x32f   : > { %v1165_v63 = vpop.f32.mrf.mxu0  ;;  %v1254_v25 = vpop.f32.mrf.mxu1 }
 0x330   : > { %v1255_v30 = vadd.f32 %v1254_v25, %v1165_v63 }
 0x333   : > { %v1877_v17 = vpop.xlane.xlu0 %1876 }
 0x334   : > { %10671 = vrcp.f32 %v1877_v17 }
 0x337   : > { %v1167_v13 = vpop.f32.mrf.mxu0  ;;  %v1256_v31 = vpop.f32.mrf.mxu1 }
 0x338   : > { %v1257_v26 = vadd.f32 %v1256_v31, %v1167_v13  ;;  %v10397_v31 = vld [vmem:[%s14179_s2 + $0xb8] sm:$0xff] }
 0x339   : > { %2435 = vmatpush.bf16.msra.mxu0 %v10397_v31 }
 0x33a   : > { %v10672_v20 = vpop.eup %10671  ;;  %2261 = vmatpush.msrb.mxu2 %v1257_v26 }
 0x33b   : > { %v1917_v39 = vmul.f32 %v10672_v20, %v11657_v37 }
 0x33c   : > { %2262 = vmatpush.msrb.mxu2 %v1255_v30 }
 0x33d   : > { %9049 = vmatmul.msk.f32.vlgmr.msrb.gmra.mxu3 %vm1745_vm1, %v1917_v39 }
 0x33f   : > { %v1170_v44 = vpop.f32.mrf.mxu0  ;;  %v1259_v59 = vpop.f32.mrf.mxu1 }
 0x340   : > { %v1260_v16 = vadd.f32 %v1259_v59, %v1170_v44  ;;  %v10396_v59 = vld [vmem:[%s14179_s2 + $0xb0] sm:$0xff] }
 0x341   : > { %2436 = vmatpush.bf16.msra.mxu0 %v10396_v59  ;;  %v14331_v59 = vld [vmem:[#allocation23_spill] sm:$0xff] }
 0x343   : > { %v1880_v57 = vpop.xlane.xlu1 %1879 }
 0x344   : > { %10673 = vrcp.f32 %v1880_v57 }
 0x347   : > { %v1172_v37 = vpop.f32.mrf.mxu0  ;;  %v1261_v18 = vpop.f32.mrf.mxu1 }
 0x348   : > { %v1262_v0 = vadd.f32 %v1261_v18, %v1172_v37  ;;  %v10394_v37 = vld [vmem:[%s14179_s2 + $0xa0] sm:$0xff] }
 0x349   : > { %v10402_v18 = vld [vmem:[%s14179_s2 + $0xe0] sm:$0xff] }
 0x34a   : > { %v10674_v35 = vpop.eup %10673  ;;  %2284 = vmatpush.msrb.mxu3 %v1262_v0  ;;  %v10401_v0 = vld [vmem:[%s14179_s2 + $0xd8] sm:$0xff] }
 0x34b   : > { %v1918_v38 = vmul.f32 %v10674_v35, %v11666_v27  ;;  %v10412_v27 = vld [vmem:[%s14180_s3 + $0xb0] sm:$0xff] }
 0x34c   : > { %2285 = vmatpush.msrb.mxu3 %v1260_v16  ;;  %v10404_v35 = vld [vmem:[%s14179_s2 + $0xf0] sm:$0xff]  ;;  %v10393_v16 = vld [vmem:[%s14179_s2 + $0x98] sm:$0xff] }
 0x34d   : > { %9050 = vmatmul.msk.f32.vlgmr.msra.gmra.mxu2 %vm1745_vm1, %v1918_v38  ;;  %v10403_v38 = vld [vmem:[%s14179_s2 + $0xe8] sm:$0xff] }
 0x34e   : > { %2662 = vmatpush.bf16.msra.mxu2 %v10413_v21  ;;  %v10395_v21 = vld [vmem:[%s14179_s2 + $0xa8] sm:$0xff] }
 0x34f   : > { %2437 = vmatpush.bf16.msra.mxu0 %v10395_v21 }
 0x352   : > { %2663 = vmatpush.bf16.msra.mxu2 %v10412_v27 }
 0x353   : > { %v1883_v41 = vpop.xlane.xlu2 %1882  ;;  %2438 = vmatpush.bf16.msra.mxu0 %v10394_v37  ;;  %v14333_v37 = vld [vmem:[#allocation8_spill] sm:$0xff] }
 0x354   : > { %10675 = vrcp.f32 %v1883_v41  ;;  %v10392_v41 = vld [vmem:[%s14179_s2 + $0x90] sm:$0xff] }
 0x356   : > { %2664 = vmatpush.bf16.msra.mxu2 %v10411_v7 }
 0x357   : > { %2439 = vmatpush.bf16.msra.mxu0 %v10393_v16 }
 0x35a   : > { %v10676_v48 = vpop.eup %10675  ;;  %2665 = vmatpush.bf16.msra.mxu2 %v10410_v28  ;;  %v14317_v28 = vld [vmem:[#allocation13_spill] sm:$0xff] }
 0x35b   : > { %v1919_v49 = vmul.f32 %v10676_v48, %v11673_v34  ;;  %v10419_v34 = vld [vmem:[%s14180_s3 + $0xe8] sm:$0xff]  ;;  %v10400_v48 = vld [vmem:[%s14179_s2 + $0xd0] sm:$0xff]  ;;  %2440 = vmatpush.bf16.msra.mxu0 %v10392_v41  ;;  %v14334_v41 = vld [vmem:[#allocation24_spill] sm:$0xff] }
 0x35d   : > { %9051 = vmatmul.msk.f32.vlgmr.msra.gmra.mxu3 %vm1745_vm1, %v1919_v49  ;;  %v10399_v49 = vld [vmem:[%s14179_s2 + $0xc8] sm:$0xff] }
 0x35e   : > { %2751 = vmatpush.bf16.msra.mxu3 %v10421_v11  ;;  %2666 = vmatpush.bf16.msra.mxu2 %v10409_v45  ;;  %v10391_v11 = vld [vmem:[%s14179_s2 + $0x88] sm:$0xff] }
 0x35f   : > { %2441 = vmatpush.bf16.msra.mxu0 %v10391_v11  ;;  %v14335_v11 = vld [vmem:[#allocation25_spill] sm:$0xff] }
 0x362   : > { %2752 = vmatpush.bf16.msra.mxu3 %v10420_v55  ;;  %2667 = vmatpush.bf16.msra.mxu2 %v10408_v54  ;;  %v10390_v55 = vld [vmem:[%s14179_s2 + $0x80] sm:$0xff] }
 0x363   : > { %2442 = vmatpush.bf16.msra.mxu0 %v10390_v55 }
 0x366   : > { %2753 = vmatpush.bf16.msra.mxu3 %v10419_v34  ;;  %2668 = vmatpush.bf16.msra.mxu2 %v10407_v40  ;;  %v10398_v34 = vld [vmem:[%s14179_s2 + $0xc0] sm:$0xff]  ;;  %v14321_v40 = vld [vmem:[#allocation16_spill] sm:$0xff] }
 0x367   : > { %2443 = vmatmul.bf16.vlgmr.msra.gmra.mxu0 %v14317_v28  ;;  %v14348_v28 = vld [vmem:[#allocation34_spill] sm:$0xff] }
 0x36a   : > { %2754 = vmatpush.bf16.msra.mxu3 %v10418_v50  ;;  %2669 = vmatpush.bf16.msra.mxu2 %v10406_v32  ;;  %v14318_v50 = vld [vmem:[#allocation14_spill] sm:$0xff] }
 0x36b   : > { %v14323_v32 = vld [vmem:[#allocation18_spill] sm:$0xff] }
 0x36e   : > { %2755 = vmatpush.bf16.msra.mxu3 %v10417_v29 }
 0x372   : > { %2756 = vmatpush.bf16.msra.mxu3 %v10416_v12  ;;  %v14320_v12 = vld [vmem:[#allocation15_spill] sm:$0xff] }
 0x376   : > { %2757 = vmatpush.bf16.msra.mxu3 %v10415_v52  ;;  %v14322_v52 = vld [vmem:[#allocation17_spill] sm:$0xff] }
 0x377   : > { %2448 = vmatmul.bf16.gmra.mxu0 %v14320_v12 }
 0x37a   : > { %2758 = vmatpush.bf16.msra.mxu3 %v10414_v19  ;;  %v1942_v51 = vpop.f32.mrf.mxu2  ;;  %v14324_v19 = vld [vmem:[#allocation19_spill] sm:$0xff] }
 0x382   : > { %v1965_v62 = vpop.f32.mrf.mxu3 }
 0x383   : > { %v11796_v47 = vpack.c.bf16 %v1965_v62, %v1942_v51  ;;  %v11798_v1 = vpop.f32.mrf.mxu2  ;;  %v14325_v51 = vld [vmem:[#allocation20_spill] sm:$0xff] }
 0x384   : > { %14309 = vst [vmem:[#allocation37_spill] sm:$0xff] %v11798_v1 }
 0x385   : > { %14308 = vst [vmem:[#allocation36_spill] sm:$0xff] %v11796_v47  ;;  %v1886_v46 = vpop.xlane.xlu0 %1885 }
 0x386   : > { %v1889_v56 = vpop.xlane.xlu1 %1888  ;;  %10677 = vrcp.f32 %v1886_v46 }
 0x387   : > { %10679 = vrcp.f32 %v1889_v56  ;;  %2453 = vmatmul.bf16.gmra.mxu0 %v14322_v52 }
 0x38a   : > { %v11800_v53 = vpop.f32.mrf.mxu3 }
 0x38b   : > { %14310 = vst [vmem:[#allocation38_spill] sm:$0xff] %v11800_v53  ;;  %v2034_v20 = vpop.f32.mrf.mxu2 }
 0x38c   : > { %v10678_v58 = vpop.eup %10677 }
 0x38d   : > { %v10680_v17 = vpop.eup %10679  ;;  %v1920_v63 = vmul.f32 %v10678_v58, %v11718_v24  ;;  %v10405_v24 = vld [vmem:[%s14179_s2 + $0xf8] sm:$0xff]  ;;  %v14327_v58 = vld [vmem:[#allocation21_spill] sm:$0xff] }
 0x38e   : > { %v1921_v25 = vmul.f32 %v10680_v17, %v11722_v10  ;;  %2484 = vmatpush.bf16.msra.mxu1 %v10405_v24 }
 0x38f   : > { %9052 = vmatmul.msk.f32.vlgmr.msrb.gmra.mxu2 %vm1745_vm1, %v1920_v63 }
 0x390   : > { %9053 = vmatmul.msk.f32.vlgmr.msrb.gmra.mxu3 %vm1745_vm1, %v1921_v25  ;;  %v14328_v25 = vld [vmem:[#allocation5_spill] sm:$0xff] }
 0x392   : > { %2485 = vmatpush.bf16.msra.mxu1 %v10404_v35 }
 0x393   : > { %v2057_v39 = vpop.f32.mrf.mxu3 }
 0x394   : > { %v11806_v13 = vpack.c.bf16 %v2057_v39, %v2034_v20  ;;  %v14329_v20 = vld [vmem:[#allocation6_spill] sm:$0xff] }
 0x396   : > { %14311 = vst [vmem:[#allocation39_spill] sm:$0xff] %v11806_v13  ;;  %2486 = vmatpush.bf16.msra.mxu1 %v10403_v38  ;;  %v14332_v38 = vld [vmem:[#allocation7_spill] sm:$0xff] }
 0x397   : > { %2670 = vmatmul.bf16.vlgmr.msra.gmra.mxu2 %v11177_v60  ;;  %2458 = vmatmul.bf16.gmra.mxu0 %v14324_v19 }
 0x398   : > { %2759 = vmatmul.bf16.vlgmr.msra.gmra.mxu3 %v11179_v61 }
 0x39a   : > { %2487 = vmatpush.bf16.msra.mxu1 %v10402_v18 }
 0x39b   : > { %v11816_v10 = vpop.f32.mrf.mxu3  ;;  %v11818_v30 = vpop.f32.mrf.mxu2 }
 0x39c   : > { %14312 = vst [vmem:[#allocation40_spill] sm:$0xff] %v11816_v10 }
 0x39d   : > { %14313 = vst [vmem:[#allocation41_spill] sm:$0xff] %v11818_v30 }
 0x39e   : > { %2488 = vmatpush.bf16.msra.mxu1 %v10401_v0 }
 0x3a2   : > { %2489 = vmatpush.bf16.msra.mxu1 %v10400_v48 }
 0x3a3   : > { %v2149_v26 = vpop.f32.mrf.mxu3  ;;  %v2126_v57 = vpop.f32.mrf.mxu2 }
 0x3a4   : > { %v11820_v44 = vpack.c.bf16 %v2149_v26, %v2126_v57  ;;  %v14330_v26 = vld [vmem:[#allocation22_spill] sm:$0xff] }
 0x3a6   : > { %14314 = vst [vmem:[#allocation42_spill] sm:$0xff] %v11820_v44  ;;  %2490 = vmatpush.bf16.msra.mxu1 %v10399_v49 }
 0x3a7   : > { %2675 = vmatmul.bf16.gmra.mxu2 %v11187_v2  ;;  %2463 = vmatmul.bf16.gmra.mxu0 %v14328_v25 }
 0x3a8   : > { %2764 = vmatmul.bf16.gmra.mxu3 %v11189_v3 }
 0x3aa   : > { %2491 = vmatpush.bf16.msra.mxu1 %v10398_v34  ;;  %v14336_v34 = vld [vmem:[#allocation9_spill] sm:$0xff] }
 0x3ad   : > { %2492 = vmatmul.bf16.vlgmr.msra.gmra.mxu1 %v14318_v50 }
 0x3b0   : > { %v11864_v27 = vpop.f32.mrf.mxu2 }
 0x3b1   : > { %14315 = vst [vmem:[#allocation43_spill] sm:$0xff] %v11864_v27 }
 0x3b7   : > { %2680 = vmatmul.bf16.gmra.mxu2 %v11197_v8  ;;  %2468 = vmatmul.bf16.gmra.mxu0 %v14332_v38 }
 0x3b8   : > { %2769 = vmatmul.bf16.gmra.mxu3 %v11199_v9 }
 0x3bd   : > { %2497 = vmatmul.bf16.gmra.mxu1 %v14321_v40 }
 0x3c0   : > { %v11866_v7 = vpop.f32.mrf.mxu3 }
 0x3c1   : > { %14316 = vst [vmem:[#allocation44_spill] sm:$0xff] %v11866_v7 }
 0x3c7   : > { %2685 = vmatmul.bf16.gmra.mxu2 %v11207_v14  ;;  %2473 = vmatmul.bf16.gmra.mxu0 %v14336_v34  ;;  %v14345_v34 = vld [vmem:[#allocation31_spill] sm:$0xff] }
 0x3c8   : > { %2774 = vmatmul.bf16.gmra.mxu3 %v11209_v15 }
 0x3cd   : > { %2502 = vmatmul.bf16.gmra.mxu1 %v14323_v32 }
 0x3d0   : > { %v2218_v45 = vpop.f32.mrf.mxu2 }
 0x3d7   : > { %2690 = vmatmul.bf16.gmra.mxu2 %v11217_v22 }
 0x3d8   : > { %2779 = vmatmul.bf16.gmra.mxu3 %v11219_v23 }
 0x3dd   : > { %2507 = vmatmul.bf16.gmra.mxu1 %v14325_v51 }
 0x3e0   : > { %v2241_v29 = vpop.f32.mrf.mxu3 }
 0x3e1   : > { %v11878_v54 = vpack.c.bf16 %v2241_v29, %v2218_v45  ;;  %v14337_v45 = vld [vmem:[#allocation10_spill] sm:$0xff] }
 0x3e3   : > { %14319 = vst [vmem:[#allocation45_spill] sm:$0xff] %v11878_v54 }
 0x3e7   : > { %2695 = vmatmul.bf16.gmra.mxu2 %v11241_v42 }
 0x3e8   : > { %2784 = vmatmul.bf16.gmra.mxu3 %v11243_v43 }
 0x3ed   : > { %2512 = vmatmul.bf16.gmra.mxu1 %v14329_v20  ;;  %v14346_v20 = vld [vmem:[#allocation32_spill] sm:$0xff] }
 0x3f7   : > { %2700 = vmatmul.bf16.gmra.mxu2 %v11265_v4 }
 0x3f8   : > { %2789 = vmatmul.bf16.gmra.mxu3 %v11267_v5 }
 0x3fd   : > { %2517 = vmatmul.bf16.gmra.mxu1 %v14333_v37 }
 0x407   : > { %2705 = vmatmul.bf16.gmra.mxu2 %v11289_v33 }
 0x408   : > { %2794 = vmatmul.bf16.gmra.mxu3 %v11291_v36 }
 0x40d   : > { %2522 = vmatmul.bf16.gmra.mxu1 %v14337_v45  ;;  %v14344_v45 = vld [vmem:[#allocation30_spill] sm:$0xff] }
 0x412   : > { %v2264_v62 = vpop.f32.mrf.mxu2 }
 0x413   : > { %v2287_v46 = vpop.f32.mrf.mxu3 }
 0x414   : > { %v11892_v56 = vpack.c.bf16 %v2287_v46, %v2264_v62 }
 0x416   : > { %14326 = vst [vmem:[#allocation46_spill] sm:$0xff] %v11892_v56  ;;  %v14349_v56 = vld [vmem:[#allocation35_spill] sm:$0xff] }
 0x417   : > { %2710 = vmatmul.bf16.gmra.mxu2 %v11313_v6 }
 0x418   : > { %2799 = vmatmul.bf16.gmra.mxu3 %v14327_v58 }
 0x41a   : > { %v2671_v17 = vpop.f32.mrf.mxu2 }
 0x41b   : > { %v2760_v63 = vpop.f32.mrf.mxu3 }
 0x41c   : > { %v2761_v57 = vadd.f32 %v2760_v63, %v2671_v17  ;;  %v14338_v17 = vld [vmem:[#allocation26_spill] sm:$0xff] }
 0x422   : > { %v2673_v39 = vpop.f32.mrf.mxu2 }
 0x423   : > { %v2762_v31 = vpop.f32.mrf.mxu3 }
 0x424   : > { %v2763_v24 = vadd.f32 %v2762_v31, %v2673_v39  ;;  %v14339_v39 = vld [vmem:[#allocation27_spill] sm:$0xff] }
 0x426   : > { %9342 = vmatpush.xpose.msk.msrb.mxu2 %vm1264_vm0, %v2763_v24 }
 0x427   : > { %2715 = vmatmul.bf16.gmra.mxu2 %v14330_v26 }
 0x428   : > { %2804 = vmatmul.bf16.gmra.mxu3 %v14331_v59 }
 0x42a   : > { %9343 = vmatpush.xpose.msk.msrb.mxu2 %vm1264_vm0, %v2761_v57  ;;  %v2676_v35 = vpop.f32.mrf.mxu2  ;;  %v14340_v57 = vld [vmem:[#allocation11_spill] sm:$0xff] }
 0x42b   : > { %v2765_v21 = vpop.f32.mrf.mxu3  ;;  %2478 = vmatmul.bf16.gmra.mxu0 %v14340_v57 }
 0x42c   : > { %v2766_v48 = vadd.f32 %v2765_v21, %v2676_v35  ;;  %v14341_v35 = vld [vmem:[#allocation12_spill] sm:$0xff] }
 0x42d   : > { %2527 = vmatmul.bf16.gmra.mxu1 %v14341_v35 }
 0x432   : > { %v2678_v18 = vpop.f32.mrf.mxu2 }
 0x433   : > { %v2767_v16 = vpop.f32.mrf.mxu3 }
 0x434   : > { %v2768_v0 = vadd.f32 %v2767_v16, %v2678_v18 }
 0x436   : > { %9345 = vmatpush.xpose.msk.msrb.mxu3 %vm1264_vm0, %v2768_v0  ;;  %v14342_v0 = vld [vmem:[#allocation28_spill] sm:$0xff] }
 0x437   : > { %2720 = vmatmul.bf16.gmra.mxu2 %v14334_v41 }
 0x438   : > { %2809 = vmatmul.bf16.gmra.mxu3 %v14335_v11 }
 0x43a   : > { %9346 = vmatpush.xpose.msk.msrb.mxu3 %vm1264_vm0, %v2766_v48  ;;  %v2681_v49 = vpop.f32.mrf.mxu2 }
 0x43b   : > { %v2770_v55 = vpop.f32.mrf.mxu3 }
 0x43c   : > { %v2771_v63 = vadd.f32 %v2770_v55, %v2681_v49 }
 0x442   : > { %v2683_v29 = vpop.f32.mrf.mxu2 }
 0x443   : > { %v2772_v62 = vpop.f32.mrf.mxu3 }
 0x444   : > { %v2773_v46 = vadd.f32 %v2772_v62, %v2683_v29  ;;  %v14343_v29 = vld [vmem:[#allocation29_spill] sm:$0xff]  ;;  %v2444_v62 = vpop.f32.mrf.mxu0 }
 0x446   : > { %9348 = vmatpush.xpose.msk.msra.mxu2 %vm1264_vm0, %v2773_v46  ;;  %v2493_v46 = vpop.f32.mrf.mxu1 }
 0x447   : > { %2725 = vmatmul.bf16.gmra.mxu2 %v14338_v17  ;;  %v2494_v30 = vadd.f32 %v2493_v46, %v2444_v62 }
 0x448   : > { %2814 = vmatmul.bf16.gmra.mxu3 %v14339_v39 }
 0x44a   : > { %9349 = vmatpush.xpose.msk.msra.mxu2 %vm1264_vm0, %v2771_v63  ;;  %v2686_v31 = vpop.f32.mrf.mxu2 }
 0x44b   : > { %v2775_v24 = vpop.f32.mrf.mxu3 }
 0x44c   : > { %v2776_v48 = vadd.f32 %v2775_v24, %v2686_v31  ;;  %v2446_v35 = vpop.f32.mrf.mxu0 }
 0x452   : > { %v2688_v21 = vpop.f32.mrf.mxu2 }
 0x453   : > { %v2777_v18 = vpop.f32.mrf.mxu3 }
 0x454   : > { %v2778_v16 = vadd.f32 %v2777_v18, %v2688_v21  ;;  %v2495_v21 = vpop.f32.mrf.mxu1  ;;  %v2449_v37 = vpop.f32.mrf.mxu0 }
 0x455   : > { %v2496_v53 = vadd.f32 %v2495_v21, %v2446_v35 }
 0x456   : > { %9351 = vmatpush.xpose.msk.msra.mxu3 %vm1264_vm0, %v2778_v16 }
 0x457   : > { %2730 = vmatmul.bf16.gmra.mxu2 %v14342_v0 }
 0x458   : > { %2819 = vmatmul.bf16.gmra.mxu3 %v14343_v29 }
 0x45a   : > { %9352 = vmatpush.xpose.msk.msra.mxu3 %vm1264_vm0, %v2776_v48  ;;  %v2691_v49 = vpop.f32.mrf.mxu2  ;;  %v14347_v48 = vld [vmem:[#allocation33_spill] sm:$0xff] }
 0x45b   : > { %v2780_v55 = vpop.f32.mrf.mxu3 }
 0x45c   : > { %v2498_v24 = vpop.f32.mrf.mxu1  ;;  %v2451_v19 = vpop.f32.mrf.mxu0 }
 0x462   : > { %v2693_v63 = vpop.f32.mrf.mxu2 }
 0x463   : > { %v2782_v57 = vpop.f32.mrf.mxu3 }
 0x464   : > { %v2500_v32 = vpop.f32.mrf.mxu1  ;;  %v2454_v12 = vpop.f32.mrf.mxu0  ;;  %v2783_v1 = vadd.f32 %v2782_v57, %v2693_v63 }
 0x465   : > { %v2501_v62 = vadd.f32 %v2500_v32, %v2451_v19 }
 0x467   : > { %2735 = vmatmul.bf16.gmra.mxu2 %v14344_v45  ;;  %v2499_v45 = vadd.f32 %v2498_v24, %v2449_v37 }
 0x468   : > { %2824 = vmatmul.bf16.gmra.mxu3 %v14345_v34 }
 0x46a   : > { %v2696_v18 = vpop.f32.mrf.mxu2 }
 0x46b   : > { %v2785_v16 = vpop.f32.mrf.mxu3 }
 0x46c   : > { %v2503_v50 = vpop.f32.mrf.mxu1  ;;  %v2456_v27 = vpop.f32.mrf.mxu0  ;;  %v2786_v34 = vadd.f32 %v2785_v16, %v2696_v18 }
 0x46d   : > { %v2504_v37 = vadd.f32 %v2503_v50, %v2454_v12 }
 0x472   : > { %v2698_v31 = vpop.f32.mrf.mxu2 }
 0x473   : > { %v2787_v38 = vpop.f32.mrf.mxu3 }
 0x474   : > { %v2505_v44 = vpop.f32.mrf.mxu1  ;;  %v2788_v47 = vadd.f32 %v2787_v38, %v2698_v31 }
 0x475   : > { %v2506_v32 = vadd.f32 %v2505_v44, %v2456_v27 }
 0x477   : > { %2740 = vmatmul.bf16.gmra.mxu2 %v14346_v20 }
 0x478   : > { %2829 = vmatmul.bf16.gmra.mxu3 %v14347_v48 }
 0x47a   : > { %v2701_v25 = vpop.f32.mrf.mxu2 }
 0x47b   : > { %v2790_v51 = vpop.f32.mrf.mxu3 }
 0x47c   : > { %v2508_v20 = vpop.f32.mrf.mxu1 }
 0x482   : > { %v2703_v52 = vpop.f32.mrf.mxu2 }
 0x483   : > { %v2792_v40 = vpop.f32.mrf.mxu3 }
 0x484   : > { %v2793_v38 = vadd.f32 %v2792_v40, %v2703_v52 }
 0x487   : > { %2745 = vmatmul.bf16.gmra.mxu2 %v14348_v28  ;;  %v2459_v28 = vpop.f32.mrf.mxu0 }
 0x488   : > { %2834 = vmatmul.bf16.gmra.mxu3 %v14349_v56  ;;  %v2781_v56 = vadd.f32 %v2780_v55, %v2691_v49  ;;  %v2509_v52 = vadd.f32 %v2508_v20, %v2459_v28 }
 0x48a   : > { %v2706_v54 = vpop.f32.mrf.mxu2 }
 0x48b   : > { %v2795_v7 = vpop.f32.mrf.mxu3 }
 0x48f   : > { %v2461_v19 = vpop.f32.mrf.mxu0 }
 0x492   : > { %v2708_v10 = vpop.f32.mrf.mxu2 }
 0x493   : > { %v2797_v13 = vpop.f32.mrf.mxu3 }
 0x497   : > { %9344 = vmatmul.msk.f32.vlgmr.msrb.gmra.mxu2 %vm1264_vm0, %v2494_v30  ;;  %v2798_v30 = vadd.f32 %v2797_v13, %v2708_v10  ;;  %v2464_v27 = vpop.f32.mrf.mxu0 }
 0x498   : > { %9347 = vmatmul.msk.f32.vlgmr.msrb.gmra.mxu3 %vm1264_vm0, %v2496_v53  ;;  %9354 = vmatpush.xpose.msk.msrb.mxu2 %vm1264_vm0, %v2783_v1  ;;  %v2796_v53 = vadd.f32 %v2795_v7, %v2706_v54 }
 0x499   : > { %9357 = vmatpush.xpose.msk.msrb.mxu3 %vm1264_vm0, %v2788_v47  ;;  %v2791_v47 = vadd.f32 %v2790_v51, %v2701_v25 }
 0x49a   : > { %v2711_v48 = vpop.f32.mrf.mxu2 }
 0x49b   : > { %v2800_v29 = vpop.f32.mrf.mxu3 }
 0x49c   : > { %9355 = vmatpush.xpose.msk.msrb.mxu2 %vm1264_vm0, %v2781_v56  ;;  %v2510_v56 = vpop.f32.mrf.mxu1  ;;  %v2801_v10 = vadd.f32 %v2800_v29, %v2711_v48 }
 0x49d   : > { %9358 = vmatpush.xpose.msk.msrb.mxu3 %vm1264_vm0, %v2786_v34  ;;  %v2511_v44 = vadd.f32 %v2510_v56, %v2461_v19  ;;  %v10437_v19 = vld [vmem:[%s14181_s4 + $0xf8] sm:$0xff] }
 0x49e   : > { %3058 = vmatpush.bf16.msrb.mxu1 %v10437_v19 }
 0x49f   : > { %9350 = vmatmul.msk.f32.vlgmr.msra.gmra.mxu2 %vm1264_vm0, %v2499_v45  ;;  %v2466_v28 = vpop.f32.mrf.mxu0 }
 0x4a0   : > { %9353 = vmatmul.msk.f32.vlgmr.msra.gmra.mxu3 %vm1264_vm0, %v2501_v62  ;;  %9360 = vmatpush.xpose.msk.msra.mxu2 %vm1264_vm0, %v2793_v38 }
 0x4a1   : > { %9363 = vmatpush.xpose.msk.msra.mxu3 %vm1264_vm0, %v2798_v30 }
 0x4a2   : > { %v2713_v1 = vpop.f32.mrf.mxu2 }
 0x4a3   : > { %v2802_v57 = vpop.f32.mrf.mxu3 }
 0x4a4   : > { %9361 = vmatpush.xpose.msk.msra.mxu2 %vm1264_vm0, %v2791_v47  ;;  %v2803_v13 = vadd.f32 %v2802_v57, %v2713_v1  ;;  %v2513_v50 = vpop.f32.mrf.mxu1 }
 0x4a5   : > { %9364 = vmatpush.xpose.msk.msra.mxu3 %vm1264_vm0, %v2796_v53  ;;  %v2514_v51 = vadd.f32 %v2513_v50, %v2464_v27 }
 0x4a7   : > { %9356 = vmatmul.msk.f32.vlgmr.msrb.gmra.mxu2 %vm1264_vm0, %v2504_v37  ;;  %v2469_v63 = vpop.f32.mrf.mxu0 }
 0x4a8   : > { %9366 = vmatpush.xpose.msk.msrb.mxu2 %vm1264_vm0, %v2803_v13  ;;  %9359 = vmatmul.msk.f32.vlgmr.msrb.gmra.mxu3 %vm1264_vm0, %v2506_v32  ;;  %v10429_v32 = vld [vmem:[%s14181_s4 + $0xb8] sm:$0xff] }
 0x4a9   : > { %2969 = vmatpush.bf16.msrb.mxu0 %v10429_v32 }
 0x4aa   : > { %v2716_v40 = vpop.f32.mrf.mxu2 }
 0x4ab   : > { %v2805_v7 = vpop.f32.mrf.mxu3 }
 0x4ac   : > { %9367 = vmatpush.xpose.msk.msrb.mxu2 %vm1264_vm0, %v2801_v10  ;;  %v2806_v34 = vadd.f32 %v2805_v7, %v2716_v40  ;;  %v2515_v20 = vpop.f32.mrf.mxu1  ;;  %v10428_v10 = vld [vmem:[%s14181_s4 + $0xb0] sm:$0xff]  ;;  %v10427_v7 = vld [vmem:[%s14181_s4 + $0xa8] sm:$0xff] }
 0x4ad   : > { %v2516_v45 = vadd.f32 %v2515_v20, %v2466_v28  ;;  %v10436_v40 = vld [vmem:[%s14181_s4 + $0xf0] sm:$0xff]  ;;  %2970 = vmatpush.bf16.msrb.mxu0 %v10428_v10  ;;  %v10434_v28 = vld [vmem:[%s14181_s4 + $0xe0] sm:$0xff]  ;;  %v10425_v20 = vld [vmem:[%s14181_s4 + $0x98] sm:$0xff] }
 0x4ae   : > { %3059 = vmatpush.bf16.msrb.mxu1 %v10436_v40 }
 0x4af   : > { %9362 = vmatmul.msk.f32.vlgmr.msra.gmra.mxu2 %vm1264_vm0, %v2509_v52  ;;  %v2471_v30 = vpop.f32.mrf.mxu0 }
 0x4b0   : > { %9365 = vmatmul.msk.f32.vlgmr.msra.gmra.mxu3 %vm1264_vm0, %v2511_v44  ;;  %v10435_v44 = vld [vmem:[%s14181_s4 + $0xe8] sm:$0xff] }
 0x4b1   : > { %2971 = vmatpush.bf16.msrb.mxu0 %v10427_v7 }
 0x4b2   : > { %v2718_v54 = vpop.f32.mrf.mxu2  ;;  %3060 = vmatpush.bf16.msrb.mxu1 %v10435_v44 }
 0x4b3   : > { %v2807_v12 = vpop.f32.mrf.mxu3 }
 0x4b4   : > { %v2808_v25 = vadd.f32 %v2807_v12, %v2718_v54  ;;  %v2518_v21 = vpop.f32.mrf.mxu1 }
 0x4b5   : > { %v2519_v16 = vadd.f32 %v2518_v21, %v2469_v63 }
 0x4b6   : > { %9369 = vmatpush.xpose.msk.msrb.mxu3 %vm1264_vm0, %v2808_v25  ;;  %3061 = vmatpush.bf16.msrb.mxu1 %v10434_v28 }
 0x4b7   : > { %9368 = vmatmul.msk.f32.vlgmr.msrb.gmra.mxu2 %vm1264_vm0, %v2514_v51  ;;  %v2474_v50 = vpop.f32.mrf.mxu0 }
 0x4ba   : > { %9370 = vmatpush.xpose.msk.msrb.mxu3 %vm1264_vm0, %v2806_v34  ;;  %v2721_v35 = vpop.f32.mrf.mxu2  ;;  %v10426_v34 = vld [vmem:[%s14181_s4 + $0xa0] sm:$0xff] }
 0x4bb   : > { %v2810_v29 = vpop.f32.mrf.mxu3  ;;  %2972 = vmatpush.bf16.msrb.mxu0 %v10426_v34 }
 0x4bc   : > { %v2811_v18 = vadd.f32 %v2810_v29, %v2721_v35  ;;  %v2520_v47 = vpop.f32.mrf.mxu1 }
 0x4bd   : > { %9371 = vmatmul.msk.f32.vlgmr.msrb.gmra.mxu3 %vm1264_vm0, %v2516_v45  ;;  %v2521_v53 = vadd.f32 %v2520_v47, %v2471_v30  ;;  %v10433_v45 = vld [vmem:[%s14181_s4 + $0xd8] sm:$0xff]  ;;  %v10430_v30 = vld [vmem:[%s14181_s4 + $0xc0] sm:$0xff] }
 0x4be   : > { %3062 = vmatpush.bf16.msrb.mxu1 %v10433_v45 }
 0x4bf   : > { %2973 = vmatpush.bf16.msrb.mxu0 %v10425_v20  ;;  %v2476_v63 = vpop.f32.mrf.mxu0 }
 0x4c2   : > { %v2723_v49 = vpop.f32.mrf.mxu2 }
 0x4c3   : > { %v2812_v55 = vpop.f32.mrf.mxu3 }
 0x4c4   : > { %v2813_v46 = vadd.f32 %v2812_v55, %v2723_v49  ;;  %v2523_v54 = vpop.f32.mrf.mxu1  ;;  %v10424_v49 = vld [vmem:[%s14181_s4 + $0x90] sm:$0xff] }
 0x4c5   : > { %v2524_v12 = vadd.f32 %v2523_v54, %v2474_v50  ;;  %v10432_v55 = vld [vmem:[%s14181_s4 + $0xd0] sm:$0xff]  ;;  %2974 = vmatpush.bf16.msrb.mxu0 %v10424_v49 }
 0x4c6   : > { %9372 = vmatpush.xpose.msk.msra.mxu2 %vm1264_vm0, %v2813_v46  ;;  %3063 = vmatpush.bf16.msrb.mxu1 %v10432_v55 }
 0x4ca   : > { %9373 = vmatpush.xpose.msk.msra.mxu2 %vm1264_vm0, %v2811_v18  ;;  %v2726_v31 = vpop.f32.mrf.mxu2  ;;  %v10423_v18 = vld [vmem:[%s14181_s4 + $0x88] sm:$0xff] }
 0x4cb   : > { %v2815_v24 = vpop.f32.mrf.mxu3  ;;  %2975 = vmatpush.bf16.msrb.mxu0 %v10423_v18 }
 0x4cc   : > { %v2816_v1 = vadd.f32 %v2815_v24, %v2726_v31  ;;  %v2525_v21 = vpop.f32.mrf.mxu1 }
 0x4cd   : > { %9374 = vmatmul.msk.f32.vlgmr.msra.gmra.mxu2 %vm1264_vm0, %v2519_v16  ;;  %v10431_v16 = vld [vmem:[%s14181_s4 + $0xc8] sm:$0xff]  ;;  %v2526_v24 = vadd.f32 %v2525_v21, %v2476_v63 }
 0x4ce   : > { %3064 = vmatpush.bf16.msrb.mxu1 %v10431_v16 }
 0x4d2   : > { %v2728_v48 = vpop.f32.mrf.mxu2  ;;  %3065 = vmatpush.bf16.msrb.mxu1 %v10430_v30 }
 0x4d3   : > { %v2817_v62 = vpop.f32.mrf.mxu3 }
 0x4d4   : > { %v2818_v38 = vadd.f32 %v2817_v62, %v2728_v48 }
 0x4d5   : > { %3066 = vmatmul.bf16.vlgmr.msrb.gmra.mxu1 %v11179_v61 }
 0x4d6   : > { %9375 = vmatpush.xpose.msk.msra.mxu3 %vm1264_vm0, %v2818_v38  ;;  %v10422_v38 = vld [vmem:[%s14181_s4 + $0x80] sm:$0xff] }
 0x4d7   : > { %2976 = vmatpush.bf16.msrb.mxu0 %v10422_v38 }
 0x4da   : > { %9376 = vmatpush.xpose.msk.msra.mxu3 %vm1264_vm0, %v2816_v1  ;;  %v2731_v37 = vpop.f32.mrf.mxu2  ;;  %2977 = vmatmul.bf16.vlgmr.msrb.gmra.mxu0 %v11177_v60 }
 0x4db   : > { %v2820_v57 = vpop.f32.mrf.mxu3 }
 0x4dc   : > { %v2821_v27 = vadd.f32 %v2820_v57, %v2731_v37  ;;  %v2479_v37 = vpop.f32.mrf.mxu0  ;;  %v2528_v57 = vpop.f32.mrf.mxu1 }
 0x4dd   : > { %9377 = vmatmul.msk.f32.vlgmr.msra.gmra.mxu3 %vm1264_vm0, %v2521_v53  ;;  %v2529_v19 = vadd.f32 %v2528_v57, %v2479_v37 }
 0x4e2   : > { %v2733_v56 = vpop.f32.mrf.mxu2 }
 0x4e3   : > { %v2822_v13 = vpop.f32.mrf.mxu3 }
 0x4e4   : > { %v2823_v52 = vadd.f32 %v2822_v13, %v2733_v56  ;;  %v2481_v44 = vpop.f32.mrf.mxu0 }
 0x4e5   : > { %3071 = vmatmul.bf16.gmra.mxu1 %v11189_v3 }
 0x4e6   : > { %9378 = vmatpush.xpose.msk.msrb.mxu2 %vm1264_vm0, %v2823_v52 }
 0x4ea   : > { %9379 = vmatpush.xpose.msk.msrb.mxu2 %vm1264_vm0, %v2821_v27  ;;  %v2736_v51 = vpop.f32.mrf.mxu2  ;;  %2982 = vmatmul.bf16.gmra.mxu0 %v11187_v2  ;;  %v2530_v27 = vpop.f32.mrf.mxu1 }
 0x4eb   : > { %v2825_v25 = vpop.f32.mrf.mxu3  ;;  %v2531_v54 = vadd.f32 %v2530_v27, %v2481_v44 }
 0x4ec   : > { %v2826_v31 = vadd.f32 %v2825_v25, %v2736_v51 }
 0x4ed   : > { %9380 = vmatmul.msk.f32.vlgmr.msrb.gmra.mxu2 %vm1264_vm0, %v2524_v12 }
 0x4f2   : > { %v2738_v35 = vpop.f32.mrf.mxu2 }
 0x4f3   : > { %v2827_v29 = vpop.f32.mrf.mxu3 }
 0x4f4   : > { %v2828_v46 = vadd.f32 %v2827_v29, %v2738_v35 }
 0x4f5   : > { %3076 = vmatmul.bf16.gmra.mxu1 %v11199_v9 }
 0x4f6   : > { %9381 = vmatpush.xpose.msk.msrb.mxu3 %vm1264_vm0, %v2828_v46 }
 0x4fa   : > { %9382 = vmatpush.xpose.msk.msrb.mxu3 %vm1264_vm0, %v2826_v31  ;;  %v2741_v48 = vpop.f32.mrf.mxu2  ;;  %2987 = vmatmul.bf16.gmra.mxu0 %v11197_v8 }
 0x4fb   : > { %v2830_v62 = vpop.f32.mrf.mxu3 }
 0x4fc   : > { %v2831_v32 = vadd.f32 %v2830_v62, %v2741_v48 }
 0x4fd   : > { %9383 = vmatmul.msk.f32.vlgmr.msrb.gmra.mxu3 %vm1264_vm0, %v2526_v24 }
 0x502   : > { %v2743_v47 = vpop.f32.mrf.mxu2 }
 0x503   : > { %v2832_v1 = vpop.f32.mrf.mxu3 }
 0x504   : > { %v2833_v53 = vadd.f32 %v2832_v1, %v2743_v47 }
 0x505   : > { %3081 = vmatmul.bf16.gmra.mxu1 %v11209_v15 }
 0x506   : > { %9384 = vmatpush.xpose.msk.msra.mxu2 %vm1264_vm0, %v2833_v53 }
 0x50a   : > { %9385 = vmatpush.xpose.msk.msra.mxu2 %vm1264_vm0, %v2831_v32  ;;  %v2746_v56 = vpop.f32.mrf.mxu2  ;;  %2992 = vmatmul.bf16.gmra.mxu0 %v11207_v14 }
 0x50b   : > { %v2835_v13 = vpop.f32.mrf.mxu3 }
 0x50c   : > { %v2836_v7 = vadd.f32 %v2835_v13, %v2746_v56 }
 0x50d   : > { %9386 = vmatmul.msk.f32.vlgmr.msra.gmra.mxu2 %vm1264_vm0, %v2529_v19 }
 0x512   : > { %v2748_v10 = vpop.f32.mrf.mxu2 }
 0x513   : > { %v2837_v40 = vpop.f32.mrf.mxu3 }
 0x514   : > { %v2838_v52 = vadd.f32 %v2837_v40, %v2748_v10 }
 0x515   : > { %3086 = vmatmul.bf16.gmra.mxu1 %v11219_v23 }
 0x516   : > { %9387 = vmatpush.xpose.msk.msra.mxu3 %vm1264_vm0, %v2838_v52 }
 0x51a   : > { %9388 = vmatpush.xpose.msk.msra.mxu3 %vm1264_vm0, %v2836_v7  ;;  %v3173_v50 = vpop.f32.mrf.mxu2  ;;  %2997 = vmatmul.bf16.gmra.mxu0 %v11217_v22 }
 0x51b   : > { %v12017_v12 = vmul.f32 0.125, %v3173_v50  ;;  %v3202_v51 = vpop.f32.mrf.mxu3 }
 0x51c   : > { %v12019_v25 = vmul.f32 0.125, %v3202_v51 }
 0x51d   : > { %9389 = vmatmul.msk.f32.vlgmr.msra.gmra.mxu3 %vm1264_vm0, %v2531_v54  ;;  %v3627_v34 = vsel %vm1745_vm1, %v12017_v12, -inf }
 0x51e   : > { %v3630_v28 = vsel %vm1745_vm1, %v12019_v25, -inf  ;;  %3628 = vmax.xlane.f32.xlu2 %v3627_v34 }
 0x51f   : > { %3631 = vmax.xlane.f32.xlu0 %v3630_v28 }
 0x522   : > { %v3231_v20 = vpop.f32.mrf.mxu2 }
 0x523   : > { %v12028_v45 = vmul.f32 0.125, %v3231_v20  ;;  %v3260_v35 = vpop.f32.mrf.mxu3 }
 0x524   : > { %v12030_v29 = vmul.f32 0.125, %v3260_v35 }
 0x525   : > { %v3633_v49 = vsel %vm1745_vm1, %v12028_v45, -inf  ;;  %3091 = vmatmul.bf16.gmra.mxu1 %v11243_v43 }
 0x526   : > { %v3636_v55 = vsel %vm1745_vm1, %v12030_v29, -inf  ;;  %3634 = vmax.xlane.f32.xlu1 %v3633_v49 }
 0x527   : > { %3637 = vmax.xlane.f32.xlu2 %v3636_v55 }
 0x52a   : > { %v3289_v46 = vpop.f32.mrf.mxu2  ;;  %3002 = vmatmul.bf16.gmra.mxu0 %v11241_v42 }
 0x52b   : > { %v3318_v21 = vpop.f32.mrf.mxu3  ;;  %v12056_v1 = vmul.f32 0.125, %v3289_v46 }
 0x52c   : > { %v12081_v46 = vmul.f32 0.125, %v3318_v21 }
 0x52d   : > { %v3639_v53 = vsel %vm1745_vm1, %v12056_v1, -inf }
 0x532   : > { %v12038_v63 = vpop.f32.mrf.mxu2 }
 0x533   : > { %v3376_v16 = vpop.f32.mrf.mxu3 }
 0x534   : > { %v12060_v37 = vmul.f32 0.125, %v3376_v16 }
 0x535   : > { %3096 = vmatmul.bf16.gmra.mxu1 %v11267_v5 }
 0x536   : > { %v3648_v57 = vsel %vm1745_vm1, %v12060_v37, -inf }
 0x53a   : > { %v3405_v18 = vpop.f32.mrf.mxu2  ;;  %3007 = vmatmul.bf16.gmra.mxu0 %v11265_v4 }
 0x53b   : > { %v12066_v32 = vmul.f32 0.125, %v3405_v18 }
 0x53d   : > { %v3651_v19 = vsel %vm1745_vm1, %v12066_v32, -inf }
 0x540   : > { %v12048_v62 = vpop.f32.mrf.mxu3 }
 0x545   : > { %3101 = vmatmul.bf16.gmra.mxu1 %v11291_v36 }
 0x54a   : > { %3012 = vmatmul.bf16.gmra.mxu0 %v11289_v33 }
 0x550   : > { %v3463_v31 = vpop.f32.mrf.mxu2 }
 0x551   : > { %v12043_v24 = vmul.f32 0.125, %v3463_v31 }
 0x552   : > { %v3067_v13 = vpop.f32.mrf.mxu1 }
 0x553   : > { %v3657_v48 = vsel %vm1745_vm1, %v12043_v24, -inf }
 0x554   : > { %3658 = vmax.xlane.f32.xlu0 %v3657_v48 }
 0x555   : > { %3106 = vmatmul.bf16.gmra.mxu1 %v14327_v58 }
 0x557   : > { %v2978_v56 = vpop.f32.mrf.mxu0 }
 0x558   : > { %v3068_v7 = vadd.f32 %v3067_v13, %v2978_v56 }
 0x55a   : > { %3017 = vmatmul.bf16.gmra.mxu0 %v11313_v6  ;;  %v3069_v52 = vpop.f32.mrf.mxu1 }
 0x55f   : > { %v2980_v10 = vpop.f32.mrf.mxu0 }
 0x560   : > { %v3492_v38 = vpop.f32.mrf.mxu3  ;;  %v3070_v44 = vadd.f32 %v3069_v52, %v2980_v10 }
 0x561   : > { %v12051_v30 = vmul.f32 0.125, %v3492_v38 }
 0x562   : > { %3820 = vmatpush.msrb.mxu2 %v3070_v44  ;;  %v3072_v50 = vpop.f32.mrf.mxu1 }
 0x563   : > { %v3660_v47 = vsel %vm1745_vm1, %v12051_v30, -inf }
 0x564   : > { %3661 = vmax.xlane.f32.xlu1 %v3660_v47  ;;  %3821 = vmatpush.msrb.mxu2 %v3068_v7 }
 0x565   : > { %3111 = vmatmul.bf16.gmra.mxu1 %v14331_v59 }
 0x567   : > { %v2983_v27 = vpop.f32.mrf.mxu0 }
 0x568   : > { %v3073_v18 = vadd.f32 %v3072_v50, %v2983_v27 }
 0x56a   : > { %3022 = vmatmul.bf16.gmra.mxu0 %v14330_v26  ;;  %v3074_v55 = vpop.f32.mrf.mxu1 }
 0x56c   : > { %3640 = vmax.xlane.f32.xlu1 %v3639_v53 }
 0x56f   : > { %v2985_v35 = vpop.f32.mrf.mxu0 }
 0x570   : > { %v12072_v40 = vpop.f32.mrf.mxu2  ;;  %v3075_v16 = vadd.f32 %v3074_v55, %v2985_v35 }
 0x572   : > { %3843 = vmatpush.msrb.mxu3 %v3075_v16 }
 0x574   : > { %3649 = vmax.xlane.f32.xlu1 %v3648_v57  ;;  %3844 = vmatpush.msrb.mxu3 %v3073_v18  ;;  %v3077_v57 = vpop.f32.mrf.mxu1 }
 0x575   : > { %3116 = vmatmul.bf16.gmra.mxu1 %v14335_v11 }
 0x577   : > { %v2988_v53 = vpop.f32.mrf.mxu0 }
 0x57a   : > { %3027 = vmatmul.bf16.gmra.mxu0 %v14334_v41 }
 0x57c   : > { %3652 = vmax.xlane.f32.xlu1 %v3651_v19 }
 0x57f   : > { %v2990_v44 = vpop.f32.mrf.mxu0 }
 0x580   : > { %v12083_v31 = vpop.f32.mrf.mxu3 }
 0x585   : > { %3121 = vmatmul.bf16.gmra.mxu1 %v14339_v39 }
 0x58a   : > { %3032 = vmatmul.bf16.gmra.mxu0 %v14338_v17 }
 0x590   : > { %v3579_v54 = vpop.f32.mrf.mxu2 }
 0x591   : > { %v12075_v51 = vmul.f32 0.125, %v3579_v54  ;;  %v3629_v34 = vpop.xlane.xlu2 %3628  ;;  %v3079_v54 = vpop.f32.mrf.mxu1 }
 0x592   : > { %v3675_v28 = vsub.f32 %v12017_v12, %v3629_v34  ;;  %v3642_v12 = vsel %vm1745_vm1, %v12081_v46, -inf  ;;  %v3632_v19 = vpop.xlane.xlu0 %3631  ;;  %v12104_v34 = vmul.f32 0.125, %v12038_v63  ;;  %v3080_v35 = vadd.f32 %v3079_v54, %v2990_v44  ;;  %v2993_v63 = vpop.f32.mrf.mxu0 }
 0x593   : > { %v3669_v20 = vsel %vm1745_vm1, %v12075_v51, -inf }
 0x594   : > { %3670 = vmax.xlane.f32.xlu2 %v3669_v20  ;;  %v3691_v49 = vmul.f32 1.442695, %v3675_v28  ;;  %v3078_v20 = vadd.f32 %v3077_v57, %v2988_v53  ;;  %3866 = vmatpush.msra.mxu2 %v3080_v35  ;;  %v3645_v18 = vsel %vm1745_vm1, %v12104_v34, -inf }
 0x596   : > { %10681 = vpow2.f32 %v3691_v49  ;;  %3867 = vmatpush.msra.mxu2 %v3078_v20 }
 0x599   : > { %v3635_v28 = vpop.xlane.xlu1 %3634  ;;  %v3082_v16 = vpop.f32.mrf.mxu1 }
 0x59a   : > { %v3638_v48 = vpop.xlane.xlu2 %3637  ;;  %v3677_v49 = vsub.f32 %v12028_v45, %v3635_v28  ;;  %3037 = vmatmul.bf16.gmra.mxu0 %v14342_v0 }
 0x59b   : > { %v3678_v38 = vsub.f32 %v12030_v29, %v3638_v48  ;;  %v3676_v29 = vsub.f32 %v12019_v25, %v3632_v19  ;;  %v12107_v25 = vmul.f32 0.125, %v12048_v62 }
 0x59c   : > { %3643 = vmax.xlane.f32.xlu2 %v3642_v12  ;;  %v12088_v21 = vpop.eup %10681  ;;  %v3695_v62 = vmul.f32 1.442695, %v3677_v49  ;;  %v14351_v49 = vld [vmem:[#allocation30_spill] sm:$0xff] }
 0x59d   : > { %v3697_v47 = vmul.f32 1.442695, %v3678_v38  ;;  %v3723_v10 = vsel %vm1745_vm1, %v12088_v21, 0.0  ;;  %v3693_v27 = vmul.f32 1.442695, %v3676_v29  ;;  %v3654_v55 = vsel %vm1745_vm1, %v12107_v25, -inf  ;;  %v2995_v38 = vpop.f32.mrf.mxu0 }
 0x59f   : > { %10683 = vpow2.f32 %v3697_v47  ;;  %v3083_v47 = vadd.f32 %v3082_v16, %v2993_v63 }
 0x5a0   : > { %v3608_v56 = vpop.f32.mrf.mxu3  ;;  %10685 = vpow2.f32 %v3693_v27 }
 0x5a1   : > { %v12091_v13 = vmul.f32 0.125, %v3608_v56  ;;  %10687 = vpow2.f32 %v3695_v62  ;;  %v3084_v12 = vpop.f32.mrf.mxu1 }
 0x5a2   : > { %v3085_v53 = vadd.f32 %v3084_v12, %v2995_v38 }
 0x5a3   : > { %v3672_v52 = vsel %vm1745_vm1, %v12091_v13, -inf }
 0x5a4   : > { %3724 = vadd.xlane.f32.xlu2 %v3723_v10  ;;  %3673 = vmax.xlane.f32.xlu0 %v3672_v52  ;;  %v14350_v10 = vld [vmem:[#allocation29_spill] sm:$0xff] }
 0x5a5   : > { %v12099_v7 = vpop.eup %10683  ;;  %3889 = vmatpush.msra.mxu3 %v3085_v53  ;;  %v12124_v56 = vpop.f32.mrf.mxu0  ;;  %3126 = vmatmul.bf16.gmra.mxu1 %v14350_v10 }
 0x5a6   : > { %v3732_v50 = vsel %vm1745_vm1, %v12099_v7, 0.0  ;;  %v12114_v48 = vpop.eup %10685 }
 0x5a7   : > { %3733 = vadd.xlane.f32.xlu1 %v3732_v50  ;;  %v3726_v45 = vsel %vm1745_vm1, %v12114_v48, 0.0  ;;  %v12120_v57 = vpop.eup %10687  ;;  %3890 = vmatpush.msra.mxu3 %v3083_v47 }
 0x5a8   : > { %v3729_v19 = vsel %vm1745_vm1, %v12120_v57, 0.0 }
 0x5a9   : > { %v12126_v29 = vpop.f32.mrf.mxu1 }
 0x5aa   : > { %3042 = vmatmul.bf16.gmra.mxu0 %v14351_v49 }
 0x5ac   : > { %3655 = vmax.xlane.f32.xlu2 %v3654_v55  ;;  %3646 = vmax.xlane.f32.xlu0 %v3645_v18  ;;  %v14352_v55 = vld [vmem:[#allocation31_spill] sm:$0xff] }
 0x5ad   : > { %v12130_v52 = vpop.f32.mrf.mxu0 }
 0x5b1   : > { %v12132_v44 = vpop.f32.mrf.mxu1 }
 0x5b2   : > { %v3090_v58 = vadd.f32 %v12132_v44, %v12130_v52 }
 0x5b4   : > { %3727 = vadd.xlane.f32.xlu0 %v3726_v45 }
 0x5b5   : > { %v3003_v28 = vpop.f32.mrf.mxu0  ;;  %3131 = vmatmul.bf16.gmra.mxu1 %v14352_v55 }
 0x5b9   : > { %v3092_v20 = vpop.f32.mrf.mxu1 }
 0x5ba   : > { %v12135_v35 = vadd.f32 %v3092_v20, %v3003_v28 }
 0x5bc   : > { %3730 = vadd.xlane.f32.xlu0 %v3729_v19 }
 0x5bd   : > { %v12143_v62 = vpop.f32.mrf.mxu0 }
 0x5c1   : > { %v12145_v16 = vpop.f32.mrf.mxu1 }
 0x5c5   : > { %v3008_v12 = vpop.f32.mrf.mxu0 }
 0x5c7   : > { %v3659_v27 = vpop.xlane.xlu0 %3658 }
 0x5c8   : > { %v3685_v50 = vsub.f32 %v12043_v24, %v3659_v27 }
 0x5c9   : > { %v3097_v47 = vpop.f32.mrf.mxu1 }
 0x5ca   : > { %v3711_v54 = vmul.f32 1.442695, %v3685_v50  ;;  %v12148_v19 = vadd.f32 %v3097_v47, %v3008_v12  ;;  %v14353_v50 = vld [vmem:[#allocation32_spill] sm:$0xff] }
 0x5cb   : > { %3047 = vmatmul.bf16.gmra.mxu0 %v14353_v50  ;;  %v14356_v50 = vld [vmem:[#allocation35_spill] sm:$0xff] }
 0x5cc   : > { %10689 = vpow2.f32 %v3711_v54  ;;  %v14354_v54 = vld [vmem:[#allocation33_spill] sm:$0xff] }
 0x5cd   : > { %3136 = vmatmul.bf16.gmra.mxu1 %v14354_v54  ;;  %v14355_v54 = vld [vmem:[#allocation34_spill] sm:$0xff] }
 0x5d2   : > { %v12139_v18 = vpop.eup %10689 }
 0x5d3   : > { %v3753_v63 = vsel %vm1745_vm1, %v12139_v18, 0.0 }
 0x5d4   : > { %3754 = vadd.xlane.f32.xlu2 %v3753_v63 }
 0x5d7   : > { %v3662_v24 = vpop.xlane.xlu1 %3661 }
 0x5d8   : > { %v3686_v45 = vsub.f32 %v12051_v30, %v3662_v24  ;;  %v12157_v30 = vpop.f32.mrf.mxu0  ;;  %v12159_v24 = vpop.f32.mrf.mxu1 }
 0x5da   : > { %v3713_v38 = vmul.f32 1.442695, %v3686_v45 }
 0x5db   : > { %3052 = vmatmul.bf16.gmra.mxu0 %v14355_v54 }
 0x5dc   : > { %10691 = vpow2.f32 %v3713_v38 }
 0x5dd   : > { %3141 = vmatmul.bf16.gmra.mxu1 %v14356_v50 }
 0x5df   : > { %v3641_v53 = vpop.xlane.xlu1 %3640 }
 0x5e0   : > { %v3679_v27 = vsub.f32 %v12056_v1, %v3641_v53  ;;  %v3013_v12 = vpop.f32.mrf.mxu0  ;;  %v3102_v47 = vpop.f32.mrf.mxu1  ;;  %v12168_v53 = vmul.f32 0.125, %v12083_v31 }
 0x5e2   : > { %v12153_v28 = vpop.eup %10691  ;;  %v3699_v20 = vmul.f32 1.442695, %v3679_v27  ;;  %v3666_v49 = vsel %vm1745_vm1, %v12168_v53, -inf }
 0x5e3   : > { %v3756_v63 = vsel %vm1745_vm1, %v12153_v28, 0.0 }
 0x5e4   : > { %10693 = vpow2.f32 %v3699_v20  ;;  %3757 = vadd.xlane.f32.xlu0 %v3756_v63  ;;  %v12170_v20 = vadd.f32 %v3102_v47, %v3013_v12 }
 0x5e7   : > { %v12161_v45 = vpop.xlane.xlu1 %3649 }
 0x5e8   : > { %v12179_v10 = vpop.f32.mrf.mxu1 }
 0x5ea   : > { %v12163_v38 = vpop.eup %10693 }
 0x5eb   : > { %v3735_v1 = vsel %vm1745_vm1, %v12163_v38, 0.0 }
 0x5ec   : > { %3736 = vadd.xlane.f32.xlu0 %v3735_v1  ;;  %v12177_v1 = vpop.f32.mrf.mxu0 }
 0x5ef   : > { %v3653_v27 = vpop.xlane.xlu1 %3652 }
 0x5f0   : > { %v3683_v63 = vsub.f32 %v12066_v32, %v3653_v27  ;;  %v3107_v47 = vpop.f32.mrf.mxu1 }
 0x5f2   : > { %v3707_v55 = vmul.f32 1.442695, %v3683_v63 }
 0x5f4   : > { %10695 = vpow2.f32 %v3707_v55  ;;  %3667 = vmax.xlane.f32.xlu0 %v3666_v49  ;;  %v3018_v32 = vpop.f32.mrf.mxu0 }
 0x5f5   : > { %v12185_v27 = vadd.f32 %v3107_v47, %v3018_v32 }
 0x5f8   : > { %v12189_v50 = vpop.f32.mrf.mxu1 }
 0x5fa   : > { %v12181_v31 = vpop.eup %10695 }
 0x5fb   : > { %v3747_v12 = vsel %vm1745_vm1, %v12181_v31, 0.0 }
 0x5fc   : > { %3748 = vadd.xlane.f32.xlu0 %v3747_v12  ;;  %v12187_v63 = vpop.f32.mrf.mxu0 }
 0x600   : > { %v3112_v39 = vpop.f32.mrf.mxu1 }
 0x604   : > { %v3023_v0 = vpop.f32.mrf.mxu0 }
 0x605   : > { %v12192_v11 = vadd.f32 %v3112_v39, %v3023_v0 }
 0x607   : > { %v3671_v55 = vpop.xlane.xlu2 %3670 }
 0x608   : > { %v3689_v49 = vsub.f32 %v12075_v51, %v3671_v55  ;;  %v12201_v51 = vpop.f32.mrf.mxu1 }
 0x60a   : > { %v3719_v54 = vmul.f32 1.442695, %v3689_v49 }
 0x60c   : > { %10697 = vpow2.f32 %v3719_v54  ;;  %v12199_v59 = vpop.f32.mrf.mxu0 }
 0x60f   : > { %v3644_v17 = vpop.xlane.xlu2 %3643 }
 0x610   : > { %v3680_v12 = vsub.f32 %v12081_v46, %v3644_v17 }
 0x612   : > { %v12195_v41 = vpop.eup %10697  ;;  %v3701_v32 = vmul.f32 1.442695, %v3680_v12 }
 0x613   : > { %v3765_v47 = vsel %vm1745_vm1, %v12195_v41, 0.0 }
 0x614   : > { %10699 = vpow2.f32 %v3701_v32  ;;  %3766 = vadd.xlane.f32.xlu1 %v3765_v47  ;;  %v3028_v49 = vpop.f32.mrf.mxu0  ;;  %v3117_v32 = vpop.f32.mrf.mxu1 }
 0x617   : > { %v3725_v54 = vpop.xlane.xlu2 %3724  ;;  %v3674_v55 = vpop.xlane.xlu0 %3673 }
 0x618   : > { %10701 = vrcp.f32 %v3725_v54  ;;  %v3690_v39 = vsub.f32 %v12091_v13, %v3674_v55 }
 0x61a   : > { %v12204_v0 = vpop.eup %10699  ;;  %v3721_v17 = vmul.f32 1.442695, %v3690_v39  ;;  %v3088_v39 = vadd.f32 %v12126_v29, %v12124_v56 }
 0x61b   : > { %v3738_v46 = vsel %vm1745_vm1, %v12204_v0, 0.0 }
 0x61c   : > { %10703 = vpow2.f32 %v3721_v17  ;;  %3739 = vadd.xlane.f32.xlu1 %v3738_v46  ;;  %v3682_v17 = vsub.f32 %v12060_v37, %v12161_v45  ;;  %v3119_v44 = vpop.f32.mrf.mxu1 }
 0x61e   : > { %v10702_v12 = vpop.eup %10701 }
 0x61f   : > { %v3787_v47 = vmul.f32 %v10702_v12, %v12088_v21  ;;  %v3647_v26 = vpop.xlane.xlu0 %3646  ;;  %v3656_v54 = vpop.xlane.xlu2 %3655  ;;  %v12223_v12 = vmul.f32 0.125, %v12072_v40 }
 0x620   : > { %v3681_v13 = vsub.f32 %v12104_v34, %v3647_v26  ;;  %v3684_v21 = vsub.f32 %v12107_v25, %v3656_v54  ;;  %v3030_v26 = vpop.f32.mrf.mxu0  ;;  %v3705_v34 = vmul.f32 1.442695, %v3682_v17  ;;  %v3734_v25 = vpop.xlane.xlu1 %3733 }
 0x621   : > { %9390 = vmatmul.msk.f32.vlgmr.msrb.gmra.mxu2 %vm1745_vm1, %v3787_v47  ;;  %v3118_v47 = vadd.f32 %v3117_v32, %v3028_v49  ;;  %v3120_v37 = vadd.f32 %v3119_v44, %v3030_v26  ;;  %v3663_v45 = vsel %vm1745_vm1, %v12223_v12, -inf }
 0x622   : > { %v12213_v55 = vpop.eup %10703  ;;  %v3703_v46 = vmul.f32 1.442695, %v3681_v13  ;;  %3912 = vmatpush.msrb.mxu2 %v3090_v58  ;;  %v3709_v56 = vmul.f32 1.442695, %v3684_v21 }
 0x623   : > { %v3768_v52 = vsel %vm1745_vm1, %v12213_v55, 0.0  ;;  %4050 = vmatpush.msra.mxu0 %v3120_v37  ;;  %v3100_v37 = vadd.f32 %v12159_v24, %v12157_v30 }
 0x624   : > { %3913 = vmatpush.msrb.mxu2 %v3088_v39  ;;  %3769 = vadd.xlane.f32.xlu2 %v3768_v52  ;;  %10705 = vpow2.f32 %v3703_v46  ;;  %v3122_v49 = vpop.f32.mrf.mxu1  ;;  %v3095_v46 = vadd.f32 %v12145_v16, %v12143_v62  ;;  %v3105_v62 = vadd.f32 %v12179_v10, %v12177_v1 }
 0x625   : > { %4051 = vmatpush.msra.mxu0 %v3118_v47 }
 0x627   : > { %v3728_v29 = vpop.xlane.xlu0 %3727 }
 0x628   : > { %10707 = vrcp.f32 %v3728_v29  ;;  %v3033_v54 = vpop.f32.mrf.mxu0 }
 0x629   : > { %10709 = vpow2.f32 %v3705_v34 }
 0x62a   : > { %v12225_v58 = vpop.eup %10705  ;;  %10711 = vpow2.f32 %v3709_v56 }
 0x62b   : > { %v3741_v40 = vsel %vm1745_vm1, %v12225_v58, 0.0  ;;  %10713 = vrcp.f32 %v3734_v25 }
 0x62c   : > { %3664 = vmax.xlane.f32.xlu2 %v3663_v45  ;;  %3742 = vadd.xlane.f32.xlu1 %v3741_v40  ;;  %v3124_v16 = vpop.f32.mrf.mxu1 }
 0x62e   : > { %v10708_v13 = vpop.eup %10707 }
 0x62f   : > { %v3788_v32 = vmul.f32 %v10708_v13, %v12114_v48  ;;  %v3731_v39 = vpop.xlane.xlu0 %3730  ;;  %v12232_v17 = vpop.eup %10709 }
 0x630   : > { %10715 = vrcp.f32 %v3731_v39  ;;  %v12236_v21 = vpop.eup %10711  ;;  %v3744_v52 = vsel %vm1745_vm1, %v12232_v17, 0.0  ;;  %v3035_v34 = vpop.f32.mrf.mxu0 }
 0x631   : > { %9391 = vmatmul.msk.f32.vlgmr.msrb.gmra.mxu3 %vm1745_vm1, %v3788_v32  ;;  %v10714_v26 = vpop.eup %10713  ;;  %v3750_v48 = vsel %vm1745_vm1, %v12236_v21, 0.0  ;;  %v3125_v47 = vadd.f32 %v3124_v16, %v3035_v34 }
 0x632   : > { %3935 = vmatpush.msrb.mxu3 %v3095_v46  ;;  %v3790_v56 = vmul.f32 %v10714_v26, %v12099_v7 }
 0x633   : > { %4073 = vmatpush.msra.mxu1 %v3125_v47 }
 0x634   : > { %3936 = vmatpush.msrb.mxu3 %v12135_v35  ;;  %3745 = vadd.xlane.f32.xlu2 %v3744_v52  ;;  %v3123_v35 = vadd.f32 %v3122_v49, %v3033_v54  ;;  %v3127_v10 = vpop.f32.mrf.mxu1 }
 0x635   : > { %3751 = vadd.xlane.f32.xlu1 %v3750_v48 }
 0x636   : > { %v10716_v44 = vpop.eup %10715  ;;  %4074 = vmatpush.msra.mxu1 %v3123_v35 }
 0x637   : > { %v3789_v29 = vmul.f32 %v10716_v44, %v12120_v57 }
 0x638   : > { %v3038_v7 = vpop.f32.mrf.mxu0 }
 0x639   : > { %9392 = vmatmul.msk.f32.vlgmr.msra.gmra.mxu2 %vm1745_vm1, %v3789_v29  ;;  %9393 = vmatmul.msk.f32.vlgmr.msra.gmra.mxu3 %vm1745_vm1, %v3790_v56  ;;  %v12254_v57 = vadd.f32 %v3127_v10, %v3038_v7  ;;  %v3110_v29 = vadd.f32 %v12189_v50, %v12187_v63  ;;  %v9480_v50 = vld [vmem:[%s14182_s5 + $0x20] sm:$0xf] }
 0x63a   : > { %3958 = vmatpush.msra.mxu2 %v3100_v37  ;;  %3981 = vmatpush.msra.mxu3 %v3105_v62  ;;  %v10389_v37 = vld [vmem:[%s14182_s5 + $0x34] sm:$0xf0] }
 0x63c   : > { %3959 = vmatpush.msra.mxu2 %v12148_v19  ;;  %3982 = vmatpush.msra.mxu3 %v12170_v20  ;;  %v12258_v30 = vpop.f32.mrf.mxu1 }
 0x640   : > { %v12256_v1 = vpop.f32.mrf.mxu0 }
 0x644   : > { %v3132_v40 = vpop.f32.mrf.mxu1 }
 0x647   : > { %v3755_v24 = vpop.xlane.xlu2 %3754 }
 0x648   : > { %10717 = vrcp.f32 %v3755_v24  ;;  %v3043_v25 = vpop.f32.mrf.mxu0  ;;  %v9472_v24 = vld [vmem:[%s14182_s5 + $0x10] sm:$0xf] }
 0x649   : > { %v12261_v13 = vadd.f32 %v3132_v40, %v3043_v25 }
 0x64c   : > { %v12266_v20 = vpop.f32.mrf.mxu1 }
 0x64e   : > { %v10718_v45 = vpop.eup %10717 }
 0x64f   : > { %v3797_v54 = vmul.f32 %v10718_v45, %v12139_v18 }
 0x650   : > { %v12264_v19 = vpop.f32.mrf.mxu0 }
 0x651   : > { %9400 = vmatmul.msk.f32.vlgmr.msra.gmra.mxu0 %vm1745_vm1, %v3797_v54  ;;  %v9464_v54 = vld [vmem:[%s14182_s5] sm:$0xf] }
 0x654   : > { %v3137_v46 = vpop.f32.mrf.mxu1 }
 0x657   : > { %v3758_v49 = vpop.xlane.xlu0 %3757 }
 0x658   : > { %10719 = vrcp.f32 %v3758_v49  ;;  %v3048_v32 = vpop.f32.mrf.mxu0  ;;  %v10383_v49 = vld [vmem:[%s14182_s5 + $0x4] sm:$0xf0] }
 0x659   : > { %v3138_v16 = vadd.f32 %v3137_v46, %v3048_v32 }
 0x65c   : > { %v3139_v34 = vpop.f32.mrf.mxu1 }
 0x65e   : > { %v10720_v39 = vpop.eup %10719 }
 0x65f   : > { %v3798_v52 = vmul.f32 %v10720_v39, %v12153_v28  ;;  %v3737_v26 = vpop.xlane.xlu0 %3736  ;;  %v9488_v28 = vld [vmem:[%s14182_s5 + $0x30] sm:$0xf]  ;;  %v9465_v39 = vor.u32 %v10383_v49, %v9464_v54 }
 0x660   : > { %10721 = vrcp.f32 %v3737_v26  ;;  %v3050_v18 = vpop.f32.mrf.mxu0 }
 0x661   : > { %9401 = vmatmul.msk.f32.vlgmr.msra.gmra.mxu1 %vm1745_vm1, %v3798_v52  ;;  %v3140_v56 = vadd.f32 %v3139_v34, %v3050_v18  ;;  %v10388_v18 = vld [vmem:[%s14182_s5 + $0x34] sm:$0xf] }
 0x663   : > { %4142 = vmatpush.msrb.mxu0 %v3140_v56  ;;  %v10384_v56 = vld [vmem:[%s14182_s5 + $0x14] sm:$0xf] }
 0x664   : > { %v3142_v10 = vpop.f32.mrf.mxu1 }
 0x665   : > { %4143 = vmatpush.msrb.mxu0 %v3138_v16 }
 0x666   : > { %v10722_v48 = vpop.eup %10721 }
 0x667   : > { %v3791_v44 = vmul.f32 %v10722_v48, %v12163_v38  ;;  %v3668_v62 = vpop.xlane.xlu0 %3667  ;;  %v9489_v38 = vor.u32 %v10389_v37, %v9488_v28  ;;  %v9490_v48 = vld [vmem:[%s14182_s5 + $0x38] sm:$0xf0]  ;;  %v10382_v28 = vld [vmem:[%s14182_s5 + $0x4] sm:$0xf]  ;;  %v9466_v37 = vld [vmem:[%s14182_s5 + $0x8] sm:$0xf0] }
 0x668   : > { %v3688_v47 = vsub.f32 %v12168_v53, %v3668_v62  ;;  %v10387_v53 = vld [vmem:[%s14182_s5 + $0x24] sm:$0xf0]  ;;  %v3053_v63 = vpop.f32.mrf.mxu0  ;;  %v9493_v34 = vor.u32 %v10388_v18, %v9490_v48  ;;  %v9482_v62 = vld [vmem:[%s14182_s5 + $0x28] sm:$0xf0] }
 0x669   : > { %9394 = vmatmul.msk.f32.vlgmr.msrb.gmra.mxu2 %vm1745_vm1, %v3791_v44  ;;  %4418 = vmatpush.bf16.msra.mxu0 %v9489_v38  ;;  %v9481_v7 = vor.u32 %v10387_v53, %v9480_v50  ;;  %v3143_v52 = vadd.f32 %v3142_v10, %v3053_v63  ;;  %v10386_v44 = vld [vmem:[%s14182_s5 + $0x24] sm:$0xf]  ;;  %v9469_v38 = vor.u32 %v10382_v28, %v9466_v37  ;;  %v10440_v28 = vld [vmem:[%s14182_s5 + $0x54] sm:$0xf]  ;;  %v9426_v37 = vld [vmem:[%s14182_s5 + $0x58] sm:$0xf0] }
 0x66a   : > { %v3717_v35 = vmul.f32 1.442695, %v3688_v47  ;;  %4004 = vmatpush.msrb.mxu2 %v3110_v29  ;;  %v9485_v16 = vor.u32 %v10386_v44, %v9482_v62  ;;  %v9474_v29 = vld [vmem:[%s14182_s5 + $0x18] sm:$0xf0]  ;;  %v3135_v44 = vadd.f32 %v12266_v20, %v12264_v19  ;;  %v10444_v20 = vld [vmem:[%s14182_s5 + $0x74] sm:$0xf] }
 0x66b   : > { %v9477_v47 = vor.u32 %v10384_v56, %v9474_v29  ;;  %v10442_v56 = vld [vmem:[%s14182_s5 + $0x64] sm:$0xf]  ;;  %v9434_v29 = vld [vmem:[%s14182_s5 + $0x68] sm:$0xf0] }
 0x66c   : > { %10723 = vpow2.f32 %v3717_v35  ;;  %4005 = vmatpush.msrb.mxu2 %v12185_v27  ;;  %v10385_v27 = vld [vmem:[%s14182_s5 + $0x14] sm:$0xf0]  ;;  %v3144_v46 = vpop.f32.mrf.mxu1 }
 0x66d   : > { %4419 = vmatpush.bf16.msra.mxu0 %v9481_v7  ;;  %v9473_v25 = vor.u32 %v10385_v27, %v9472_v24  ;;  %v3115_v27 = vadd.f32 %v12201_v51, %v12199_v59 }
 0x66f   : > { %v3749_v51 = vpop.xlane.xlu0 %3748 }
 0x670   : > { %v3055_v32 = vpop.f32.mrf.mxu0 }
 0x671   : > { %4420 = vmatpush.bf16.msra.mxu0 %v9473_v25  ;;  %v3145_v26 = vadd.f32 %v3144_v46, %v3055_v32  ;;  %v14357_v25 = vld [vmem:[#allocation36_spill] sm:$0xff]  ;;  %v14359_v46 = vld [vmem:[#allocation38_spill] sm:$0xff] }
 0x672   : > { %v12294_v45 = vpop.eup %10723 }
 0x673   : > { %v3762_v40 = vsel %vm1745_vm1, %v12294_v45, 0.0  ;;  %4165 = vmatpush.msrb.mxu1 %v3145_v26 }
 0x674   : > { %3763 = vadd.xlane.f32.xlu0 %v3762_v40 }
 0x675   : > { %4421 = vmatpush.bf16.msra.mxu0 %v9465_v39  ;;  %4166 = vmatpush.msrb.mxu1 %v3143_v52  ;;  %v14358_v39 = vld [vmem:[#allocation37_spill] sm:$0xff] }
 0x676   : > { %v2291_v52 = vpack.c.bf16 %v14359_v46, %v14358_v39  ;;  %v9432_v46 = vld [vmem:[%s14182_s5 + $0x60] sm:$0xf] }
 0x677   : > { %4467 = vmatpush.bf16.msra.mxu1 %v9493_v34 }
 0x67b   : > { %4468 = vmatpush.bf16.msra.mxu1 %v9485_v16 }
 0x67f   : > { %4469 = vmatpush.bf16.msra.mxu1 %v9477_v47  ;;  %v9437_v47 = vor.u32 %v10442_v56, %v9434_v29  ;;  %v10466_v56 = vld [vmem:[%s14180_s3 + $0x120] sm:$0xff] }
 0x680   : > { %v10474_v29 = vld [vmem:[%s14180_s3 + $0x160] sm:$0xff] }
 0x683   : > { %4470 = vmatpush.bf16.msra.mxu1 %v9469_v38  ;;  %v10438_v38 = vld [vmem:[%s14182_s5 + $0x44] sm:$0xf] }
 0x687   : > { %v3767_v35 = vpop.xlane.xlu1 %3766 }
 0x688   : > { %10725 = vrcp.f32 %v3767_v35  ;;  %v9429_v35 = vor.u32 %v10440_v28, %v9426_v37  ;;  %v10473_v28 = vld [vmem:[%s14180_s3 + $0x158] sm:$0xff] }
 0x68e   : > { %v10726_v50 = vpop.eup %10725 }
 0x68f   : > { %v3801_v53 = vmul.f32 %v10726_v50, %v12195_v41  ;;  %v3740_v63 = vpop.xlane.xlu1 %3739  ;;  %v9418_v50 = vld [vmem:[%s14182_s5 + $0x48] sm:$0xf0] }
 0x690   : > { %10727 = vrcp.f32 %v3740_v63  ;;  %v14363_v63 = vld [vmem:[#allocation42_spill] sm:$0xff] }
 0x691   : > { %9404 = vmatmul.msk.f32.vlgmr.msrb.gmra.mxu0 %vm1745_vm1, %v3801_v53  ;;  %v9421_v53 = vor.u32 %v10438_v38, %v9418_v50 }
 0x696   : > { %v10728_v7 = vpop.eup %10727 }
 0x697   : > { %v3792_v10 = vmul.f32 %v10728_v7, %v12204_v0  ;;  %v3770_v24 = vpop.xlane.xlu2 %3769  ;;  %v14364_v7 = vld [vmem:[#allocation43_spill] sm:$0xff] }
 0x698   : > { %10729 = vrcp.f32 %v3770_v24 }
 0x699   : > { %9395 = vmatmul.msk.f32.vlgmr.msrb.gmra.mxu3 %vm1745_vm1, %v3792_v10  ;;  %9494 = vmatmul.msk.bf16.vlgmr.msra.gmra.mxu0 %vm1264_vm0, %v14357_v25  ;;  %v14365_v10 = vld [vmem:[#allocation44_spill] sm:$0xff] }
 0x69a   : > { %4027 = vmatpush.msrb.mxu3 %v3115_v27  ;;  %v2295_v24 = vpack.c.bf16 %v14365_v10, %v14364_v7  ;;  %v10472_v7 = vld [vmem:[%s14180_s3 + $0x150] sm:$0xff] }
 0x69c   : > { %4028 = vmatpush.msrb.mxu3 %v12192_v11 }
 0x69e   : > { %v10730_v41 = vpop.eup %10729 }
 0x69f   : > { %v3802_v40 = vmul.f32 %v10730_v41, %v12213_v55  ;;  %v3665_v54 = vpop.xlane.xlu2 %3664  ;;  %v3743_v0 = vpop.xlane.xlu1 %3742  ;;  %v3130_v55 = vadd.f32 %v12258_v30, %v12256_v1 }
 0x6a0   : > { %v3687_v49 = vsub.f32 %v12223_v12, %v3665_v54  ;;  %10731 = vrcp.f32 %v3743_v0  ;;  %v14366_v0 = vld [vmem:[#allocation45_spill] sm:$0xff] }
 0x6a1   : > { %9405 = vmatmul.msk.f32.vlgmr.msrb.gmra.mxu1 %vm1745_vm1, %v3802_v40 }
 0x6a2   : > { %v3715_v59 = vmul.f32 1.442695, %v3687_v49 }
 0x6a4   : > { %10733 = vpow2.f32 %v3715_v59  ;;  %v3823_v54 = vpop.f32.mrf.mxu2  ;;  %v9440_v59 = vld [vmem:[%s14182_s5 + $0x70] sm:$0xf] }
 0x6a5   : > { %10735 = vrcp.f32 %v3749_v51 }
 0x6a6   : > { %v10732_v32 = vpop.eup %10731 }
 0x6a7   : > { %v3746_v26 = vpop.xlane.xlu2 %3745  ;;  %v3793_v11 = vmul.f32 %v10732_v32, %v12225_v58 }
 0x6a8   : > { %10737 = vrcp.f32 %v3746_v26  ;;  %v3752_v18 = vpop.xlane.xlu1 %3751 }
 0x6a9   : > { %9495 = vmatmul.msk.bf16.gmra.mxu0 %vm1264_vm0, %v2291_v52  ;;  %9502 = vmatmul.msk.bf16.vlgmr.msra.gmra.mxu1 %vm1264_vm0, %v14357_v25  ;;  %10739 = vrcp.f32 %v3752_v18  ;;  %v14367_v18 = vld [vmem:[#allocation46_spill] sm:$0xff] }
 0x6aa   : > { %v12348_v12 = vpop.eup %10733  ;;  %9396 = vmatmul.msk.f32.vlgmr.msra.gmra.mxu2 %vm1745_vm1, %v3793_v11 }
 0x6ab   : > { %4096 = vmatpush.msra.mxu2 %v3130_v55  ;;  %v3759_v48 = vsel %vm1745_vm1, %v12348_v12, 0.0  ;;  %v10736_v58 = vpop.eup %10735 }
 0x6ac   : > { %3760 = vadd.xlane.f32.xlu2 %v3759_v48  ;;  %v3795_v30 = vmul.f32 %v10736_v58, %v12181_v31  ;;  %v14361_v31 = vld [vmem:[#allocation41_spill] sm:$0xff]  ;;  %v9424_v48 = vld [vmem:[%s14182_s5 + $0x50] sm:$0xf]  ;;  %v10441_v58 = vld [vmem:[%s14182_s5 + $0x54] sm:$0xf0] }
 0x6ad   : > { %4097 = vmatpush.msra.mxu2 %v12254_v57  ;;  %v14360_v57 = vld [vmem:[#allocation39_spill] sm:$0xff] }
 0x6ae   : > { %v10738_v34 = vpop.eup %10737 }
 0x6af   : > { %v3794_v1 = vmul.f32 %v10738_v34, %v12232_v17  ;;  %v10740_v62 = vpop.eup %10739  ;;  %v14362_v17 = vld [vmem:[#allocation40_spill] sm:$0xff] }
 0x6b0   : > { %v3796_v16 = vmul.f32 %v10740_v62, %v12236_v21  ;;  %v2293_v19 = vpack.c.bf16 %v14362_v17, %v14361_v31  ;;  %v9442_v21 = vld [vmem:[%s14182_s5 + $0x78] sm:$0xf0]  ;;  %v10439_v62 = vld [vmem:[%s14182_s5 + $0x44] sm:$0xf0]  ;;  %v10468_v31 = vld [vmem:[%s14180_s3 + $0x130] sm:$0xff] }
 0x6b1   : > { %9397 = vmatmul.msk.f32.vlgmr.msra.gmra.mxu3 %vm1745_vm1, %v3794_v1  ;;  %v10469_v34 = vld [vmem:[%s14180_s3 + $0x138] sm:$0xff]  ;;  %v9425_v1 = vor.u32 %v10441_v58, %v9424_v48  ;;  %v10476_v17 = vld [vmem:[%s14180_s3 + $0x170] sm:$0xff] }
 0x6b2   : > { %9398 = vmatmul.msk.f32.vlgmr.msrb.gmra.mxu2 %vm1745_vm1, %v3795_v30  ;;  %4119 = vmatpush.msra.mxu3 %v3135_v44  ;;  %v10477_v30 = vld [vmem:[%s14180_s3 + $0x178] sm:$0xff]  ;;  %v9416_v44 = vld [vmem:[%s14182_s5 + $0x40] sm:$0xf] }
 0x6b3   : > { %4868 = vmatpush.bf16.msrb.mxu0 %v10469_v34  ;;  %4957 = vmatpush.bf16.msrb.mxu1 %v10477_v30 }
 0x6b4   : > { %4120 = vmatpush.msra.mxu3 %v12261_v13  ;;  %v9445_v13 = vor.u32 %v10444_v20, %v9442_v21  ;;  %v3846_v40 = vpop.f32.mrf.mxu3  ;;  %v10475_v20 = vld [vmem:[%s14180_s3 + $0x168] sm:$0xff] }
 0x6b5   : > { %v12405_v49 = vpack.c.bf16 %v3846_v40, %v3823_v54  ;;  %v10462_v54 = vld [vmem:[%s14180_s3 + $0x100] sm:$0xff] }
 0x6b7   : > { %4869 = vmatpush.bf16.msrb.mxu0 %v10468_v31  ;;  %4958 = vmatpush.bf16.msrb.mxu1 %v10476_v17 }
 0x6b9   : > { %9399 = vmatmul.msk.f32.vlgmr.msrb.gmra.mxu3 %vm1745_vm1, %v3796_v16  ;;  %9496 = vmatmul.msk.bf16.gmra.mxu0 %vm1264_vm0, %v14360_v57 }
 0x6ba   : > { %9503 = vmatmul.msk.bf16.gmra.mxu1 %vm1264_vm0, %v2291_v52  ;;  %4305 = vmatpush.bf16.msrb.mxu3 %v9445_v13  ;;  %v10443_v52 = vld [vmem:[%s14182_s5 + $0x64] sm:$0xf0] }
 0x6bb   : > { %v9433_v11 = vor.u32 %v10443_v52, %v9432_v46  ;;  %4959 = vmatpush.bf16.msrb.mxu1 %v10475_v20 }
 0x6bc   : > { %v3869_v32 = vpop.f32.mrf.mxu2  ;;  %v3892_v39 = vpop.f32.mrf.mxu3 }
 0x6bd   : > { %v12426_v55 = vpack.c.bf16 %v3892_v39, %v3869_v32 }
 0x6be   : > { %4306 = vmatpush.bf16.msrb.mxu3 %v9437_v47  ;;  %v10465_v47 = vld [vmem:[%s14180_s3 + $0x118] sm:$0xff] }
 0x6bf   : > { %4960 = vmatpush.bf16.msrb.mxu1 %v10474_v29 }
 0x6c2   : > { %4307 = vmatpush.bf16.msrb.mxu3 %v9429_v35 }
 0x6c3   : > { %4961 = vmatpush.bf16.msrb.mxu1 %v10473_v28 }
 0x6c6   : > { %4308 = vmatpush.bf16.msrb.mxu3 %v9421_v53 }
 0x6c7   : > { %4962 = vmatpush.bf16.msrb.mxu1 %v10472_v7  ;;  %v10452_v7 = vld [vmem:[%s14179_s2 + $0x130] sm:$0xff] }
 0x6c9   : > { %9497 = vmatmul.msk.bf16.gmra.mxu0 %vm1264_vm0, %v2293_v19 }
 0x6ca   : > { %9504 = vmatmul.msk.bf16.gmra.mxu1 %vm1264_vm0, %v14360_v57  ;;  %v9417_v57 = vor.u32 %v10439_v62, %v9416_v44 }
 0x6ce   : > { %v12424_v26 = vpop.f32.mrf.mxu0 }
 0x6d9   : > { %9498 = vmatmul.msk.bf16.gmra.mxu0 %vm1264_vm0, %v14363_v63 }
 0x6da   : > { %9505 = vmatmul.msk.bf16.gmra.mxu1 %vm1264_vm0, %v2293_v19  ;;  %v10467_v19 = vld [vmem:[%s14180_s3 + $0x128] sm:$0xff] }
 0x6db   : > { %4870 = vmatpush.bf16.msrb.mxu0 %v10467_v19 }
 0x6de   : > { %v12466_v21 = vpop.f32.mrf.mxu1 }
 0x6df   : > { %4871 = vmatpush.bf16.msrb.mxu0 %v10466_v56 }
 0x6e3   : > { %4872 = vmatpush.bf16.msrb.mxu0 %v10465_v47 }
 0x6e7   : > { %v3764_v27 = vpop.xlane.xlu0 %3763 }
 0x6e8   : > { %10741 = vrcp.f32 %v3764_v27  ;;  %v10471_v27 = vld [vmem:[%s14180_s3 + $0x148] sm:$0xff] }
 0x6e9   : > { %9499 = vmatmul.msk.bf16.gmra.mxu0 %vm1264_vm0, %v2295_v24  ;;  %4963 = vmatpush.bf16.msrb.mxu1 %v10471_v27  ;;  %v10451_v27 = vld [vmem:[%s14179_s2 + $0x128] sm:$0xff] }
 0x6ea   : > { %9506 = vmatmul.msk.bf16.gmra.mxu1 %vm1264_vm0, %v14363_v63  ;;  %v10464_v63 = vld [vmem:[%s14180_s3 + $0x110] sm:$0xff] }
 0x6eb   : > { %4873 = vmatpush.bf16.msrb.mxu0 %v10464_v63  ;;  %v10461_v63 = vld [vmem:[%s14179_s2 + $0x178] sm:$0xff] }
 0x6ec   : > { %v3915_v37 = vpop.f32.mrf.mxu2 }
 0x6ee   : > { %v10742_v25 = vpop.eup %10741 }
 0x6ef   : > { %v3800_v41 = vmul.f32 %v10742_v25, %v12294_v45  ;;  %v10445_v45 = vld [vmem:[%s14182_s5 + $0x74] sm:$0xf0] }
 0x6f0   : > { %v9441_v51 = vor.u32 %v10445_v45, %v9440_v59 }
 0x6f1   : > { %9403 = vmatmul.msk.f32.vlgmr.msra.gmra.mxu3 %vm1745_vm1, %v3800_v41 }
 0x6f2   : > { %4256 = vmatpush.bf16.msrb.mxu2 %v9441_v51  ;;  %4690 = vmatpush.bf16.msra.mxu3 %v10461_v63 }
 0x6f6   : > { %4257 = vmatpush.bf16.msrb.mxu2 %v9433_v11 }
 0x6f9   : > { %9454 = vmatmul.msk.bf16.vlgmr.msrb.gmra.mxu3 %vm1264_vm0, %v12405_v49  ;;  %9500 = vmatmul.msk.bf16.gmra.mxu0 %vm1264_vm0, %v14366_v0 }
 0x6fa   : > { %9507 = vmatmul.msk.bf16.gmra.mxu1 %vm1264_vm0, %v2295_v24  ;;  %4258 = vmatpush.bf16.msrb.mxu2 %v9425_v1  ;;  %v10463_v24 = vld [vmem:[%s14180_s3 + $0x108] sm:$0xff] }
 0x6fb   : > { %4874 = vmatpush.bf16.msrb.mxu0 %v10463_v24 }
 0x6fe   : > { %4259 = vmatpush.bf16.msrb.mxu2 %v9417_v57 }
 0x6ff   : > { %4875 = vmatpush.bf16.msrb.mxu0 %v10462_v54 }
 0x709   : > { %9455 = vmatmul.msk.bf16.gmra.mxu3 %vm1264_vm0, %v12426_v55  ;;  %9501 = vmatmul.msk.bf16.gmra.mxu0 %vm1264_vm0, %v14367_v18 }
 0x70a   : > { %9508 = vmatmul.msk.bf16.gmra.mxu1 %vm1264_vm0, %v14366_v0  ;;  %v10470_v0 = vld [vmem:[%s14180_s3 + $0x140] sm:$0xff] }
 0x70b   : > { %4964 = vmatpush.bf16.msrb.mxu1 %v10470_v0  ;;  %v10450_v0 = vld [vmem:[%s14179_s2 + $0x120] sm:$0xff] }
 0x70e   : > { %v12452_v16 = vpop.f32.mrf.mxu0 }
 0x716   : > { %v12468_v13 = vpop.f32.mrf.mxu0 }
 0x717   : > { %14368 = vst [vmem:[#allocation36_spill] sm:$0xff] %v12468_v13 }
 0x719   : > { %4876 = vmatmul.bf16.vlgmr.msrb.gmra.mxu0 %v11177_v60 }
 0x71a   : > { %9509 = vmatmul.msk.bf16.gmra.mxu1 %vm1264_vm0, %v14367_v18 }
 0x71c   : > { %v3938_v38 = vpop.f32.mrf.mxu3 }
 0x71d   : > { %v4173_v35 = vpack.c.bf16 %v3938_v38, %v3915_v37 }
 0x71e   : > { %v12484_v50 = vpop.f32.mrf.mxu1  ;;  %v12486_v53 = vpop.f32.mrf.mxu0 }
 0x71f   : > { %14369 = vst [vmem:[#allocation37_spill] sm:$0xff] %v12486_v53  ;;  %v3761_v10 = vpop.xlane.xlu2 %3760  ;;  %9456 = vmatmul.msk.bf16.gmra.mxu3 %vm1264_vm0, %v4173_v35 }
 0x720   : > { %10743 = vrcp.f32 %v3761_v10  ;;  %v10460_v10 = vld [vmem:[%s14179_s2 + $0x170] sm:$0xff] }
 0x721   : > { %4691 = vmatpush.bf16.msra.mxu3 %v10460_v10 }
 0x726   : > { %v10744_v25 = vpop.eup %10743  ;;  %v12501_v41 = vpop.f32.mrf.mxu0 }
 0x727   : > { %14370 = vst [vmem:[#allocation38_spill] sm:$0xff] %v12501_v41  ;;  %v12503_v40 = vpop.f32.mrf.mxu1  ;;  %v3799_v59 = vmul.f32 %v10744_v25, %v12348_v12  ;;  %v10459_v25 = vld [vmem:[%s14179_s2 + $0x168] sm:$0xff] }
 0x728   : > { %14371 = vst [vmem:[#allocation39_spill] sm:$0xff] %v12503_v40  ;;  %4692 = vmatpush.bf16.msra.mxu3 %v10459_v25  ;;  %v14400_v25 = vld [vmem:[#allocation21_spill] sm:$0xff] }
 0x729   : > { %9402 = vmatmul.msk.f32.vlgmr.msra.gmra.mxu2 %vm1745_vm1, %v3799_v59  ;;  %4881 = vmatmul.bf16.gmra.mxu0 %v11187_v2  ;;  %v10458_v59 = vld [vmem:[%s14179_s2 + $0x160] sm:$0xff] }
 0x72a   : > { %4965 = vmatmul.bf16.vlgmr.msrb.gmra.mxu1 %v11179_v61 }
 0x72c   : > { %4693 = vmatpush.bf16.msra.mxu3 %v10458_v59  ;;  %v10454_v59 = vld [vmem:[%s14179_s2 + $0x140] sm:$0xff] }
 0x72d   : > { %v3961_v32 = vpop.f32.mrf.mxu2 }
 0x72e   : > { %v12515_v45 = vpop.f32.mrf.mxu0 }
 0x72f   : > { %14372 = vst [vmem:[#allocation41_spill] sm:$0xff] %v12515_v45  ;;  %v12517_v51 = vpop.f32.mrf.mxu1 }
 0x730   : > { %14373 = vst [vmem:[#allocation40_spill] sm:$0xff] %v12517_v51 }
 0x731   : > { %9446 = vmatmul.msk.bf16.vlgmr.msrb.gmra.mxu2 %vm1264_vm0, %v12405_v49 }
 0x734   : > { %v3984_v39 = vpop.f32.mrf.mxu3 }
 0x735   : > { %v4174_v46 = vpack.c.bf16 %v3984_v39, %v3961_v32  ;;  %v4007_v48 = vpop.f32.mrf.mxu2  ;;  %v10449_v32 = vld [vmem:[%s14179_s2 + $0x118] sm:$0xff] }
 0x736   : > { %v12521_v52 = vpop.f32.mrf.mxu0  ;;  %v10457_v39 = vld [vmem:[%s14179_s2 + $0x158] sm:$0xff] }
 0x737   : > { %14374 = vst [vmem:[#allocation42_spill] sm:$0xff] %v12521_v52  ;;  %v12523_v12 = vpop.f32.mrf.mxu1  ;;  %9457 = vmatmul.msk.bf16.gmra.mxu3 %vm1264_vm0, %v4174_v46 }
 0x738   : > { %14375 = vst [vmem:[#allocation43_spill] sm:$0xff] %v12523_v12  ;;  %4694 = vmatpush.bf16.msra.mxu3 %v10457_v39 }
 0x739   : > { %4886 = vmatmul.bf16.gmra.mxu0 %v11197_v8 }
 0x73a   : > { %4970 = vmatmul.bf16.gmra.mxu1 %v11189_v3 }
 0x73c   : > { %v4030_v49 = vpop.f32.mrf.mxu3 }
 0x73d   : > { %v4175_v58 = vpack.c.bf16 %v4030_v49, %v4007_v48  ;;  %v10448_v48 = vld [vmem:[%s14179_s2 + $0x110] sm:$0xff] }
 0x73e   : > { %v12528_v11 = vpop.f32.mrf.mxu0 }
 0x73f   : > { %14376 = vst [vmem:[#allocation44_spill] sm:$0xff] %v12528_v11  ;;  %v12530_v18 = vpop.f32.mrf.mxu1  ;;  %v14417_v11 = vld [vmem:[#allocation15_spill] sm:$0xff] }
 0x740   : > { %14377 = vst [vmem:[#allocation45_spill] sm:$0xff] %v12530_v18  ;;  %v14421_v18 = vld [vmem:[#allocation28_spill] sm:$0xff] }
 0x741   : > { %9447 = vmatmul.msk.bf16.gmra.mxu2 %vm1264_vm0, %v12426_v55  ;;  %v4176_v55 = vpack.c.bf16 %v12466_v21, %v12424_v26 }
 0x746   : > { %v12534_v34 = vpop.f32.mrf.mxu0 }
 0x747   : > { %14378 = vst [vmem:[#allocation46_spill] sm:$0xff] %v12534_v34  ;;  %v12536_v1 = vpop.f32.mrf.mxu1  ;;  %9458 = vmatmul.msk.bf16.gmra.mxu3 %vm1264_vm0, %v4175_v58 }
 0x748   : > { %14379 = vst [vmem:[#allocation47_spill] sm:$0xff] %v12536_v1  ;;  %v14439_v1 = vld [vmem:[#allocation5_spill] sm:$0xff] }
 0x749   : > { %4891 = vmatmul.bf16.gmra.mxu0 %v11207_v14 }
 0x74a   : > { %4975 = vmatmul.bf16.gmra.mxu1 %v11199_v9 }
 0x74e   : > { %v12543_v44 = vpop.f32.mrf.mxu0 }
 0x74f   : > { %v12541_v30 = vpop.f32.mrf.mxu1  ;;  %14381 = vst [vmem:[#allocation49_spill] sm:$0xff] %v12543_v44  ;;  %v14415_v44 = vld [vmem:[#allocation27_spill] sm:$0xff] }
 0x750   : > { %14380 = vst [vmem:[#allocation48_spill] sm:$0xff] %v12541_v30 }
 0x751   : > { %9448 = vmatmul.msk.bf16.gmra.mxu2 %vm1264_vm0, %v4173_v35  ;;  %v10453_v35 = vld [vmem:[%s14179_s2 + $0x138] sm:$0xff] }
 0x752   : > { %4641 = vmatpush.bf16.msra.mxu2 %v10453_v35  ;;  %v10455_v35 = vld [vmem:[%s14179_s2 + $0x148] sm:$0xff] }
 0x756   : > { %v12551_v57 = vpop.f32.mrf.mxu0  ;;  %4642 = vmatpush.bf16.msra.mxu2 %v10452_v7 }
 0x757   : > { %v12548_v62 = vpop.f32.mrf.mxu1  ;;  %9459 = vmatmul.msk.bf16.gmra.mxu3 %vm1264_vm0, %v4176_v55  ;;  %14383 = vst [vmem:[#allocation51_spill] sm:$0xff] %v12551_v57 }
 0x758   : > { %14382 = vst [vmem:[#allocation50_spill] sm:$0xff] %v12548_v62 }
 0x759   : > { %4896 = vmatmul.bf16.gmra.mxu0 %v11217_v22 }
 0x75a   : > { %4980 = vmatmul.bf16.gmra.mxu1 %v11209_v15  ;;  %4643 = vmatpush.bf16.msra.mxu2 %v10451_v27 }
 0x75e   : > { %v12558_v17 = vpop.f32.mrf.mxu0  ;;  %4644 = vmatpush.bf16.msra.mxu2 %v10450_v0  ;;  %v10446_v0 = vld [vmem:[%s14179_s2 + $0x100] sm:$0xff] }
 0x75f   : > { %v12555_v31 = vpop.f32.mrf.mxu1  ;;  %14385 = vst [vmem:[#allocation53_spill] sm:$0xff] %v12558_v17 }
 0x760   : > { %14384 = vst [vmem:[#allocation52_spill] sm:$0xff] %v12555_v31 }
 0x761   : > { %9449 = vmatmul.msk.bf16.gmra.mxu2 %vm1264_vm0, %v4174_v46 }
 0x762   : > { %4645 = vmatpush.bf16.msra.mxu2 %v10449_v32 }
 0x766   : > { %v12564_v26 = vpop.f32.mrf.mxu0  ;;  %4646 = vmatpush.bf16.msra.mxu2 %v10448_v48 }
 0x767   : > { %v12560_v19 = vpop.f32.mrf.mxu1  ;;  %14387 = vst [vmem:[#allocation55_spill] sm:$0xff] %v12564_v26 }
 0x768   : > { %14386 = vst [vmem:[#allocation54_spill] sm:$0xff] %v12560_v19 }
 0x769   : > { %4901 = vmatmul.bf16.gmra.mxu0 %v11241_v42 }
 0x76a   : > { %4985 = vmatmul.bf16.gmra.mxu1 %v11219_v23 }
 0x76e   : > { %v12571_v56 = vpop.f32.mrf.mxu0 }
 0x76f   : > { %v12566_v20 = vpop.f32.mrf.mxu1  ;;  %14390 = vst [vmem:[#allocation58_spill] sm:$0xff] %v12571_v56 }
 0x770   : > { %14388 = vst [vmem:[#allocation56_spill] sm:$0xff] %v12566_v20  ;;  %v14414_v20 = vld [vmem:[#allocation26_spill] sm:$0xff] }
 0x771   : > { %9450 = vmatmul.msk.bf16.gmra.mxu2 %vm1264_vm0, %v4175_v58  ;;  %v10456_v58 = vld [vmem:[%s14179_s2 + $0x150] sm:$0xff] }
 0x772   : > { %4695 = vmatpush.bf16.msra.mxu3 %v10456_v58 }
 0x774   : > { %v4122_v10 = vpop.f32.mrf.mxu3 }
 0x776   : > { %v12578_v47 = vpop.f32.mrf.mxu0  ;;  %4696 = vmatpush.bf16.msra.mxu3 %v10455_v35 }
 0x777   : > { %v12569_v21 = vpop.f32.mrf.mxu1  ;;  %14392 = vst [vmem:[#allocation60_spill] sm:$0xff] %v12578_v47 }
 0x778   : > { %14389 = vst [vmem:[#allocation57_spill] sm:$0xff] %v12569_v21 }
 0x779   : > { %4906 = vmatmul.bf16.gmra.mxu0 %v11265_v4 }
 0x77a   : > { %4990 = vmatmul.bf16.gmra.mxu1 %v11243_v43  ;;  %4697 = vmatpush.bf16.msra.mxu3 %v10454_v59 }
 0x77e   : > { %v12583_v37 = vpop.f32.mrf.mxu0 }
 0x77f   : > { %v12575_v29 = vpop.f32.mrf.mxu1  ;;  %14394 = vst [vmem:[#allocation62_spill] sm:$0xff] %v12583_v37  ;;  %v14409_v37 = vld [vmem:[#allocation13_spill] sm:$0xff] }
 0x780   : > { %14391 = vst [vmem:[#allocation59_spill] sm:$0xff] %v12575_v29 }
 0x781   : > { %9451 = vmatmul.msk.bf16.gmra.mxu2 %vm1264_vm0, %v4176_v55  ;;  %v10447_v55 = vld [vmem:[%s14179_s2 + $0x108] sm:$0xff] }
 0x782   : > { %4647 = vmatpush.bf16.msra.mxu2 %v10447_v55 }
 0x786   : > { %v12600_v24 = vpop.f32.mrf.mxu0  ;;  %4648 = vmatpush.bf16.msra.mxu2 %v10446_v0  ;;  %v12658_v0 = vpop.f32.mrf.mxu3 }
 0x787   : > { %v12580_v28 = vpop.f32.mrf.mxu1  ;;  %14396 = vst [vmem:[#allocation64_spill] sm:$0xff] %v12600_v24  ;;  %v14432_v24 = vld [vmem:[#allocation20_spill] sm:$0xff] }
 0x788   : > { %14393 = vst [vmem:[#allocation61_spill] sm:$0xff] %v12580_v28 }
 0x789   : > { %4911 = vmatmul.bf16.gmra.mxu0 %v11289_v33 }
 0x78a   : > { %4995 = vmatmul.bf16.gmra.mxu1 %v11267_v5 }
 0x78e   : > { %v12624_v46 = vpop.f32.mrf.mxu0 }
 0x78f   : > { %v12586_v38 = vpop.f32.mrf.mxu1  ;;  %14398 = vst [vmem:[#allocation66_spill] sm:$0xff] %v12624_v46  ;;  %v14401_v46 = vld [vmem:[#allocation22_spill] sm:$0xff] }
 0x790   : > { %14395 = vst [vmem:[#allocation63_spill] sm:$0xff] %v12586_v38 }
 0x791   : > { %14404 = vst [vmem:[#allocation22_spill] sm:$0xff] %v12658_v0 }
 0x796   : > { %v4877_v63 = vpop.f32.mrf.mxu0 }
 0x797   : > { %v12608_v54 = vpop.f32.mrf.mxu1 }
 0x798   : > { %14397 = vst [vmem:[#allocation65_spill] sm:$0xff] %v12608_v54  ;;  %v14429_v54 = vld [vmem:[#allocation30_spill] sm:$0xff] }
 0x799   : > { %4916 = vmatmul.bf16.gmra.mxu0 %v11313_v6 }
 0x79a   : > { %5000 = vmatmul.bf16.gmra.mxu1 %v11291_v36 }
 0x79e   : > { %v4879_v39 = vpop.f32.mrf.mxu0 }
 0x79f   : > { %v12626_v49 = vpop.f32.mrf.mxu1 }
 0x7a0   : > { %14399 = vst [vmem:[#allocation67_spill] sm:$0xff] %v12626_v49 }
 0x7a6   : > { %v4882_v35 = vpop.f32.mrf.mxu0 }
 0x7a7   : > { %v4966_v7 = vpop.f32.mrf.mxu1 }
 0x7a8   : > { %v4967_v55 = vadd.f32 %v4966_v7, %v4877_v63 }
 0x7a9   : > { %4921 = vmatmul.bf16.gmra.mxu0 %v14401_v46 }
 0x7aa   : > { %5005 = vmatmul.bf16.gmra.mxu1 %v14400_v25 }
 0x7ac   : > { %v4099_v27 = vpop.f32.mrf.mxu2 }
 0x7ad   : > { %v4177_v32 = vpack.c.bf16 %v4122_v10, %v4099_v27  ;;  %v14403_v10 = vld [vmem:[#allocation23_spill] sm:$0xff]  ;;  %v4178_v27 = vpack.c.bf16 %v12484_v50, %v12452_v16  ;;  %v14407_v50 = vld [vmem:[#allocation24_spill] sm:$0xff] }
 0x7ae   : > { %v4884_v63 = vpop.f32.mrf.mxu0 }
 0x7af   : > { %9452 = vmatmul.msk.bf16.gmra.mxu2 %vm1264_vm0, %v4177_v32  ;;  %9460 = vmatmul.msk.bf16.gmra.mxu3 %vm1264_vm0, %v4177_v32  ;;  %v4968_v48 = vpop.f32.mrf.mxu1 }
 0x7b0   : > { %v4969_v58 = vadd.f32 %v4968_v48, %v4879_v39 }
 0x7b2   : > { %9798 = vmatpush.xpose.msk.msra.mxu0 %vm1264_vm0, %v4969_v58  ;;  %v12666_v58 = vpop.f32.mrf.mxu3 }
 0x7b3   : > { %14406 = vst [vmem:[#allocation68_spill] sm:$0xff] %v12666_v58 }
 0x7b4   : > { %v12653_v38 = vpop.f32.mrf.mxu2 }
 0x7b5   : > { %14402 = vst [vmem:[#allocation21_spill] sm:$0xff] %v12653_v38 }
 0x7b6   : > { %9799 = vmatpush.xpose.msk.msra.mxu0 %vm1264_vm0, %v4967_v55  ;;  %v4887_v48 = vpop.f32.mrf.mxu0  ;;  %v14408_v55 = vld [vmem:[#allocation25_spill] sm:$0xff] }
 0x7b7   : > { %v4971_v49 = vpop.f32.mrf.mxu1 }
 0x7b8   : > { %v4972_v32 = vadd.f32 %v4971_v49, %v4882_v35 }
 0x7b9   : > { %4926 = vmatmul.bf16.gmra.mxu0 %v14407_v50 }
 0x7ba   : > { %5010 = vmatmul.bf16.gmra.mxu1 %v14403_v10 }
 0x7bc   : > { %v12663_v39 = vpop.f32.mrf.mxu2 }
 0x7bd   : > { %14405 = vst [vmem:[#allocation23_spill] sm:$0xff] %v12663_v39 }
 0x7be   : > { %v4889_v49 = vpop.f32.mrf.mxu0 }
 0x7bf   : > { %9453 = vmatmul.msk.bf16.gmra.mxu2 %vm1264_vm0, %v4178_v27  ;;  %9461 = vmatmul.msk.bf16.gmra.mxu3 %vm1264_vm0, %v4178_v27  ;;  %v4973_v7 = vpop.f32.mrf.mxu1  ;;  %v14410_v27 = vld [vmem:[#allocation14_spill] sm:$0xff] }
 0x7c0   : > { %v4974_v59 = vadd.f32 %v4973_v7, %v4884_v63 }
 0x7c2   : > { %9801 = vmatpush.xpose.msk.msra.mxu1 %vm1264_vm0, %v4974_v59  ;;  %v12674_v59 = vpop.f32.mrf.mxu3 }
 0x7c3   : > { %14412 = vst [vmem:[#allocation25_spill] sm:$0xff] %v12674_v59  ;;  %v14443_v59 = vld [vmem:[#allocation34_spill] sm:$0xff] }
 0x7c4   : > { %v12672_v63 = vpop.f32.mrf.mxu2 }
 0x7c5   : > { %14411 = vst [vmem:[#allocation24_spill] sm:$0xff] %v12672_v63  ;;  %v14446_v63 = vld [vmem:[#allocation7_spill] sm:$0xff] }
 0x7c6   : > { %9802 = vmatpush.xpose.msk.msra.mxu1 %vm1264_vm0, %v4972_v32  ;;  %v4892_v56 = vpop.f32.mrf.mxu0 }
 0x7c7   : > { %v4976_v16 = vpop.f32.mrf.mxu1 }
 0x7c8   : > { %v4977_v32 = vadd.f32 %v4976_v16, %v4887_v48 }
 0x7c9   : > { %4931 = vmatmul.bf16.gmra.mxu0 %v14414_v20 }
 0x7ca   : > { %5015 = vmatmul.bf16.gmra.mxu1 %v14408_v55  ;;  %v12682_v31 = vpop.f32.mrf.mxu3 }
 0x7cb   : > { %14416 = vst [vmem:[#allocation70_spill] sm:$0xff] %v12682_v31  ;;  %v14422_v31 = vld [vmem:[#allocation29_spill] sm:$0xff] }
 0x7cc   : > { %v12678_v17 = vpop.f32.mrf.mxu2 }
 0x7cd   : > { %14413 = vst [vmem:[#allocation69_spill] sm:$0xff] %v12678_v17 }
 0x7cf   : > { %4649 = vmatmul.bf16.vlgmr.msra.gmra.mxu2 %v14409_v37  ;;  %4698 = vmatmul.bf16.vlgmr.msra.gmra.mxu3 %v14410_v27  ;;  %v4978_v35 = vpop.f32.mrf.mxu1 }
 0x7d0   : > { %v4979_v7 = vadd.f32 %v4978_v35, %v4889_v49  ;;  %v14418_v49 = vld [vmem:[#allocation16_spill] sm:$0xff]  ;;  %v4894_v35 = vpop.f32.mrf.mxu0 }
 0x7d2   : > { %9804 = vmatpush.xpose.msk.msrb.mxu0 %vm1264_vm0, %v4979_v7  ;;  %v12689_v30 = vpop.f32.mrf.mxu3 }
 0x7d3   : > { %14420 = vst [vmem:[#allocation72_spill] sm:$0xff] %v12689_v30  ;;  %v14440_v30 = vld [vmem:[#allocation6_spill] sm:$0xff] }
 0x7d4   : > { %v12686_v7 = vpop.f32.mrf.mxu2 }
 0x7d5   : > { %14419 = vst [vmem:[#allocation71_spill] sm:$0xff] %v12686_v7 }
 0x7d6   : > { %9805 = vmatpush.xpose.msk.msrb.mxu0 %vm1264_vm0, %v4977_v32 }
 0x7d7   : > { %v4981_v29 = vpop.f32.mrf.mxu1 }
 0x7d8   : > { %v4982_v32 = vadd.f32 %v4981_v29, %v4892_v56  ;;  %v12692_v45 = vpop.f32.mrf.mxu0  ;;  %v14426_v56 = vld [vmem:[#allocation18_spill] sm:$0xff] }
 0x7d9   : > { %4936 = vmatmul.bf16.gmra.mxu0 %v14421_v18 }
 0x7da   : > { %5020 = vmatmul.bf16.gmra.mxu1 %v14415_v44 }
 0x7dc   : > { %v12698_v53 = vpop.f32.mrf.mxu2 }
 0x7dd   : > { %14423 = vst [vmem:[#allocation73_spill] sm:$0xff] %v12698_v53  ;;  %v14430_v53 = vld [vmem:[#allocation31_spill] sm:$0xff] }
 0x7df   : > { %4654 = vmatmul.bf16.gmra.mxu2 %v14417_v11  ;;  %4703 = vmatmul.bf16.gmra.mxu3 %v14418_v49  ;;  %v4983_v48 = vpop.f32.mrf.mxu1 }
 0x7e0   : > { %v4984_v16 = vadd.f32 %v4983_v48, %v4894_v35  ;;  %v12700_v35 = vpop.f32.mrf.mxu3  ;;  %v14425_v48 = vld [vmem:[#allocation17_spill] sm:$0xff]  ;;  %v12704_v29 = vpop.f32.mrf.mxu0 }
 0x7e1   : > { %14424 = vst [vmem:[#allocation74_spill] sm:$0xff] %v12700_v35  ;;  %v14431_v35 = vld [vmem:[#allocation19_spill] sm:$0xff] }
 0x7e2   : > { %9807 = vmatpush.xpose.msk.msrb.mxu1 %vm1264_vm0, %v4984_v16 }
 0x7e4   : > { %v12710_v39 = vpop.f32.mrf.mxu2 }
 0x7e5   : > { %14428 = vst [vmem:[#allocation76_spill] sm:$0xff] %v12710_v39  ;;  %v14438_v39 = vld [vmem:[#allocation33_spill] sm:$0xff] }
 0x7e6   : > { %9808 = vmatpush.xpose.msk.msrb.mxu1 %vm1264_vm0, %v4982_v32 }
 0x7e7   : > { %v12694_v17 = vpop.f32.mrf.mxu1 }
 0x7e8   : > { %v12708_v32 = vpop.f32.mrf.mxu3  ;;  %v12712_v51 = vpop.f32.mrf.mxu0 }
 0x7e9   : > { %14427 = vst [vmem:[#allocation75_spill] sm:$0xff] %v12708_v32  ;;  %4941 = vmatmul.bf16.gmra.mxu0 %v14429_v54  ;;  %v14436_v32 = vld [vmem:[#allocation32_spill] sm:$0xff] }
 0x7ea   : > { %5025 = vmatmul.bf16.gmra.mxu1 %v14422_v31 }
 0x7ec   : > { %v12726_v21 = vpop.f32.mrf.mxu2 }
 0x7ed   : > { %14434 = vst [vmem:[#allocation78_spill] sm:$0xff] %v12726_v21 }
 0x7ef   : > { %4659 = vmatmul.bf16.gmra.mxu2 %v14425_v48  ;;  %4708 = vmatmul.bf16.gmra.mxu3 %v14426_v56  ;;  %v12706_v16 = vpop.f32.mrf.mxu1 }
 0x7f0   : > { %v12720_v28 = vpop.f32.mrf.mxu0  ;;  %v12722_v47 = vpop.f32.mrf.mxu3 }
 0x7f1   : > { %14433 = vst [vmem:[#allocation77_spill] sm:$0xff] %v12722_v47 }
 0x7f4   : > { %v12735_v34 = vpop.f32.mrf.mxu2 }
 0x7f5   : > { %14437 = vst [vmem:[#allocation80_spill] sm:$0xff] %v12735_v34  ;;  %v14444_v34 = vld [vmem:[#allocation35_spill] sm:$0xff] }
 0x7f7   : > { %v12714_v58 = vpop.f32.mrf.mxu1 }
 0x7f8   : > { %v12728_v57 = vpop.f32.mrf.mxu0  ;;  %v12732_v62 = vpop.f32.mrf.mxu3 }
 0x7f9   : > { %14435 = vst [vmem:[#allocation79_spill] sm:$0xff] %v12732_v62  ;;  %4946 = vmatmul.bf16.gmra.mxu0 %v14436_v32 }
 0x7fa   : > { %5030 = vmatmul.bf16.gmra.mxu1 %v14430_v53 }
 0x7fc   : > { %v12744_v7 = vpop.f32.mrf.mxu2 }
 0x7fd   : > { %14442 = vst [vmem:[#allocation82_spill] sm:$0xff] %v12744_v7 }
 0x7ff   : > { %4664 = vmatmul.bf16.gmra.mxu2 %v14431_v35  ;;  %4713 = vmatmul.bf16.gmra.mxu3 %v14432_v24  ;;  %v12724_v26 = vpop.f32.mrf.mxu1  ;;  %v14451_v24 = vld [vmem:[#allocation9_spill] sm:$0xff]  ;;  %v14452_v35 = vld [vmem:[#allocation10_spill] sm:$0xff] }
 0x800   : > { %v12740_v47 = vpop.f32.mrf.mxu0  ;;  %v12742_v21 = vpop.f32.mrf.mxu3 }
 0x801   : > { %14441 = vst [vmem:[#allocation81_spill] sm:$0xff] %v12742_v21 }
 0x804   : > { %v12756_v40 = vpop.f32.mrf.mxu2 }
 0x805   : > { %14448 = vst [vmem:[#allocation84_spill] sm:$0xff] %v12756_v40 }
 0x807   : > { %v12730_v19 = vpop.f32.mrf.mxu1 }
 0x808   : > { %v12746_v12 = vpop.f32.mrf.mxu0  ;;  %v12752_v41 = vpop.f32.mrf.mxu3 }
 0x809   : > { %4951 = vmatmul.bf16.gmra.mxu0 %v14443_v59  ;;  %14445 = vst [vmem:[#allocation83_spill] sm:$0xff] %v12752_v41 }
 0x80a   : > { %5035 = vmatmul.bf16.gmra.mxu1 %v14438_v39 }
 0x80f   : > { %4669 = vmatmul.bf16.gmra.mxu2 %v14439_v1  ;;  %4718 = vmatmul.bf16.gmra.mxu3 %v14440_v30  ;;  %v4998_v52 = vpop.f32.mrf.mxu1  ;;  %v14447_v30 = vld [vmem:[#allocation8_spill] sm:$0xff]  ;;  %v12764_v1 = vpop.f32.mrf.mxu2 }
 0x810   : > { %v4914_v0 = vpop.f32.mrf.mxu0  ;;  %v12762_v38 = vpop.f32.mrf.mxu3  ;;  %14450 = vst [vmem:[#allocation86_spill] sm:$0xff] %v12764_v1  ;;  %v14457_v1 = vld [vmem:[#allocation11_spill] sm:$0xff] }
 0x811   : > { %14449 = vst [vmem:[#allocation85_spill] sm:$0xff] %v12762_v38 }
 0x817   : > { %v12748_v62 = vpop.f32.mrf.mxu1 }
 0x818   : > { %v12758_v13 = vpop.f32.mrf.mxu0 }
 0x81a   : > { %5040 = vmatmul.bf16.gmra.mxu1 %v14444_v34 }
 0x81f   : > { %4674 = vmatmul.bf16.gmra.mxu2 %v14446_v63  ;;  %4723 = vmatmul.bf16.gmra.mxu3 %v14447_v30  ;;  %v5003_v21 = vpop.f32.mrf.mxu1 }
 0x820   : > { %v12768_v41 = vpop.f32.mrf.mxu0 }
 0x827   : > { %v12760_v7 = vpop.f32.mrf.mxu1 }
 0x828   : > { %v12774_v56 = vpop.f32.mrf.mxu0 }
 0x82f   : > { %4679 = vmatmul.bf16.gmra.mxu2 %v14451_v24  ;;  %4728 = vmatmul.bf16.gmra.mxu3 %v14452_v35  ;;  %v5008_v63 = vpop.f32.mrf.mxu1  ;;  %v14458_v24 = vld [vmem:[#allocation12_spill] sm:$0xff] }
 0x830   : > { %v12784_v35 = vpop.f32.mrf.mxu0 }
 0x832   : > { %v12770_v30 = vpop.f32.mrf.mxu2  ;;  %v12772_v40 = vpop.f32.mrf.mxu3 }
 0x833   : > { %14453 = vst [vmem:[#allocation87_spill] sm:$0xff] %v12770_v30 }
 0x834   : > { %14454 = vst [vmem:[#allocation88_spill] sm:$0xff] %v12772_v40 }
 0x837   : > { %v12776_v48 = vpop.f32.mrf.mxu1 }
 0x838   : > { %v12790_v40 = vpop.f32.mrf.mxu0 }
 0x83a   : > { %v12778_v49 = vpop.f32.mrf.mxu2  ;;  %v12780_v38 = vpop.f32.mrf.mxu3 }
 0x83b   : > { %14455 = vst [vmem:[#allocation89_spill] sm:$0xff] %v12778_v49 }
 0x83c   : > { %14456 = vst [vmem:[#allocation90_spill] sm:$0xff] %v12780_v38 }
 0x83f   : > { %4684 = vmatmul.bf16.gmra.mxu2 %v14457_v1  ;;  %4733 = vmatmul.bf16.gmra.mxu3 %v14458_v24  ;;  %v5013_v11 = vpop.f32.mrf.mxu1 }
 0x840   : > { %v12798_v38 = vpop.f32.mrf.mxu0 }
 0x842   : > { %v12786_v27 = vpop.f32.mrf.mxu2  ;;  %v12788_v30 = vpop.f32.mrf.mxu3 }
 0x843   : > { %14459 = vst [vmem:[#allocation91_spill] sm:$0xff] %v12786_v27  ;;  %v4989_v27 = vadd.f32 %v12706_v16, %v12704_v29  ;;  %v4999_v29 = vadd.f32 %v4998_v52, %v12740_v47  ;;  %v5004_v16 = vadd.f32 %v5003_v21, %v4914_v0  ;;  %v5002_v52 = vadd.f32 %v12748_v62, %v12746_v12 }
 0x844   : > { %14460 = vst [vmem:[#allocation92_spill] sm:$0xff] %v12788_v30  ;;  %v4987_v30 = vadd.f32 %v12694_v17, %v12692_v45  ;;  %v5007_v21 = vadd.f32 %v12760_v7, %v12758_v13 }
 0x847   : > { %v12792_v37 = vpop.f32.mrf.mxu1 }
 0x84a   : > { %v12794_v34 = vpop.f32.mrf.mxu2  ;;  %v12796_v49 = vpop.f32.mrf.mxu3 }
 0x84b   : > { %14461 = vst [vmem:[#allocation93_spill] sm:$0xff] %v12794_v34  ;;  %v12808_v34 = vpop.f32.mrf.mxu0 }
 0x84c   : > { %14462 = vst [vmem:[#allocation94_spill] sm:$0xff] %v12796_v49 }
 0x84f   : > { %v12800_v1 = vpop.f32.mrf.mxu1 }
 0x852   : > { %v4650_v24 = vpop.f32.mrf.mxu2  ;;  %v4699_v59 = vpop.f32.mrf.mxu3 }
 0x853   : > { %v4700_v39 = vadd.f32 %v4699_v59, %v4650_v24  ;;  %v4994_v24 = vadd.f32 %v12724_v26, %v12720_v28  ;;  %v4934_v45 = vpop.f32.mrf.mxu0 }
 0x855   : > { %9800 = vmatmul.msk.f32.vlgmr.msra.gmra.mxu0 %vm1264_vm0, %v4700_v39  ;;  %v4992_v39 = vadd.f32 %v12714_v58, %v12712_v51 }
 0x856   : > { %9810 = vmatpush.xpose.msk.msra.mxu0 %vm1264_vm0, %v4989_v27 }
 0x857   : > { %v12810_v49 = vpop.f32.mrf.mxu1 }
 0x85a   : > { %9811 = vmatpush.xpose.msk.msra.mxu0 %vm1264_vm0, %v4987_v30  ;;  %v4652_v32 = vpop.f32.mrf.mxu2  ;;  %v4701_v53 = vpop.f32.mrf.mxu3 }
 0x85b   : > { %v4702_v54 = vadd.f32 %v4701_v53, %v4652_v32  ;;  %v4997_v53 = vadd.f32 %v12730_v19, %v12728_v57  ;;  %v4937_v26 = vpop.f32.mrf.mxu0 }
 0x85d   : > { %9803 = vmatmul.msk.f32.vlgmr.msra.gmra.mxu1 %vm1264_vm0, %v4702_v54 }
 0x85e   : > { %9813 = vmatpush.xpose.msk.msra.mxu1 %vm1264_vm0, %v4994_v24 }
 0x85f   : > { %v5023_v17 = vpop.f32.mrf.mxu1 }
 0x862   : > { %9814 = vmatpush.xpose.msk.msra.mxu1 %vm1264_vm0, %v4992_v39  ;;  %v4655_v27 = vpop.f32.mrf.mxu2  ;;  %v4704_v59 = vpop.f32.mrf.mxu3  ;;  %v5009_v39 = vadd.f32 %v5008_v63, %v12768_v41  ;;  %v5012_v41 = vadd.f32 %v12776_v48, %v12774_v56 }
 0x863   : > { %v4705_v30 = vadd.f32 %v4704_v59, %v4655_v27  ;;  %v4939_v47 = vpop.f32.mrf.mxu0 }
 0x865   : > { %9806 = vmatmul.msk.f32.vlgmr.msrb.gmra.mxu0 %vm1264_vm0, %v4705_v30  ;;  %v5014_v30 = vadd.f32 %v5013_v11, %v12784_v35  ;;  %v5017_v11 = vadd.f32 %v12792_v37, %v12790_v40 }
 0x866   : > { %9816 = vmatpush.xpose.msk.msrb.mxu0 %vm1264_vm0, %v4999_v29 }
 0x867   : > { %v5026_v28 = vpop.f32.mrf.mxu1 }
 0x86a   : > { %9817 = vmatpush.xpose.msk.msrb.mxu0 %vm1264_vm0, %v4997_v53  ;;  %v4657_v51 = vpop.f32.mrf.mxu2  ;;  %v4706_v54 = vpop.f32.mrf.mxu3 }
 0x86b   : > { %v4707_v58 = vadd.f32 %v4706_v54, %v4657_v51  ;;  %v4942_v0 = vpop.f32.mrf.mxu0  ;;  %v5019_v51 = vadd.f32 %v12800_v1, %v12798_v38  ;;  %v5022_v1 = vadd.f32 %v12810_v49, %v12808_v34 }
 0x86d   : > { %9809 = vmatmul.msk.f32.vlgmr.msrb.gmra.mxu1 %vm1264_vm0, %v4707_v58 }
 0x86e   : > { %9819 = vmatpush.xpose.msk.msrb.mxu1 %vm1264_vm0, %v5004_v16  ;;  %v5024_v16 = vadd.f32 %v5023_v17, %v4934_v45  ;;  %v5027_v45 = vadd.f32 %v5026_v28, %v4937_v26 }
 0x86f   : > { %v5028_v32 = vpop.f32.mrf.mxu1 }
 0x870   : > { %v5029_v38 = vadd.f32 %v5028_v32, %v4939_v47 }
 0x872   : > { %9820 = vmatpush.xpose.msk.msrb.mxu1 %vm1264_vm0, %v5002_v52  ;;  %v4660_v57 = vpop.f32.mrf.mxu2  ;;  %v4709_v19 = vpop.f32.mrf.mxu3 }
 0x873   : > { %v4710_v24 = vadd.f32 %v4709_v19, %v4660_v57  ;;  %v4944_v63 = vpop.f32.mrf.mxu0 }
 0x875   : > { %9812 = vmatmul.msk.f32.vlgmr.msra.gmra.mxu0 %vm1264_vm0, %v4710_v24 }
 0x876   : > { %9822 = vmatpush.xpose.msk.msra.mxu0 %vm1264_vm0, %v5009_v39 }
 0x877   : > { %v5031_v27 = vpop.f32.mrf.mxu1 }
 0x878   : > { %v5032_v47 = vadd.f32 %v5031_v27, %v4942_v0 }
 0x87a   : > { %9823 = vmatpush.xpose.msk.msra.mxu0 %vm1264_vm0, %v5007_v21  ;;  %v4662_v12 = vpop.f32.mrf.mxu2  ;;  %v4711_v62 = vpop.f32.mrf.mxu3 }
 0x87b   : > { %v4712_v59 = vadd.f32 %v4711_v62, %v4662_v12  ;;  %v4947_v35 = vpop.f32.mrf.mxu0 }
 0x87d   : > { %9815 = vmatmul.msk.f32.vlgmr.msra.gmra.mxu1 %vm1264_vm0, %v4712_v59 }
 0x87e   : > { %9825 = vmatpush.xpose.msk.msra.mxu1 %vm1264_vm0, %v5014_v30 }
 0x87f   : > { %v5033_v29 = vpop.f32.mrf.mxu1 }
 0x880   : > { %v5034_v39 = vadd.f32 %v5033_v29, %v4944_v63 }
 0x882   : > { %9826 = vmatpush.xpose.msk.msra.mxu1 %vm1264_vm0, %v5012_v41  ;;  %v4665_v13 = vpop.f32.mrf.mxu2  ;;  %v4714_v7 = vpop.f32.mrf.mxu3 }
 0x883   : > { %v4715_v53 = vadd.f32 %v4714_v7, %v4665_v13  ;;  %v4949_v57 = vpop.f32.mrf.mxu0  ;;  %v10485_v13 = vld [vmem:[%s14181_s4 + $0x138] sm:$0xff] }
 0x884   : > { %v10493_v7 = vld [vmem:[%s14181_s4 + $0x178] sm:$0xff]  ;;  %5175 = vmatpush.bf16.msrb.mxu2 %v10485_v13 }
 0x885   : > { %9818 = vmatmul.msk.f32.vlgmr.msrb.gmra.mxu0 %vm1264_vm0, %v4715_v53  ;;  %5264 = vmatpush.bf16.msrb.mxu3 %v10493_v7  ;;  %v10484_v53 = vld [vmem:[%s14181_s4 + $0x130] sm:$0xff] }
 0x886   : > { %9828 = vmatpush.xpose.msk.msrb.mxu0 %vm1264_vm0, %v5019_v51  ;;  %v10492_v51 = vld [vmem:[%s14181_s4 + $0x170] sm:$0xff] }
 0x887   : > { %v5036_v54 = vpop.f32.mrf.mxu1 }
 0x888   : > { %v5037_v26 = vadd.f32 %v5036_v54, %v4947_v35  ;;  %5176 = vmatpush.bf16.msrb.mxu2 %v10484_v53  ;;  %v10491_v35 = vld [vmem:[%s14181_s4 + $0x168] sm:$0xff] }
 0x889   : > { %5265 = vmatpush.bf16.msrb.mxu3 %v10492_v51 }
 0x88a   : > { %9829 = vmatpush.xpose.msk.msrb.mxu0 %vm1264_vm0, %v5017_v11  ;;  %v4667_v48 = vpop.f32.mrf.mxu2  ;;  %v4716_v56 = vpop.f32.mrf.mxu3  ;;  %v10483_v11 = vld [vmem:[%s14181_s4 + $0x128] sm:$0xff] }
 0x88b   : > { %v4717_v58 = vadd.f32 %v4716_v56, %v4667_v48  ;;  %v4952_v34 = vpop.f32.mrf.mxu0 }
 0x88c   : > { %5177 = vmatpush.bf16.msrb.mxu2 %v10483_v11 }
 0x88d   : > { %9821 = vmatmul.msk.f32.vlgmr.msrb.gmra.mxu1 %vm1264_vm0, %v4717_v58  ;;  %5266 = vmatpush.bf16.msrb.mxu3 %v10491_v35  ;;  %v10482_v58 = vld [vmem:[%s14181_s4 + $0x120] sm:$0xff] }
 0x88e   : > { %9831 = vmatpush.xpose.msk.msrb.mxu1 %vm1264_vm0, %v5024_v16  ;;  %v10490_v16 = vld [vmem:[%s14181_s4 + $0x160] sm:$0xff] }
 0x88f   : > { %v5038_v19 = vpop.f32.mrf.mxu1 }
 0x890   : > { %v5039_v62 = vadd.f32 %v5038_v19, %v4949_v57  ;;  %5178 = vmatpush.bf16.msrb.mxu2 %v10482_v58 }
 0x891   : > { %5267 = vmatpush.bf16.msrb.mxu3 %v10490_v16 }
 0x892   : > { %9832 = vmatpush.xpose.msk.msrb.mxu1 %vm1264_vm0, %v5022_v1  ;;  %v4670_v52 = vpop.f32.mrf.mxu2  ;;  %v4719_v40 = vpop.f32.mrf.mxu3  ;;  %v10481_v1 = vld [vmem:[%s14181_s4 + $0x118] sm:$0xff] }
 0x893   : > { %v4720_v37 = vadd.f32 %v4719_v40, %v4670_v52  ;;  %v4954_v28 = vpop.f32.mrf.mxu0 }
 0x894   : > { %5179 = vmatpush.bf16.msrb.mxu2 %v10481_v1 }
 0x895   : > { %9824 = vmatmul.msk.f32.vlgmr.msra.gmra.mxu0 %vm1264_vm0, %v4720_v37 }
 0x896   : > { %9834 = vmatpush.xpose.msk.msra.mxu0 %vm1264_vm0, %v5029_v38  ;;  %v10489_v38 = vld [vmem:[%s14181_s4 + $0x158] sm:$0xff] }
 0x897   : > { %v5041_v49 = vpop.f32.mrf.mxu1  ;;  %5268 = vmatpush.bf16.msrb.mxu3 %v10489_v38 }
 0x898   : > { %v5042_v29 = vadd.f32 %v5041_v49, %v4952_v34 }
 0x89a   : > { %9835 = vmatpush.xpose.msk.msra.mxu0 %vm1264_vm0, %v5027_v45  ;;  %v4672_v17 = vpop.f32.mrf.mxu2  ;;  %v4721_v24 = vpop.f32.mrf.mxu3  ;;  %v10480_v45 = vld [vmem:[%s14181_s4 + $0x110] sm:$0xff] }
 0x89b   : > { %v4722_v21 = vadd.f32 %v4721_v24, %v4672_v17  ;;  %v10488_v17 = vld [vmem:[%s14181_s4 + $0x150] sm:$0xff]  ;;  %5180 = vmatpush.bf16.msrb.mxu2 %v10480_v45 }
 0x89c   : > { %5269 = vmatpush.bf16.msrb.mxu3 %v10488_v17 }
 0x89d   : > { %9827 = vmatmul.msk.f32.vlgmr.msra.gmra.mxu1 %vm1264_vm0, %v4722_v21  ;;  %v10487_v21 = vld [vmem:[%s14181_s4 + $0x148] sm:$0xff] }
 0x89e   : > { %9837 = vmatpush.xpose.msk.msra.mxu1 %vm1264_vm0, %v5034_v39  ;;  %v10479_v39 = vld [vmem:[%s14181_s4 + $0x108] sm:$0xff] }
 0x89f   : > { %v5043_v30 = vpop.f32.mrf.mxu1  ;;  %5181 = vmatpush.bf16.msrb.mxu2 %v10479_v39 }
 0x8a0   : > { %v5044_v0 = vadd.f32 %v5043_v30, %v4954_v28  ;;  %5270 = vmatpush.bf16.msrb.mxu3 %v10487_v21 }
 0x8a2   : > { %9838 = vmatpush.xpose.msk.msra.mxu1 %vm1264_vm0, %v5032_v47  ;;  %v4675_v32 = vpop.f32.mrf.mxu2  ;;  %v4724_v12 = vpop.f32.mrf.mxu3 }
 0x8a3   : > { %v4725_v59 = vadd.f32 %v4724_v12, %v4675_v32 }
 0x8a5   : > { %9830 = vmatmul.msk.f32.vlgmr.msrb.gmra.mxu0 %vm1264_vm0, %v4725_v59  ;;  %v10486_v59 = vld [vmem:[%s14181_s4 + $0x140] sm:$0xff] }
 0x8a6   : > { %9840 = vmatpush.xpose.msk.msrb.mxu0 %vm1264_vm0, %v5039_v62  ;;  %v10478_v62 = vld [vmem:[%s14181_s4 + $0x100] sm:$0xff]  ;;  %5271 = vmatpush.bf16.msrb.mxu3 %v10486_v59 }
 0x8a7   : > { %5182 = vmatpush.bf16.msrb.mxu2 %v10478_v62 }
 0x8a9   : > { %5272 = vmatmul.bf16.vlgmr.msrb.gmra.mxu3 %v11179_v61 }
 0x8aa   : > { %9841 = vmatpush.xpose.msk.msrb.mxu0 %vm1264_vm0, %v5037_v26  ;;  %v4677_v41 = vpop.f32.mrf.mxu2  ;;  %v4726_v63 = vpop.f32.mrf.mxu3  ;;  %5183 = vmatmul.bf16.vlgmr.msrb.gmra.mxu2 %v11177_v60 }
 0x8ab   : > { %v4727_v27 = vadd.f32 %v4726_v63, %v4677_v41 }
 0x8ad   : > { %9833 = vmatmul.msk.f32.vlgmr.msrb.gmra.mxu1 %vm1264_vm0, %v4727_v27 }
 0x8ae   : > { %9843 = vmatpush.xpose.msk.msrb.mxu1 %vm1264_vm0, %v5044_v0 }
 0x8b2   : > { %9844 = vmatpush.xpose.msk.msrb.mxu1 %vm1264_vm0, %v5042_v29  ;;  %v4680_v54 = vpop.f32.mrf.mxu2  ;;  %v4729_v48 = vpop.f32.mrf.mxu3 }
 0x8b3   : > { %v4730_v56 = vadd.f32 %v4729_v48, %v4680_v54 }
 0x8b5   : > { %9836 = vmatmul.msk.f32.vlgmr.msra.gmra.mxu0 %vm1264_vm0, %v4730_v56 }
 0x8b9   : > { %5277 = vmatmul.bf16.gmra.mxu3 %v11189_v3 }
 0x8ba   : > { %v4682_v52 = vpop.f32.mrf.mxu2  ;;  %v4731_v40 = vpop.f32.mrf.mxu3  ;;  %5188 = vmatmul.bf16.gmra.mxu2 %v11187_v2 }
 0x8bb   : > { %v4732_v37 = vadd.f32 %v4731_v40, %v4682_v52 }
 0x8bd   : > { %9839 = vmatmul.msk.f32.vlgmr.msra.gmra.mxu1 %vm1264_vm0, %v4732_v37 }
 0x8c2   : > { %v4685_v34 = vpop.f32.mrf.mxu2  ;;  %v4734_v49 = vpop.f32.mrf.mxu3 }
 0x8c3   : > { %v4735_v47 = vadd.f32 %v4734_v49, %v4685_v34 }
 0x8c5   : > { %9842 = vmatmul.msk.f32.vlgmr.msrb.gmra.mxu0 %vm1264_vm0, %v4735_v47 }
 0x8c9   : > { %5282 = vmatmul.bf16.gmra.mxu3 %v11199_v9 }
 0x8ca   : > { %v4687_v28 = vpop.f32.mrf.mxu2  ;;  %v4736_v30 = vpop.f32.mrf.mxu3  ;;  %5193 = vmatmul.bf16.gmra.mxu2 %v11197_v8 }
 0x8cb   : > { %v4737_v41 = vadd.f32 %v4736_v30, %v4687_v28 }
 0x8cd   : > { %9845 = vmatmul.msk.f32.vlgmr.msrb.gmra.mxu1 %vm1264_vm0, %v4737_v41 }
 0x8d2   : > { %v5379_v57 = vpop.f32.mrf.mxu0 }
 0x8d3   : > { %v12899_v19 = vmul.f32 0.125, %v5379_v57 }
 0x8d5   : > { %v5833_v24 = vsel %vm1745_vm1, %v12899_v19, -inf }
 0x8d6   : > { %5834 = vmax.xlane.f32.xlu1 %v5833_v24 }
 0x8d9   : > { %5287 = vmatmul.bf16.gmra.mxu3 %v11209_v15 }
 0x8da   : > { %v5408_v32 = vpop.f32.mrf.mxu1  ;;  %5198 = vmatmul.bf16.gmra.mxu2 %v11207_v14 }
 0x8db   : > { %v5818_v12 = vmul.f32 0.125, %v5408_v32 }
 0x8dd   : > { %v5836_v26 = vsel %vm1745_vm1, %v5818_v12, -inf }
 0x8de   : > { %5837 = vmax.xlane.f32.xlu2 %v5836_v26 }
 0x8e2   : > { %v5437_v63 = vpop.f32.mrf.mxu0 }
 0x8e3   : > { %v5819_v0 = vmul.f32 0.125, %v5437_v63 }
 0x8e5   : > { %v5839_v27 = vsel %vm1745_vm1, %v5819_v0, -inf }
 0x8e6   : > { %5840 = vmax.xlane.f32.xlu0 %v5839_v27 }
 0x8e9   : > { %5292 = vmatmul.bf16.gmra.mxu3 %v11219_v23 }
 0x8ea   : > { %v5466_v29 = vpop.f32.mrf.mxu1  ;;  %5203 = vmatmul.bf16.gmra.mxu2 %v11217_v22 }
 0x8eb   : > { %v12927_v13 = vmul.f32 0.125, %v5466_v29 }
 0x8ed   : > { %v5842_v7 = vsel %vm1745_vm1, %v12927_v13, -inf }
 0x8ee   : > { %5843 = vmax.xlane.f32.xlu1 %v5842_v7 }
 0x8f2   : > { %v5495_v53 = vpop.f32.mrf.mxu0 }
 0x8f3   : > { %v12933_v51 = vmul.f32 0.125, %v5495_v53 }
 0x8f5   : > { %v5845_v11 = vsel %vm1745_vm1, %v12933_v51, -inf }
 0x8f6   : > { %5846 = vmax.xlane.f32.xlu2 %v5845_v11 }
 0x8f9   : > { %5297 = vmatmul.bf16.gmra.mxu3 %v11243_v43 }
 0x8fa   : > { %v5524_v35 = vpop.f32.mrf.mxu1  ;;  %5208 = vmatmul.bf16.gmra.mxu2 %v11241_v42 }
 0x8fb   : > { %v12937_v54 = vmul.f32 0.125, %v5524_v35 }
 0x8fd   : > { %v5848_v48 = vsel %vm1745_vm1, %v12937_v54, -inf }
 0x8fe   : > { %5849 = vmax.xlane.f32.xlu0 %v5848_v48 }
 0x902   : > { %v5553_v56 = vpop.f32.mrf.mxu0 }
 0x903   : > { %v12943_v58 = vmul.f32 0.125, %v5553_v56 }
 0x905   : > { %v5851_v16 = vsel %vm1745_vm1, %v12943_v58, -inf }
 0x906   : > { %5852 = vmax.xlane.f32.xlu1 %v5851_v16 }
 0x909   : > { %5302 = vmatmul.bf16.gmra.mxu3 %v11267_v5 }
 0x90a   : > { %v5582_v1 = vpop.f32.mrf.mxu1  ;;  %5213 = vmatmul.bf16.gmra.mxu2 %v11265_v4 }
 0x90b   : > { %v12947_v38 = vmul.f32 0.125, %v5582_v1 }
 0x90d   : > { %v5854_v52 = vsel %vm1745_vm1, %v12947_v38, -inf }
 0x90e   : > { %5855 = vmax.xlane.f32.xlu2 %v5854_v52 }
 0x912   : > { %v5611_v40 = vpop.f32.mrf.mxu0 }
 0x913   : > { %v12953_v37 = vmul.f32 0.125, %v5611_v40 }
 0x915   : > { %v5857_v57 = vsel %vm1745_vm1, %v12953_v37, -inf }
 0x916   : > { %5858 = vmax.xlane.f32.xlu2 %v5857_v57 }
 0x919   : > { %5307 = vmatmul.bf16.gmra.mxu3 %v11291_v36 }
 0x91a   : > { %5218 = vmatmul.bf16.gmra.mxu2 %v11289_v33  ;;  %v5640_v32 = vpop.f32.mrf.mxu1 }
 0x91b   : > { %v12970_v62 = vmul.f32 0.125, %v5640_v32 }
 0x922   : > { %v5669_v30 = vpop.f32.mrf.mxu0 }
 0x923   : > { %v12978_v63 = vmul.f32 0.125, %v5669_v30 }
 0x925   : > { %v5863_v29 = vsel %vm1745_vm1, %v12978_v63, -inf }
 0x929   : > { %5312 = vmatmul.bf16.gmra.mxu3 %v14400_v25 }
 0x92a   : > { %5223 = vmatmul.bf16.gmra.mxu2 %v11313_v6  ;;  %v5698_v56 = vpop.f32.mrf.mxu1 }
 0x92b   : > { %v12989_v16 = vmul.f32 0.125, %v5698_v56 }
 0x92c   : > { %v5273_v48 = vpop.f32.mrf.mxu3 }
 0x92d   : > { %v5184_v35 = vpop.f32.mrf.mxu2 }
 0x932   : > { %v5727_v57 = vpop.f32.mrf.mxu0 }
 0x939   : > { %5317 = vmatmul.bf16.gmra.mxu3 %v14403_v10 }
 0x93a   : > { %5228 = vmatmul.bf16.gmra.mxu2 %v14401_v46 }
 0x949   : > { %v5835_v45 = vpop.xlane.xlu1 %5834  ;;  %5322 = vmatmul.bf16.gmra.mxu3 %v14408_v55 }
 0x94a   : > { %v5881_v17 = vsub.f32 %v12899_v19, %v5835_v45  ;;  %v5866_v45 = vsel %vm1745_vm1, %v12989_v16, -inf  ;;  %5233 = vmatmul.bf16.gmra.mxu2 %v14407_v50 }
 0x94c   : > { %v5897_v24 = vmul.f32 1.442695, %v5881_v17 }
 0x94e   : > { %10745 = vpow2.f32 %v5897_v24  ;;  %v5186_v24 = vpop.f32.mrf.mxu2 }
 0x951   : > { %v5838_v39 = vpop.xlane.xlu2 %5837 }
 0x952   : > { %v5882_v21 = vsub.f32 %v5818_v12, %v5838_v39  ;;  %v5860_v12 = vsel %vm1745_vm1, %v12970_v62, -inf  ;;  %v5275_v39 = vpop.f32.mrf.mxu3 }
 0x954   : > { %v12966_v34 = vpop.eup %10745  ;;  %v5899_v49 = vmul.f32 1.442695, %v5882_v21  ;;  %v5274_v21 = vadd.f32 %v5273_v48, %v5184_v35  ;;  %v5785_v35 = vpop.f32.mrf.mxu0 }
 0x955   : > { %v5929_v47 = vsel %vm1745_vm1, %v12966_v34, 0.0 }
 0x956   : > { %10747 = vpow2.f32 %v5899_v49  ;;  %5930 = vadd.xlane.f32.xlu0 %v5929_v47  ;;  %v5276_v49 = vadd.f32 %v5275_v39, %v5186_v24  ;;  %v12998_v47 = vmul.f32 0.125, %v5727_v57 }
 0x958   : > { %6026 = vmatpush.msra.mxu0 %v5276_v49 }
 0x959   : > { %v5841_v19 = vpop.xlane.xlu0 %5840  ;;  %5327 = vmatmul.bf16.gmra.mxu3 %v14415_v44 }
 0x95a   : > { %v5883_v59 = vsub.f32 %v5819_v0, %v5841_v19  ;;  %6027 = vmatpush.msra.mxu0 %v5274_v21  ;;  %v5869_v19 = vsel %vm1745_vm1, %v12998_v47, -inf  ;;  %5238 = vmatmul.bf16.gmra.mxu2 %v14414_v20 }
 0x95c   : > { %v12972_v26 = vpop.eup %10747  ;;  %v5901_v28 = vmul.f32 1.442695, %v5883_v59 }
 0x95d   : > { %v5932_v41 = vsel %vm1745_vm1, %v12972_v26, 0.0 }
 0x95e   : > { %10749 = vpow2.f32 %v5901_v28  ;;  %5861 = vmax.xlane.f32.xlu0 %v5860_v12  ;;  %5933 = vadd.xlane.f32.xlu1 %v5932_v41  ;;  %v5189_v12 = vpop.f32.mrf.mxu2  ;;  %v5278_v41 = vpop.f32.mrf.mxu3 }
 0x961   : > { %v5844_v0 = vpop.xlane.xlu1 %5843 }
 0x962   : > { %v5884_v27 = vsub.f32 %v12927_v13, %v5844_v0  ;;  %v5756_v0 = vpop.f32.mrf.mxu1 }
 0x964   : > { %v12985_v7 = vpop.eup %10749  ;;  %v5903_v53 = vmul.f32 1.442695, %v5884_v27  ;;  %v13009_v27 = vmul.f32 0.125, %v5756_v0 }
 0x965   : > { %v5935_v11 = vsel %vm1745_vm1, %v12985_v7, 0.0 }
 0x966   : > { %10751 = vpow2.f32 %v5903_v53  ;;  %5936 = vadd.xlane.f32.xlu1 %v5935_v11  ;;  %5864 = vmax.xlane.f32.xlu0 %v5863_v29  ;;  %v5872_v48 = vsel %vm1745_vm1, %v13009_v27, -inf }
 0x969   : > { %v5847_v1 = vpop.xlane.xlu2 %5846  ;;  %5332 = vmatmul.bf16.gmra.mxu3 %v14422_v31 }
 0x96a   : > { %v5885_v13 = vsub.f32 %v12933_v51, %v5847_v1  ;;  %v5191_v1 = vpop.f32.mrf.mxu2  ;;  %5243 = vmatmul.bf16.gmra.mxu2 %v14421_v18 }
 0x96c   : > { %v12992_v52 = vpop.eup %10751  ;;  %v5905_v40 = vmul.f32 1.442695, %v5885_v13  ;;  %v5280_v13 = vpop.f32.mrf.mxu3 }
 0x96d   : > { %v5938_v17 = vsel %vm1745_vm1, %v12992_v52, 0.0  ;;  %v5281_v57 = vadd.f32 %v5280_v13, %v5191_v1 }
 0x96e   : > { %10753 = vpow2.f32 %v5905_v40  ;;  %5867 = vmax.xlane.f32.xlu1 %v5866_v45  ;;  %5939 = vadd.xlane.f32.xlu2 %v5938_v17  ;;  %v5279_v40 = vadd.f32 %v5278_v41, %v5189_v12  ;;  %v13018_v45 = vmul.f32 0.125, %v5785_v35 }
 0x96f   : > { %6049 = vmatpush.msra.mxu1 %v5281_v57 }
 0x970   : > { %v5875_v24 = vsel %vm1745_vm1, %v13018_v45, -inf }
 0x971   : > { %v5850_v51 = vpop.xlane.xlu0 %5849  ;;  %6050 = vmatpush.msra.mxu1 %v5279_v40 }
 0x972   : > { %v5886_v32 = vsub.f32 %v12937_v54, %v5850_v51  ;;  %v5194_v51 = vpop.f32.mrf.mxu2 }
 0x974   : > { %v13005_v59 = vpop.eup %10753  ;;  %v5907_v28 = vmul.f32 1.442695, %v5886_v32  ;;  %v5283_v32 = vpop.f32.mrf.mxu3 }
 0x975   : > { %v5941_v30 = vsel %vm1745_vm1, %v13005_v59, 0.0  ;;  %v5284_v35 = vadd.f32 %v5283_v32, %v5194_v51  ;;  %v14463_v32 = vld [vmem:[#allocation30_spill] sm:$0xff] }
 0x976   : > { %10755 = vpow2.f32 %v5907_v28  ;;  %5942 = vadd.xlane.f32.xlu2 %v5941_v30  ;;  %5870 = vmax.xlane.f32.xlu1 %v5869_v19  ;;  %v5814_v19 = vpop.f32.mrf.mxu1 }
 0x977   : > { %v13029_v28 = vmul.f32 0.125, %v5814_v19  ;;  %v14464_v19 = vld [vmem:[#allocation31_spill] sm:$0xff] }
 0x979   : > { %v5853_v29 = vpop.xlane.xlu1 %5852  ;;  %5337 = vmatmul.bf16.gmra.mxu3 %v14464_v19  ;;  %v14468_v19 = vld [vmem:[#allocation35_spill] sm:$0xff] }
 0x97a   : > { %v5887_v54 = vsub.f32 %v12943_v58, %v5853_v29  ;;  %v5878_v29 = vsel %vm1745_vm1, %v13029_v28, -inf  ;;  %5248 = vmatmul.bf16.gmra.mxu2 %v14463_v32 }
 0x97c   : > { %v13012_v53 = vpop.eup %10755  ;;  %v5909_v11 = vmul.f32 1.442695, %v5887_v54  ;;  %v5196_v54 = vpop.f32.mrf.mxu2 }
 0x97d   : > { %v5944_v56 = vsel %vm1745_vm1, %v13012_v53, 0.0 }
 0x97e   : > { %10757 = vpow2.f32 %v5909_v11  ;;  %5873 = vmax.xlane.f32.xlu2 %v5872_v48  ;;  %5945 = vadd.xlane.f32.xlu0 %v5944_v56  ;;  %v5285_v11 = vpop.f32.mrf.mxu3 }
 0x97f   : > { %v5286_v48 = vadd.f32 %v5285_v11, %v5196_v54  ;;  %v14466_v54 = vld [vmem:[#allocation33_spill] sm:$0xff] }
 0x981   : > { %v5856_v58 = vpop.xlane.xlu2 %5855  ;;  %6072 = vmatpush.msrb.mxu0 %v5286_v48 }
 0x982   : > { %v5888_v17 = vsub.f32 %v12947_v38, %v5856_v58 }
 0x983   : > { %6073 = vmatpush.msrb.mxu0 %v5284_v35 }
 0x984   : > { %v13025_v39 = vpop.eup %10757  ;;  %v5911_v21 = vmul.f32 1.442695, %v5888_v17  ;;  %v5199_v1 = vpop.f32.mrf.mxu2 }
 0x985   : > { %v5947_v49 = vsel %vm1745_vm1, %v13025_v39, 0.0 }
 0x986   : > { %10759 = vpow2.f32 %v5911_v21  ;;  %5948 = vadd.xlane.f32.xlu0 %v5947_v49  ;;  %5876 = vmax.xlane.f32.xlu2 %v5875_v24  ;;  %v5288_v13 = vpop.f32.mrf.mxu3 }
 0x987   : > { %v5289_v58 = vadd.f32 %v5288_v13, %v5199_v1 }
 0x989   : > { %v5859_v30 = vpop.xlane.xlu2 %5858  ;;  %5342 = vmatmul.bf16.gmra.mxu3 %v14466_v54 }
 0x98a   : > { %v5889_v38 = vsub.f32 %v12953_v37, %v5859_v30 }
 0x98c   : > { %v13032_v12 = vpop.eup %10759  ;;  %v5913_v41 = vmul.f32 1.442695, %v5889_v38  ;;  %v5201_v40 = vpop.f32.mrf.mxu2 }
 0x98d   : > { %v5950_v0 = vsel %vm1745_vm1, %v13032_v12, 0.0 }
 0x98e   : > { %10761 = vpow2.f32 %v5913_v41  ;;  %5951 = vadd.xlane.f32.xlu1 %v5950_v0  ;;  %5879 = vmax.xlane.f32.xlu0 %v5878_v29  ;;  %v5290_v57 = vpop.f32.mrf.mxu3  ;;  %v14465_v29 = vld [vmem:[#allocation32_spill] sm:$0xff] }
 0x98f   : > { %v5291_v17 = vadd.f32 %v5290_v57, %v5201_v40  ;;  %5253 = vmatmul.bf16.gmra.mxu2 %v14465_v29  ;;  %v14467_v40 = vld [vmem:[#allocation34_spill] sm:$0xff] }
 0x991   : > { %6095 = vmatpush.msrb.mxu1 %v5291_v17 }
 0x993   : > { %6096 = vmatpush.msrb.mxu1 %v5289_v58 }
 0x994   : > { %v13040_v37 = vpop.eup %10761  ;;  %v5204_v24 = vpop.f32.mrf.mxu2 }
 0x995   : > { %v5953_v56 = vsel %vm1745_vm1, %v13040_v37, 0.0 }
 0x996   : > { %5954 = vadd.xlane.f32.xlu1 %v5953_v56  ;;  %v5293_v21 = vpop.f32.mrf.mxu3 }
 0x997   : > { %v5294_v54 = vadd.f32 %v5293_v21, %v5204_v24 }
 0x999   : > { %5347 = vmatmul.bf16.gmra.mxu3 %v14468_v19 }
 0x99c   : > { %v5206_v49 = vpop.f32.mrf.mxu2 }
 0x99e   : > { %v5295_v51 = vpop.f32.mrf.mxu3 }
 0x99f   : > { %5258 = vmatmul.bf16.gmra.mxu2 %v14467_v40  ;;  %v5296_v32 = vadd.f32 %v5295_v51, %v5206_v49 }
 0x9a4   : > { %v5209_v30 = vpop.f32.mrf.mxu2 }
 0x9a6   : > { %v5298_v38 = vpop.f32.mrf.mxu3 }
 0x9a7   : > { %v5299_v19 = vadd.f32 %v5298_v38, %v5209_v30 }
 0x9ac   : > { %v5211_v41 = vpop.f32.mrf.mxu2 }
 0x9ae   : > { %v5300_v0 = vpop.f32.mrf.mxu3 }
 0x9af   : > { %v5301_v44 = vadd.f32 %v5300_v0, %v5211_v41 }
 0x9b4   : > { %v5214_v11 = vpop.f32.mrf.mxu2 }
 0x9b6   : > { %v5303_v35 = vpop.f32.mrf.mxu3 }
 0x9b7   : > { %v5304_v41 = vadd.f32 %v5303_v35, %v5214_v11 }
 0x9bc   : > { %v5216_v56 = vpop.f32.mrf.mxu2 }
 0x9be   : > { %v5305_v1 = vpop.f32.mrf.mxu3 }
 0x9c6   : > { %v5308_v18 = vpop.f32.mrf.mxu3 }
 0x9c9   : > { %v5931_v48 = vpop.xlane.xlu0 %5930 }
 0x9ca   : > { %10763 = vrcp.f32 %v5931_v48  ;;  %v5219_v48 = vpop.f32.mrf.mxu2 }
 0x9ce   : > { %v5310_v51 = vpop.f32.mrf.mxu3 }
 0x9d0   : > { %v10764_v13 = vpop.eup %10763 }
 0x9d1   : > { %v5993_v57 = vmul.f32 %v10764_v13, %v12966_v34  ;;  %v5862_v58 = vpop.xlane.xlu0 %5861  ;;  %v5934_v17 = vpop.xlane.xlu1 %5933 }
 0x9d2   : > { %v5890_v29 = vsub.f32 %v12970_v62, %v5862_v58  ;;  %10765 = vrcp.f32 %v5934_v17  ;;  %v5221_v21 = vpop.f32.mrf.mxu2 }
 0x9d3   : > { %9846 = vmatmul.msk.f32.vlgmr.msra.gmra.mxu0 %vm1745_vm1, %v5993_v57 }
 0x9d4   : > { %v5915_v31 = vmul.f32 1.442695, %v5890_v29  ;;  %6118 = vmatpush.msra.mxu0 %v5296_v32  ;;  %v5306_v32 = vadd.f32 %v5305_v1, %v5216_v56  ;;  %v5311_v56 = vadd.f32 %v5310_v51, %v5221_v21  ;;  %v9896_v21 = vld [vmem:[%s14182_s5 + $0xb0] sm:$0xf]  ;;  %v10501_v51 = vld [vmem:[%s14182_s5 + $0xb4] sm:$0xf0] }
 0x9d6   : > { %10767 = vpow2.f32 %v5915_v31  ;;  %6119 = vmatpush.msra.mxu0 %v5294_v54  ;;  %v5313_v54 = vpop.f32.mrf.mxu3 }
 0x9d8   : > { %v10766_v40 = vpop.eup %10765 }
 0x9d9   : > { %v5994_v34 = vmul.f32 %v10766_v40, %v12972_v26  ;;  %v5937_v13 = vpop.xlane.xlu1 %5936  ;;  %v5865_v20 = vpop.xlane.xlu0 %5864  ;;  %v5309_v40 = vadd.f32 %v5308_v18, %v5219_v48 }
 0x9da   : > { %10769 = vrcp.f32 %v5937_v13  ;;  %v5891_v62 = vsub.f32 %v12978_v63, %v5865_v20 }
 0x9db   : > { %9847 = vmatmul.msk.f32.vlgmr.msra.gmra.mxu1 %vm1745_vm1, %v5994_v34 }
 0x9dc   : > { %v13058_v49 = vpop.eup %10767  ;;  %v5917_v24 = vmul.f32 1.442695, %v5891_v62  ;;  %6141 = vmatpush.msra.mxu1 %v5301_v44 }
 0x9dd   : > { %v5956_v31 = vsel %vm1745_vm1, %v13058_v49, 0.0 }
 0x9de   : > { %10771 = vpow2.f32 %v5917_v24  ;;  %5957 = vadd.xlane.f32.xlu2 %v5956_v31  ;;  %6142 = vmatpush.msra.mxu1 %v5299_v19  ;;  %v5224_v19 = vpop.f32.mrf.mxu2  ;;  %v5315_v13 = vpop.f32.mrf.mxu3 }
 0x9df   : > { %v5314_v31 = vadd.f32 %v5313_v54, %v5224_v19 }
 0x9e0   : > { %v10770_v26 = vpop.eup %10769 }
 0x9e1   : > { %v5995_v30 = vmul.f32 %v10770_v26, %v12985_v7  ;;  %v5868_v38 = vpop.xlane.xlu1 %5867  ;;  %v5940_v20 = vpop.xlane.xlu2 %5939 }
 0x9e2   : > { %v5892_v63 = vsub.f32 %v12989_v16, %v5868_v38  ;;  %10773 = vrcp.f32 %v5940_v20  ;;  %v10500_v20 = vld [vmem:[%s14182_s5 + $0xb4] sm:$0xf] }
 0x9e3   : > { %9848 = vmatmul.msk.f32.vlgmr.msrb.gmra.mxu0 %vm1745_vm1, %v5995_v30 }
 0x9e4   : > { %v13065_v44 = vpop.eup %10771  ;;  %v5919_v0 = vmul.f32 1.442695, %v5892_v63  ;;  %6164 = vmatpush.msrb.mxu0 %v5306_v32  ;;  %v9898_v63 = vld [vmem:[%s14182_s5 + $0xb8] sm:$0xf0] }
 0x9e5   : > { %v5959_v29 = vsel %vm1745_vm1, %v13065_v44, 0.0 }
 0x9e6   : > { %10775 = vpow2.f32 %v5919_v0  ;;  %5960 = vadd.xlane.f32.xlu0 %v5959_v29  ;;  %6165 = vmatpush.msrb.mxu0 %v5304_v41  ;;  %v5226_v34 = vpop.f32.mrf.mxu2  ;;  %v5318_v38 = vpop.f32.mrf.mxu3  ;;  %v9901_v41 = vor.u32 %v10500_v20, %v9898_v63 }
 0x9e7   : > { %v5316_v62 = vadd.f32 %v5315_v13, %v5226_v34 }
 0x9e8   : > { %v10774_v7 = vpop.eup %10773  ;;  %6511 = vmatpush.bf16.msra.mxu3 %v9901_v41 }
 0x9e9   : > { %v5996_v16 = vmul.f32 %v10774_v7, %v12992_v52  ;;  %v5943_v1 = vpop.xlane.xlu2 %5942  ;;  %v5871_v11 = vpop.xlane.xlu1 %5870 }
 0x9ea   : > { %10777 = vrcp.f32 %v5943_v1  ;;  %v5893_v35 = vsub.f32 %v12998_v47, %v5871_v11 }
 0x9eb   : > { %9849 = vmatmul.msk.f32.vlgmr.msrb.gmra.mxu1 %vm1745_vm1, %v5996_v16 }
 0x9ec   : > { %v13072_v57 = vpop.eup %10775  ;;  %v5921_v58 = vmul.f32 1.442695, %v5893_v35  ;;  %6187 = vmatpush.msrb.mxu1 %v5311_v56 }
 0x9ed   : > { %v5962_v17 = vsel %vm1745_vm1, %v13072_v57, 0.0 }
 0x9ee   : > { %10779 = vpow2.f32 %v5921_v58  ;;  %5963 = vadd.xlane.f32.xlu1 %v5962_v17  ;;  %6188 = vmatpush.msrb.mxu1 %v5309_v40  ;;  %v5229_v30 = vpop.f32.mrf.mxu2  ;;  %v5320_v35 = vpop.f32.mrf.mxu3 }
 0x9ef   : > { %v5319_v40 = vadd.f32 %v5318_v38, %v5229_v30 }
 0x9f0   : > { %v10778_v52 = vpop.eup %10777 }
 0x9f1   : > { %v5997_v24 = vmul.f32 %v10778_v52, %v13005_v59  ;;  %v5874_v47 = vpop.xlane.xlu2 %5873  ;;  %v5946_v18 = vpop.xlane.xlu0 %5945  ;;  %v9897_v59 = vor.u32 %v10501_v51, %v9896_v21 }
 0x9f2   : > { %v5894_v48 = vsub.f32 %v13009_v27, %v5874_v47  ;;  %10781 = vrcp.f32 %v5946_v18 }
 0x9f3   : > { %9850 = vmatmul.msk.f32.vlgmr.msra.gmra.mxu0 %vm1745_vm1, %v5997_v24  ;;  %6462 = vmatpush.bf16.msra.mxu2 %v9897_v59 }
 0x9f4   : > { %v13085_v26 = vpop.eup %10779  ;;  %v5923_v32 = vmul.f32 1.442695, %v5894_v48  ;;  %6210 = vmatpush.msra.mxu0 %v5316_v62 }
 0x9f5   : > { %v5965_v27 = vsel %vm1745_vm1, %v13085_v26, 0.0 }
 0x9f6   : > { %10783 = vpow2.f32 %v5923_v32  ;;  %5966 = vadd.xlane.f32.xlu2 %v5965_v27  ;;  %6211 = vmatpush.msra.mxu0 %v5314_v31  ;;  %v5231_v11 = vpop.f32.mrf.mxu2  ;;  %v5323_v18 = vpop.f32.mrf.mxu3 }
 0x9f8   : > { %v10782_v0 = vpop.eup %10781 }
 0x9f9   : > { %v5998_v29 = vmul.f32 %v10782_v0, %v13012_v53  ;;  %v5949_v19 = vpop.xlane.xlu0 %5948  ;;  %v5877_v54 = vpop.xlane.xlu2 %5876  ;;  %v5321_v53 = vadd.f32 %v5320_v35, %v5231_v11  ;;  %v10499_v35 = vld [vmem:[%s14182_s5 + $0xa4] sm:$0xf0] }
 0x9fa   : > { %10785 = vrcp.f32 %v5949_v19  ;;  %v5895_v7 = vsub.f32 %v13018_v45, %v5877_v54 }
 0x9fb   : > { %9851 = vmatmul.msk.f32.vlgmr.msra.gmra.mxu1 %vm1745_vm1, %v5998_v29 }
 0x9fc   : > { %v13098_v56 = vpop.eup %10783  ;;  %v5925_v16 = vmul.f32 1.442695, %v5895_v7  ;;  %6233 = vmatpush.msra.mxu1 %v5321_v53 }
 0x9fd   : > { %v5968_v1 = vsel %vm1745_vm1, %v13098_v56, 0.0 }
 0x9fe   : > { %10787 = vpow2.f32 %v5925_v16  ;;  %5969 = vadd.xlane.f32.xlu0 %v5968_v1  ;;  %6234 = vmatpush.msra.mxu1 %v5319_v40  ;;  %v5234_v47 = vpop.f32.mrf.mxu2  ;;  %v5325_v32 = vpop.f32.mrf.mxu3  ;;  %v10498_v40 = vld [vmem:[%s14182_s5 + $0xa4] sm:$0xf] }
 0x9ff   : > { %v5324_v59 = vadd.f32 %v5323_v18, %v5234_v47 }
 0xa00   : > { %v10786_v58 = vpop.eup %10785 }
 0xa01   : > { %v5999_v17 = vmul.f32 %v10786_v58, %v13025_v39  ;;  %v5952_v34 = vpop.xlane.xlu1 %5951  ;;  %v5880_v45 = vpop.xlane.xlu0 %5879  ;;  %v9890_v58 = vld [vmem:[%s14182_s5 + $0xa8] sm:$0xf0] }
 0xa02   : > { %10789 = vrcp.f32 %v5952_v34  ;;  %v5896_v13 = vsub.f32 %v13029_v28, %v5880_v45  ;;  %v9880_v34 = vld [vmem:[%s14182_s5 + $0x90] sm:$0xf]  ;;  %v10497_v45 = vld [vmem:[%s14182_s5 + $0x94] sm:$0xf0] }
 0xa03   : > { %9852 = vmatmul.msk.f32.vlgmr.msrb.gmra.mxu0 %vm1745_vm1, %v5999_v17  ;;  %v9893_v17 = vor.u32 %v10498_v40, %v9890_v58 }
 0xa04   : > { %v13105_v52 = vpop.eup %10787  ;;  %v5927_v62 = vmul.f32 1.442695, %v5896_v13  ;;  %v10496_v13 = vld [vmem:[%s14182_s5 + $0x94] sm:$0xf] }
 0xa05   : > { %v5971_v24 = vsel %vm1745_vm1, %v13105_v52, 0.0  ;;  %6512 = vmatpush.bf16.msra.mxu3 %v9893_v17 }
 0xa06   : > { %10791 = vpow2.f32 %v5927_v62  ;;  %5972 = vadd.xlane.f32.xlu1 %v5971_v24  ;;  %v5236_v51 = vpop.f32.mrf.mxu2  ;;  %v5328_v20 = vpop.f32.mrf.mxu3  ;;  %v9881_v62 = vor.u32 %v10497_v45, %v9880_v34  ;;  %v9882_v24 = vld [vmem:[%s14182_s5 + $0x98] sm:$0xf0] }
 0xa07   : > { %v5326_v27 = vadd.f32 %v5325_v32, %v5236_v51  ;;  %v9874_v32 = vld [vmem:[%s14182_s5 + $0x88] sm:$0xf0] }
 0xa08   : > { %v10790_v48 = vpop.eup %10789 }
 0xa09   : > { %v6000_v39 = vmul.f32 %v10790_v48, %v13032_v12  ;;  %v5955_v31 = vpop.xlane.xlu1 %5954  ;;  %6256 = vmatpush.msrb.mxu0 %v5326_v27  ;;  %v9885_v48 = vor.u32 %v10496_v13, %v9882_v24 }
 0xa0a   : > { %10793 = vrcp.f32 %v5955_v31  ;;  %v10495_v31 = vld [vmem:[%s14182_s5 + $0x84] sm:$0xf0] }
 0xa0b   : > { %9853 = vmatmul.msk.f32.vlgmr.msrb.gmra.mxu1 %vm1745_vm1, %v6000_v39  ;;  %6257 = vmatpush.msrb.mxu0 %v5324_v59  ;;  %v9872_v39 = vld [vmem:[%s14182_s5 + $0x80] sm:$0xf] }
 0xa0c   : > { %v13111_v28 = vpop.eup %10791  ;;  %6513 = vmatpush.bf16.msra.mxu3 %v9885_v48  ;;  %v9873_v51 = vor.u32 %v10495_v31, %v9872_v39 }
 0xa0d   : > { %v5974_v21 = vsel %vm1745_vm1, %v13111_v28, 0.0 }
 0xa0e   : > { %5975 = vadd.xlane.f32.xlu2 %v5974_v21  ;;  %v5239_v12 = vpop.f32.mrf.mxu2  ;;  %v5330_v41 = vpop.f32.mrf.mxu3  ;;  %v10494_v21 = vld [vmem:[%s14182_s5 + $0x84] sm:$0xf] }
 0xa0f   : > { %v5329_v0 = vadd.f32 %v5328_v20, %v5239_v12  ;;  %v9877_v59 = vor.u32 %v10494_v21, %v9874_v32  ;;  %v10508_v32 = vld [vmem:[%s14179_s2 + $0x1b0] sm:$0xff] }
 0xa10   : > { %v10794_v30 = vpop.eup %10793 }
 0xa11   : > { %v6001_v38 = vmul.f32 %v10794_v30, %v13040_v37  ;;  %v9888_v37 = vld [vmem:[%s14182_s5 + $0xa0] sm:$0xf]  ;;  %6514 = vmatpush.bf16.msra.mxu3 %v9877_v59 }
 0xa12   : > { %v9889_v53 = vor.u32 %v10499_v35, %v9888_v37 }
 0xa13   : > { %9854 = vmatmul.msk.f32.vlgmr.msra.gmra.mxu0 %vm1745_vm1, %v6001_v38 }
 0xa14   : > { %6463 = vmatpush.bf16.msra.mxu2 %v9889_v53 }
 0xa16   : > { %v5241_v63 = vpop.f32.mrf.mxu2  ;;  %v5333_v54 = vpop.f32.mrf.mxu3 }
 0xa17   : > { %v5331_v29 = vadd.f32 %v5330_v41, %v5241_v63 }
 0xa18   : > { %6464 = vmatpush.bf16.msra.mxu2 %v9881_v62 }
 0xa19   : > { %6279 = vmatpush.msrb.mxu1 %v5331_v29 }
 0xa1b   : > { %6280 = vmatpush.msrb.mxu1 %v5329_v0 }
 0xa1c   : > { %6465 = vmatpush.bf16.msra.mxu2 %v9873_v51 }
 0xa1e   : > { %v5244_v19 = vpop.f32.mrf.mxu2  ;;  %v5335_v16 = vpop.f32.mrf.mxu3 }
 0xa1f   : > { %v5334_v1 = vadd.f32 %v5333_v54, %v5244_v19 }
 0xa26   : > { %v5246_v7 = vpop.f32.mrf.mxu2  ;;  %v5338_v18 = vpop.f32.mrf.mxu3 }
 0xa27   : > { %v5336_v11 = vadd.f32 %v5335_v16, %v5246_v7 }
 0xa29   : > { %6302 = vmatpush.msra.mxu0 %v5336_v11 }
 0xa2b   : > { %6303 = vmatpush.msra.mxu0 %v5334_v1 }
 0xa2e   : > { %v5249_v47 = vpop.f32.mrf.mxu2  ;;  %v5340_v30 = vpop.f32.mrf.mxu3 }
 0xa2f   : > { %v5339_v11 = vadd.f32 %v5338_v18, %v5249_v47 }
 0xa36   : > { %v5251_v27 = vpop.f32.mrf.mxu2  ;;  %v5343_v12 = vpop.f32.mrf.mxu3 }
 0xa37   : > { %v5341_v54 = vadd.f32 %v5340_v30, %v5251_v27 }
 0xa3e   : > { %v5254_v38 = vpop.f32.mrf.mxu2  ;;  %v5345_v41 = vpop.f32.mrf.mxu3 }
 0xa46   : > { %v5256_v20 = vpop.f32.mrf.mxu2  ;;  %v5348_v35 = vpop.f32.mrf.mxu3 }
 0xa47   : > { %v5346_v53 = vadd.f32 %v5345_v41, %v5256_v20  ;;  %v10507_v20 = vld [vmem:[%s14179_s2 + $0x1a8] sm:$0xff] }
 0xa4e   : > { %v5259_v37 = vpop.f32.mrf.mxu2  ;;  %v5350_v45 = vpop.f32.mrf.mxu3 }
 0xa4f   : > { %v5349_v31 = vadd.f32 %v5348_v35, %v5259_v37  ;;  %v10515_v35 = vld [vmem:[%s14179_s2 + $0x1e8] sm:$0xff] }
 0xa50   : > { %v6029_v29 = vpop.f32.mrf.mxu0 }
 0xa51   : > { %v5958_v63 = vpop.xlane.xlu2 %5957 }
 0xa52   : > { %10795 = vrcp.f32 %v5958_v63  ;;  %v10506_v63 = vld [vmem:[%s14179_s2 + $0x1a0] sm:$0xff] }
 0xa56   : > { %v5261_v34 = vpop.f32.mrf.mxu2 }
 0xa57   : > { %v5351_v47 = vadd.f32 %v5350_v45, %v5261_v34  ;;  %v10511_v34 = vld [vmem:[%s14179_s2 + $0x1c8] sm:$0xff]  ;;  %v10510_v45 = vld [vmem:[%s14179_s2 + $0x1c0] sm:$0xff] }
 0xa58   : > { %v10796_v0 = vpop.eup %10795  ;;  %v6052_v19 = vpop.f32.mrf.mxu1 }
 0xa59   : > { %v6002_v7 = vmul.f32 %v10796_v0, %v13058_v49  ;;  %v6377_v16 = vpack.c.bf16 %v6052_v19, %v6029_v29  ;;  %v5961_v1 = vpop.xlane.xlu0 %5960  ;;  %v5344_v49 = vadd.f32 %v5343_v12, %v5254_v38  ;;  %v10517_v29 = vld [vmem:[%s14179_s2 + $0x1f8] sm:$0xff] }
 0xa5a   : > { %10797 = vrcp.f32 %v5961_v1  ;;  %v10505_v19 = vld [vmem:[%s14179_s2 + $0x198] sm:$0xff] }
 0xa5b   : > { %9855 = vmatmul.msk.f32.vlgmr.msra.gmra.mxu1 %vm1745_vm1, %v6002_v7  ;;  %9902 = vmatmul.msk.bf16.vlgmr.msra.gmra.mxu2 %vm1264_vm0, %v6377_v16 }
 0xa5c   : > { %9910 = vmatmul.msk.bf16.vlgmr.msra.gmra.mxu3 %vm1264_vm0, %v6377_v16  ;;  %6325 = vmatpush.msra.mxu1 %v5341_v54  ;;  %v10516_v54 = vld [vmem:[%s14179_s2 + $0x1f0] sm:$0xff] }
 0xa5e   : > { %6326 = vmatpush.msra.mxu1 %v5339_v11 }
 0xa60   : > { %v10798_v40 = vpop.eup %10797  ;;  %v6075_v62 = vpop.f32.mrf.mxu0 }
 0xa61   : > { %v6003_v58 = vmul.f32 %v10798_v40, %v13065_v44  ;;  %v5964_v17 = vpop.xlane.xlu1 %5963  ;;  %v10503_v40 = vld [vmem:[%s14179_s2 + $0x188] sm:$0xff] }
 0xa62   : > { %10799 = vrcp.f32 %v5964_v17  ;;  %v14469_v17 = vld [vmem:[#allocation13_spill] sm:$0xff] }
 0xa63   : > { %9856 = vmatmul.msk.f32.vlgmr.msrb.gmra.mxu0 %vm1745_vm1, %v6003_v58  ;;  %v10513_v58 = vld [vmem:[%s14179_s2 + $0x1d8] sm:$0xff] }
 0xa64   : > { %6348 = vmatpush.msrb.mxu0 %v5346_v53  ;;  %v10502_v53 = vld [vmem:[%s14179_s2 + $0x180] sm:$0xff] }
 0xa66   : > { %6349 = vmatpush.msrb.mxu0 %v5344_v49  ;;  %v10512_v49 = vld [vmem:[%s14179_s2 + $0x1d0] sm:$0xff] }
 0xa68   : > { %v10800_v13 = vpop.eup %10799  ;;  %v6098_v24 = vpop.f32.mrf.mxu1 }
 0xa69   : > { %v6004_v18 = vmul.f32 %v10800_v13, %v13072_v57  ;;  %v6378_v48 = vpack.c.bf16 %v6098_v24, %v6075_v62  ;;  %v5967_v39 = vpop.xlane.xlu2 %5966  ;;  %v10509_v57 = vld [vmem:[%s14179_s2 + $0x1b8] sm:$0xff]  ;;  %v14470_v13 = vld [vmem:[#allocation14_spill] sm:$0xff]  ;;  %v14471_v62 = vld [vmem:[#allocation15_spill] sm:$0xff] }
 0xa6a   : > { %10801 = vrcp.f32 %v5967_v39  ;;  %v14472_v24 = vld [vmem:[#allocation16_spill] sm:$0xff] }
 0xa6b   : > { %9857 = vmatmul.msk.f32.vlgmr.msrb.gmra.mxu1 %vm1745_vm1, %v6004_v18  ;;  %9903 = vmatmul.msk.bf16.gmra.mxu2 %vm1264_vm0, %v6378_v48  ;;  %v14474_v18 = vld [vmem:[#allocation18_spill] sm:$0xff]  ;;  %v14476_v39 = vld [vmem:[#allocation20_spill] sm:$0xff] }
 0xa6c   : > { %9911 = vmatmul.msk.bf16.gmra.mxu3 %vm1264_vm0, %v6378_v48  ;;  %6371 = vmatpush.msrb.mxu1 %v5351_v47  ;;  %v14473_v47 = vld [vmem:[#allocation17_spill] sm:$0xff]  ;;  %v14475_v48 = vld [vmem:[#allocation19_spill] sm:$0xff] }
 0xa6e   : > { %6372 = vmatpush.msrb.mxu1 %v5349_v31  ;;  %v14477_v31 = vld [vmem:[#allocation5_spill] sm:$0xff] }
 0xa70   : > { %v10802_v44 = vpop.eup %10801  ;;  %v6121_v27 = vpop.f32.mrf.mxu0 }
 0xa71   : > { %v6005_v21 = vmul.f32 %v10802_v44, %v13085_v26  ;;  %v5970_v51 = vpop.xlane.xlu0 %5969 }
 0xa72   : > { %10803 = vrcp.f32 %v5970_v51 }
 0xa73   : > { %9858 = vmatmul.msk.f32.vlgmr.msra.gmra.mxu0 %vm1745_vm1, %v6005_v21 }
 0xa74   : > { %6717 = vmatpush.bf16.msra.mxu0 %v10509_v57  ;;  %v10525_v57 = vld [vmem:[%s14180_s3 + $0x1b8] sm:$0xff] }
 0xa75   : > { %6944 = vmatpush.bf16.msrb.mxu2 %v10525_v57  ;;  %v14494_v57 = vld [vmem:[#allocation8_spill] sm:$0xff] }
 0xa78   : > { %v10804_v59 = vpop.eup %10803  ;;  %v6144_v30 = vpop.f32.mrf.mxu1  ;;  %6718 = vmatpush.bf16.msra.mxu0 %v10508_v32  ;;  %v10533_v32 = vld [vmem:[%s14180_s3 + $0x1f8] sm:$0xff] }
 0xa79   : > { %v6006_v38 = vmul.f32 %v10804_v59, %v13098_v56  ;;  %v6379_v26 = vpack.c.bf16 %v6144_v30, %v6121_v27  ;;  %v5973_v12 = vpop.xlane.xlu1 %5972  ;;  %v14478_v59 = vld [vmem:[#allocation21_spill] sm:$0xff]  ;;  %v14479_v27 = vld [vmem:[#allocation36_spill] sm:$0xff]  ;;  %7033 = vmatpush.bf16.msrb.mxu3 %v10533_v32 }
 0xa7a   : > { %10805 = vrcp.f32 %v5973_v12  ;;  %v4424_v30 = vadd.f32 %v14479_v27, %v14478_v59  ;;  %v14495_v32 = vld [vmem:[#allocation9_spill] sm:$0xff]  ;;  %v10540_v59 = vld [vmem:[%s14181_s4 + $0x1b0] sm:$0xff] }
 0xa7b   : > { %9859 = vmatmul.msk.f32.vlgmr.msra.gmra.mxu1 %vm1745_vm1, %v6006_v38  ;;  %9904 = vmatmul.msk.bf16.gmra.mxu2 %vm1264_vm0, %v6379_v26  ;;  %v14480_v38 = vld [vmem:[#allocation22_spill] sm:$0xff] }
 0xa7c   : > { %9912 = vmatmul.msk.bf16.gmra.mxu3 %vm1264_vm0, %v6379_v26  ;;  %6719 = vmatpush.bf16.msra.mxu0 %v10507_v20  ;;  %v14481_v26 = vld [vmem:[#allocation39_spill] sm:$0xff] }
 0xa7d   : > { %6766 = vmatpush.bf16.msra.mxu1 %v10517_v29  ;;  %v4473_v12 = vadd.f32 %v14481_v26, %v14480_v38  ;;  %v10532_v29 = vld [vmem:[%s14180_s3 + $0x1f0] sm:$0xff] }
 0xa7e   : > { %7034 = vmatpush.bf16.msrb.mxu3 %v10532_v29  ;;  %v14498_v29 = vld [vmem:[#allocation71_spill] sm:$0xff] }
 0xa80   : > { %v10806_v41 = vpop.eup %10805  ;;  %6720 = vmatpush.bf16.msra.mxu0 %v10506_v63  ;;  %v6167_v16 = vpop.f32.mrf.mxu0 }
 0xa81   : > { %v6007_v56 = vmul.f32 %v10806_v41, %v13105_v52  ;;  %v5976_v0 = vpop.xlane.xlu2 %5975  ;;  %v10504_v52 = vld [vmem:[%s14179_s2 + $0x190] sm:$0xff]  ;;  %6767 = vmatpush.bf16.msra.mxu1 %v10516_v54  ;;  %v10531_v54 = vld [vmem:[%s14180_s3 + $0x1e8] sm:$0xff] }
 0xa82   : > { %10807 = vrcp.f32 %v5976_v0  ;;  %v10524_v0 = vld [vmem:[%s14180_s3 + $0x1b0] sm:$0xff]  ;;  %7035 = vmatpush.bf16.msrb.mxu3 %v10531_v54 }
 0xa83   : > { %9860 = vmatmul.msk.f32.vlgmr.msrb.gmra.mxu0 %vm1745_vm1, %v6007_v56  ;;  %6945 = vmatpush.bf16.msrb.mxu2 %v10524_v0  ;;  %v10539_v0 = vld [vmem:[%s14181_s4 + $0x1a8] sm:$0xff] }
 0xa84   : > { %6721 = vmatpush.bf16.msra.mxu0 %v10505_v19  ;;  %v10523_v19 = vld [vmem:[%s14180_s3 + $0x1a8] sm:$0xff] }
 0xa85   : > { %6768 = vmatpush.bf16.msra.mxu1 %v10515_v35  ;;  %v10522_v35 = vld [vmem:[%s14180_s3 + $0x1a0] sm:$0xff] }
 0xa87   : > { %6946 = vmatpush.bf16.msrb.mxu2 %v10523_v19  ;;  %v14499_v19 = vld [vmem:[#allocation42_spill] sm:$0xff] }
 0xa88   : > { %v10808_v7 = vpop.eup %10807  ;;  %v6190_v1 = vpop.f32.mrf.mxu1  ;;  %6722 = vmatpush.bf16.msra.mxu0 %v10504_v52  ;;  %v14484_v52 = vld [vmem:[#allocation6_spill] sm:$0xff]  ;;  %v4434_v54 = vadd.f32 %v14499_v19, %v14498_v29 }
 0xa89   : > { %v6008_v11 = vmul.f32 %v10808_v7, %v13111_v28  ;;  %v6380_v37 = vpack.c.bf16 %v6190_v1, %v6167_v16  ;;  %v10514_v28 = vld [vmem:[%s14179_s2 + $0x1e0] sm:$0xff]  ;;  %v14485_v7 = vld [vmem:[#allocation7_spill] sm:$0xff] }
 0xa8a   : > { %6769 = vmatpush.bf16.msra.mxu1 %v10514_v28 }
 0xa8b   : > { %9861 = vmatmul.msk.f32.vlgmr.msrb.gmra.mxu1 %vm1745_vm1, %v6008_v11  ;;  %9905 = vmatmul.msk.bf16.gmra.mxu2 %vm1264_vm0, %v6380_v37 }
 0xa8c   : > { %9913 = vmatmul.msk.bf16.gmra.mxu3 %vm1264_vm0, %v6380_v37  ;;  %6723 = vmatpush.bf16.msra.mxu0 %v10503_v40  ;;  %v10530_v40 = vld [vmem:[%s14180_s3 + $0x1e0] sm:$0xff] }
 0xa8d   : > { %6947 = vmatpush.bf16.msrb.mxu2 %v10522_v35  ;;  %7036 = vmatpush.bf16.msrb.mxu3 %v10530_v40 }
 0xa8e   : > { %6770 = vmatpush.bf16.msra.mxu1 %v10513_v58  ;;  %v10529_v58 = vld [vmem:[%s14180_s3 + $0x1d8] sm:$0xff] }
 0xa90   : > { %6724 = vmatpush.bf16.msra.mxu0 %v10502_v53  ;;  %v6213_v44 = vpop.f32.mrf.mxu0  ;;  %v10521_v53 = vld [vmem:[%s14180_s3 + $0x198] sm:$0xff] }
 0xa91   : > { %6948 = vmatpush.bf16.msrb.mxu2 %v10521_v53  ;;  %7037 = vmatpush.bf16.msrb.mxu3 %v10529_v58  ;;  %v10549_v58 = vld [vmem:[%s14181_s4 + $0x1f8] sm:$0xff] }
 0xa92   : > { %6771 = vmatpush.bf16.msra.mxu1 %v10512_v49  ;;  %v14489_v49 = vld [vmem:[#allocation38_spill] sm:$0xff] }
 0xa93   : > { %6725 = vmatmul.bf16.vlgmr.msra.gmra.mxu0 %v14469_v17  ;;  %v14488_v17 = vld [vmem:[#allocation24_spill] sm:$0xff] }
 0xa96   : > { %6772 = vmatpush.bf16.msra.mxu1 %v10511_v34  ;;  %v4429_v34 = vadd.f32 %v14489_v49, %v14488_v17  ;;  %v10537_v17 = vld [vmem:[%s14181_s4 + $0x198] sm:$0xff]  ;;  %v14504_v49 = vld [vmem:[#allocation10_spill] sm:$0xff] }
 0xa9a   : > { %6773 = vmatpush.bf16.msra.mxu1 %v10510_v45  ;;  %v14490_v45 = vld [vmem:[#allocation25_spill] sm:$0xff] }
 0xa9d   : > { %6774 = vmatmul.bf16.vlgmr.msra.gmra.mxu1 %v14470_v13  ;;  %v14491_v13 = vld [vmem:[#allocation43_spill] sm:$0xff] }
 0xa9e   : > { %7340 = vmatpush.bf16.msrb.mxu1 %v10549_v58 }
 0xaa3   : > { %6730 = vmatmul.bf16.gmra.mxu0 %v14471_v62  ;;  %v4478_v62 = vadd.f32 %v14491_v13, %v14490_v45  ;;  %v10548_v45 = vld [vmem:[%s14181_s4 + $0x1f0] sm:$0xff] }
 0xaa4   : > { %v10536_v13 = vld [vmem:[%s14181_s4 + $0x190] sm:$0xff]  ;;  %7341 = vmatpush.bf16.msrb.mxu1 %v10548_v45 }
 0xaad   : > { %6779 = vmatmul.bf16.gmra.mxu1 %v14472_v24 }
 0xab3   : > { %6735 = vmatmul.bf16.gmra.mxu0 %v14473_v47 }
 0xabd   : > { %6784 = vmatmul.bf16.gmra.mxu1 %v14474_v18 }
 0xac3   : > { %6740 = vmatmul.bf16.gmra.mxu0 %v14475_v48 }
 0xacd   : > { %6789 = vmatmul.bf16.gmra.mxu1 %v14476_v39  ;;  %v10520_v39 = vld [vmem:[%s14180_s3 + $0x190] sm:$0xff] }
 0xace   : > { %6949 = vmatpush.bf16.msrb.mxu2 %v10520_v39 }
 0xad3   : > { %6745 = vmatmul.bf16.gmra.mxu0 %v14477_v31  ;;  %v10528_v31 = vld [vmem:[%s14180_s3 + $0x1d0] sm:$0xff] }
 0xad4   : > { %7038 = vmatpush.bf16.msrb.mxu3 %v10528_v31 }
 0xad8   : > { %v6236_v21 = vpop.f32.mrf.mxu1 }
 0xad9   : > { %v6381_v51 = vpack.c.bf16 %v6236_v21, %v6213_v44  ;;  %v10541_v44 = vld [vmem:[%s14181_s4 + $0x1b8] sm:$0xff]  ;;  %v10519_v21 = vld [vmem:[%s14180_s3 + $0x188] sm:$0xff] }
 0xada   : > { %7251 = vmatpush.bf16.msrb.mxu0 %v10541_v44  ;;  %6950 = vmatpush.bf16.msrb.mxu2 %v10519_v21  ;;  %v10547_v44 = vld [vmem:[%s14181_s4 + $0x1e8] sm:$0xff] }
 0xadb   : > { %9906 = vmatmul.msk.bf16.gmra.mxu2 %vm1264_vm0, %v6381_v51  ;;  %9914 = vmatmul.msk.bf16.gmra.mxu3 %vm1264_vm0, %v6381_v51  ;;  %v10527_v51 = vld [vmem:[%s14180_s3 + $0x1c8] sm:$0xff] }
 0xadc   : > { %7039 = vmatpush.bf16.msrb.mxu3 %v10527_v51  ;;  %v10535_v21 = vld [vmem:[%s14181_s4 + $0x188] sm:$0xff]  ;;  %7342 = vmatpush.bf16.msrb.mxu1 %v10547_v44  ;;  %v14508_v51 = vld [vmem:[#allocation76_spill] sm:$0xff] }
 0xadd   : > { %6794 = vmatmul.bf16.gmra.mxu1 %v14484_v52  ;;  %v10538_v52 = vld [vmem:[%s14181_s4 + $0x1a0] sm:$0xff] }
 0xade   : > { %v6467_v20 = vpop.f32.mrf.mxu2  ;;  %7252 = vmatpush.bf16.msrb.mxu0 %v10540_v59  ;;  %v10546_v59 = vld [vmem:[%s14181_s4 + $0x1e0] sm:$0xff] }
 0xadf   : > { %v13244_v63 = vadd.f32 %v6467_v20, %v4424_v30  ;;  %v6516_v41 = vpop.f32.mrf.mxu3  ;;  %v10526_v20 = vld [vmem:[%s14180_s3 + $0x1c0] sm:$0xff] }
 0xae0   : > { %v13246_v56 = vadd.f32 %v6516_v41, %v4473_v12  ;;  %v6259_v11 = vpop.f32.mrf.mxu0  ;;  %v10518_v12 = vld [vmem:[%s14180_s3 + $0x180] sm:$0xff]  ;;  %7040 = vmatpush.bf16.msrb.mxu3 %v10526_v20  ;;  %7343 = vmatpush.bf16.msrb.mxu1 %v10546_v59  ;;  %v14519_v59 = vld [vmem:[#allocation80_spill] sm:$0xff] }
 0xae1   : > { %14482 = vst [vmem:[#allocation13_spill] sm:$0xff] %v13244_v63  ;;  %6951 = vmatpush.bf16.msrb.mxu2 %v10518_v12  ;;  %v14511_v12 = vld [vmem:[#allocation50_spill] sm:$0xff] }
 0xae2   : > { %14483 = vst [vmem:[#allocation14_spill] sm:$0xff] %v13246_v56  ;;  %7253 = vmatpush.bf16.msrb.mxu0 %v10539_v0 }
 0xae3   : > { %6750 = vmatmul.bf16.gmra.mxu0 %v14485_v7  ;;  %v14500_v7 = vld [vmem:[#allocation72_spill] sm:$0xff] }
 0xae6   : > { %v13262_v16 = vpop.f32.mrf.mxu2  ;;  %7254 = vmatpush.bf16.msrb.mxu0 %v10538_v52 }
 0xae7   : > { %14486 = vst [vmem:[#allocation15_spill] sm:$0xff] %v13262_v16  ;;  %v13264_v1 = vpop.f32.mrf.mxu3 }
 0xae8   : > { %14487 = vst [vmem:[#allocation16_spill] sm:$0xff] %v13264_v1  ;;  %v6282_v37 = vpop.f32.mrf.mxu1 }
 0xae9   : > { %v6382_v28 = vpack.c.bf16 %v6282_v37, %v6259_v11  ;;  %v14501_v11 = vld [vmem:[#allocation47_spill] sm:$0xff] }
 0xaea   : > { %v4483_v37 = vadd.f32 %v14501_v11, %v14500_v7  ;;  %7255 = vmatpush.bf16.msrb.mxu0 %v10537_v17  ;;  %v14514_v7 = vld [vmem:[#allocation12_spill] sm:$0xff]  ;;  %v10544_v11 = vld [vmem:[%s14181_s4 + $0x1d0] sm:$0xff] }
 0xaeb   : > { %9907 = vmatmul.msk.bf16.gmra.mxu2 %vm1264_vm0, %v6382_v28  ;;  %9915 = vmatmul.msk.bf16.gmra.mxu3 %vm1264_vm0, %v6382_v28 }
 0xaed   : > { %6799 = vmatmul.bf16.gmra.mxu1 %v14494_v57  ;;  %v14509_v57 = vld [vmem:[#allocation46_spill] sm:$0xff] }
 0xaee   : > { %v6472_v24 = vpop.f32.mrf.mxu2  ;;  %7256 = vmatpush.bf16.msrb.mxu0 %v10536_v13 }
 0xaef   : > { %v13284_v47 = vadd.f32 %v6472_v24, %v4429_v34  ;;  %v6521_v18 = vpop.f32.mrf.mxu3  ;;  %v14505_v34 = vld [vmem:[#allocation11_spill] sm:$0xff] }
 0xaf0   : > { %v13286_v48 = vadd.f32 %v6521_v18, %v4478_v62  ;;  %v6305_v38 = vpop.f32.mrf.mxu0 }
 0xaf1   : > { %14492 = vst [vmem:[#allocation17_spill] sm:$0xff] %v13284_v47 }
 0xaf2   : > { %14493 = vst [vmem:[#allocation18_spill] sm:$0xff] %v13286_v48  ;;  %7257 = vmatpush.bf16.msrb.mxu0 %v10535_v21 }
 0xaf3   : > { %6755 = vmatmul.bf16.gmra.mxu0 %v14495_v32  ;;  %v4439_v32 = vadd.f32 %v14509_v57, %v14508_v51  ;;  %v14518_v57 = vld [vmem:[#allocation54_spill] sm:$0xff] }
 0xaf6   : > { %v13308_v27 = vpop.f32.mrf.mxu2 }
 0xaf7   : > { %14496 = vst [vmem:[#allocation19_spill] sm:$0xff] %v13308_v27  ;;  %v13310_v30 = vpop.f32.mrf.mxu3 }
 0xaf8   : > { %14497 = vst [vmem:[#allocation20_spill] sm:$0xff] %v13310_v30  ;;  %v6328_v26 = vpop.f32.mrf.mxu1 }
 0xaf9   : > { %v6383_v41 = vpack.c.bf16 %v6328_v26, %v6305_v38  ;;  %v10534_v38 = vld [vmem:[%s14181_s4 + $0x180] sm:$0xff]  ;;  %v14510_v26 = vld [vmem:[#allocation75_spill] sm:$0xff] }
 0xafa   : > { %v4488_v20 = vadd.f32 %v14511_v12, %v14510_v26  ;;  %7258 = vmatpush.bf16.msrb.mxu0 %v10534_v38  ;;  %v14520_v38 = vld [vmem:[#allocation51_spill] sm:$0xff] }
 0xafb   : > { %9908 = vmatmul.msk.bf16.gmra.mxu2 %vm1264_vm0, %v6383_v41  ;;  %9916 = vmatmul.msk.bf16.gmra.mxu3 %vm1264_vm0, %v6383_v41 }
 0xafd   : > { %6804 = vmatmul.bf16.gmra.mxu1 %v14504_v49 }
 0xafe   : > { %v6477_v35 = vpop.f32.mrf.mxu2 }
 0xaff   : > { %v13330_v40 = vadd.f32 %v6477_v35, %v4434_v54  ;;  %v6526_v28 = vpop.f32.mrf.mxu3  ;;  %v10545_v54 = vld [vmem:[%s14181_s4 + $0x1d8] sm:$0xff] }
 0xb00   : > { %v13332_v53 = vadd.f32 %v6526_v28, %v4483_v37  ;;  %v6351_v18 = vpop.f32.mrf.mxu0  ;;  %7344 = vmatpush.bf16.msrb.mxu1 %v10545_v54  ;;  %v10543_v37 = vld [vmem:[%s14181_s4 + $0x1c8] sm:$0xff]  ;;  %v10542_v28 = vld [vmem:[%s14181_s4 + $0x1c0] sm:$0xff] }
 0xb01   : > { %14502 = vst [vmem:[#allocation5_spill] sm:$0xff] %v13330_v40 }
 0xb02   : > { %14503 = vst [vmem:[#allocation21_spill] sm:$0xff] %v13332_v53 }
 0xb03   : > { %6760 = vmatmul.bf16.gmra.mxu0 %v14505_v34 }
 0xb04   : > { %7345 = vmatpush.bf16.msrb.mxu1 %v10544_v11 }
 0xb06   : > { %v13348_v62 = vpop.f32.mrf.mxu2 }
 0xb07   : > { %14506 = vst [vmem:[#allocation36_spill] sm:$0xff] %v13348_v62  ;;  %v13350_v24 = vpop.f32.mrf.mxu3 }
 0xb08   : > { %14507 = vst [vmem:[#allocation22_spill] sm:$0xff] %v13350_v24  ;;  %v6374_v39 = vpop.f32.mrf.mxu1  ;;  %7346 = vmatpush.bf16.msrb.mxu1 %v10543_v37 }
 0xb09   : > { %v6384_v31 = vpack.c.bf16 %v6374_v39, %v6351_v18 }
 0xb0b   : > { %9909 = vmatmul.msk.bf16.gmra.mxu2 %vm1264_vm0, %v6384_v31  ;;  %9917 = vmatmul.msk.bf16.gmra.mxu3 %vm1264_vm0, %v6384_v31 }
 0xb0c   : > { %7347 = vmatpush.bf16.msrb.mxu1 %v10542_v28  ;;  %v14525_v28 = vld [vmem:[#allocation83_spill] sm:$0xff] }
 0xb0d   : > { %6809 = vmatmul.bf16.gmra.mxu1 %v14514_v7 }
 0xb0e   : > { %v6482_v41 = vpop.f32.mrf.mxu2 }
 0xb0f   : > { %v13370_v0 = vadd.f32 %v6482_v41, %v4439_v32  ;;  %v6531_v29 = vpop.f32.mrf.mxu3 }
 0xb10   : > { %v13372_v19 = vadd.f32 %v6531_v29, %v4488_v20  ;;  %v13377_v52 = vpop.f32.mrf.mxu0 }
 0xb11   : > { %14512 = vst [vmem:[#allocation39_spill] sm:$0xff] %v13370_v0 }
 0xb12   : > { %14513 = vst [vmem:[#allocation6_spill] sm:$0xff] %v13372_v19 }
 0xb13   : > { %7259 = vmatmul.bf16.vlgmr.msrb.gmra.mxu0 %v11177_v60 }
 0xb16   : > { %v13436_v44 = vpop.f32.mrf.mxu2 }
 0xb17   : > { %14515 = vst [vmem:[#allocation7_spill] sm:$0xff] %v13436_v44 }
 0xb18   : > { %v13387_v35 = vpop.f32.mrf.mxu0 }
 0xb1a   : > { %v13394_v58 = vpop.f32.mrf.mxu1 }
 0xb1b   : > { %6952 = vmatmul.bf16.vlgmr.msrb.gmra.mxu2 %v11177_v60  ;;  %7041 = vmatmul.bf16.vlgmr.msrb.gmra.mxu3 %v11179_v61 }
 0xb1d   : > { %7348 = vmatmul.bf16.vlgmr.msrb.gmra.mxu1 %v11179_v61 }
 0xb20   : > { %v13396_v17 = vpop.f32.mrf.mxu0 }
 0xb22   : > { %v13400_v49 = vpop.f32.mrf.mxu1 }
 0xb23   : > { %7264 = vmatmul.bf16.gmra.mxu0 %v11187_v2 }
 0xb28   : > { %v13402_v34 = vpop.f32.mrf.mxu0 }
 0xb2a   : > { %v13406_v60 = vpop.f32.mrf.mxu1 }
 0xb2b   : > { %6957 = vmatmul.bf16.gmra.mxu2 %v11187_v2  ;;  %7046 = vmatmul.bf16.gmra.mxu3 %v11189_v3 }
 0xb2d   : > { %7353 = vmatmul.bf16.gmra.mxu1 %v11189_v3 }
 0xb30   : > { %v13408_v45 = vpop.f32.mrf.mxu0 }
 0xb32   : > { %v13412_v13 = vpop.f32.mrf.mxu1 }
 0xb33   : > { %7269 = vmatmul.bf16.gmra.mxu0 %v11197_v8 }
 0xb38   : > { %v13414_v61 = vpop.f32.mrf.mxu0 }
 0xb3a   : > { %v13418_v18 = vpop.f32.mrf.mxu1 }
 0xb3b   : > { %6962 = vmatmul.bf16.gmra.mxu2 %v11197_v8  ;;  %7051 = vmatmul.bf16.gmra.mxu3 %v11199_v9 }
 0xb3d   : > { %7358 = vmatmul.bf16.gmra.mxu1 %v11199_v9  ;;  %v13438_v9 = vpop.f32.mrf.mxu3 }
 0xb3e   : > { %14516 = vst [vmem:[#allocation24_spill] sm:$0xff] %v13438_v9 }
 0xb40   : > { %v13420_v2 = vpop.f32.mrf.mxu0 }
 0xb42   : > { %v13424_v39 = vpop.f32.mrf.mxu1 }
 0xb43   : > { %7274 = vmatmul.bf16.gmra.mxu0 %v11207_v14 }
 0xb48   : > { %v13426_v3 = vpop.f32.mrf.mxu0 }
 0xb4a   : > { %v13430_v31 = vpop.f32.mrf.mxu1 }
 0xb4b   : > { %6967 = vmatmul.bf16.gmra.mxu2 %v11207_v14  ;;  %7056 = vmatmul.bf16.gmra.mxu3 %v11209_v15  ;;  %v14517_v14 = vld [vmem:[#allocation79_spill] sm:$0xff] }
 0xb4c   : > { %v4493_v32 = vadd.f32 %v14518_v57, %v14517_v14  ;;  %v14526_v14 = vld [vmem:[#allocation57_spill] sm:$0xff] }
 0xb4d   : > { %7363 = vmatmul.bf16.gmra.mxu1 %v11209_v15  ;;  %v4444_v15 = vadd.f32 %v14520_v38, %v14519_v59  ;;  %v4498_v57 = vadd.f32 %v14526_v14, %v14525_v28  ;;  %v14528_v59 = vld [vmem:[#allocation55_spill] sm:$0xff] }
 0xb50   : > { %v13432_v8 = vpop.f32.mrf.mxu0 }
 0xb52   : > { %v13440_v21 = vpop.f32.mrf.mxu1 }
 0xb53   : > { %7279 = vmatmul.bf16.gmra.mxu0 %v11217_v22 }
 0xb58   : > { %v13442_v51 = vpop.f32.mrf.mxu0 }
 0xb5a   : > { %v13454_v29 = vpop.f32.mrf.mxu1 }
 0xb5b   : > { %6972 = vmatmul.bf16.gmra.mxu2 %v11217_v22  ;;  %7061 = vmatmul.bf16.gmra.mxu3 %v11219_v23 }
 0xb5d   : > { %7368 = vmatmul.bf16.gmra.mxu1 %v11219_v23 }
 0xb5e   : > { %v6487_v26 = vpop.f32.mrf.mxu2  ;;  %v6536_v12 = vpop.f32.mrf.mxu3 }
 0xb5f   : > { %v13450_v20 = vadd.f32 %v6487_v26, %v4444_v15  ;;  %v13452_v41 = vadd.f32 %v6536_v12, %v4493_v32  ;;  %v14527_v32 = vld [vmem:[#allocation84_spill] sm:$0xff] }
 0xb60   : > { %v13456_v54 = vpop.f32.mrf.mxu0  ;;  %v4449_v23 = vadd.f32 %v14528_v59, %v14527_v32  ;;  %v14534_v59 = vld [vmem:[#allocation60_spill] sm:$0xff] }
 0xb61   : > { %14521 = vst [vmem:[#allocation38_spill] sm:$0xff] %v13450_v20 }
 0xb62   : > { %14522 = vst [vmem:[#allocation25_spill] sm:$0xff] %v13452_v41  ;;  %v13464_v11 = vpop.f32.mrf.mxu1 }
 0xb63   : > { %7284 = vmatmul.bf16.gmra.mxu0 %v11241_v42 }
 0xb66   : > { %v13460_v22 = vpop.f32.mrf.mxu2  ;;  %v13462_v7 = vpop.f32.mrf.mxu3 }
 0xb67   : > { %14523 = vst [vmem:[#allocation43_spill] sm:$0xff] %v13460_v22 }
 0xb68   : > { %14524 = vst [vmem:[#allocation8_spill] sm:$0xff] %v13462_v7  ;;  %v13466_v37 = vpop.f32.mrf.mxu0 }
 0xb6a   : > { %v13478_v7 = vpop.f32.mrf.mxu1 }
 0xb6b   : > { %6977 = vmatmul.bf16.gmra.mxu2 %v11241_v42  ;;  %7066 = vmatmul.bf16.gmra.mxu3 %v11243_v43 }
 0xb6d   : > { %7373 = vmatmul.bf16.gmra.mxu1 %v11243_v43 }
 0xb6e   : > { %v6492_v38 = vpop.f32.mrf.mxu2  ;;  %v6541_v15 = vpop.f32.mrf.mxu3 }
 0xb6f   : > { %v13474_v26 = vadd.f32 %v6492_v38, %v4449_v23  ;;  %v13476_v12 = vadd.f32 %v6541_v15, %v4498_v57  ;;  %v14533_v57 = vld [vmem:[#allocation87_spill] sm:$0xff]  ;;  %v14535_v38 = vld [vmem:[#allocation88_spill] sm:$0xff]  ;;  %v14536_v15 = vld [vmem:[#allocation61_spill] sm:$0xff] }
 0xb70   : > { %v13480_v22 = vpop.f32.mrf.mxu0  ;;  %v4454_v23 = vadd.f32 %v14534_v59, %v14533_v57  ;;  %v4503_v43 = vadd.f32 %v14536_v15, %v14535_v38  ;;  %v14545_v15 = vld [vmem:[#allocation92_spill] sm:$0xff] }
 0xb71   : > { %14529 = vst [vmem:[#allocation9_spill] sm:$0xff] %v13474_v26 }
 0xb72   : > { %14530 = vst [vmem:[#allocation71_spill] sm:$0xff] %v13476_v12  ;;  %v13488_v14 = vpop.f32.mrf.mxu1 }
 0xb73   : > { %7289 = vmatmul.bf16.gmra.mxu0 %v11265_v4 }
 0xb76   : > { %v13484_v42 = vpop.f32.mrf.mxu2  ;;  %v13486_v28 = vpop.f32.mrf.mxu3 }
 0xb77   : > { %14531 = vst [vmem:[#allocation42_spill] sm:$0xff] %v13484_v42 }
 0xb78   : > { %14532 = vst [vmem:[#allocation72_spill] sm:$0xff] %v13486_v28  ;;  %v13490_v32 = vpop.f32.mrf.mxu0 }
 0xb7a   : > { %v13502_v28 = vpop.f32.mrf.mxu1 }
 0xb7b   : > { %6982 = vmatmul.bf16.gmra.mxu2 %v11265_v4  ;;  %7071 = vmatmul.bf16.gmra.mxu3 %v11267_v5 }
 0xb7d   : > { %7378 = vmatmul.bf16.gmra.mxu1 %v11267_v5 }
 0xb7e   : > { %v6497_v12 = vpop.f32.mrf.mxu2  ;;  %v6546_v26 = vpop.f32.mrf.mxu3 }
 0xb7f   : > { %v13498_v41 = vadd.f32 %v6497_v12, %v4454_v23  ;;  %v13500_v42 = vadd.f32 %v6546_v26, %v4503_v43  ;;  %v14543_v26 = vld [vmem:[#allocation91_spill] sm:$0xff]  ;;  %v14544_v12 = vld [vmem:[#allocation64_spill] sm:$0xff]  ;;  %v14546_v43 = vld [vmem:[#allocation65_spill] sm:$0xff] }
 0xb80   : > { %v13504_v20 = vpop.f32.mrf.mxu0  ;;  %v4459_v23 = vadd.f32 %v14544_v12, %v14543_v26  ;;  %v4508_v5 = vadd.f32 %v14546_v43, %v14545_v15 }
 0xb81   : > { %14537 = vst [vmem:[#allocation47_spill] sm:$0xff] %v13498_v41 }
 0xb82   : > { %14538 = vst [vmem:[#allocation10_spill] sm:$0xff] %v13500_v42  ;;  %v13512_v59 = vpop.f32.mrf.mxu1 }
 0xb83   : > { %14539 = vst [vmem:[#allocation11_spill] sm:$0xff] %v13504_v20  ;;  %7294 = vmatmul.bf16.gmra.mxu0 %v11289_v33 }
 0xb86   : > { %v13508_v4 = vpop.f32.mrf.mxu2  ;;  %v13510_v57 = vpop.f32.mrf.mxu3 }
 0xb87   : > { %14540 = vst [vmem:[#allocation76_spill] sm:$0xff] %v13508_v4 }
 0xb88   : > { %14541 = vst [vmem:[#allocation46_spill] sm:$0xff] %v13510_v57  ;;  %v13514_v38 = vpop.f32.mrf.mxu0 }
 0xb89   : > { %14542 = vst [vmem:[#allocation75_spill] sm:$0xff] %v13514_v38 }
 0xb8a   : > { %v13526_v57 = vpop.f32.mrf.mxu1 }
 0xb8b   : > { %6987 = vmatmul.bf16.gmra.mxu2 %v11289_v33  ;;  %7076 = vmatmul.bf16.gmra.mxu3 %v11291_v36  ;;  %14549 = vst [vmem:[#allocation79_spill] sm:$0xff] %v13526_v57 }
 0xb8d   : > { %7383 = vmatmul.bf16.gmra.mxu1 %v11291_v36 }
 0xb8e   : > { %v6502_v42 = vpop.f32.mrf.mxu2  ;;  %v6551_v41 = vpop.f32.mrf.mxu3 }
 0xb8f   : > { %v13522_v44 = vadd.f32 %v6502_v42, %v4459_v23  ;;  %v13524_v4 = vadd.f32 %v6551_v41, %v4508_v5 }
 0xb90   : > { %v13528_v9 = vpop.f32.mrf.mxu0 }
 0xb91   : > { %14547 = vst [vmem:[#allocation50_spill] sm:$0xff] %v13522_v44 }
 0xb92   : > { %14548 = vst [vmem:[#allocation12_spill] sm:$0xff] %v13524_v4  ;;  %v13536_v12 = vpop.f32.mrf.mxu1 }
 0xb93   : > { %7299 = vmatmul.bf16.gmra.mxu0 %v11313_v6  ;;  %14552 = vst [vmem:[#allocation51_spill] sm:$0xff] %v13536_v12 }
 0xb96   : > { %v13532_v33 = vpop.f32.mrf.mxu2  ;;  %v13534_v26 = vpop.f32.mrf.mxu3 }
 0xb97   : > { %14550 = vst [vmem:[#allocation54_spill] sm:$0xff] %v13532_v33 }
 0xb98   : > { %14551 = vst [vmem:[#allocation80_spill] sm:$0xff] %v13534_v26  ;;  %v13538_v15 = vpop.f32.mrf.mxu0 }
 0xb9a   : > { %v13542_v23 = vpop.f32.mrf.mxu1 }
 0xb9b   : > { %6992 = vmatmul.bf16.gmra.mxu2 %v11313_v6  ;;  %7081 = vmatmul.bf16.gmra.mxu3 %v14400_v25 }
 0xb9d   : > { %7388 = vmatmul.bf16.gmra.mxu1 %v14400_v25 }
 0xb9e   : > { %v6953_v41 = vpop.f32.mrf.mxu2  ;;  %v7042_v42 = vpop.f32.mrf.mxu3 }
 0xb9f   : > { %v7043_v4 = vadd.f32 %v7042_v42, %v6953_v41 }
 0xba0   : > { %v13544_v43 = vpop.f32.mrf.mxu0 }
 0xba1   : > { %14553 = vst [vmem:[#allocation83_spill] sm:$0xff] %v13544_v43 }
 0xba2   : > { %v13548_v33 = vpop.f32.mrf.mxu1 }
 0xba3   : > { %7304 = vmatmul.bf16.gmra.mxu0 %v14401_v46 }
 0xba6   : > { %v6955_v36 = vpop.f32.mrf.mxu2  ;;  %v7044_v5 = vpop.f32.mrf.mxu3 }
 0xba7   : > { %v7045_v26 = vadd.f32 %v7044_v5, %v6955_v36 }
 0xba8   : > { %v13551_v6 = vpop.f32.mrf.mxu0 }
 0xba9   : > { %10206 = vmatpush.xpose.msk.msra.mxu2 %vm1264_vm0, %v7045_v26 }
 0xbaa   : > { %v13556_v0 = vpop.f32.mrf.mxu1 }
 0xbab   : > { %6997 = vmatmul.bf16.gmra.mxu2 %v14401_v46  ;;  %7086 = vmatmul.bf16.gmra.mxu3 %v14403_v10  ;;  %14554 = vst [vmem:[#allocation57_spill] sm:$0xff] %v13556_v0 }
 0xbad   : > { %10207 = vmatpush.xpose.msk.msra.mxu2 %vm1264_vm0, %v7043_v4  ;;  %7393 = vmatmul.bf16.gmra.mxu1 %v14403_v10 }
 0xbae   : > { %v6958_v44 = vpop.f32.mrf.mxu2  ;;  %v7047_v25 = vpop.f32.mrf.mxu3 }
 0xbaf   : > { %v7048_v4 = vadd.f32 %v7047_v25, %v6958_v44 }
 0xbb0   : > { %v13558_v19 = vpop.f32.mrf.mxu0 }
 0xbb1   : > { %14555 = vst [vmem:[#allocation84_spill] sm:$0xff] %v13558_v19 }
 0xbb2   : > { %v13562_v41 = vpop.f32.mrf.mxu1 }
 0xbb3   : > { %7309 = vmatmul.bf16.gmra.mxu0 %v14407_v50 }
 0xbb6   : > { %v6960_v26 = vpop.f32.mrf.mxu2  ;;  %v7049_v36 = vpop.f32.mrf.mxu3 }
 0xbb7   : > { %v7050_v5 = vadd.f32 %v7049_v36, %v6960_v26  ;;  %v14559_v26 = vld [vmem:[#allocation26_spill] sm:$0xff] }
 0xbb8   : > { %v13565_v46 = vpop.f32.mrf.mxu0 }
 0xbb9   : > { %10209 = vmatpush.xpose.msk.msra.mxu3 %vm1264_vm0, %v7050_v5  ;;  %14556 = vst [vmem:[#allocation55_spill] sm:$0xff] %v13565_v46 }
 0xbba   : > { %v13570_v62 = vpop.f32.mrf.mxu1 }
 0xbbb   : > { %7002 = vmatmul.bf16.gmra.mxu2 %v14407_v50  ;;  %7091 = vmatmul.bf16.gmra.mxu3 %v14408_v55  ;;  %14557 = vst [vmem:[#allocation87_spill] sm:$0xff] %v13570_v62 }
 0xbbd   : > { %10210 = vmatpush.xpose.msk.msra.mxu3 %vm1264_vm0, %v7048_v4  ;;  %7398 = vmatmul.bf16.gmra.mxu1 %v14408_v55  ;;  %v14562_v4 = vld [vmem:[#allocation27_spill] sm:$0xff] }
 0xbbe   : > { %v6963_v42 = vpop.f32.mrf.mxu2  ;;  %v7052_v10 = vpop.f32.mrf.mxu3 }
 0xbbf   : > { %v7053_v25 = vadd.f32 %v7052_v10, %v6963_v42 }
 0xbc0   : > { %v13572_v24 = vpop.f32.mrf.mxu0 }
 0xbc1   : > { %14558 = vst [vmem:[#allocation60_spill] sm:$0xff] %v13572_v24 }
 0xbc2   : > { %v13576_v44 = vpop.f32.mrf.mxu1 }
 0xbc3   : > { %7314 = vmatmul.bf16.gmra.mxu0 %v14559_v26  ;;  %14560 = vst [vmem:[#allocation88_spill] sm:$0xff] %v13576_v44 }
 0xbc6   : > { %v6965_v36 = vpop.f32.mrf.mxu2  ;;  %v7054_v5 = vpop.f32.mrf.mxu3 }
 0xbc7   : > { %v7055_v40 = vadd.f32 %v7054_v5, %v6965_v36  ;;  %v14564_v36 = vld [vmem:[#allocation28_spill] sm:$0xff] }
 0xbc8   : > { %v13579_v50 = vpop.f32.mrf.mxu0 }
 0xbc9   : > { %10212 = vmatpush.xpose.msk.msrb.mxu2 %vm1264_vm0, %v7055_v40  ;;  %14561 = vst [vmem:[#allocation61_spill] sm:$0xff] %v13579_v50 }
 0xbca   : > { %v13584_v27 = vpop.f32.mrf.mxu1 }
 0xbcb   : > { %7007 = vmatmul.bf16.gmra.mxu2 %v14559_v26  ;;  %7096 = vmatmul.bf16.gmra.mxu3 %v14562_v4  ;;  %14563 = vst [vmem:[#allocation91_spill] sm:$0xff] %v13584_v27 }
 0xbcd   : > { %10213 = vmatpush.xpose.msk.msrb.mxu2 %vm1264_vm0, %v7053_v25  ;;  %7403 = vmatmul.bf16.gmra.mxu1 %v14562_v4  ;;  %v14566_v25 = vld [vmem:[#allocation29_spill] sm:$0xff] }
 0xbce   : > { %v6968_v53 = vpop.f32.mrf.mxu2  ;;  %v7057_v55 = vpop.f32.mrf.mxu3 }
 0xbcf   : > { %v7058_v26 = vadd.f32 %v7057_v55, %v6968_v53  ;;  %v14569_v55 = vld [vmem:[#allocation31_spill] sm:$0xff] }
 0xbd0   : > { %v13586_v30 = vpop.f32.mrf.mxu0 }
 0xbd2   : > { %v13590_v42 = vpop.f32.mrf.mxu1 }
 0xbd3   : > { %7319 = vmatmul.bf16.gmra.mxu0 %v14564_v36  ;;  %14565 = vst [vmem:[#allocation64_spill] sm:$0xff] %v13590_v42 }
 0xbd6   : > { %v6970_v40 = vpop.f32.mrf.mxu2  ;;  %v7059_v5 = vpop.f32.mrf.mxu3 }
 0xbd7   : > { %v7060_v47 = vadd.f32 %v7059_v5, %v6970_v40  ;;  %v14568_v40 = vld [vmem:[#allocation30_spill] sm:$0xff] }
 0xbd8   : > { %v13593_v10 = vpop.f32.mrf.mxu0 }
 0xbd9   : > { %10215 = vmatpush.xpose.msk.msrb.mxu3 %vm1264_vm0, %v7060_v47 }
 0xbda   : > { %v13598_v16 = vpop.f32.mrf.mxu1 }
 0xbdb   : > { %7012 = vmatmul.bf16.gmra.mxu2 %v14564_v36  ;;  %7101 = vmatmul.bf16.gmra.mxu3 %v14566_v25 }
 0xbdd   : > { %10216 = vmatpush.xpose.msk.msrb.mxu3 %vm1264_vm0, %v7058_v26  ;;  %7408 = vmatmul.bf16.gmra.mxu1 %v14566_v25  ;;  %v14572_v25 = vld [vmem:[#allocation32_spill] sm:$0xff] }
 0xbde   : > { %v6973_v48 = vpop.f32.mrf.mxu2  ;;  %v7062_v4 = vpop.f32.mrf.mxu3 }
 0xbe0   : > { %v13600_v1 = vpop.f32.mrf.mxu0 }
 0xbe1   : > { %14567 = vst [vmem:[#allocation92_spill] sm:$0xff] %v13600_v1 }
 0xbe2   : > { %v13604_v63 = vpop.f32.mrf.mxu1 }
 0xbe3   : > { %7324 = vmatmul.bf16.gmra.mxu0 %v14568_v40 }
 0xbe6   : > { %v6975_v47 = vpop.f32.mrf.mxu2  ;;  %v7064_v5 = vpop.f32.mrf.mxu3 }
 0xbe7   : > { %v7065_v43 = vadd.f32 %v7064_v5, %v6975_v47 }
 0xbe8   : > { %v13606_v53 = vpop.f32.mrf.mxu0 }
 0xbea   : > { %v13610_v56 = vpop.f32.mrf.mxu1 }
 0xbeb   : > { %7017 = vmatmul.bf16.gmra.mxu2 %v14568_v40  ;;  %7106 = vmatmul.bf16.gmra.mxu3 %v14569_v55  ;;  %14570 = vst [vmem:[#allocation65_spill] sm:$0xff] %v13610_v56  ;;  %v14575_v40 = vld [vmem:[#allocation33_spill] sm:$0xff] }
 0xbed   : > { %7413 = vmatmul.bf16.gmra.mxu1 %v14569_v55  ;;  %v14578_v55 = vld [vmem:[#allocation34_spill] sm:$0xff] }
 0xbee   : > { %v6978_v36 = vpop.f32.mrf.mxu2  ;;  %v7067_v26 = vpop.f32.mrf.mxu3 }
 0xbf0   : > { %v13612_v27 = vpop.f32.mrf.mxu0 }
 0xbf1   : > { %14571 = vst [vmem:[#allocation26_spill] sm:$0xff] %v13612_v27 }
 0xbf2   : > { %v13616_v38 = vpop.f32.mrf.mxu1 }
 0xbf3   : > { %7329 = vmatmul.bf16.gmra.mxu0 %v14572_v25  ;;  %14573 = vst [vmem:[#allocation27_spill] sm:$0xff] %v13616_v38 }
 0xbf6   : > { %v6980_v24 = vpop.f32.mrf.mxu2  ;;  %v7069_v12 = vpop.f32.mrf.mxu3 }
 0xbf7   : > { %v7070_v38 = vadd.f32 %v7069_v12, %v6980_v24  ;;  %v6781_v24 = vadd.f32 %v13406_v60, %v13396_v17  ;;  %v6788_v60 = vadd.f32 %v13424_v39, %v13414_v61  ;;  %v6791_v61 = vadd.f32 %v13430_v31, %v13420_v2 }
 0xbf8   : > { %v13618_v42 = vpop.f32.mrf.mxu0  ;;  %v6798_v2 = vadd.f32 %v13464_v11, %v13442_v51  ;;  %v6801_v51 = vadd.f32 %v13478_v7, %v13456_v54  ;;  %v6803_v54 = vadd.f32 %v13488_v14, %v13466_v37  ;;  %v7352_v37 = vadd.f32 %v13548_v33, %v13538_v15 }
 0xbf9   : > { %14574 = vst [vmem:[#allocation28_spill] sm:$0xff] %v13618_v42  ;;  %v6806_v14 = vadd.f32 %v13502_v28, %v13480_v22  ;;  %v7370_v33 = vadd.f32 %v13598_v16, %v13586_v30  ;;  %v6808_v16 = vadd.f32 %v13512_v59, %v13490_v32 }
 0xbfa   : > { %v13622_v19 = vpop.f32.mrf.mxu1  ;;  %v14585_v30 = vld [vmem:[#allocation27_spill] sm:$0xff] }
 0xbfb   : > { %7022 = vmatmul.bf16.gmra.mxu2 %v14572_v25  ;;  %7111 = vmatmul.bf16.gmra.mxu3 %v14575_v40  ;;  %14576 = vst [vmem:[#allocation29_spill] sm:$0xff] %v13622_v19  ;;  %v14581_v25 = vld [vmem:[#allocation35_spill] sm:$0xff] }
 0xbfd   : > { %7418 = vmatmul.bf16.gmra.mxu1 %v14575_v40 }
 0xbfe   : > { %v6983_v50 = vpop.f32.mrf.mxu2  ;;  %v7072_v62 = vpop.f32.mrf.mxu3 }
 0xc00   : > { %v13624_v57 = vpop.f32.mrf.mxu0 }
 0xc01   : > { %14577 = vst [vmem:[#allocation30_spill] sm:$0xff] %v13624_v57 }
 0xc02   : > { %v13628_v44 = vpop.f32.mrf.mxu1 }
 0xc03   : > { %7334 = vmatmul.bf16.gmra.mxu0 %v14578_v55  ;;  %14579 = vst [vmem:[#allocation31_spill] sm:$0xff] %v13628_v44  ;;  %v6776_v44 = vadd.f32 %v13394_v58, %v13377_v52 }
 0xc06   : > { %v6985_v27 = vpop.f32.mrf.mxu2  ;;  %v7074_v20 = vpop.f32.mrf.mxu3 }
 0xc08   : > { %v13630_v46 = vpop.f32.mrf.mxu0 }
 0xc09   : > { %14580 = vst [vmem:[#allocation32_spill] sm:$0xff] %v13630_v46 }
 0xc0a   : > { %v13634_v1 = vpop.f32.mrf.mxu1 }
 0xc0b   : > { %7027 = vmatmul.bf16.gmra.mxu2 %v14578_v55  ;;  %7116 = vmatmul.bf16.gmra.mxu3 %v14581_v25  ;;  %14582 = vst [vmem:[#allocation33_spill] sm:$0xff] %v13634_v1  ;;  %v6778_v55 = vadd.f32 %v13400_v49, %v13387_v35  ;;  %v6783_v35 = vadd.f32 %v13412_v13, %v13402_v34 }
 0xc0c   : > { %v7075_v49 = vadd.f32 %v7074_v20, %v6985_v27  ;;  %v6786_v27 = vadd.f32 %v13418_v18, %v13408_v45 }
 0xc0d   : > { %7423 = vmatmul.bf16.gmra.mxu1 %v14581_v25  ;;  %v7063_v25 = vadd.f32 %v7062_v4, %v6973_v48  ;;  %v7073_v48 = vadd.f32 %v7072_v62, %v6983_v50  ;;  %v6796_v62 = vadd.f32 %v13454_v29, %v13432_v8 }
 0xc0e   : > { %v6988_v42 = vpop.f32.mrf.mxu2  ;;  %v7077_v56 = vpop.f32.mrf.mxu3 }
 0xc10   : > { %v13636_v19 = vpop.f32.mrf.mxu0 }
 0xc11   : > { %14583 = vst [vmem:[#allocation34_spill] sm:$0xff] %v13636_v19  ;;  %v7068_v19 = vadd.f32 %v7067_v26, %v6978_v36 }
 0xc12   : > { %v13639_v0 = vpop.f32.mrf.mxu1 }
 0xc13   : > { %14584 = vst [vmem:[#allocation35_spill] sm:$0xff] %v13639_v0 }
 0xc16   : > { %v6990_v40 = vpop.f32.mrf.mxu2  ;;  %v7079_v57 = vpop.f32.mrf.mxu3 }
 0xc18   : > { %v13645_v46 = vpop.f32.mrf.mxu0 }
 0xc1a   : > { %v13653_v52 = vpop.f32.mrf.mxu1 }
 0xc1b   : > { %10208 = vmatmul.msk.f32.vlgmr.msra.gmra.mxu2 %vm1264_vm0, %v6776_v44  ;;  %10211 = vmatmul.msk.f32.vlgmr.msra.gmra.mxu3 %vm1264_vm0, %v6778_v55 }
 0xc1c   : > { %10218 = vmatpush.xpose.msk.msra.mxu2 %vm1264_vm0, %v7065_v43  ;;  %10221 = vmatpush.xpose.msk.msra.mxu3 %vm1264_vm0, %v7070_v38  ;;  %v7080_v38 = vadd.f32 %v7079_v57, %v6990_v40 }
 0xc1e   : > { %v6993_v1 = vpop.f32.mrf.mxu2  ;;  %v7082_v0 = vpop.f32.mrf.mxu3 }
 0xc20   : > { %10219 = vmatpush.xpose.msk.msra.mxu2 %vm1264_vm0, %v7063_v25  ;;  %10222 = vmatpush.xpose.msk.msra.mxu3 %vm1264_vm0, %v7068_v19  ;;  %v13659_v58 = vpop.f32.mrf.mxu0  ;;  %v7078_v19 = vadd.f32 %v7077_v56, %v6988_v42  ;;  %v7083_v56 = vadd.f32 %v7082_v0, %v6993_v1  ;;  %v6793_v1 = vadd.f32 %v13440_v21, %v13426_v3 }
 0xc22   : > { %v13667_v34 = vpop.f32.mrf.mxu1 }
 0xc23   : > { %10214 = vmatmul.msk.f32.vlgmr.msrb.gmra.mxu2 %vm1264_vm0, %v6781_v24  ;;  %10217 = vmatmul.msk.f32.vlgmr.msrb.gmra.mxu3 %vm1264_vm0, %v6783_v35 }
 0xc24   : > { %10224 = vmatpush.xpose.msk.msrb.mxu2 %vm1264_vm0, %v7075_v49  ;;  %10227 = vmatpush.xpose.msk.msrb.mxu3 %vm1264_vm0, %v7080_v38 }
 0xc26   : > { %v6995_v12 = vpop.f32.mrf.mxu2  ;;  %v7084_v43 = vpop.f32.mrf.mxu3 }
 0xc27   : > { %v7085_v17 = vadd.f32 %v7084_v43, %v6995_v12 }
 0xc28   : > { %10225 = vmatpush.xpose.msk.msrb.mxu2 %vm1264_vm0, %v7073_v48  ;;  %10228 = vmatpush.xpose.msk.msrb.mxu3 %vm1264_vm0, %v7078_v19  ;;  %v13674_v13 = vpop.f32.mrf.mxu0 }
 0xc29   : > { %10230 = vmatpush.xpose.msk.msra.mxu0 %vm1264_vm0, %v7085_v17 }
 0xc2a   : > { %v13682_v45 = vpop.f32.mrf.mxu1 }
 0xc2b   : > { %10220 = vmatmul.msk.f32.vlgmr.msra.gmra.mxu2 %vm1264_vm0, %v6786_v27  ;;  %10223 = vmatmul.msk.f32.vlgmr.msra.gmra.mxu3 %vm1264_vm0, %v6788_v60 }
 0xc2d   : > { %10231 = vmatpush.xpose.msk.msra.mxu0 %vm1264_vm0, %v7083_v56 }
 0xc2e   : > { %v6998_v20 = vpop.f32.mrf.mxu2  ;;  %v7087_v57 = vpop.f32.mrf.mxu3 }
 0xc2f   : > { %v7088_v50 = vadd.f32 %v7087_v57, %v6998_v20 }
 0xc30   : > { %10232 = vmatmul.msk.f32.vlgmr.msra.gmra.mxu0 %vm1264_vm0, %v6796_v62  ;;  %v13688_v0 = vpop.f32.mrf.mxu0 }
 0xc32   : > { %v13692_v29 = vpop.f32.mrf.mxu1 }
 0xc33   : > { %10226 = vmatmul.msk.f32.vlgmr.msrb.gmra.mxu2 %vm1264_vm0, %v6791_v61  ;;  %10229 = vmatmul.msk.f32.vlgmr.msrb.gmra.mxu3 %vm1264_vm0, %v6793_v1  ;;  %v7372_v61 = vadd.f32 %v13604_v63, %v13593_v10 }
 0xc36   : > { %v7000_v18 = vpop.f32.mrf.mxu2  ;;  %v7089_v39 = vpop.f32.mrf.mxu3 }
 0xc37   : > { %v7090_v8 = vadd.f32 %v7089_v39, %v7000_v18  ;;  %v7350_v39 = vadd.f32 %v13542_v23, %v13528_v9  ;;  %v7357_v9 = vadd.f32 %v13562_v41, %v13551_v6  ;;  %v14588_v6 = vld [vmem:[#allocation92_spill] sm:$0xff]  ;;  %v14589_v41 = vld [vmem:[#allocation65_spill] sm:$0xff] }
 0xc38   : > { %v13695_v44 = vpop.f32.mrf.mxu0 }
 0xc39   : > { %10233 = vmatpush.xpose.msk.msra.mxu1 %vm1264_vm0, %v7090_v8 }
 0xc3a   : > { %v13701_v21 = vpop.f32.mrf.mxu1 }
 0xc3d   : > { %10234 = vmatpush.xpose.msk.msra.mxu1 %vm1264_vm0, %v7088_v50 }
 0xc3e   : > { %v7003_v3 = vpop.f32.mrf.mxu2  ;;  %v7092_v31 = vpop.f32.mrf.mxu3 }
 0xc3f   : > { %v7093_v26 = vadd.f32 %v7092_v31, %v7003_v3 }
 0xc40   : > { %10235 = vmatmul.msk.f32.vlgmr.msra.gmra.mxu1 %vm1264_vm0, %v6798_v2  ;;  %v13703_v42 = vpop.f32.mrf.mxu0  ;;  %v7377_v2 = vadd.f32 %v14585_v30, %v13606_v53 }
 0xc42   : > { %v13705_v36 = vpop.f32.mrf.mxu1 }
 0xc46   : > { %v7005_v4 = vpop.f32.mrf.mxu2  ;;  %v7094_v47 = vpop.f32.mrf.mxu3 }
 0xc47   : > { %v7095_v5 = vadd.f32 %v7094_v47, %v7005_v4  ;;  %v14586_v4 = vld [vmem:[#allocation83_spill] sm:$0xff]  ;;  %v14587_v47 = vld [vmem:[#allocation57_spill] sm:$0xff] }
 0xc48   : > { %v13708_v40 = vpop.f32.mrf.mxu0 }
 0xc49   : > { %10236 = vmatpush.xpose.msk.msra.mxu2 %vm1264_vm0, %v7095_v5  ;;  %v7355_v5 = vadd.f32 %v14587_v47, %v14586_v4  ;;  %v14600_v47 = vld [vmem:[#allocation61_spill] sm:$0xff] }
 0xc4a   : > { %v13714_v25 = vpop.f32.mrf.mxu1 }
 0xc4d   : > { %10237 = vmatpush.xpose.msk.msra.mxu2 %vm1264_vm0, %v7093_v26 }
 0xc4e   : > { %v7008_v11 = vpop.f32.mrf.mxu2  ;;  %v7097_v55 = vpop.f32.mrf.mxu3 }
 0xc4f   : > { %v7098_v19 = vadd.f32 %v7097_v55, %v7008_v11 }
 0xc50   : > { %10238 = vmatmul.msk.f32.vlgmr.msra.gmra.mxu2 %vm1264_vm0, %v6801_v51  ;;  %v13716_v24 = vpop.f32.mrf.mxu0  ;;  %v7375_v51 = vadd.f32 %v14589_v41, %v14588_v6 }
 0xc52   : > { %v13718_v48 = vpop.f32.mrf.mxu1 }
 0xc56   : > { %v7010_v35 = vpop.f32.mrf.mxu2  ;;  %v7099_v49 = vpop.f32.mrf.mxu3 }
 0xc57   : > { %v7100_v38 = vadd.f32 %v7099_v49, %v7010_v35  ;;  %v14590_v49 = vld [vmem:[#allocation55_spill] sm:$0xff] }
 0xc58   : > { %v13724_v43 = vpop.f32.mrf.mxu0 }
 0xc59   : > { %10239 = vmatpush.xpose.msk.msra.mxu3 %vm1264_vm0, %v7100_v38  ;;  %v14591_v38 = vld [vmem:[#allocation88_spill] sm:$0xff] }
 0xc5a   : > { %v13727_v17 = vpop.f32.mrf.mxu1 }
 0xc5d   : > { %10240 = vmatpush.xpose.msk.msra.mxu3 %vm1264_vm0, %v7098_v19  ;;  %v7362_v19 = vadd.f32 %v14591_v38, %v14590_v49  ;;  %v14607_v49 = vld [vmem:[#allocation35_spill] sm:$0xff] }
 0xc5e   : > { %v7013_v7 = vpop.f32.mrf.mxu2  ;;  %v7102_v12 = vpop.f32.mrf.mxu3 }
 0xc5f   : > { %v7103_v57 = vadd.f32 %v7102_v12, %v7013_v7  ;;  %v14593_v7 = vld [vmem:[#allocation79_spill] sm:$0xff] }
 0xc60   : > { %10241 = vmatmul.msk.f32.vlgmr.msra.gmra.mxu3 %vm1264_vm0, %v6803_v54  ;;  %v13732_v20 = vpop.f32.mrf.mxu0  ;;  %v14592_v54 = vld [vmem:[#allocation11_spill] sm:$0xff] }
 0xc61   : > { %v6811_v12 = vadd.f32 %v14593_v7, %v14592_v54 }
 0xc62   : > { %v13729_v62 = vpop.f32.mrf.mxu1 }
 0xc66   : > { %v7015_v27 = vpop.f32.mrf.mxu2  ;;  %v7104_v60 = vpop.f32.mrf.mxu3 }
 0xc67   : > { %v7105_v56 = vadd.f32 %v7104_v60, %v7015_v27  ;;  %v14594_v27 = vld [vmem:[#allocation28_spill] sm:$0xff]  ;;  %v14595_v60 = vld [vmem:[#allocation31_spill] sm:$0xff] }
 0xc68   : > { %v13746_v15 = vpop.f32.mrf.mxu0 }
 0xc69   : > { %10242 = vmatpush.xpose.msk.msrb.mxu0 %vm1264_vm0, %v7105_v56  ;;  %v7382_v56 = vadd.f32 %v14595_v60, %v14594_v27  ;;  %v14608_v27 = vld [vmem:[#allocation30_spill] sm:$0xff]  ;;  %v14609_v60 = vld [vmem:[#allocation33_spill] sm:$0xff] }
 0xc6a   : > { %v7414_v8 = vpop.f32.mrf.mxu1 }
 0xc6d   : > { %10243 = vmatpush.xpose.msk.msrb.mxu0 %vm1264_vm0, %v7103_v57 }
 0xc6e   : > { %v7018_v1 = vpop.f32.mrf.mxu2  ;;  %v7107_v18 = vpop.f32.mrf.mxu3 }
 0xc6f   : > { %v7108_v50 = vadd.f32 %v7107_v18, %v7018_v1 }
 0xc70   : > { %10244 = vmatmul.msk.f32.vlgmr.msrb.gmra.mxu0 %vm1264_vm0, %v6806_v14  ;;  %v7330_v23 = vpop.f32.mrf.mxu0  ;;  %v14596_v14 = vld [vmem:[#allocation84_spill] sm:$0xff] }
 0xc71   : > { %8102 = vmatpush.msra.mxu0 %v7352_v37 }
 0xc72   : > { %v13748_v10 = vpop.f32.mrf.mxu1 }
 0xc73   : > { %8103 = vmatpush.msra.mxu0 %v7350_v39 }
 0xc75   : > { %8194 = vmatpush.msrb.mxu0 %v7372_v61  ;;  %v14597_v61 = vld [vmem:[#allocation87_spill] sm:$0xff] }
 0xc76   : > { %v7020_v22 = vpop.f32.mrf.mxu2  ;;  %v7109_v28 = vpop.f32.mrf.mxu3  ;;  %v7360_v1 = vadd.f32 %v14597_v61, %v14596_v14 }
 0xc77   : > { %8195 = vmatpush.msrb.mxu0 %v7370_v33  ;;  %v7110_v63 = vadd.f32 %v7109_v28, %v7020_v22  ;;  %v14598_v33 = vld [vmem:[#allocation26_spill] sm:$0xff]  ;;  %v14599_v22 = vld [vmem:[#allocation29_spill] sm:$0xff] }
 0xc78   : > { %v13763_v55 = vpop.f32.mrf.mxu0  ;;  %v7380_v28 = vadd.f32 %v14599_v22, %v14598_v33 }
 0xc79   : > { %10245 = vmatpush.xpose.msk.msrb.mxu1 %vm1264_vm0, %v7110_v63 }
 0xc7a   : > { %v7419_v26 = vpop.f32.mrf.mxu1 }
 0xc7d   : > { %10246 = vmatpush.xpose.msk.msrb.mxu1 %vm1264_vm0, %v7108_v50 }
 0xc7e   : > { %v7023_v3 = vpop.f32.mrf.mxu2  ;;  %v7112_v31 = vpop.f32.mrf.mxu3 }
 0xc7f   : > { %v7113_v35 = vadd.f32 %v7112_v31, %v7023_v3 }
 0xc80   : > { %10247 = vmatmul.msk.f32.vlgmr.msrb.gmra.mxu1 %vm1264_vm0, %v6808_v16  ;;  %v7335_v18 = vpop.f32.mrf.mxu0  ;;  %v13782_v16 = vadd.f32 %v7414_v8, %v13732_v20  ;;  %v14604_v8 = vld [vmem:[#allocation60_spill] sm:$0xff] }
 0xc81   : > { %8125 = vmatpush.msra.mxu1 %v7357_v9 }
 0xc82   : > { %v13765_v53 = vpop.f32.mrf.mxu1 }
 0xc83   : > { %8126 = vmatpush.msra.mxu1 %v7355_v5  ;;  %v14601_v5 = vld [vmem:[#allocation64_spill] sm:$0xff] }
 0xc84   : > { %v7367_v6 = vadd.f32 %v14601_v5, %v14600_v47 }
 0xc85   : > { %8217 = vmatpush.msrb.mxu1 %v7377_v2  ;;  %v13784_v2 = vadd.f32 %v7419_v26, %v7330_v23  ;;  %v14605_v23 = vld [vmem:[#allocation91_spill] sm:$0xff] }
 0xc86   : > { %v7025_v11 = vpop.f32.mrf.mxu2  ;;  %v7114_v32 = vpop.f32.mrf.mxu3  ;;  %v7365_v26 = vadd.f32 %v14605_v23, %v14604_v8 }
 0xc87   : > { %8218 = vmatpush.msrb.mxu1 %v7375_v51  ;;  %v7115_v59 = vadd.f32 %v7114_v32, %v7025_v11  ;;  %v14602_v51 = vld [vmem:[#allocation75_spill] sm:$0xff] }
 0xc88   : > { %v7337_v31 = vpop.f32.mrf.mxu0  ;;  %v14603_v11 = vld [vmem:[#allocation51_spill] sm:$0xff] }
 0xc89   : > { %10248 = vmatpush.xpose.msk.msrb.mxu2 %vm1264_vm0, %v7115_v59  ;;  %v6813_v32 = vadd.f32 %v14603_v11, %v14602_v51 }
 0xc8a   : > { %v7424_v39 = vpop.f32.mrf.mxu1 }
 0xc8b   : > { %v13786_v3 = vadd.f32 %v7424_v39, %v7335_v18 }
 0xc8d   : > { %10249 = vmatpush.xpose.msk.msrb.mxu2 %vm1264_vm0, %v7113_v35  ;;  %v14606_v35 = vld [vmem:[#allocation32_spill] sm:$0xff] }
 0xc8e   : > { %v7028_v57 = vpop.f32.mrf.mxu2  ;;  %v7117_v37 = vpop.f32.mrf.mxu3  ;;  %v7387_v38 = vadd.f32 %v14607_v49, %v14606_v35 }
 0xc8f   : > { %v7118_v30 = vadd.f32 %v7117_v37, %v7028_v57 }
 0xc90   : > { %10250 = vmatmul.msk.f32.vlgmr.msrb.gmra.mxu2 %vm1264_vm0, %v6811_v12 }
 0xc91   : > { %8148 = vmatpush.msra.mxu2 %v7362_v19 }
 0xc92   : > { %v7426_v4 = vpop.f32.mrf.mxu1 }
 0xc93   : > { %8149 = vmatpush.msra.mxu2 %v7360_v1  ;;  %v13790_v41 = vadd.f32 %v7426_v4, %v7337_v31 }
 0xc95   : > { %8240 = vmatpush.msrb.mxu2 %v7382_v56  ;;  %v7385_v56 = vadd.f32 %v14609_v60, %v14608_v27 }
 0xc96   : > { %v7030_v63 = vpop.f32.mrf.mxu2  ;;  %v7119_v50 = vpop.f32.mrf.mxu3 }
 0xc97   : > { %8241 = vmatpush.msrb.mxu2 %v7380_v28  ;;  %v7120_v9 = vadd.f32 %v7119_v50, %v7030_v63 }
 0xc99   : > { %10251 = vmatpush.xpose.msk.msrb.mxu3 %vm1264_vm0, %v7120_v9 }
 0xc9d   : > { %10252 = vmatpush.xpose.msk.msrb.mxu3 %vm1264_vm0, %v7118_v30 }
 0xc9e   : > { %v7455_v59 = vpop.f32.mrf.mxu2  ;;  %v7484_v20 = vpop.f32.mrf.mxu3 }
 0xc9f   : > { %v7893_v19 = vmul.f32 0.125, %v7455_v59  ;;  %v7894_v54 = vmul.f32 0.125, %v7484_v20 }
 0xca0   : > { %10253 = vmatmul.msk.f32.vlgmr.msrb.gmra.mxu3 %vm1264_vm0, %v6813_v32 }
 0xca1   : > { %8171 = vmatpush.msra.mxu3 %v7367_v6  ;;  %v7912_v7 = vsel %vm1745_vm1, %v7894_v54, -inf  ;;  %v7909_v12 = vsel %vm1745_vm1, %v7893_v19, -inf }
 0xca2   : > { %7913 = vmax.xlane.f32.xlu1 %v7912_v7  ;;  %7910 = vmax.xlane.f32.xlu0 %v7909_v12 }
 0xca3   : > { %8172 = vmatpush.msra.mxu3 %v7365_v26 }
 0xca5   : > { %8263 = vmatpush.msrb.mxu3 %v7387_v38 }
 0xca6   : > { %v7513_v57 = vpop.f32.mrf.mxu2  ;;  %v7542_v37 = vpop.f32.mrf.mxu3 }
 0xca7   : > { %8264 = vmatpush.msrb.mxu3 %v7385_v56  ;;  %v7895_v14 = vmul.f32 0.125, %v7513_v57  ;;  %v7896_v61 = vmul.f32 0.125, %v7542_v37 }
 0xca9   : > { %v7918_v1 = vsel %vm1745_vm1, %v7896_v61, -inf  ;;  %v7915_v18 = vsel %vm1745_vm1, %v7895_v14, -inf }
 0xcaa   : > { %7919 = vmax.xlane.f32.xlu0 %v7918_v1  ;;  %7916 = vmax.xlane.f32.xlu2 %v7915_v18 }
 0xcad   : > { %v7687_v60 = vpop.f32.mrf.mxu0 }
 0xcae   : > { %v7571_v39 = vpop.f32.mrf.mxu2  ;;  %v7600_v33 = vpop.f32.mrf.mxu3 }
 0xcaf   : > { %v7897_v22 = vmul.f32 0.125, %v7571_v39  ;;  %v7898_v28 = vmul.f32 0.125, %v7600_v33 }
 0xcb1   : > { %v7924_v63 = vsel %vm1745_vm1, %v7898_v28, -inf  ;;  %v7921_v50 = vsel %vm1745_vm1, %v7897_v22, -inf }
 0xcb2   : > { %7925 = vmax.xlane.f32.xlu2 %v7924_v63  ;;  %7922 = vmax.xlane.f32.xlu1 %v7921_v50 }
 0xcb6   : > { %v7629_v9 = vpop.f32.mrf.mxu2  ;;  %v7658_v30 = vpop.f32.mrf.mxu3 }
 0xcb7   : > { %v7899_v31 = vmul.f32 0.125, %v7629_v9  ;;  %v13808_v4 = vmul.f32 0.125, %v7658_v30 }
 0xcb9   : > { %v7930_v47 = vsel %vm1745_vm1, %v13808_v4, -inf  ;;  %v7927_v5 = vsel %vm1745_vm1, %v7899_v31, -inf }
 0xcba   : > { %7931 = vmax.xlane.f32.xlu1 %v7930_v47  ;;  %7928 = vmax.xlane.f32.xlu0 %v7927_v5 }
 0xcbd   : > { %v7716_v50 = vpop.f32.mrf.mxu1 }
 0xcbe   : > { %v13835_v5 = vmul.f32 0.125, %v7716_v50 }
 0xcd3   : > { %v7745_v9 = vpop.f32.mrf.mxu2 }
 0xce3   : > { %v7774_v39 = vpop.f32.mrf.mxu3 }
 0xce4   : > { %v13833_v30 = vmul.f32 0.125, %v7774_v39 }
 0xd13   : > { %v7861_v39 = vpop.f32.mrf.mxu2 }
 0xd14   : > { %v13870_v50 = vmul.f32 0.125, %v7861_v39 }
 0xd15   : > { %v7914_v6 = vpop.xlane.xlu1 %7913  ;;  %v7911_v51 = vpop.xlane.xlu0 %7910 }
 0xd16   : > { %v7958_v11 = vsub.f32 %v7894_v54, %v7914_v6  ;;  %v7957_v32 = vsub.f32 %v7893_v19, %v7911_v51  ;;  %v13821_v54 = vmul.f32 0.125, %v7687_v60  ;;  %v13837_v6 = vmul.f32 0.125, %v7745_v9 }
 0xd18   : > { %v7975_v59 = vmul.f32 1.442695, %v7958_v11  ;;  %v7973_v20 = vmul.f32 1.442695, %v7957_v32  ;;  %v7933_v18 = vsel %vm1745_vm1, %v13821_v54, -inf }
 0xd1a   : > { %10809 = vpow2.f32 %v7975_v59 }
 0xd1b   : > { %10811 = vpow2.f32 %v7973_v20  ;;  %v7942_v20 = vsel %vm1745_vm1, %v13833_v30, -inf }
 0xd1d   : > { %v7920_v8 = vpop.xlane.xlu0 %7919  ;;  %v7917_v23 = vpop.xlane.xlu2 %7916 }
 0xd1e   : > { %v7960_v26 = vsub.f32 %v7896_v61, %v7920_v8  ;;  %v7959_v35 = vsub.f32 %v7895_v14, %v7917_v23  ;;  %v7936_v8 = vsel %vm1745_vm1, %v13835_v5, -inf  ;;  %v7939_v23 = vsel %vm1745_vm1, %v13837_v6, -inf }
 0xd20   : > { %v13813_v49 = vpop.eup %10809  ;;  %v7979_v38 = vmul.f32 1.442695, %v7960_v26  ;;  %v7977_v7 = vmul.f32 1.442695, %v7959_v35 }
 0xd21   : > { %v13815_v12 = vpop.eup %10811  ;;  %v8008_v27 = vsel %vm1745_vm1, %v13813_v49, 0.0 }
 0xd22   : > { %10813 = vpow2.f32 %v7979_v38  ;;  %v8005_v19 = vsel %vm1745_vm1, %v13815_v12, 0.0  ;;  %8009 = vadd.xlane.f32.xlu0 %v8008_v27  ;;  %v7832_v27 = vpop.f32.mrf.mxu1 }
 0xd23   : > { %10815 = vpow2.f32 %v7977_v7  ;;  %8006 = vadd.xlane.f32.xlu2 %v8005_v19  ;;  %v7803_v19 = vpop.f32.mrf.mxu0 }
 0xd25   : > { %v7923_v56 = vpop.xlane.xlu1 %7922  ;;  %v7926_v57 = vpop.xlane.xlu2 %7925 }
 0xd26   : > { %v7961_v61 = vsub.f32 %v7897_v22, %v7923_v56  ;;  %v7962_v33 = vsub.f32 %v7898_v28, %v7926_v57  ;;  %v13858_v56 = vmul.f32 0.125, %v7832_v27  ;;  %v7392_v27 = vadd.f32 %v13667_v34, %v13645_v46 }
 0xd28   : > { %v13823_v37 = vpop.eup %10813  ;;  %v7981_v47 = vmul.f32 1.442695, %v7961_v61  ;;  %v7983_v51 = vmul.f32 1.442695, %v7962_v33  ;;  %v13862_v61 = vmul.f32 0.125, %v7803_v19 }
 0xd29   : > { %v13825_v14 = vpop.eup %10815  ;;  %v8014_v1 = vsel %vm1745_vm1, %v13823_v37, 0.0 }
 0xd2a   : > { %v8011_v63 = vsel %vm1745_vm1, %v13825_v14, 0.0  ;;  %7934 = vmax.xlane.f32.xlu0 %v7933_v18  ;;  %10817 = vpow2.f32 %v7981_v47  ;;  %v7948_v18 = vsel %vm1745_vm1, %v13858_v56, -inf  ;;  %v7945_v33 = vsel %vm1745_vm1, %v13862_v61, -inf }
 0xd2b   : > { %8015 = vadd.xlane.f32.xlu2 %v8014_v1  ;;  %8012 = vadd.xlane.f32.xlu1 %v8011_v63  ;;  %10819 = vpow2.f32 %v7983_v51  ;;  %v7890_v63 = vpop.f32.mrf.mxu3  ;;  %v7951_v47 = vsel %vm1745_vm1, %v13870_v50, -inf }
 0xd2c   : > { %v13872_v9 = vmul.f32 0.125, %v7890_v63  ;;  %v7402_v63 = vadd.f32 %v13705_v36, %v13695_v44 }
 0xd2d   : > { %v7929_v22 = vpop.xlane.xlu0 %7928  ;;  %v7932_v11 = vpop.xlane.xlu1 %7931 }
 0xd2e   : > { %v7963_v32 = vsub.f32 %v7899_v31, %v7929_v22  ;;  %v7964_v59 = vsub.f32 %v13808_v4, %v7932_v11  ;;  %v7954_v22 = vsel %vm1745_vm1, %v13872_v9, -inf }
 0xd30   : > { %v7985_v28 = vmul.f32 1.442695, %v7963_v32  ;;  %v7987_v26 = vmul.f32 1.442695, %v7964_v59  ;;  %v13846_v31 = vpop.eup %10817 }
 0xd31   : > { %v13848_v35 = vpop.eup %10819  ;;  %v8017_v38 = vsel %vm1745_vm1, %v13846_v31, 0.0 }
 0xd32   : > { %7943 = vmax.xlane.f32.xlu0 %v7942_v20  ;;  %10821 = vpow2.f32 %v7985_v28  ;;  %v8020_v60 = vsel %vm1745_vm1, %v13848_v35, 0.0 }
 0xd33   : > { %7937 = vmax.xlane.f32.xlu1 %v7936_v8  ;;  %7940 = vmax.xlane.f32.xlu2 %v7939_v23  ;;  %10823 = vpow2.f32 %v7987_v26  ;;  %v7397_v8 = vadd.f32 %v13692_v29, %v13674_v13  ;;  %v14610_v13 = vld [vmem:[#allocation34_spill] sm:$0xff] }
 0xd34   : > { %v7390_v29 = vadd.f32 %v13653_v52, %v14610_v13 }
 0xd38   : > { %v13850_v4 = vpop.eup %10821 }
 0xd39   : > { %v8023_v7 = vsel %vm1745_vm1, %v13850_v4, 0.0  ;;  %v13860_v57 = vpop.eup %10823 }
 0xd3a   : > { %8024 = vadd.xlane.f32.xlu0 %v8023_v7  ;;  %v8026_v1 = vsel %vm1745_vm1, %v13860_v57, 0.0 }
 0xd3b   : > { %8018 = vadd.xlane.f32.xlu1 %v8017_v38  ;;  %8021 = vadd.xlane.f32.xlu2 %v8020_v60  ;;  %v7395_v60 = vadd.f32 %v13682_v45, %v13659_v58 }
 0xd42   : > { %7949 = vmax.xlane.f32.xlu0 %v7948_v18 }
 0xd43   : > { %8027 = vadd.xlane.f32.xlu1 %v8026_v1  ;;  %7946 = vmax.xlane.f32.xlu2 %v7945_v33  ;;  %v7407_v1 = vadd.f32 %v13718_v48, %v13708_v40  ;;  %v7400_v48 = vadd.f32 %v13701_v21, %v13688_v0 }
 0xd4b   : > { %7952 = vmax.xlane.f32.xlu1 %v7951_v47  ;;  %7955 = vmax.xlane.f32.xlu2 %v7954_v22 }
 0xd95   : > { %v8010_v51 = vpop.xlane.xlu0 %8009 }
 0xd96   : > { %v8007_v11 = vpop.xlane.xlu2 %8006  ;;  %10825 = vrcp.f32 %v8010_v51 }
 0xd97   : > { %10827 = vrcp.f32 %v8007_v11 }
 0xd9c   : > { %v10826_v32 = vpop.eup %10825 }
 0xd9d   : > { %v10828_v28 = vpop.eup %10827  ;;  %v8070_v59 = vmul.f32 %v10826_v32, %v13813_v49  ;;  %v7935_v20 = vpop.xlane.xlu0 %7934 }
 0xd9e   : > { %v8069_v23 = vmul.f32 %v10828_v28, %v13815_v12  ;;  %v8016_v26 = vpop.xlane.xlu2 %8015  ;;  %v8013_v38 = vpop.xlane.xlu1 %8012  ;;  %v7965_v7 = vsub.f32 %v13821_v54, %v7935_v20 }
 0xd9f   : > { %10829 = vrcp.f32 %v8016_v26  ;;  %10255 = vmatmul.msk.f32.vlgmr.msra.gmra.mxu1 %vm1745_vm1, %v8070_v59 }
 0xda0   : > { %10831 = vrcp.f32 %v8013_v38  ;;  %v7989_v49 = vmul.f32 1.442695, %v7965_v7  ;;  %10254 = vmatmul.msk.f32.vlgmr.msra.gmra.mxu0 %vm1745_vm1, %v8069_v23  ;;  %8309 = vmatpush.msra.mxu1 %v7397_v8  ;;  %v7412_v8 = vadd.f32 %v13729_v62, %v13724_v43  ;;  %v7422_v7 = vadd.f32 %v13765_v53, %v13763_v55 }
 0xda1   : > { %8286 = vmatpush.msra.mxu0 %v7392_v27  ;;  %v7417_v43 = vadd.f32 %v13748_v10, %v13746_v15 }
 0xda2   : > { %10833 = vpow2.f32 %v7989_v49  ;;  %8310 = vmatpush.msra.mxu1 %v7395_v60 }
 0xda3   : > { %8287 = vmatpush.msra.mxu0 %v7390_v29  ;;  %v10557_v29 = vld [vmem:[%s14182_s5 + $0xf4] sm:$0xf0] }
 0xda5   : > { %v10830_v12 = vpop.eup %10829  ;;  %v7944_v46 = vpop.xlane.xlu0 %7943 }
 0xda6   : > { %v10832_v34 = vpop.eup %10831  ;;  %v8072_v54 = vmul.f32 %v10830_v12, %v13823_v37  ;;  %v7938_v19 = vpop.xlane.xlu1 %7937  ;;  %v7968_v58 = vsub.f32 %v13833_v30, %v7944_v46  ;;  %v7405_v37 = vadd.f32 %v13714_v25, %v13703_v42 }
 0xda7   : > { %v7941_v45 = vpop.xlane.xlu2 %7940  ;;  %v8071_v18 = vmul.f32 %v10832_v34, %v13825_v14  ;;  %v7966_v52 = vsub.f32 %v13835_v5, %v7938_v19  ;;  %v10296_v19 = vld [vmem:[%s14182_s5 + $0xe0] sm:$0xf] }
 0xda8   : > { %v7967_v39 = vsub.f32 %v13837_v6, %v7941_v45  ;;  %v13898_v33 = vpop.eup %10833  ;;  %v7995_v47 = vmul.f32 1.442695, %v7968_v58  ;;  %10257 = vmatmul.msk.f32.vlgmr.msra.gmra.mxu3 %vm1745_vm1, %v8072_v54  ;;  %v10555_v58 = vld [vmem:[%s14182_s5 + $0xe4] sm:$0xf0] }
 0xda9   : > { %v7991_v30 = vmul.f32 1.442695, %v7966_v52  ;;  %10256 = vmatmul.msk.f32.vlgmr.msra.gmra.mxu2 %vm1745_vm1, %v8071_v18  ;;  %8355 = vmatpush.msra.mxu3 %v7407_v1  ;;  %v8029_v40 = vsel %vm1745_vm1, %v13898_v33, 0.0  ;;  %v10297_v18 = vor.u32 %v10555_v58, %v10296_v19  ;;  %v10288_v52 = vld [vmem:[%s14182_s5 + $0xd0] sm:$0xf]  ;;  %v14612_v58 = vld [vmem:[#allocation13_spill] sm:$0xff] }
 0xdaa   : > { %v7993_v22 = vmul.f32 1.442695, %v7967_v39  ;;  %10835 = vpow2.f32 %v7995_v47  ;;  %8332 = vmatpush.msra.mxu2 %v7402_v63  ;;  %8030 = vadd.xlane.f32.xlu0 %v8029_v40  ;;  %v10553_v39 = vld [vmem:[%s14182_s5 + $0xd4] sm:$0xf0]  ;;  %v10306_v63 = vld [vmem:[%s14182_s5 + $0xf8] sm:$0xf0] }
 0xdab   : > { %10837 = vpow2.f32 %v7991_v30  ;;  %8356 = vmatpush.msra.mxu3 %v7405_v37  ;;  %v10289_v37 = vor.u32 %v10553_v39, %v10288_v52  ;;  %v14615_v39 = vld [vmem:[#allocation23_spill] sm:$0xff] }
 0xdac   : > { %10839 = vpow2.f32 %v7993_v22  ;;  %8333 = vmatpush.msra.mxu2 %v7400_v48  ;;  %v10280_v48 = vld [vmem:[%s14182_s5 + $0xc0] sm:$0xf] }
 0xdad   : > { %v8025_v42 = vpop.xlane.xlu0 %8024 }
 0xdae   : > { %v8019_v44 = vpop.xlane.xlu1 %8018 }
 0xdaf   : > { %10841 = vrcp.f32 %v8019_v44  ;;  %v8022_v36 = vpop.xlane.xlu2 %8021  ;;  %v10551_v44 = vld [vmem:[%s14182_s5 + $0xc4] sm:$0xf0] }
 0xdb0   : > { %v13910_v25 = vpop.eup %10835  ;;  %10843 = vrcp.f32 %v8025_v42 }
 0xdb1   : > { %v13912_v14 = vpop.eup %10837  ;;  %10845 = vrcp.f32 %v8022_v36  ;;  %v8038_v0 = vsel %vm1745_vm1, %v13910_v25, 0.0 }
 0xdb2   : > { %v13916_v21 = vpop.eup %10839  ;;  %8039 = vadd.xlane.f32.xlu0 %v8038_v0  ;;  %v8032_v5 = vsel %vm1745_vm1, %v13912_v14, 0.0  ;;  %v10554_v0 = vld [vmem:[%s14182_s5 + $0xe4] sm:$0xf] }
 0xdb3   : > { %8033 = vadd.xlane.f32.xlu1 %v8032_v5  ;;  %v8035_v6 = vsel %vm1745_vm1, %v13916_v21, 0.0 }
 0xdb4   : > { %8036 = vadd.xlane.f32.xlu2 %v8035_v6  ;;  %v10281_v6 = vor.u32 %v10551_v44, %v10280_v48 }
 0xdb5   : > { %v10842_v51 = vpop.eup %10841  ;;  %v7950_v59 = vpop.xlane.xlu0 %7949 }
 0xdb6   : > { %v10844_v11 = vpop.eup %10843  ;;  %v8073_v32 = vmul.f32 %v10842_v51, %v13846_v31  ;;  %v8028_v28 = vpop.xlane.xlu1 %8027  ;;  %v7970_v26 = vsub.f32 %v13858_v56, %v7950_v59  ;;  %v7410_v31 = vadd.f32 %v13727_v17, %v13716_v24  ;;  %v10552_v51 = vld [vmem:[%s14182_s5 + $0xd4] sm:$0xf]  ;;  %v10282_v59 = vld [vmem:[%s14182_s5 + $0xc8] sm:$0xf0] }
 0xdb7   : > { %v10846_v20 = vpop.eup %10845  ;;  %v8075_v23 = vmul.f32 %v10844_v11, %v13850_v4  ;;  %10847 = vrcp.f32 %v8028_v28  ;;  %v7947_v38 = vpop.xlane.xlu2 %7946  ;;  %v10290_v11 = vld [vmem:[%s14182_s5 + $0xd8] sm:$0xf0]  ;;  %v10550_v28 = vld [vmem:[%s14182_s5 + $0xc4] sm:$0xf] }
 0xdb8   : > { %v8074_v27 = vmul.f32 %v10846_v20, %v13848_v35  ;;  %v7969_v60 = vsub.f32 %v13862_v61, %v7947_v38  ;;  %10258 = vmatmul.msk.f32.vlgmr.msrb.gmra.mxu0 %vm1745_vm1, %v8073_v32  ;;  %v7999_v62 = vmul.f32 1.442695, %v7970_v26 }
 0xdb9   : > { %10260 = vmatmul.msk.f32.vlgmr.msrb.gmra.mxu2 %vm1745_vm1, %v8075_v23  ;;  %8378 = vmatpush.msrb.mxu0 %v7412_v8  ;;  %v10285_v8 = vor.u32 %v10550_v28, %v10282_v59  ;;  %v14623_v28 = vld [vmem:[#allocation69_spill] sm:$0xff] }
 0xdba   : > { %v7997_v4 = vmul.f32 1.442695, %v7969_v60  ;;  %10259 = vmatmul.msk.f32.vlgmr.msrb.gmra.mxu1 %vm1745_vm1, %v8074_v27  ;;  %8424 = vmatpush.msrb.mxu2 %v7422_v7  ;;  %10849 = vpow2.f32 %v7999_v62  ;;  %v14624_v59 = vld [vmem:[#allocation41_spill] sm:$0xff] }
 0xdbb   : > { %8401 = vmatpush.msrb.mxu1 %v7417_v43  ;;  %8379 = vmatpush.msrb.mxu0 %v7410_v31 }
 0xdbc   : > { %10851 = vpow2.f32 %v7997_v4  ;;  %8425 = vmatpush.msrb.mxu2 %v13784_v2 }
 0xdbd   : > { %v10848_v55 = vpop.eup %10847  ;;  %8402 = vmatpush.msrb.mxu1 %v13782_v16 }
 0xdbe   : > { %v8076_v24 = vmul.f32 %v10848_v55, %v13860_v57  ;;  %v7953_v17 = vpop.xlane.xlu1 %7952 }
 0xdbf   : > { %v7971_v15 = vsub.f32 %v13870_v50, %v7953_v17  ;;  %v7956_v10 = vpop.xlane.xlu2 %7955 }
 0xdc0   : > { %v7972_v53 = vsub.f32 %v13872_v9, %v7956_v10  ;;  %10261 = vmatmul.msk.f32.vlgmr.msrb.gmra.mxu3 %vm1745_vm1, %v8076_v24  ;;  %v13944_v35 = vpop.eup %10849 }
 0xdc1   : > { %v8001_v56 = vmul.f32 1.442695, %v7971_v15  ;;  %8447 = vmatpush.msrb.mxu3 %v13790_v41  ;;  %v8044_v16 = vsel %vm1745_vm1, %v13944_v35, 0.0 }
 0xdc2   : > { %v13947_v61 = vpop.eup %10851  ;;  %v8003_v2 = vmul.f32 1.442695, %v7972_v53  ;;  %8045 = vadd.xlane.f32.xlu2 %v8044_v16 }
 0xdc3   : > { %10853 = vpow2.f32 %v8001_v56  ;;  %8448 = vmatpush.msrb.mxu3 %v13786_v3  ;;  %v8041_v57 = vsel %vm1745_vm1, %v13947_v61, 0.0  ;;  %v10304_v3 = vld [vmem:[%s14182_s5 + $0xf0] sm:$0xf] }
 0xdc4   : > { %10855 = vpow2.f32 %v8003_v2  ;;  %8042 = vadd.xlane.f32.xlu1 %v8041_v57  ;;  %v10305_v46 = vor.u32 %v10557_v29, %v10304_v3 }
 0xdc9   : > { %v13954_v50 = vpop.eup %10853 }
 0xdca   : > { %v13956_v9 = vpop.eup %10855  ;;  %v8047_v41 = vsel %vm1745_vm1, %v13954_v50, 0.0 }
 0xdcb   : > { %8048 = vadd.xlane.f32.xlu0 %v8047_v41  ;;  %v8050_v49 = vsel %vm1745_vm1, %v13956_v9, 0.0 }
 0xdcc   : > { %8051 = vadd.xlane.f32.xlu1 %v8050_v49 }
 0xe1c   : > { %v8128_v43 = vpop.f32.mrf.mxu1 }
 0xe1d   : > { %v8031_v13 = vpop.xlane.xlu0 %8030  ;;  %v8105_v31 = vpop.f32.mrf.mxu0 }
 0xe1e   : > { %10857 = vrcp.f32 %v8031_v13  ;;  %v8453_v55 = vpack.c.bf16 %v8128_v43, %v8105_v31 }
 0xe24   : > { %v10858_v12 = vpop.eup %10857 }
 0xe25   : > { %v8077_v34 = vmul.f32 %v10858_v12, %v13898_v33  ;;  %v8040_v54 = vpop.xlane.xlu0 %8039  ;;  %v10556_v33 = vld [vmem:[%s14182_s5 + $0xf4] sm:$0xf] }
 0xe26   : > { %10859 = vrcp.f32 %v8040_v54  ;;  %v8034_v45 = vpop.xlane.xlu1 %8033  ;;  %v10309_v40 = vor.u32 %v10556_v33, %v10306_v63  ;;  %v14611_v54 = vld [vmem:[#allocation14_spill] sm:$0xff]  ;;  %v14616_v33 = vld [vmem:[#allocation37_spill] sm:$0xff] }
 0xe27   : > { %10861 = vrcp.f32 %v8034_v45  ;;  %v8037_v1 = vpop.xlane.xlu2 %8036  ;;  %10262 = vmatmul.msk.f32.vlgmr.msra.gmra.mxu0 %vm1745_vm1, %v8077_v34  ;;  %v4426_v63 = vadd.f32 %v14616_v33, %v14615_v39  ;;  %v14639_v39 = vld [vmem:[#allocation78_spill] sm:$0xff]  ;;  %v14640_v33 = vld [vmem:[#allocation49_spill] sm:$0xff] }
 0xe28   : > { %10863 = vrcp.f32 %v8037_v1  ;;  %8538 = vmatpush.bf16.msra.mxu0 %v10305_v46  ;;  %v14613_v1 = vld [vmem:[#allocation68_spill] sm:$0xff] }
 0xe2b   : > { %v8174_v10 = vpop.f32.mrf.mxu3 }
 0xe2c   : > { %v10860_v47 = vpop.eup %10859  ;;  %8539 = vmatpush.bf16.msra.mxu0 %v10297_v18  ;;  %v8151_v15 = vpop.f32.mrf.mxu2  ;;  %v14614_v18 = vld [vmem:[#allocation40_spill] sm:$0xff] }
 0xe2d   : > { %v10862_v30 = vpop.eup %10861  ;;  %v8080_v22 = vmul.f32 %v10860_v47, %v13910_v25  ;;  %v10298_v25 = vld [vmem:[%s14182_s5 + $0xe8] sm:$0xf0]  ;;  %v8454_v53 = vpack.c.bf16 %v8174_v10, %v8151_v15  ;;  %v4475_v52 = vadd.f32 %v14614_v18, %v14613_v1  ;;  %v14617_v47 = vld [vmem:[#allocation16_spill] sm:$0xff]  ;;  %v14628_v10 = vld [vmem:[#allocation5_spill] sm:$0xff] }
 0xe2e   : > { %v10864_v42 = vpop.eup %10863  ;;  %v8078_v36 = vmul.f32 %v10862_v30, %v13912_v14  ;;  %v10301_v14 = vor.u32 %v10554_v0, %v10298_v25  ;;  %v14618_v30 = vld [vmem:[#allocation15_spill] sm:$0xff]  ;;  %v14637_v1 = vld [vmem:[#allocation77_spill] sm:$0xff]  ;;  %v14638_v18 = vld [vmem:[#allocation52_spill] sm:$0xff] }
 0xe2f   : > { %v8079_v5 = vmul.f32 %v10864_v42, %v13916_v21  ;;  %10265 = vmatmul.msk.f32.vlgmr.msra.gmra.mxu3 %vm1745_vm1, %v8080_v22  ;;  %v10293_v21 = vor.u32 %v10552_v51, %v10290_v11  ;;  %v6558_v22 = vadd.f32 %v14618_v30, %v4426_v63  ;;  %v14621_v11 = vld [vmem:[#allocation70_spill] sm:$0xff]  ;;  %v4441_v63 = vadd.f32 %v14640_v33, %v14639_v39  ;;  %v14642_v30 = vld [vmem:[#allocation7_spill] sm:$0xff] }
 0xe30   : > { %10263 = vmatmul.msk.f32.vlgmr.msra.gmra.mxu1 %vm1745_vm1, %v8078_v36  ;;  %8540 = vmatpush.bf16.msra.mxu0 %v10289_v37  ;;  %v6559_v37 = vadd.f32 %v14617_v47, %v4475_v52  ;;  %v4490_v52 = vadd.f32 %v14638_v18, %v14637_v1  ;;  %v14641_v47 = vld [vmem:[#allocation24_spill] sm:$0xff]  ;;  %v14664_v1 = vld [vmem:[#allocation63_spill] sm:$0xff]  ;;  %v14666_v33 = vld [vmem:[#allocation46_spill] sm:$0xff] }
 0xe31   : > { %10264 = vmatmul.msk.f32.vlgmr.msra.gmra.mxu2 %vm1745_vm1, %v8079_v5  ;;  %8587 = vmatpush.bf16.msra.mxu1 %v10309_v40  ;;  %v14619_v5 = vld [vmem:[#allocation18_spill] sm:$0xff] }
 0xe34   : > { %8541 = vmatpush.bf16.msra.mxu0 %v10281_v6 }
 0xe35   : > { %8588 = vmatpush.bf16.msra.mxu1 %v10301_v14  ;;  %v8046_v32 = vpop.xlane.xlu2 %8045  ;;  %v14620_v14 = vld [vmem:[#allocation17_spill] sm:$0xff] }
 0xe36   : > { %10865 = vrcp.f32 %v8046_v32 }
 0xe37   : > { %v8043_v20 = vpop.xlane.xlu1 %8042  ;;  %v8220_v56 = vpop.f32.mrf.mxu1 }
 0xe38   : > { %10867 = vrcp.f32 %v8043_v20  ;;  %v4431_v20 = vadd.f32 %v14624_v59, %v14623_v28  ;;  %v14648_v28 = vld [vmem:[#allocation53_spill] sm:$0xff] }
 0xe39   : > { %8589 = vmatpush.bf16.msra.mxu1 %v10293_v21  ;;  %v14622_v21 = vld [vmem:[#allocation45_spill] sm:$0xff] }
 0xe3a   : > { %v4480_v32 = vadd.f32 %v14622_v21, %v14621_v11  ;;  %v14646_v11 = vld [vmem:[#allocation56_spill] sm:$0xff] }
 0xe3c   : > { %v10866_v23 = vpop.eup %10865  ;;  %v8243_v16 = vpop.f32.mrf.mxu2 }
 0xe3d   : > { %8590 = vmatpush.bf16.msra.mxu1 %v10285_v8  ;;  %v8082_v38 = vmul.f32 %v10866_v23, %v13944_v35  ;;  %v8197_v35 = vpop.f32.mrf.mxu0 }
 0xe3e   : > { %v10868_v26 = vpop.eup %10867  ;;  %v8049_v7 = vpop.xlane.xlu0 %8048 }
 0xe3f   : > { %v8081_v27 = vmul.f32 %v10868_v26, %v13947_v61  ;;  %10869 = vrcp.f32 %v8049_v7  ;;  %v8052_v60 = vpop.xlane.xlu1 %8051  ;;  %10267 = vmatmul.msk.f32.vlgmr.msrb.gmra.mxu1 %vm1745_vm1, %v8082_v38  ;;  %v8455_v61 = vpack.c.bf16 %v8220_v56, %v8197_v35  ;;  %v14625_v26 = vld [vmem:[#allocation20_spill] sm:$0xff]  ;;  %v14626_v7 = vld [vmem:[#allocation19_spill] sm:$0xff]  ;;  %v14629_v35 = vld [vmem:[#allocation74_spill] sm:$0xff] }
 0xe40   : > { %10871 = vrcp.f32 %v8052_v60  ;;  %v6563_v38 = vadd.f32 %v14625_v26, %v4480_v32  ;;  %v14630_v56 = vld [vmem:[#allocation48_spill] sm:$0xff]  ;;  %v14647_v32 = vld [vmem:[#allocation82_spill] sm:$0xff] }
 0xe41   : > { %10266 = vmatmul.msk.f32.vlgmr.msrb.gmra.mxu0 %vm1745_vm1, %v8081_v27  ;;  %v6562_v27 = vadd.f32 %v14626_v7, %v4431_v20  ;;  %v4446_v59 = vadd.f32 %v14648_v28, %v14647_v32  ;;  %v14649_v20 = vld [vmem:[#allocation43_spill] sm:$0xff]  ;;  %v14674_v28 = vld [vmem:[#allocation80_spill] sm:$0xff] }
 0xe43   : > { %v8266_v2 = vpop.f32.mrf.mxu3 }
 0xe44   : > { %v8456_v57 = vpack.c.bf16 %v8266_v2, %v8243_v16  ;;  %v14631_v2 = vld [vmem:[#allocation73_spill] sm:$0xff]  ;;  %v14632_v16 = vld [vmem:[#allocation44_spill] sm:$0xff] }
 0xe45   : > { %v10870_v62 = vpop.eup %10869 }
 0xe46   : > { %v10872_v4 = vpop.eup %10871  ;;  %v8083_v24 = vmul.f32 %v10870_v62, %v13954_v50 }
 0xe47   : > { %v8084_v17 = vmul.f32 %v10872_v4, %v13956_v9  ;;  %10318 = vmatmul.msk.bf16.vlgmr.msra.gmra.mxu1 %vm1264_vm0, %v8453_v55 }
 0xe48   : > { %10268 = vmatmul.msk.f32.vlgmr.msrb.gmra.mxu2 %vm1745_vm1, %v8083_v24 }
 0xe49   : > { %10269 = vmatmul.msk.f32.vlgmr.msrb.gmra.mxu3 %vm1745_vm1, %v8084_v17  ;;  %10310 = vmatmul.msk.bf16.vlgmr.msra.gmra.mxu0 %vm1264_vm0, %v8453_v55  ;;  %v14627_v17 = vld [vmem:[#allocation21_spill] sm:$0xff] }
 0xe57   : > { %10319 = vmatmul.msk.bf16.gmra.mxu1 %vm1264_vm0, %v8454_v53 }
 0xe59   : > { %10311 = vmatmul.msk.bf16.gmra.mxu0 %vm1264_vm0, %v8454_v53 }
 0xe67   : > { %10320 = vmatmul.msk.bf16.gmra.mxu1 %vm1264_vm0, %v8455_v61 }
 0xe69   : > { %10312 = vmatmul.msk.bf16.gmra.mxu0 %vm1264_vm0, %v8455_v61  ;;  %v4485_v61 = vadd.f32 %v14630_v56, %v14629_v35  ;;  %v14656_v35 = vld [vmem:[#allocation58_spill] sm:$0xff] }
 0xe77   : > { %10321 = vmatmul.msk.bf16.gmra.mxu1 %vm1264_vm0, %v8456_v57 }
 0xe79   : > { %10313 = vmatmul.msk.bf16.gmra.mxu0 %vm1264_vm0, %v8456_v57  ;;  %v4436_v57 = vadd.f32 %v14632_v16, %v14631_v2  ;;  %v14658_v16 = vld [vmem:[#allocation72_spill] sm:$0xff] }
 0xea4   : > { %v8289_v50 = vpop.f32.mrf.mxu0 }
 0xead   : > { %v8312_v9 = vpop.f32.mrf.mxu1 }
 0xeae   : > { %v8457_v41 = vpack.c.bf16 %v8312_v9, %v8289_v50  ;;  %v14633_v50 = vld [vmem:[#allocation22_spill] sm:$0xff] }
 0xeaf   : > { %v6567_v9 = vadd.f32 %v14633_v50, %v4485_v61  ;;  %v14657_v61 = vld [vmem:[#allocation42_spill] sm:$0xff] }
 0xeb0   : > { %10314 = vmatmul.msk.bf16.gmra.mxu0 %vm1264_vm0, %v8457_v41  ;;  %10322 = vmatmul.msk.bf16.gmra.mxu1 %vm1264_vm0, %v8457_v41  ;;  %v14634_v41 = vld [vmem:[#allocation36_spill] sm:$0xff] }
 0xeb2   : > { %v8358_v13 = vpop.f32.mrf.mxu3 }
 0xeb4   : > { %v8335_v49 = vpop.f32.mrf.mxu2 }
 0xeb5   : > { %v8458_v29 = vpack.c.bf16 %v8358_v13, %v8335_v49  ;;  %v6566_v49 = vadd.f32 %v14634_v41, %v4436_v57 }
 0xebc   : > { %v8404_v3 = vpop.f32.mrf.mxu1 }
 0xebe   : > { %v8381_v12 = vpop.f32.mrf.mxu0 }
 0xebf   : > { %v8459_v48 = vpack.c.bf16 %v8404_v3, %v8381_v12 }
 0xec0   : > { %10315 = vmatmul.msk.bf16.gmra.mxu0 %vm1264_vm0, %v8458_v29  ;;  %10323 = vmatmul.msk.bf16.gmra.mxu1 %vm1264_vm0, %v8458_v29 }
 0xec4   : > { %v8592_v46 = vpop.f32.mrf.mxu1 }
 0xec5   : > { %v8633_v19 = vadd.f32 %v8592_v46, %v14611_v54  ;;  %v14635_v54 = vld [vmem:[#allocation6_spill] sm:$0xff] }
 0xec6   : > { %v8543_v34 = vpop.f32.mrf.mxu0 }
 0xec7   : > { %v8632_v45 = vadd.f32 %v8543_v34, %v14612_v58  ;;  %8665 = vst [vmem:[%s14043_s26 + $0x8] sm:$0xff] %v8633_v19  ;;  %v14636_v58 = vld [vmem:[#allocation39_spill] sm:$0xff] }
 0xec9   : > { %8664 = vst [vmem:[%s14043_s26] sm:$0xff] %v8632_v45 }
 0xecb   : > { %v8427_v8 = vpop.f32.mrf.mxu2 }
 0xecc   : > { %v8594_v40 = vpop.f32.mrf.mxu1  ;;  %v8450_v23 = vpop.f32.mrf.mxu3 }
 0xecd   : > { %v8635_v42 = vadd.f32 %v8594_v40, %v6559_v37  ;;  %v8460_v31 = vpack.c.bf16 %v8450_v23, %v8427_v8  ;;  %v6571_v37 = vadd.f32 %v14641_v47, %v4490_v52  ;;  %v6574_v8 = vadd.f32 %v14649_v20, %v4446_v59  ;;  %v14650_v23 = vld [vmem:[#allocation8_spill] sm:$0xff] }
 0xece   : > { %v8545_v44 = vpop.f32.mrf.mxu0  ;;  %v14665_v52 = vld [vmem:[#allocation76_spill] sm:$0xff] }
 0xecf   : > { %v8634_v36 = vadd.f32 %v8545_v44, %v6558_v22  ;;  %8667 = vst [vmem:[%s14043_s26 + $0x18] sm:$0xff] %v8635_v42  ;;  %v6570_v22 = vadd.f32 %v14642_v30, %v4441_v63 }
 0xed0   : > { %10316 = vmatmul.msk.bf16.gmra.mxu0 %vm1264_vm0, %v8459_v48  ;;  %10324 = vmatmul.msk.bf16.gmra.mxu1 %vm1264_vm0, %v8459_v48 }
 0xed1   : > { %8666 = vst [vmem:[%s14043_s26 + $0x10] sm:$0xff] %v8634_v36 }
 0xed4   : > { %v8597_v0 = vpop.f32.mrf.mxu1 }
 0xed5   : > { %v8637_v6 = vadd.f32 %v8597_v0, %v14619_v5 }
 0xed6   : > { %v8548_v25 = vpop.f32.mrf.mxu0 }
 0xed7   : > { %v8636_v51 = vadd.f32 %v8548_v25, %v14620_v14  ;;  %8669 = vst [vmem:[%s14043_s26 + $0x28] sm:$0xff] %v8637_v6  ;;  %v14643_v25 = vld [vmem:[#allocation38_spill] sm:$0xff]  ;;  %v14644_v6 = vld [vmem:[#allocation25_spill] sm:$0xff] }
 0xed9   : > { %8668 = vst [vmem:[%s14043_s26 + $0x20] sm:$0xff] %v8636_v51  ;;  %v14645_v51 = vld [vmem:[#allocation81_spill] sm:$0xff] }
 0xeda   : > { %v4495_v21 = vadd.f32 %v14646_v11, %v14645_v51  ;;  %v14672_v51 = vld [vmem:[#allocation67_spill] sm:$0xff] }
 0xedc   : > { %v8599_v60 = vpop.f32.mrf.mxu1  ;;  %v6575_v26 = vadd.f32 %v14650_v23, %v4495_v21  ;;  %v14673_v21 = vld [vmem:[#allocation54_spill] sm:$0xff] }
 0xedd   : > { %v8639_v62 = vadd.f32 %v8599_v60, %v6563_v38 }
 0xede   : > { %v8550_v43 = vpop.f32.mrf.mxu0 }
 0xedf   : > { %v8638_v4 = vadd.f32 %v8550_v43, %v6562_v27  ;;  %8671 = vst [vmem:[%s14043_s26 + $0x38] sm:$0xff] %v8639_v62  ;;  %v14651_v62 = vld [vmem:[#allocation9_spill] sm:$0xff] }
 0xee0   : > { %10317 = vmatmul.msk.bf16.gmra.mxu0 %vm1264_vm0, %v8460_v31  ;;  %10325 = vmatmul.msk.bf16.gmra.mxu1 %vm1264_vm0, %v8460_v31 }
 0xee1   : > { %8670 = vst [vmem:[%s14043_s26 + $0x30] sm:$0xff] %v8638_v4 }
 0xee4   : > { %v8602_v55 = vpop.f32.mrf.mxu1 }
 0xee5   : > { %v8641_v15 = vadd.f32 %v8602_v55, %v14627_v17  ;;  %v14652_v55 = vld [vmem:[#allocation71_spill] sm:$0xff]  ;;  %v14653_v17 = vld [vmem:[#allocation85_spill] sm:$0xff] }
 0xee6   : > { %v8553_v24 = vpop.f32.mrf.mxu0 }
 0xee7   : > { %v8640_v53 = vadd.f32 %v8553_v24, %v14628_v10  ;;  %8673 = vst [vmem:[%s14043_s26 + $0x48] sm:$0xff] %v8641_v15  ;;  %v14654_v15 = vld [vmem:[#allocation59_spill] sm:$0xff] }
 0xee8   : > { %v4500_v10 = vadd.f32 %v14654_v15, %v14653_v17 }
 0xee9   : > { %8672 = vst [vmem:[%s14043_s26 + $0x40] sm:$0xff] %v8640_v53  ;;  %v14655_v53 = vld [vmem:[#allocation86_spill] sm:$0xff] }
 0xeea   : > { %v4451_v56 = vadd.f32 %v14656_v35, %v14655_v53  ;;  %v6579_v57 = vadd.f32 %v14658_v16, %v4500_v10 }
 0xeec   : > { %v8604_v13 = vpop.f32.mrf.mxu1  ;;  %v6578_v2 = vadd.f32 %v14657_v61, %v4451_v56 }
 0xeed   : > { %v8643_v29 = vadd.f32 %v8604_v13, %v6567_v9 }
 0xeee   : > { %v8555_v3 = vpop.f32.mrf.mxu0 }
 0xeef   : > { %v8642_v12 = vadd.f32 %v8555_v3, %v6566_v49  ;;  %8675 = vst [vmem:[%s14043_s26 + $0x58] sm:$0xff] %v8643_v29  ;;  %v14659_v29 = vld [vmem:[#allocation47_spill] sm:$0xff] }
 0xef1   : > { %8674 = vst [vmem:[%s14043_s26 + $0x50] sm:$0xff] %v8642_v12 }
 0xef4   : > { %v8607_v46 = vpop.f32.mrf.mxu1 }
 0xef5   : > { %v8645_v19 = vadd.f32 %v8607_v46, %v14635_v54  ;;  %v14660_v46 = vld [vmem:[#allocation10_spill] sm:$0xff]  ;;  %v14661_v54 = vld [vmem:[#allocation89_spill] sm:$0xff] }
 0xef6   : > { %v8558_v34 = vpop.f32.mrf.mxu0 }
 0xef7   : > { %v8644_v45 = vadd.f32 %v8558_v34, %v14636_v58  ;;  %8677 = vst [vmem:[%s14043_s26 + $0x68] sm:$0xff] %v8645_v19  ;;  %v14662_v19 = vld [vmem:[#allocation62_spill] sm:$0xff] }
 0xef8   : > { %v4456_v58 = vadd.f32 %v14662_v19, %v14661_v54 }
 0xef9   : > { %8676 = vst [vmem:[%s14043_s26 + $0x60] sm:$0xff] %v8644_v45  ;;  %v14663_v45 = vld [vmem:[#allocation90_spill] sm:$0xff] }
 0xefa   : > { %v4505_v18 = vadd.f32 %v14664_v1, %v14663_v45  ;;  %v6582_v39 = vadd.f32 %v14665_v52, %v4456_v58 }
 0xefc   : > { %v8609_v40 = vpop.f32.mrf.mxu1  ;;  %v6583_v63 = vadd.f32 %v14666_v33, %v4505_v18 }
 0xefd   : > { %v8647_v44 = vadd.f32 %v8609_v40, %v6571_v37 }
 0xefe   : > { %v8560_v48 = vpop.f32.mrf.mxu0 }
 0xeff   : > { %v8646_v42 = vadd.f32 %v8560_v48, %v6570_v22  ;;  %8679 = vst [vmem:[%s14043_s26 + $0x78] sm:$0xff] %v8647_v44  ;;  %v14667_v44 = vld [vmem:[#allocation50_spill] sm:$0xff] }
 0xf01   : > { %8678 = vst [vmem:[%s14043_s26 + $0x70] sm:$0xff] %v8646_v42 }
 0xf2d   : > { %v8563_v36 = vpop.f32.mrf.mxu0  ;;  %v8612_v0 = vpop.f32.mrf.mxu1 }
 0xf2e   : > { %v8648_v5 = vadd.f32 %v8563_v36, %v14643_v25  ;;  %v8649_v14 = vadd.f32 %v8612_v0, %v14644_v6  ;;  %v14668_v36 = vld [vmem:[#allocation12_spill] sm:$0xff]  ;;  %v14669_v25 = vld [vmem:[#allocation93_spill] sm:$0xff] }
 0xf30   : > { %8680 = vst [vmem:[%s14043_s26 + $0x80] sm:$0xff] %v8648_v5  ;;  %v14670_v5 = vld [vmem:[#allocation66_spill] sm:$0xff] }
 0xf31   : > { %8681 = vst [vmem:[%s14043_s26 + $0x88] sm:$0xff] %v8649_v14  ;;  %v4461_v6 = vadd.f32 %v14670_v5, %v14669_v25  ;;  %v14671_v14 = vld [vmem:[#allocation94_spill] sm:$0xff] }
 0xf32   : > { %v4510_v11 = vadd.f32 %v14672_v51, %v14671_v14 }
 0xf33   : > { %v6586_v32 = vadd.f32 %v14673_v21, %v4461_v6 }
 0xf34   : > { %v6587_v59 = vadd.f32 %v14674_v28, %v4510_v11 }
 0xf35   : > { %v8565_v38 = vpop.f32.mrf.mxu0  ;;  %v8614_v7 = vpop.f32.mrf.mxu1 }
 0xf36   : > { %v8650_v27 = vadd.f32 %v8565_v38, %v6574_v8  ;;  %v8651_v60 = vadd.f32 %v8614_v7, %v6575_v26 }
 0xf38   : > { %8682 = vst [vmem:[%s14043_s26 + $0x90] sm:$0xff] %v8650_v27 }
 0xf39   : > { %8683 = vst [vmem:[%s14043_s26 + $0x98] sm:$0xff] %v8651_v60 }
 0xf3d   : > { %v8568_v31 = vpop.f32.mrf.mxu0  ;;  %v8617_v43 = vpop.f32.mrf.mxu1 }
 0xf3e   : > { %v8652_v4 = vadd.f32 %v8568_v31, %v14651_v62  ;;  %v8653_v24 = vadd.f32 %v8617_v43, %v14652_v55 }
 0xf40   : > { %8684 = vst [vmem:[%s14043_s26 + $0xa0] sm:$0xff] %v8652_v4 }
 0xf41   : > { %8685 = vst [vmem:[%s14043_s26 + $0xa8] sm:$0xff] %v8653_v24 }
 0xf45   : > { %v8570_v50 = vpop.f32.mrf.mxu0  ;;  %v8619_v9 = vpop.f32.mrf.mxu1 }
 0xf46   : > { %v8654_v41 = vadd.f32 %v8570_v50, %v6578_v2  ;;  %v8655_v49 = vadd.f32 %v8619_v9, %v6579_v57 }
 0xf48   : > { %8686 = vst [vmem:[%s14043_s26 + $0xb0] sm:$0xff] %v8654_v41 }
 0xf49   : > { %8687 = vst [vmem:[%s14043_s26 + $0xb8] sm:$0xff] %v8655_v49 }
 0xf4d   : > { %v8573_v13 = vpop.f32.mrf.mxu0  ;;  %v8622_v3 = vpop.f32.mrf.mxu1 }
 0xf4e   : > { %v8656_v12 = vadd.f32 %v8573_v13, %v14659_v29  ;;  %v8657_v34 = vadd.f32 %v8622_v3, %v14660_v46 }
 0xf50   : > { %8688 = vst [vmem:[%s14043_s26 + $0xc0] sm:$0xff] %v8656_v12 }
 0xf51   : > { %8689 = vst [vmem:[%s14043_s26 + $0xc8] sm:$0xff] %v8657_v34 }
 0xf55   : > { %v8575_v47 = vpop.f32.mrf.mxu0  ;;  %v8624_v37 = vpop.f32.mrf.mxu1 }
 0xf56   : > { %v8658_v30 = vadd.f32 %v8575_v47, %v6582_v39  ;;  %v8659_v22 = vadd.f32 %v8624_v37, %v6583_v63 }
 0xf58   : > { %8690 = vst [vmem:[%s14043_s26 + $0xd0] sm:$0xff] %v8658_v30 }
 0xf59   : > { %8691 = vst [vmem:[%s14043_s26 + $0xd8] sm:$0xff] %v8659_v22 }
 0xf5d   : > { %v8578_v40 = vpop.f32.mrf.mxu0  ;;  %v8627_v48 = vpop.f32.mrf.mxu1 }
 0xf5e   : > { %v8660_v42 = vadd.f32 %v8578_v40, %v14667_v44  ;;  %v8661_v0 = vadd.f32 %v8627_v48, %v14668_v36 }
 0xf60   : > { %8692 = vst [vmem:[%s14043_s26 + $0xe0] sm:$0xff] %v8660_v42 }
 0xf61   : > { %8693 = vst [vmem:[%s14043_s26 + $0xe8] sm:$0xff] %v8661_v0 }
 0xf65   : > { %v8580_v20 = vpop.f32.mrf.mxu0  ;;  %v8629_v8 = vpop.f32.mrf.mxu1 }
 0xf66   : > { %v8662_v23 = vadd.f32 %v8580_v20, %v6586_v32  ;;  %v8663_v26 = vadd.f32 %v8629_v8, %v6587_v59 }
 0xf68   : > { %8694 = vst [vmem:[%s14043_s26 + $0xf0] sm:$0xff] %v8662_v23 }
 0xf69   : > { %8695 = vst [vmem:[%s14043_s26 + $0xf8] sm:$0xff] %v8663_v26 }
 0xf6a   : > { %10900 = shalt.err (!%p10897_p3)
}
 0xf6b   : > { %s10937_s11 = smov 256   ;;  %s10938_s26 = smov 16  }
 0xf6c   : > { %10576 = dma.vmem_to_hbm [thread:$0]  (%p11012_p5), %s8711_s25, 4096, %s8713_s17, %s8697_s18, %s10937_s11, %s10937_s11, %s10938_s26  }
 0xf6d PF: > { %p10582_p4 = scmp.ge.s32.totalorder %s10935_s24, 2  ;;  %s8727_s12 = sand.u32 1, %s10923_s21  }
 0xf6e   : > { %s8728_s14 = scalar_lea.sflag [#allocation3], %s8727_s12 }
 0xf6f   : > { %p10579_p7 = pnand %p10582_p4, %p11016_p6 }
 0xf71   : > { %p10580_p8 = pneg %p10579_p7 }
 0xf73   : > { %10918 = dma.done.wait (%p10580_p8), %s8728_s14, 4096  }
 0xf74   : > { %10920 = vsyncadd (%p10580_p8), %s8728_s14, 4294963200  ;;  %p16_p9 = scmp.ge.s32.totalorder %s10999_s27, 4   ;;  %s14675_s21 = smov %s10927_s22 }
 0xf75   : > { %s14676_s22 = smov %s10931_s23  ;;  %s14677_s23 = smov %s11010_s30 }
 0xf76   : > { %s14678_s24 = smov %s10999_s27  ;;  %18 = sbr.rel (!%p16_p9) target bundleno = 3 (0x3), region = 94 }
 0xf7b   :  { %8734 = vsyncpa [#allocation3], 1 }
 0xf7c   :  { %8736 = vsyncpa [#allocation3 + $0x1], 1 }

</bundles_post_ra>
